<compile_context>
chip_gen: v5e
topology: v5e:2x2
jax: 0.10.0
libtpu: 0.0.40
codegen_flags: <defaults>
</compile_context>

<pallas_src>
import functools

import jax
import jax.numpy as jnp
from jax.experimental import pallas as pl
from jax.experimental.pallas import tpu as pltpu


# ----------------------------------------------------------------------------------
# Pallas kernels: tiled matmul (bf16 operands, f32 acc) + fused bias/residual/act.
# Two variants: single K step (no scratch) and multi K step (f32 accumulator).
# ----------------------------------------------------------------------------------
def _mm_kernel_single(*refs, activation, has_residual, has_second):
    i = 0
    x_ref = refs[i]; i += 1
    w_ref = refs[i]; i += 1
    if has_second:
        x2_ref = refs[i]; i += 1
        w2_ref = refs[i]; i += 1
    b_ref = refs[i]; i += 1
    if has_residual:
        r_ref = refs[i]; i += 1
    o_ref = refs[i]

    y = jnp.dot(x_ref[...], w_ref[...], preferred_element_type=jnp.float32)
    if has_second:
        y = y + jnp.dot(x2_ref[...], w2_ref[...], preferred_element_type=jnp.float32)
    y = y + b_ref[...]
    if has_residual:
        y = y + r_ref[...].astype(jnp.float32)
    if activation == "relu":
        y = jnp.maximum(y, 0.0)
    elif activation == "sigmoid":
        y = jax.nn.sigmoid(y)
    o_ref[...] = y.astype(o_ref.dtype)


def _mm_kernel_multik(*refs, activation, has_residual, has_second):
    i = 0
    x_ref = refs[i]; i += 1
    w_ref = refs[i]; i += 1
    if has_second:
        x2_ref = refs[i]; i += 1
        w2_ref = refs[i]; i += 1
    b_ref = refs[i]; i += 1
    if has_residual:
        r_ref = refs[i]; i += 1
    o_ref = refs[i]; i += 1
    acc_ref = refs[i]

    k = pl.program_id(2)

    @pl.when(k == 0)
    def _():
        acc_ref[...] = jnp.zeros_like(acc_ref)

    acc_ref[...] += jnp.dot(x_ref[...], w_ref[...], preferred_element_type=jnp.float32)
    if has_second:
        acc_ref[...] += jnp.dot(x2_ref[...], w2_ref[...],
                                preferred_element_type=jnp.float32)

    @pl.when(k == pl.num_programs(2) - 1)
    def _():
        y = acc_ref[...] + b_ref[...]
        if has_residual:
            y = y + r_ref[...].astype(jnp.float32)
        if activation == "relu":
            y = jnp.maximum(y, 0.0)
        elif activation == "sigmoid":
            y = jax.nn.sigmoid(y)
        o_ref[...] = y.astype(o_ref.dtype)


def _round_up(x, m):
    return (x + m - 1) // m * m


def _cdiv(a, b):
    return -(-a // b)


_SMALL_M = 16      # below this, skip pallas_call and use a plain fused dot
_MAX_TK = 2048     # cap on the K tile (keeps VMEM footprint modest on v7x)


@functools.lru_cache(maxsize=1)
def _use_256_tiles():
    """256x256 output tiles only on chips with a 256x256 MXU (v6e / v7x)."""
    try:
        kind = jax.devices()[0].device_kind.lower()
    except Exception:
        return False
    return ("v6" in kind) or ("v7" in kind) or ("7x" in kind)


def matmul_fused(x, w, bias, activation="none", residual=None,
                 x2=None, w2=None, out_dtype=jnp.bfloat16):
    """act(x @ w [+ x2 @ w2] + bias [+ residual]).
    x:[M,K], w:[K,N] (BN scale already folded), bias:[N] f32,
    residual optional [M,N], x2/w2 optional second input stream (same K).
    MXU operands are bf16, accumulation f32, output `out_dtype` (default bf16)."""
    M, K = x.shape
    N = w.shape[1]
    has_second = x2 is not None
    has_residual = residual is not None

    # --- tiny-M path: a pallas launch + padding to 16 rows would be pure waste ------
    if M < _SMALL_M:
        y = jnp.dot(x.astype(jnp.bfloat16), w.astype(jnp.bfloat16),
                    preferred_element_type=jnp.float32)
        if has_second:
            y = y + jnp.dot(x2.astype(jnp.bfloat16), w2.astype(jnp.bfloat16),
                            preferred_element_type=jnp.float32)
        y = y + bias.astype(jnp.float32)[None, :]
        if has_residual:
            y = y + residual.astype(jnp.float32)
        if activation == "relu":
            y = jnp.maximum(y, 0.0)
        elif activation == "sigmoid":
            y = jax.nn.sigmoid(y)
        return y.astype(out_dtype)

    big = _use_256_tiles()

    # --- M tiling ---------------------------------------------------------------------
    if M <= 128:
        tm = _round_up(M, 16)           # bf16 sublane packing -> multiple of 16
        Mp = tm
    elif big and M >= 256:
        tm = 256
        Mp = _round_up(M, 256)
    else:
        tm = 128
        Mp = _round_up(M, 128)

    # --- N tiling ---------------------------------------------------------------------
    Np = _round_up(N, 128)
    tn = 256 if (big and Np % 256 == 0) else 128

    # guarantee >= 2 independent output tiles when possible (v7x has 2 TensorCores)
    if (Mp // tm) * (Np // tn) < 2:
        if Np // 128 >= 2:
            tn = 128
        elif tm >= 32:
            tm = _round_up(_cdiv(tm, 2), 16)
            Mp = _round_up(M, tm)

    # --- K tiling (usually a single step) ----------------------------------------------
    Kp0 = _round_up(K, 128)
    nk = _cdiv(Kp0, _MAX_TK)
    tk = _round_up(_cdiv(Kp0, nk), 128)
    Kp = nk * tk

    def pad2(a, s0, s1):
        if a.shape == (s0, s1):
            return a
        return jnp.pad(a, ((0, s0 - a.shape[0]), (0, s1 - a.shape[1])))

    inputs = [pad2(x.astype(jnp.bfloat16), Mp, Kp),
              pad2(w.astype(jnp.bfloat16), Kp, Np)]
    if has_second:
        assert x2.shape[1] == K and w2.shape == (K, N)
        inputs += [pad2(x2.astype(jnp.bfloat16), Mp, Kp),
                   pad2(w2.astype(jnp.bfloat16), Kp, Np)]
    bp = bias.astype(jnp.float32)
    if Np != N:
        bp = jnp.pad(bp, (0, Np - N))
    inputs.append(bp.reshape(1, Np))
    if has_residual:
        inputs.append(pad2(residual.astype(jnp.bfloat16), Mp, Np))

    m_tiles, n_tiles = Mp // tm, Np // tn
    # When there are more M tiles than N tiles, order the grid (j, i[, k]) so the
    # weight block index is constant across consecutive steps -> weight stays resident.
    weight_major = m_tiles > n_tiles

    if nk == 1:
        grid = (n_tiles, m_tiles) if weight_major else (m_tiles, n_tiles)
        if weight_major:
            xm = lambda j, i: (i, 0); wmap = lambda j, i: (0, j)
            bm = lambda j, i: (0, j); om = lambda j, i: (i, j)
        else:
            xm = lambda i, j: (i, 0); wmap = lambda i, j: (0, j)
            bm = lambda i, j: (0, j); om = lambda i, j: (i, j)
        sem = ("parallel", "parallel")
        kernel = functools.partial(_mm_kernel_single, activation=activation,
                                   has_residual=has_residual, has_second=has_second)
        scratch = []
    else:
        grid = (n_tiles, m_tiles, nk) if weight_major else (m_tiles, n_tiles, nk)
        if weight_major:
            xm = lambda j, i, k: (i, k); wmap = lambda j, i, k: (k, j)
            bm = lambda j, i, k: (0, j); om = lambda j, i, k: (i, j)
        else:
            xm = lambda i, j, k: (i, k); wmap = lambda i, j, k: (k, j)
            bm = lambda i, j, k: (0, j); om = lambda i, j, k: (i, j)
        sem = ("parallel", "parallel", "arbitrary")
        kernel = functools.partial(_mm_kernel_multik, activation=activation,
                                   has_residual=has_residual, has_second=has_second)
        scratch = [pltpu.VMEM((tm, tn), jnp.float32)]

    in_specs = [pl.BlockSpec((tm, tk), xm), pl.BlockSpec((tk, tn), wmap)]
    if has_second:
        in_specs += [pl.BlockSpec((tm, tk), xm), pl.BlockSpec((tk, tn), wmap)]
    in_specs.append(pl.BlockSpec((1, tn), bm))
    if has_residual:
        in_specs.append(pl.BlockSpec((tm, tn), om))

    out = pl.pallas_call(
        kernel,
        out_shape=jax.ShapeDtypeStruct((Mp, Np), out_dtype),
        grid_spec=pltpu.PrefetchScalarGridSpec(
            num_scalar_prefetch=0,
            grid=grid,
            in_specs=in_specs,
            out_specs=pl.BlockSpec((tm, tn), om),
            scratch_shapes=scratch,
        ),
        compiler_params=pltpu.CompilerParams(dimension_semantics=sem),
    )(*inputs)

    if (Mp, Np) != (M, N):
        out = out[:M, :N]
    return out


# ----------------------------------------------------------------------------------
# Conv lowering (im2col glue, bf16) using the fused Pallas matmul
# ----------------------------------------------------------------------------------
def im2col(x, kh, kw, stride, pad):
    """x NHWC -> patches [N*Ho*Wo, kh*kw*C] (kh-major, kw, then C ordering)."""
    if pad > 0:
        x = jnp.pad(x, ((0, 0), (pad, pad), (pad, pad), (0, 0)))
    N, H, W, C = x.shape
    Ho = (H - kh) // stride + 1
    Wo = (W - kw) // stride + 1
    cols = []
    for i in range(kh):
        for j in range(kw):
            cols.append(
                x[:, i: i + (Ho - 1) * stride + 1: stride,
                     j: j + (Wo - 1) * stride + 1: stride, :])
    patches = jnp.concatenate(cols, axis=-1)        # [N, Ho, Wo, kh*kw*C]
    return patches.reshape(N * Ho * Wo, kh * kw * C), (N, Ho, Wo)


def conv_prepared(x, p, stride, pad, activation, residual=None,
                  out_dtype=jnp.bfloat16):
    """x NHWC (bf16); p = dict(w=[K,N] bf16 (BN-scale folded), b=[N] f32, ks=int)."""
    wmat, bias, ks = p["w"], p["b"], p["ks"]
    O = wmat.shape[1]
    xb = x if x.dtype == jnp.bfloat16 else x.astype(jnp.bfloat16)
    if ks == 1 and stride == 1 and pad == 0:
        N_, H_, W_, C_ = xb.shape
        cols = xb.reshape(N_ * H_ * W_, C_)
        N, Ho, Wo = N_, H_, W_
    else:
        cols, (N, Ho, Wo) = im2col(xb, ks, ks, stride, pad)
    res2d = None if residual is None else residual.reshape(N * Ho * Wo, O)
    y = matmul_fused(cols, wmat, bias, activation, residual=res2d, out_dtype=out_dtype)
    return y.reshape(N, Ho, Wo, O)


# ----------------------------------------------------------------------------------
# Plain-JAX glue ops (pooling / resize) -- gather-free on TPU
# ----------------------------------------------------------------------------------
def maxpool3x3s2(x):  # NHWC, kernel=3 stride=2 pad=1 (matches nn.MaxPool2d)
    return jax.lax.reduce_window(
        x, jnp.array(-jnp.inf, x.dtype), jax.lax.max,
        window_dimensions=(1, 3, 3, 1),
        window_strides=(1, 2, 2, 1),
        padding=((0, 0), (1, 1), (1, 1), (0, 0)),
    )


def nearest_upsample(x, Ho, Wo):  # NHWC, F.interpolate(mode='nearest')
    N, H, W, C = x.shape
    if Ho % H == 0 and Wo % W == 0:            # integer factor -> broadcast, no gather
        fh, fw = Ho // H, Wo // W
        y = jnp.broadcast_to(x[:, :, None, :, None, :], (N, H, fh, W, fw, C))
        return y.reshape(N, Ho, Wo, C)
    hi = (jnp.arange(Ho) * H // Ho).astype(jnp.int32)
    wi = (jnp.arange(Wo) * W // Wo).astype(jnp.int32)
    return jnp.take(jnp.take(x, hi, axis=1), wi, axis=2)


def _interp_matrix_ac(out_size, in_size):
    """Row/col interpolation matrix for bilinear, align_corners=True."""
    if in_size == 1:
        return jnp.ones((out_size, 1), jnp.float32)
    if out_size == 1:
        return jnp.zeros((1, in_size), jnp.float32).at[0, 0].set(1.0)
    y = jnp.arange(out_size, dtype=jnp.float32) * ((in_size - 1) / (out_size - 1))
    i0 = jnp.floor(y).astype(jnp.int32)
    i1 = jnp.minimum(i0 + 1, in_size - 1)
    f = y - i0.astype(jnp.float32)
    return (jax.nn.one_hot(i0, in_size, dtype=jnp.float32) * (1.0 - f)[:, None]
            + jax.nn.one_hot(i1, in_size, dtype=jnp.float32) * f[:, None])


def bilinear_resize_ac(x, Ho, Wo):  # NHWC, bilinear, align_corners=True (as matmuls)
    x = x.astype(jnp.float32)
    _, H, W, _ = x.shape
    Mh = _interp_matrix_ac(Ho, H)
    Mw = _interp_matrix_ac(Wo, W)
    x = jnp.einsum("oh,nhwc->nowc", Mh, x)
    x = jnp.einsum("pw,nowc->nopc", Mw, x)
    return x


# ----------------------------------------------------------------------------------
# Deterministic parameter initialization (BN folded + weights pre-transformed ONCE)
# ----------------------------------------------------------------------------------
class ParamGen:
    def __init__(self, seed=0):
        self.key = jax.random.PRNGKey(seed)

    def _next(self):
        self.key, k = jax.random.split(self.key)
        return k

    def conv(self, o, i, kh, kw):
        fan_in = i * kh * kw
        std = (2.0 / (1.0 + 1.0 ** 2) / fan_in) ** 0.5     # kaiming_normal_(a=1)
        return std * jax.random.normal(self._next(), (o, i, kh, kw), jnp.float32)

    def bn(self, c):
        return dict(
            gamma=1.0 + 0.1 * jax.random.normal(self._next(), (c,), jnp.float32),
            beta=0.1 * jax.random.normal(self._next(), (c,), jnp.float32),
            mean=0.1 * jax.random.normal(self._next(), (c,), jnp.float32),
            var=1.0 + 0.1 * jnp.abs(jax.random.normal(self._next(), (c,), jnp.float32)),
        )


def fold_bn(bn, eps=1e-5):
    scale = bn["gamma"] / jnp.sqrt(bn["var"] + eps)
    bias = bn["beta"] - bn["mean"] * scale
    return scale, bias


def _prep(w_oihw, scale, bias):
    O, I, kh, kw = w_oihw.shape
    wm = jnp.transpose(w_oihw, (2, 3, 1, 0)).reshape(kh * kw * I, O) * scale[None, :]
    return dict(w=wm.astype(jnp.bfloat16), b=bias.astype(jnp.float32), ks=kh)


def prep_conv_bn(g, i, o, ks):
    w = g.conv(o, i, ks, ks)
    s, b = fold_bn(g.bn(o))
    return _prep(w, s, b)


def prep_conv(g, i, o, ks):
    w = g.conv(o, i, ks, ks)
    return _prep(w, jnp.ones((o,), jnp.float32), jnp.zeros((o,), jnp.float32))


def prep_block(g, i, o, stride):
    p = dict(conv1=prep_conv_bn(g, i, o, 3), conv2=prep_conv_bn(g, o, o, 3))
    if i != o or stride != 1:
        p["down"] = prep_conv_bn(g, i, o, 1)
    return p


def prep_arm(g, i, o):
    conv = prep_conv_bn(g, i, o, 3)
    w = g.conv(o, o, 1, 1)
    s, b = fold_bn(g.bn(o))             # bn_atten folded into conv_atten
    return dict(conv=conv, conv_atten=_prep(w, s, b))


def prep_ffm(g, in_chan=256, out_chan=256):
    w = g.conv(out_chan, in_chan, 1, 1)
    s, b = fold_bn(g.bn(out_chan))
    wm = (jnp.transpose(w, (2, 3, 1, 0)).reshape(in_chan, out_chan) * s[None, :]
          ).astype(jnp.bfloat16)
    half = in_chan // 2                 # concat([fsp, fcp]) -> split weight rows
    return dict(
        convblk_w_top=wm[:half], convblk_w_bot=wm[half:],
        convblk_b=b.astype(jnp.float32),
        conv1=prep_conv(g, out_chan, out_chan // 4, 1),
        conv2=prep_conv(g, out_chan // 4, out_chan, 1),
    )


def prep_out(g, i, m, n_classes):
    return dict(conv=prep_conv_bn(g, i, m, 3), conv_out=prep_conv(g, m, n_classes, 1))


def init_bisenet_params(n_classes, seed=0):
    g = ParamGen(seed)
    resnet = dict(
        conv1=prep_conv_bn(g, 3, 64, 7),
        layer1=[prep_block(g, 64, 64, 1), prep_block(g, 64, 64, 1)],
        layer2=[prep_block(g, 64, 128, 2), prep_block(g, 128, 128, 1)],
        layer3=[prep_block(g, 128, 256, 2), prep_block(g, 256, 256, 1)],
        layer4=[prep_block(g, 256, 512, 2), prep_block(g, 512, 512, 1)],
    )
    cp = dict(
        resnet=resnet,
        arm16=prep_arm(g, 256, 128), arm32=prep_arm(g, 512, 128),
        conv_head32=prep_conv_bn(g, 128, 128, 3),
        conv_head16=prep_conv_bn(g, 128, 128, 3),
        conv_avg=prep_conv_bn(g, 512, 128, 1),
    )
    return dict(cp=cp, ffm=prep_ffm(g),
                conv_out=prep_out(g, 256, 256, n_classes),
                conv_out16=prep_out(g, 128, 64, n_classes),
                conv_out32=prep_out(g, 128, 64, n_classes))


# ----------------------------------------------------------------------------------
# Forward pass (semantics of the PyTorch modules; activations bf16 end-to-end)
# ----------------------------------------------------------------------------------
def basic_block(x, p, stride):
    r = conv_prepared(x, p["conv1"], stride, 1, "relu")
    if "down" in p:
        sc = conv_prepared(x, p["down"], stride, 0, "none")
    else:
        sc = x
    # shortcut add + final ReLU fused into the second conv's epilogue
    return conv_prepared(r, p["conv2"], 1, 1, "relu", residual=sc)


def resnet18_forward(x, p):
    x = conv_prepared(x, p["conv1"], 2, 3, "relu")
    x = maxpool3x3s2(x)

    def run_layer(feat, blocks, stride):
        feat = basic_block(feat, blocks[0], stride)
        for bp in blocks[1:]:
            feat = basic_block(feat, bp, 1)
        return feat

    x = run_layer(x, p["layer1"], 1)
    feat8 = run_layer(x, p["layer2"], 2)
    feat16 = run_layer(feat8, p["layer3"], 2)
    feat32 = run_layer(feat16, p["layer4"], 2)
    return feat8, feat16, feat32


def arm_forward(x, p):
    feat = conv_prepared(x, p["conv"], 1, 1, "relu")
    atten = jnp.mean(feat.astype(jnp.float32), axis=(1, 2), keepdims=True)
    atten = conv_prepared(atten, p["conv_atten"], 1, 0, "sigmoid")
    return feat * atten.astype(feat.dtype)


def context_path_forward(x, p):
    feat8, feat16, feat32 = resnet18_forward(x, p["resnet"])
    H8, W8 = feat8.shape[1:3]
    H16, W16 = feat16.shape[1:3]
    H32, W32 = feat32.shape[1:3]

    avg = jnp.mean(feat32.astype(jnp.float32), axis=(1, 2), keepdims=True)
    avg = conv_prepared(avg, p["conv_avg"], 1, 0, "relu")
    avg_up = nearest_upsample(avg, H32, W32)

    feat32_arm = arm_forward(feat32, p["arm32"])
    feat32_sum = feat32_arm + avg_up
    feat32_up = nearest_upsample(feat32_sum, H16, W16)
    feat32_up = conv_prepared(feat32_up, p["conv_head32"], 1, 1, "relu")

    feat16_arm = arm_forward(feat16, p["arm16"])
    feat16_sum = feat16_arm + feat32_up
    feat16_up = nearest_upsample(feat16_sum, H8, W8)
    feat16_up = conv_prepared(feat16_up, p["conv_head16"], 1, 1, "relu")

    return feat8, feat16_up, feat32_up


def ffm_forward(fsp, fcp, p):
    # conv(concat([fsp, fcp])) == fsp @ W_top + fcp @ W_bot  -> one dual-stream kernel
    N_, H_, W_, C1 = fsp.shape
    C2 = fcp.shape[-1]
    x1 = fsp.astype(jnp.bfloat16).reshape(N_ * H_ * W_, C1)
    x2 = fcp.astype(jnp.bfloat16).reshape(N_ * H_ * W_, C2)
    feat = matmul_fused(x1, p["convblk_w_top"], p["convblk_b"], "relu",
                        x2=x2, w2=p["convblk_w_bot"])
    O = p["convblk_w_top"].shape[1]
    feat = feat.reshape(N_, H_, W_, O)

    atten = jnp.mean(feat.astype(jnp.float32), axis=(1, 2), keepdims=True)
    atten = conv_prepared(atten, p["conv1"], 1, 0, "relu")
    atten = conv_prepared(atten, p["conv2"], 1, 0, "sigmoid")
    return feat * (atten.astype(feat.dtype) + jnp.asarray(1.0, feat.dtype))


def bisenet_output(x, p):
    x = conv_prepared(x, p["conv"], 1, 1, "relu")
    x = conv_prepared(x, p["conv_out"], 1, 0, "none", out_dtype=jnp.float32)
    return x


def bisenet_forward(x_nchw, params):
    x = jnp.transpose(x_nchw, (0, 2, 3, 1)).astype(jnp.bfloat16)  # NCHW -> NHWC, bf16
    H, W = x.shape[1:3]

    feat_res8, feat_cp8, feat_cp16 = context_path_forward(x, params["cp"])
    feat_fuse = ffm_forward(feat_res8, feat_cp8, params["ffm"])

    feat_out = bisenet_output(feat_fuse, params["conv_out"])
    feat_out16 = bisenet_output(feat_cp8, params["conv_out16"])
    feat_out32 = bisenet_output(feat_cp16, params["conv_out32"])

    feat_out = bilinear_resize_ac(feat_out, H, W)
    feat_out16 = bilinear_resize_ac(feat_out16, H, W)
    feat_out32 = bilinear_resize_ac(feat_out32, H, W)

    to_nchw = lambda t: jnp.transpose(t, (0, 3, 1, 2))
    return to_nchw(feat_out), to_nchw(feat_out16), to_nchw(feat_out32)


# ----------------------------------------------------------------------------------
if __name__ == "__main__":
    n_classes = 19
    N, C, H, W = 1, 3, 64, 64

    key = jax.random.PRNGKey(0)
    x = jax.random.normal(key, (N, C, H, W), jnp.float32)
    params = init_bisenet_params(n_classes, seed=0)

    fwd = jax.jit(lambda inp: bisenet_forward(inp, params))
    out, out16, out32 = fwd(x)
    jax.block_until_ready((out, out16, out32))

    assert out.shape == (N, n_classes, H, W)
    assert out16.shape == (N, n_classes, H, W)
    assert out32.shape == (N, n_classes, H, W)
    assert (jnp.all(jnp.isfinite(out)) and jnp.all(jnp.isfinite(out16))
            and jnp.all(jnp.isfinite(out32)))
    print("KERNEL_OK")
</pallas_src>

<mosaic_0001>
module attributes {stable_mosaic.version = 11 : i64} {
  func.func @_mm_kernel_single(%arg0: i32, %arg1: i32, %arg2: memref<128x256xbf16, #tpu.memory_space<vmem>>, %arg3: memref<256x128xbf16, #tpu.memory_space<vmem>>, %arg4: memref<1x128xf32, #tpu.memory_space<vmem>>, %arg5: memref<128x128xbf16, #tpu.memory_space<vmem>>) attributes {dimension_semantics = [#tpu.dimension_semantics<parallel>, #tpu.dimension_semantics<parallel>], iteration_bounds = array<i64: 1, 8>, scalar_prefetch = 0 : i64, scratch_operands = 0 : i64, tpu.core_type = #tpu.core_type<tc>, window_params = [{transform_indices = @transform_0, window_bounds = array<i64: 128, 256>}, {transform_indices = @transform_1, window_bounds = array<i64: 256, 128>}, {transform_indices = @transform_2, window_bounds = array<i64: 1, 128>}, {transform_indices = @transform_3, window_bounds = array<i64: 128, 128>}]} {
    %c0 = arith.constant 0 : index
    %c0_0 = arith.constant 0 : index
    %0 = vector.load %arg2[%c0, %c0_0] : memref<128x256xbf16, #tpu.memory_space<vmem>>, vector<128x256xbf16>
    %c0_1 = arith.constant 0 : index
    %c0_2 = arith.constant 0 : index
    %1 = vector.load %arg3[%c0_1, %c0_2] : memref<256x128xbf16, #tpu.memory_space<vmem>>, vector<256x128xbf16>
    %cst = arith.constant dense<0.000000e+00> : vector<128x128xf32>
    %2 = tpu.matmul %0, %1, %cst {dimension_numbers = #tpu.dot_dimension_numbers<[1], [0], [0], [1], [0, 0, 1, 1], [], []>} : vector<128x256xbf16>, vector<256x128xbf16>, vector<128x128xf32> -> vector<128x128xf32>
    %c0_3 = arith.constant 0 : index
    %c0_4 = arith.constant 0 : index
    %3 = vector.load %arg4[%c0_3, %c0_4] : memref<1x128xf32, #tpu.memory_space<vmem>>, vector<1x128xf32>
    %4 = vector.broadcast %3 : vector<1x128xf32> to vector<128x128xf32>
    %5 = arith.addf %2, %4 : vector<128x128xf32>
    %cst_5 = arith.constant 0.000000e+00 : f32
    %6 = vector.broadcast %cst_5 : f32 to vector<128x128xf32>
    %7 = arith.maximumf %5, %6 : vector<128x128xf32>
    %8 = arith.truncf %7 : vector<128x128xf32> to vector<128x128xbf16>
    %c0_6 = arith.constant 0 : index
    %c0_7 = arith.constant 0 : index
    %9 = vector.load %arg5[%c0_6, %c0_7] : memref<128x128xbf16, #tpu.memory_space<vmem>>, vector<128x128xbf16>
    tpu.vector_store %arg5[%c0_6, %c0_7], %8 {strides = array<i32>} : memref<128x128xbf16, #tpu.memory_space<vmem>>, vector<128x128xbf16>,
    return
  }
  func.func @transform_0(%arg0: i32, %arg1: i32) -> (i32, i32) {
    %c0_i32 = arith.constant 0 : i32
    %c0_i32_0 = arith.constant 0 : i32
    return %arg1, %c0_i32 : i32, i32
  }
  func.func @transform_1(%arg0: i32, %arg1: i32) -> (i32, i32) {
    %c0_i32 = arith.constant 0 : i32
    %c0_i32_0 = arith.constant 0 : i32
    return %c0_i32, %arg0 : i32, i32
  }
  func.func @transform_2(%arg0: i32, %arg1: i32) -> (i32, i32) {
    %c0_i32 = arith.constant 0 : i32
    %c0_i32_0 = arith.constant 0 : i32
    return %c0_i32, %arg0 : i32, i32
  }
  func.func @transform_3(%arg0: i32, %arg1: i32) -> (i32, i32) {
    %c0_i32 = arith.constant 0 : i32
    return %arg1, %arg0 : i32, i32
  }
}

module attributes {stable_mosaic.version = 11 : i64} {
  func.func @_mm_kernel_single(%arg0: i32, %arg1: i32, %arg2: memref<128x640xbf16, #tpu.memory_space<vmem>>, %arg3: memref<640x128xbf16, #tpu.memory_space<vmem>>, %arg4: memref<1x128xf32, #tpu.memory_space<vmem>>, %arg5: memref<128x128xbf16, #tpu.memory_space<vmem>>) attributes {dimension_semantics = [#tpu.dimension_semantics<parallel>, #tpu.dimension_semantics<parallel>], iteration_bounds = array<i64: 1, 2>, scalar_prefetch = 0 : i64, scratch_operands = 0 : i64, tpu.core_type = #tpu.core_type<tc>, window_params = [{transform_indices = @transform_0, window_bounds = array<i64: 128, 640>}, {transform_indices = @transform_1, window_bounds = array<i64: 640, 128>}, {transform_indices = @transform_2, window_bounds = array<i64: 1, 128>}, {transform_indices = @transform_3, window_bounds = array<i64: 128, 128>}]} {
    %c0 = arith.constant 0 : index
    %c0_0 = arith.constant 0 : index
    %0 = vector.load %arg2[%c0, %c0_0] : memref<128x640xbf16, #tpu.memory_space<vmem>>, vector<128x640xbf16>
    %c0_1 = arith.constant 0 : index
    %c0_2 = arith.constant 0 : index
    %1 = vector.load %arg3[%c0_1, %c0_2] : memref<640x128xbf16, #tpu.memory_space<vmem>>, vector<640x128xbf16>
    %cst = arith.constant dense<0.000000e+00> : vector<128x128xf32>
    %2 = tpu.matmul %0, %1, %cst {dimension_numbers = #tpu.dot_dimension_numbers<[1], [0], [0], [1], [0, 0, 1, 1], [], []>} : vector<128x640xbf16>, vector<640x128xbf16>, vector<128x128xf32> -> vector<128x128xf32>
    %c0_3 = arith.constant 0 : index
    %c0_4 = arith.constant 0 : index
    %3 = vector.load %arg4[%c0_3, %c0_4] : memref<1x128xf32, #tpu.memory_space<vmem>>, vector<1x128xf32>
    %4 = vector.broadcast %3 : vector<1x128xf32> to vector<128x128xf32>
    %5 = arith.addf %2, %4 : vector<128x128xf32>
    %cst_5 = arith.constant 0.000000e+00 : f32
    %6 = vector.broadcast %cst_5 : f32 to vector<128x128xf32>
    %7 = arith.maximumf %5, %6 : vector<128x128xf32>
    %8 = arith.truncf %7 : vector<128x128xf32> to vector<128x128xbf16>
    %c0_6 = arith.constant 0 : index
    %c0_7 = arith.constant 0 : index
    %9 = vector.load %arg5[%c0_6, %c0_7] : memref<128x128xbf16, #tpu.memory_space<vmem>>, vector<128x128xbf16>
    tpu.vector_store %arg5[%c0_6, %c0_7], %8 {strides = array<i32>} : memref<128x128xbf16, #tpu.memory_space<vmem>>, vector<128x128xbf16>,
    return
  }
  func.func @transform_0(%arg0: i32, %arg1: i32) -> (i32, i32) {
    %c0_i32 = arith.constant 0 : i32
    %c0_i32_0 = arith.constant 0 : i32
    return %arg1, %c0_i32 : i32, i32
  }
  func.func @transform_1(%arg0: i32, %arg1: i32) -> (i32, i32) {
    %c0_i32 = arith.constant 0 : i32
    %c0_i32_0 = arith.constant 0 : i32
    return %c0_i32, %arg0 : i32, i32
  }
  func.func @transform_2(%arg0: i32, %arg1: i32) -> (i32, i32) {
    %c0_i32 = arith.constant 0 : i32
    %c0_i32_0 = arith.constant 0 : i32
    return %c0_i32, %arg0 : i32, i32
  }
  func.func @transform_3(%arg0: i32, %arg1: i32) -> (i32, i32) {
    %c0_i32 = arith.constant 0 : i32
    return %arg1, %arg0 : i32, i32
  }
}

module attributes {stable_mosaic.version = 11 : i64} {
  func.func @_mm_kernel_single(%arg0: i32, %arg1: i32, %arg2: memref<128x640xbf16, #tpu.memory_space<vmem>>, %arg3: memref<640x128xbf16, #tpu.memory_space<vmem>>, %arg4: memref<1x128xf32, #tpu.memory_space<vmem>>, %arg5: memref<128x128xbf16, #tpu.memory_space<vmem>>, %arg6: memref<128x128xbf16, #tpu.memory_space<vmem>>) attributes {dimension_semantics = [#tpu.dimension_semantics<parallel>, #tpu.dimension_semantics<parallel>], iteration_bounds = array<i64: 1, 2>, scalar_prefetch = 0 : i64, scratch_operands = 0 : i64, tpu.core_type = #tpu.core_type<tc>, window_params = [{transform_indices = @transform_0, window_bounds = array<i64: 128, 640>}, {transform_indices = @transform_1, window_bounds = array<i64: 640, 128>}, {transform_indices = @transform_2, window_bounds = array<i64: 1, 128>}, {transform_indices = @transform_3, window_bounds = array<i64: 128, 128>}, {transform_indices = @transform_4, window_bounds = array<i64: 128, 128>}]} {
    %c0 = arith.constant 0 : index
    %c0_0 = arith.constant 0 : index
    %0 = vector.load %arg2[%c0, %c0_0] : memref<128x640xbf16, #tpu.memory_space<vmem>>, vector<128x640xbf16>
    %c0_1 = arith.constant 0 : index
    %c0_2 = arith.constant 0 : index
    %1 = vector.load %arg3[%c0_1, %c0_2] : memref<640x128xbf16, #tpu.memory_space<vmem>>, vector<640x128xbf16>
    %cst = arith.constant dense<0.000000e+00> : vector<128x128xf32>
    %2 = tpu.matmul %0, %1, %cst {dimension_numbers = #tpu.dot_dimension_numbers<[1], [0], [0], [1], [0, 0, 1, 1], [], []>} : vector<128x640xbf16>, vector<640x128xbf16>, vector<128x128xf32> -> vector<128x128xf32>
    %c0_3 = arith.constant 0 : index
    %c0_4 = arith.constant 0 : index
    %3 = vector.load %arg4[%c0_3, %c0_4] : memref<1x128xf32, #tpu.memory_space<vmem>>, vector<1x128xf32>
    %4 = vector.broadcast %3 : vector<1x128xf32> to vector<128x128xf32>
    %5 = arith.addf %2, %4 : vector<128x128xf32>
    %c0_5 = arith.constant 0 : index
    %c0_6 = arith.constant 0 : index
    %6 = vector.load %arg5[%c0_5, %c0_6] : memref<128x128xbf16, #tpu.memory_space<vmem>>, vector<128x128xbf16>
    %7 = arith.extf %6 : vector<128x128xbf16> to vector<128x128xf32>
    %8 = arith.addf %5, %7 : vector<128x128xf32>
    %cst_7 = arith.constant 0.000000e+00 : f32
    %9 = vector.broadcast %cst_7 : f32 to vector<128x128xf32>
    %10 = arith.maximumf %8, %9 : vector<128x128xf32>
    %11 = arith.truncf %10 : vector<128x128xf32> to vector<128x128xbf16>
    %c0_8 = arith.constant 0 : index
    %c0_9 = arith.constant 0 : index
    %12 = vector.load %arg6[%c0_8, %c0_9] : memref<128x128xbf16, #tpu.memory_space<vmem>>, vector<128x128xbf16>
    tpu.vector_store %arg6[%c0_8, %c0_9], %11 {strides = array<i32>} : memref<128x128xbf16, #tpu.memory_space<vmem>>, vector<128x128xbf16>,
    return
  }
  func.func @transform_0(%arg0: i32, %arg1: i32) -> (i32, i32) {
    %c0_i32 = arith.constant 0 : i32
    %c0_i32_0 = arith.constant 0 : i32
    return %arg1, %c0_i32 : i32, i32
  }
  func.func @transform_1(%arg0: i32, %arg1: i32) -> (i32, i32) {
    %c0_i32 = arith.constant 0 : i32
    %c0_i32_0 = arith.constant 0 : i32
    return %c0_i32, %arg0 : i32, i32
  }
  func.func @transform_2(%arg0: i32, %arg1: i32) -> (i32, i32) {
    %c0_i32 = arith.constant 0 : i32
    %c0_i32_0 = arith.constant 0 : i32
    return %c0_i32, %arg0 : i32, i32
  }
  func.func @transform_3(%arg0: i32, %arg1: i32) -> (i32, i32) {
    %c0_i32 = arith.constant 0 : i32
    return %arg1, %arg0 : i32, i32
  }
  func.func @transform_4(%arg0: i32, %arg1: i32) -> (i32, i32) {
    %c0_i32 = arith.constant 0 : i32
    return %arg1, %arg0 : i32, i32
  }
}

module attributes {stable_mosaic.version = 11 : i64} {
  func.func @_mm_kernel_single(%arg0: i32, %arg1: i32, %arg2: memref<32x640xbf16, #tpu.memory_space<vmem>>, %arg3: memref<640x128xbf16, #tpu.memory_space<vmem>>, %arg4: memref<1x128xf32, #tpu.memory_space<vmem>>, %arg5: memref<32x128xbf16, #tpu.memory_space<vmem>>) attributes {dimension_semantics = [#tpu.dimension_semantics<parallel>, #tpu.dimension_semantics<parallel>], iteration_bounds = array<i64: 1, 2>, scalar_prefetch = 0 : i64, scratch_operands = 0 : i64, tpu.core_type = #tpu.core_type<tc>, window_params = [{transform_indices = @transform_0, window_bounds = array<i64: 32, 640>}, {transform_indices = @transform_1, window_bounds = array<i64: 640, 128>}, {transform_indices = @transform_2, window_bounds = array<i64: 1, 128>}, {transform_indices = @transform_3, window_bounds = array<i64: 32, 128>}]} {
    %c0 = arith.constant 0 : index
    %c0_0 = arith.constant 0 : index
    %0 = vector.load %arg2[%c0, %c0_0] : memref<32x640xbf16, #tpu.memory_space<vmem>>, vector<32x640xbf16>
    %c0_1 = arith.constant 0 : index
    %c0_2 = arith.constant 0 : index
    %1 = vector.load %arg3[%c0_1, %c0_2] : memref<640x128xbf16, #tpu.memory_space<vmem>>, vector<640x128xbf16>
    %cst = arith.constant dense<0.000000e+00> : vector<32x128xf32>
    %2 = tpu.matmul %0, %1, %cst {dimension_numbers = #tpu.dot_dimension_numbers<[1], [0], [0], [1], [0, 0, 1, 1], [], []>} : vector<32x640xbf16>, vector<640x128xbf16>, vector<32x128xf32> -> vector<32x128xf32>
    %c0_3 = arith.constant 0 : index
    %c0_4 = arith.constant 0 : index
    %3 = vector.load %arg4[%c0_3, %c0_4] : memref<1x128xf32, #tpu.memory_space<vmem>>, vector<1x128xf32>
    %4 = vector.broadcast %3 : vector<1x128xf32> to vector<32x128xf32>
    %5 = arith.addf %2, %4 : vector<32x128xf32>
    %cst_5 = arith.constant 0.000000e+00 : f32
    %6 = vector.broadcast %cst_5 : f32 to vector<32x128xf32>
    %7 = arith.maximumf %5, %6 : vector<32x128xf32>
    %8 = arith.truncf %7 : vector<32x128xf32> to vector<32x128xbf16>
    %c0_6 = arith.constant 0 : index
    %c0_7 = arith.constant 0 : index
    %9 = vector.load %arg5[%c0_6, %c0_7] : memref<32x128xbf16, #tpu.memory_space<vmem>>, vector<32x128xbf16>
    tpu.vector_store %arg5[%c0_6, %c0_7], %8 {strides = array<i32>} : memref<32x128xbf16, #tpu.memory_space<vmem>>, vector<32x128xbf16>,
    return
  }
  func.func @transform_0(%arg0: i32, %arg1: i32) -> (i32, i32) {
    %c0_i32 = arith.constant 0 : i32
    %c0_i32_0 = arith.constant 0 : i32
    return %arg1, %c0_i32 : i32, i32
  }
  func.func @transform_1(%arg0: i32, %arg1: i32) -> (i32, i32) {
    %c0_i32 = arith.constant 0 : i32
    %c0_i32_0 = arith.constant 0 : i32
    return %c0_i32, %arg0 : i32, i32
  }
  func.func @transform_2(%arg0: i32, %arg1: i32) -> (i32, i32) {
    %c0_i32 = arith.constant 0 : i32
    %c0_i32_0 = arith.constant 0 : i32
    return %c0_i32, %arg0 : i32, i32
  }
  func.func @transform_3(%arg0: i32, %arg1: i32) -> (i32, i32) {
    %c0_i32 = arith.constant 0 : i32
    return %arg1, %arg0 : i32, i32
  }
}

module attributes {stable_mosaic.version = 11 : i64} {
  func.func @_mm_kernel_single(%arg0: i32, %arg1: i32, %arg2: memref<32x128xbf16, #tpu.memory_space<vmem>>, %arg3: memref<128x128xbf16, #tpu.memory_space<vmem>>, %arg4: memref<1x128xf32, #tpu.memory_space<vmem>>, %arg5: memref<32x128xbf16, #tpu.memory_space<vmem>>) attributes {dimension_semantics = [#tpu.dimension_semantics<parallel>, #tpu.dimension_semantics<parallel>], iteration_bounds = array<i64: 1, 2>, scalar_prefetch = 0 : i64, scratch_operands = 0 : i64, tpu.core_type = #tpu.core_type<tc>, window_params = [{transform_indices = @transform_0, window_bounds = array<i64: 32, 128>}, {transform_indices = @transform_1, window_bounds = array<i64: 128, 128>}, {transform_indices = @transform_2, window_bounds = array<i64: 1, 128>}, {transform_indices = @transform_3, window_bounds = array<i64: 32, 128>}]} {
    %c0 = arith.constant 0 : index
    %c0_0 = arith.constant 0 : index
    %0 = vector.load %arg2[%c0, %c0_0] : memref<32x128xbf16, #tpu.memory_space<vmem>>, vector<32x128xbf16>
    %c0_1 = arith.constant 0 : index
    %c0_2 = arith.constant 0 : index
    %1 = vector.load %arg3[%c0_1, %c0_2] : memref<128x128xbf16, #tpu.memory_space<vmem>>, vector<128x128xbf16>
    %cst = arith.constant dense<0.000000e+00> : vector<32x128xf32>
    %2 = tpu.matmul %0, %1, %cst {dimension_numbers = #tpu.dot_dimension_numbers<[1], [0], [0], [1], [0, 0, 1, 1], [], []>} : vector<32x128xbf16>, vector<128x128xbf16>, vector<32x128xf32> -> vector<32x128xf32>
    %c0_3 = arith.constant 0 : index
    %c0_4 = arith.constant 0 : index
    %3 = vector.load %arg4[%c0_3, %c0_4] : memref<1x128xf32, #tpu.memory_space<vmem>>, vector<1x128xf32>
    %4 = vector.broadcast %3 : vector<1x128xf32> to vector<32x128xf32>
    %5 = arith.addf %2, %4 : vector<32x128xf32>
    %6 = arith.truncf %5 : vector<32x128xf32> to vector<32x128xbf16>
    %c0_5 = arith.constant 0 : index
    %c0_6 = arith.constant 0 : index
    %7 = vector.load %arg5[%c0_5, %c0_6] : memref<32x128xbf16, #tpu.memory_space<vmem>>, vector<32x128xbf16>
    tpu.vector_store %arg5[%c0_5, %c0_6], %6 {strides = array<i32>} : memref<32x128xbf16, #tpu.memory_space<vmem>>, vector<32x128xbf16>,
    return
  }
  func.func @transform_0(%arg0: i32, %arg1: i32) -> (i32, i32) {
    %c0_i32 = arith.constant 0 : i32
    %c0_i32_0 = arith.constant 0 : i32
    return %arg1, %c0_i32 : i32, i32
  }
  func.func @transform_1(%arg0: i32, %arg1: i32) -> (i32, i32) {
    %c0_i32 = arith.constant 0 : i32
    %c0_i32_0 = arith.constant 0 : i32
    return %c0_i32, %arg0 : i32, i32
  }
  func.func @transform_2(%arg0: i32, %arg1: i32) -> (i32, i32) {
    %c0_i32 = arith.constant 0 : i32
    %c0_i32_0 = arith.constant 0 : i32
    return %c0_i32, %arg0 : i32, i32
  }
  func.func @transform_3(%arg0: i32, %arg1: i32) -> (i32, i32) {
    %c0_i32 = arith.constant 0 : i32
    return %arg1, %arg0 : i32, i32
  }
}

module attributes {stable_mosaic.version = 11 : i64} {
  func.func @_mm_kernel_single(%arg0: i32, %arg1: i32, %arg2: memref<32x1152xbf16, #tpu.memory_space<vmem>>, %arg3: memref<1152x128xbf16, #tpu.memory_space<vmem>>, %arg4: memref<1x128xf32, #tpu.memory_space<vmem>>, %arg5: memref<32x128xbf16, #tpu.memory_space<vmem>>, %arg6: memref<32x128xbf16, #tpu.memory_space<vmem>>) attributes {dimension_semantics = [#tpu.dimension_semantics<parallel>, #tpu.dimension_semantics<parallel>], iteration_bounds = array<i64: 1, 2>, scalar_prefetch = 0 : i64, scratch_operands = 0 : i64, tpu.core_type = #tpu.core_type<tc>, window_params = [{transform_indices = @transform_0, window_bounds = array<i64: 32, 1152>}, {transform_indices = @transform_1, window_bounds = array<i64: 1152, 128>}, {transform_indices = @transform_2, window_bounds = array<i64: 1, 128>}, {transform_indices = @transform_3, window_bounds = array<i64: 32, 128>}, {transform_indices = @transform_4, window_bounds = array<i64: 32, 128>}]} {
    %c0 = arith.constant 0 : index
    %c0_0 = arith.constant 0 : index
    %0 = vector.load %arg2[%c0, %c0_0] : memref<32x1152xbf16, #tpu.memory_space<vmem>>, vector<32x1152xbf16>
    %c0_1 = arith.constant 0 : index
    %c0_2 = arith.constant 0 : index
    %1 = vector.load %arg3[%c0_1, %c0_2] : memref<1152x128xbf16, #tpu.memory_space<vmem>>, vector<1152x128xbf16>
    %cst = arith.constant dense<0.000000e+00> : vector<32x128xf32>
    %2 = tpu.matmul %0, %1, %cst {dimension_numbers = #tpu.dot_dimension_numbers<[1], [0], [0], [1], [0, 0, 1, 1], [], []>} : vector<32x1152xbf16>, vector<1152x128xbf16>, vector<32x128xf32> -> vector<32x128xf32>
    %c0_3 = arith.constant 0 : index
    %c0_4 = arith.constant 0 : index
    %3 = vector.load %arg4[%c0_3, %c0_4] : memref<1x128xf32, #tpu.memory_space<vmem>>, vector<1x128xf32>
    %4 = vector.broadcast %3 : vector<1x128xf32> to vector<32x128xf32>
    %5 = arith.addf %2, %4 : vector<32x128xf32>
    %c0_5 = arith.constant 0 : index
    %c0_6 = arith.constant 0 : index
    %6 = vector.load %arg5[%c0_5, %c0_6] : memref<32x128xbf16, #tpu.memory_space<vmem>>, vector<32x128xbf16>
    %7 = arith.extf %6 : vector<32x128xbf16> to vector<32x128xf32>
    %8 = arith.addf %5, %7 : vector<32x128xf32>
    %cst_7 = arith.constant 0.000000e+00 : f32
    %9 = vector.broadcast %cst_7 : f32 to vector<32x128xf32>
    %10 = arith.maximumf %8, %9 : vector<32x128xf32>
    %11 = arith.truncf %10 : vector<32x128xf32> to vector<32x128xbf16>
    %c0_8 = arith.constant 0 : index
    %c0_9 = arith.constant 0 : index
    %12 = vector.load %arg6[%c0_8, %c0_9] : memref<32x128xbf16, #tpu.memory_space<vmem>>, vector<32x128xbf16>
    tpu.vector_store %arg6[%c0_8, %c0_9], %11 {strides = array<i32>} : memref<32x128xbf16, #tpu.memory_space<vmem>>, vector<32x128xbf16>,
    return
  }
  func.func @transform_0(%arg0: i32, %arg1: i32) -> (i32, i32) {
    %c0_i32 = arith.constant 0 : i32
    %c0_i32_0 = arith.constant 0 : i32
    return %arg1, %c0_i32 : i32, i32
  }
  func.func @transform_1(%arg0: i32, %arg1: i32) -> (i32, i32) {
    %c0_i32 = arith.constant 0 : i32
    %c0_i32_0 = arith.constant 0 : i32
    return %c0_i32, %arg0 : i32, i32
  }
  func.func @transform_2(%arg0: i32, %arg1: i32) -> (i32, i32) {
    %c0_i32 = arith.constant 0 : i32
    %c0_i32_0 = arith.constant 0 : i32
    return %c0_i32, %arg0 : i32, i32
  }
  func.func @transform_3(%arg0: i32, %arg1: i32) -> (i32, i32) {
    %c0_i32 = arith.constant 0 : i32
    return %arg1, %arg0 : i32, i32
  }
  func.func @transform_4(%arg0: i32, %arg1: i32) -> (i32, i32) {
    %c0_i32 = arith.constant 0 : i32
    return %arg1, %arg0 : i32, i32
  }
}

module attributes {stable_mosaic.version = 11 : i64} {
  func.func @_mm_kernel_single(%arg0: i32, %arg1: i32, %arg2: memref<32x1152xbf16, #tpu.memory_space<vmem>>, %arg3: memref<1152x128xbf16, #tpu.memory_space<vmem>>, %arg4: memref<1x128xf32, #tpu.memory_space<vmem>>, %arg5: memref<32x128xbf16, #tpu.memory_space<vmem>>) attributes {dimension_semantics = [#tpu.dimension_semantics<parallel>, #tpu.dimension_semantics<parallel>], iteration_bounds = array<i64: 1, 2>, scalar_prefetch = 0 : i64, scratch_operands = 0 : i64, tpu.core_type = #tpu.core_type<tc>, window_params = [{transform_indices = @transform_0, window_bounds = array<i64: 32, 1152>}, {transform_indices = @transform_1, window_bounds = array<i64: 1152, 128>}, {transform_indices = @transform_2, window_bounds = array<i64: 1, 128>}, {transform_indices = @transform_3, window_bounds = array<i64: 32, 128>}]} {
    %c0 = arith.constant 0 : index
    %c0_0 = arith.constant 0 : index
    %0 = vector.load %arg2[%c0, %c0_0] : memref<32x1152xbf16, #tpu.memory_space<vmem>>, vector<32x1152xbf16>
    %c0_1 = arith.constant 0 : index
    %c0_2 = arith.constant 0 : index
    %1 = vector.load %arg3[%c0_1, %c0_2] : memref<1152x128xbf16, #tpu.memory_space<vmem>>, vector<1152x128xbf16>
    %cst = arith.constant dense<0.000000e+00> : vector<32x128xf32>
    %2 = tpu.matmul %0, %1, %cst {dimension_numbers = #tpu.dot_dimension_numbers<[1], [0], [0], [1], [0, 0, 1, 1], [], []>} : vector<32x1152xbf16>, vector<1152x128xbf16>, vector<32x128xf32> -> vector<32x128xf32>
    %c0_3 = arith.constant 0 : index
    %c0_4 = arith.constant 0 : index
    %3 = vector.load %arg4[%c0_3, %c0_4] : memref<1x128xf32, #tpu.memory_space<vmem>>, vector<1x128xf32>
    %4 = vector.broadcast %3 : vector<1x128xf32> to vector<32x128xf32>
    %5 = arith.addf %2, %4 : vector<32x128xf32>
    %cst_5 = arith.constant 0.000000e+00 : f32
    %6 = vector.broadcast %cst_5 : f32 to vector<32x128xf32>
    %7 = arith.maximumf %5, %6 : vector<32x128xf32>
    %8 = arith.truncf %7 : vector<32x128xf32> to vector<32x128xbf16>
    %c0_6 = arith.constant 0 : index
    %c0_7 = arith.constant 0 : index
    %9 = vector.load %arg5[%c0_6, %c0_7] : memref<32x128xbf16, #tpu.memory_space<vmem>>, vector<32x128xbf16>
    tpu.vector_store %arg5[%c0_6, %c0_7], %8 {strides = array<i32>} : memref<32x128xbf16, #tpu.memory_space<vmem>>, vector<32x128xbf16>,
    return
  }
  func.func @transform_0(%arg0: i32, %arg1: i32) -> (i32, i32) {
    %c0_i32 = arith.constant 0 : i32
    %c0_i32_0 = arith.constant 0 : i32
    return %arg1, %c0_i32 : i32, i32
  }
  func.func @transform_1(%arg0: i32, %arg1: i32) -> (i32, i32) {
    %c0_i32 = arith.constant 0 : i32
    %c0_i32_0 = arith.constant 0 : i32
    return %c0_i32, %arg0 : i32, i32
  }
  func.func @transform_2(%arg0: i32, %arg1: i32) -> (i32, i32) {
    %c0_i32 = arith.constant 0 : i32
    %c0_i32_0 = arith.constant 0 : i32
    return %c0_i32, %arg0 : i32, i32
  }
  func.func @transform_3(%arg0: i32, %arg1: i32) -> (i32, i32) {
    %c0_i32 = arith.constant 0 : i32
    return %arg1, %arg0 : i32, i32
  }
}

module attributes {stable_mosaic.version = 11 : i64} {
  func.func @_mm_kernel_single(%arg0: i32, %arg1: i32, %arg2: memref<16x1152xbf16, #tpu.memory_space<vmem>>, %arg3: memref<1152x128xbf16, #tpu.memory_space<vmem>>, %arg4: memref<1x128xf32, #tpu.memory_space<vmem>>, %arg5: memref<16x128xbf16, #tpu.memory_space<vmem>>) attributes {dimension_semantics = [#tpu.dimension_semantics<parallel>, #tpu.dimension_semantics<parallel>], iteration_bounds = array<i64: 1, 2>, scalar_prefetch = 0 : i64, scratch_operands = 0 : i64, tpu.core_type = #tpu.core_type<tc>, window_params = [{transform_indices = @transform_0, window_bounds = array<i64: 16, 1152>}, {transform_indices = @transform_1, window_bounds = array<i64: 1152, 128>}, {transform_indices = @transform_2, window_bounds = array<i64: 1, 128>}, {transform_indices = @transform_3, window_bounds = array<i64: 16, 128>}]} {
    %c0 = arith.constant 0 : index
    %c0_0 = arith.constant 0 : index
    %0 = vector.load %arg2[%c0, %c0_0] : memref<16x1152xbf16, #tpu.memory_space<vmem>>, vector<16x1152xbf16>
    %c0_1 = arith.constant 0 : index
    %c0_2 = arith.constant 0 : index
    %1 = vector.load %arg3[%c0_1, %c0_2] : memref<1152x128xbf16, #tpu.memory_space<vmem>>, vector<1152x128xbf16>
    %cst = arith.constant dense<0.000000e+00> : vector<16x128xf32>
    %2 = tpu.matmul %0, %1, %cst {dimension_numbers = #tpu.dot_dimension_numbers<[1], [0], [0], [1], [0, 0, 1, 1], [], []>} : vector<16x1152xbf16>, vector<1152x128xbf16>, vector<16x128xf32> -> vector<16x128xf32>
    %c0_3 = arith.constant 0 : index
    %c0_4 = arith.constant 0 : index
    %3 = vector.load %arg4[%c0_3, %c0_4] : memref<1x128xf32, #tpu.memory_space<vmem>>, vector<1x128xf32>
    %4 = vector.broadcast %3 : vector<1x128xf32> to vector<16x128xf32>
    %5 = arith.addf %2, %4 : vector<16x128xf32>
    %cst_5 = arith.constant 0.000000e+00 : f32
    %6 = vector.broadcast %cst_5 : f32 to vector<16x128xf32>
    %7 = arith.maximumf %5, %6 : vector<16x128xf32>
    %8 = arith.truncf %7 : vector<16x128xf32> to vector<16x128xbf16>
    %c0_6 = arith.constant 0 : index
    %c0_7 = arith.constant 0 : index
    %9 = vector.load %arg5[%c0_6, %c0_7] : memref<16x128xbf16, #tpu.memory_space<vmem>>, vector<16x128xbf16>
    tpu.vector_store %arg5[%c0_6, %c0_7], %8 {strides = array<i32>} : memref<16x128xbf16, #tpu.memory_space<vmem>>, vector<16x128xbf16>,
    return
  }
  func.func @transform_0(%arg0: i32, %arg1: i32) -> (i32, i32) {
    %c0_i32 = arith.constant 0 : i32
    %c0_i32_0 = arith.constant 0 : i32
    return %arg0, %c0_i32 : i32, i32
  }
  func.func @transform_1(%arg0: i32, %arg1: i32) -> (i32, i32) {
    %c0_i32 = arith.constant 0 : i32
    %c0_i32_0 = arith.constant 0 : i32
    return %c0_i32, %arg1 : i32, i32
  }
  func.func @transform_2(%arg0: i32, %arg1: i32) -> (i32, i32) {
    %c0_i32 = arith.constant 0 : i32
    %c0_i32_0 = arith.constant 0 : i32
    return %c0_i32, %arg1 : i32, i32
  }
  func.func @transform_3(%arg0: i32, %arg1: i32) -> (i32, i32) {
    %c0_i32 = arith.constant 0 : i32
    return %arg0, %arg1 : i32, i32
  }
}

module attributes {stable_mosaic.version = 11 : i64} {
  func.func @_mm_kernel_multik(%arg0: i32, %arg1: i32, %arg2: i32, %arg3: memref<16x1152xbf16, #tpu.memory_space<vmem>>, %arg4: memref<1152x128xbf16, #tpu.memory_space<vmem>>, %arg5: memref<1x128xf32, #tpu.memory_space<vmem>>, %arg6: memref<16x128xbf16, #tpu.memory_space<vmem>>, %arg7: memref<16x128xf32, #tpu.memory_space<vmem>>) attributes {dimension_semantics = [#tpu.dimension_semantics<parallel>, #tpu.dimension_semantics<parallel>, #tpu.dimension_semantics<arbitrary>], iteration_bounds = array<i64: 1, 2, 2>, scalar_prefetch = 0 : i64, scratch_operands = 1 : i64, tpu.core_type = #tpu.core_type<tc>, window_params = [{transform_indices = @transform_0, window_bounds = array<i64: 16, 1152>}, {transform_indices = @transform_1, window_bounds = array<i64: 1152, 128>}, {transform_indices = @transform_2, window_bounds = array<i64: 1, 128>}, {transform_indices = @transform_3, window_bounds = array<i64: 16, 128>}]} {
    %c0_i32 = arith.constant 0 : i32
    %0 = arith.cmpi eq, %arg2, %c0_i32 : i32
    %1 = arith.extui %0 : i1 to i32
    %c0_i32_0 = arith.constant 0 : i32
    %2 = arith.cmpi ne, %1, %c0_i32_0 : i32
    scf.if %2 {
      %cst_9 = arith.constant 0.000000e+00 : f32
      %12 = vector.broadcast %cst_9 : f32 to vector<16x128xf32>
      %c0_10 = arith.constant 0 : index
      %c0_11 = arith.constant 0 : index
      %13 = vector.load %arg7[%c0_10, %c0_11] : memref<16x128xf32, #tpu.memory_space<vmem>>, vector<16x128xf32>
      tpu.vector_store %arg7[%c0_10, %c0_11], %12 {strides = array<i32>} : memref<16x128xf32, #tpu.memory_space<vmem>>, vector<16x128xf32>,
    } else {
    }
    %c0 = arith.constant 0 : index
    %c0_1 = arith.constant 0 : index
    %3 = vector.load %arg7[%c0, %c0_1] : memref<16x128xf32, #tpu.memory_space<vmem>>, vector<16x128xf32>
    %c0_2 = arith.constant 0 : index
    %c0_3 = arith.constant 0 : index
    %4 = vector.load %arg3[%c0_2, %c0_3] : memref<16x1152xbf16, #tpu.memory_space<vmem>>, vector<16x1152xbf16>
    %c0_4 = arith.constant 0 : index
    %c0_5 = arith.constant 0 : index
    %5 = vector.load %arg4[%c0_4, %c0_5] : memref<1152x128xbf16, #tpu.memory_space<vmem>>, vector<1152x128xbf16>
    %cst = arith.constant dense<0.000000e+00> : vector<16x128xf32>
    %6 = tpu.matmul %4, %5, %cst {dimension_numbers = #tpu.dot_dimension_numbers<[1], [0], [0], [1], [0, 0, 1, 1], [], []>} : vector<16x1152xbf16>, vector<1152x128xbf16>, vector<16x128xf32> -> vector<16x128xf32>
    %7 = arith.addf %3, %6 : vector<16x128xf32>
    %c0_6 = arith.constant 0 : index
    %c0_7 = arith.constant 0 : index
    %8 = vector.load %arg7[%c0_6, %c0_7] : memref<16x128xf32, #tpu.memory_space<vmem>>, vector<16x128xf32>
    tpu.vector_store %arg7[%c0_6, %c0_7], %7 {strides = array<i32>} : memref<16x128xf32, #tpu.memory_space<vmem>>, vector<16x128xf32>,
    %c1_i32 = arith.constant 1 : i32
    %9 = arith.cmpi eq, %arg2, %c1_i32 : i32
    %10 = arith.extui %9 : i1 to i32
    %c0_i32_8 = arith.constant 0 : i32
    %11 = arith.cmpi ne, %10, %c0_i32_8 : i32
    scf.if %11 {
      %c0_9 = arith.constant 0 : index
      %c0_10 = arith.constant 0 : index
      %12 = vector.load %arg7[%c0_9, %c0_10] : memref<16x128xf32, #tpu.memory_space<vmem>>, vector<16x128xf32>
      %c0_11 = arith.constant 0 : index
      %c0_12 = arith.constant 0 : index
      %13 = vector.load %arg5[%c0_11, %c0_12] : memref<1x128xf32, #tpu.memory_space<vmem>>, vector<1x128xf32>
      %14 = vector.broadcast %13 : vector<1x128xf32> to vector<16x128xf32>
      %15 = arith.addf %12, %14 : vector<16x128xf32>
      %cst_13 = arith.constant 0.000000e+00 : f32
      %16 = vector.broadcast %cst_13 : f32 to vector<16x128xf32>
      %17 = arith.maximumf %15, %16 : vector<16x128xf32>
      %18 = arith.truncf %17 : vector<16x128xf32> to vector<16x128xbf16>
      %c0_14 = arith.constant 0 : index
      %c0_15 = arith.constant 0 : index
      %19 = vector.load %arg6[%c0_14, %c0_15] : memref<16x128xbf16, #tpu.memory_space<vmem>>, vector<16x128xbf16>
      tpu.vector_store %arg6[%c0_14, %c0_15], %18 {strides = array<i32>} : memref<16x128xbf16, #tpu.memory_space<vmem>>, vector<16x128xbf16>,
    } else {
    }
    return
  }
  func.func @transform_0(%arg0: i32, %arg1: i32, %arg2: i32) -> (i32, i32) {
    %c0_i32 = arith.constant 0 : i32
    return %arg0, %arg2 : i32, i32
  }
  func.func @transform_1(%arg0: i32, %arg1: i32, %arg2: i32) -> (i32, i32) {
    %c0_i32 = arith.constant 0 : i32
    return %arg2, %arg1 : i32, i32
  }
  func.func @transform_2(%arg0: i32, %arg1: i32, %arg2: i32) -> (i32, i32) {
    %c0_i32 = arith.constant 0 : i32
    %c0_i32_0 = arith.constant 0 : i32
    return %c0_i32, %arg1 : i32, i32
  }
  func.func @transform_3(%arg0: i32, %arg1: i32, %arg2: i32) -> (i32, i32) {
    %c0_i32 = arith.constant 0 : i32
    return %arg0, %arg1 : i32, i32
  }
}

module attributes {stable_mosaic.version = 11 : i64} {
  func.func @_mm_kernel_single(%arg0: i32, %arg1: i32, %arg2: memref<16x128xbf16, #tpu.memory_space<vmem>>, %arg3: memref<128x128xbf16, #tpu.memory_space<vmem>>, %arg4: memref<1x128xf32, #tpu.memory_space<vmem>>, %arg5: memref<16x128xbf16, #tpu.memory_space<vmem>>) attributes {dimension_semantics = [#tpu.dimension_semantics<parallel>, #tpu.dimension_semantics<parallel>], iteration_bounds = array<i64: 1, 2>, scalar_prefetch = 0 : i64, scratch_operands = 0 : i64, tpu.core_type = #tpu.core_type<tc>, window_params = [{transform_indices = @transform_0, window_bounds = array<i64: 16, 128>}, {transform_indices = @transform_1, window_bounds = array<i64: 128, 128>}, {transform_indices = @transform_2, window_bounds = array<i64: 1, 128>}, {transform_indices = @transform_3, window_bounds = array<i64: 16, 128>}]} {
    %c0 = arith.constant 0 : index
    %c0_0 = arith.constant 0 : index
    %0 = vector.load %arg2[%c0, %c0_0] : memref<16x128xbf16, #tpu.memory_space<vmem>>, vector<16x128xbf16>
    %c0_1 = arith.constant 0 : index
    %c0_2 = arith.constant 0 : index
    %1 = vector.load %arg3[%c0_1, %c0_2] : memref<128x128xbf16, #tpu.memory_space<vmem>>, vector<128x128xbf16>
    %cst = arith.constant dense<0.000000e+00> : vector<16x128xf32>
    %2 = tpu.matmul %0, %1, %cst {dimension_numbers = #tpu.dot_dimension_numbers<[1], [0], [0], [1], [0, 0, 1, 1], [], []>} : vector<16x128xbf16>, vector<128x128xbf16>, vector<16x128xf32> -> vector<16x128xf32>
    %c0_3 = arith.constant 0 : index
    %c0_4 = arith.constant 0 : index
    %3 = vector.load %arg4[%c0_3, %c0_4] : memref<1x128xf32, #tpu.memory_space<vmem>>, vector<1x128xf32>
    %4 = vector.broadcast %3 : vector<1x128xf32> to vector<16x128xf32>
    %5 = arith.addf %2, %4 : vector<16x128xf32>
    %6 = arith.truncf %5 : vector<16x128xf32> to vector<16x128xbf16>
    %c0_5 = arith.constant 0 : index
    %c0_6 = arith.constant 0 : index
    %7 = vector.load %arg5[%c0_5, %c0_6] : memref<16x128xbf16, #tpu.memory_space<vmem>>, vector<16x128xbf16>
    tpu.vector_store %arg5[%c0_5, %c0_6], %6 {strides = array<i32>} : memref<16x128xbf16, #tpu.memory_space<vmem>>, vector<16x128xbf16>,
    return
  }
  func.func @transform_0(%arg0: i32, %arg1: i32) -> (i32, i32) {
    %c0_i32 = arith.constant 0 : i32
    %c0_i32_0 = arith.constant 0 : i32
    return %arg0, %c0_i32 : i32, i32
  }
  func.func @transform_1(%arg0: i32, %arg1: i32) -> (i32, i32) {
    %c0_i32 = arith.constant 0 : i32
    %c0_i32_0 = arith.constant 0 : i32
    return %c0_i32, %arg1 : i32, i32
  }
  func.func @transform_2(%arg0: i32, %arg1: i32) -> (i32, i32) {
    %c0_i32 = arith.constant 0 : i32
    %c0_i32_0 = arith.constant 0 : i32
    return %c0_i32, %arg1 : i32, i32
  }
  func.func @transform_3(%arg0: i32, %arg1: i32) -> (i32, i32) {
    %c0_i32 = arith.constant 0 : i32
    return %arg0, %arg1 : i32, i32
  }
}

module attributes {stable_mosaic.version = 11 : i64} {
  func.func @_mm_kernel_multik(%arg0: i32, %arg1: i32, %arg2: i32, %arg3: memref<16x1152xbf16, #tpu.memory_space<vmem>>, %arg4: memref<1152x128xbf16, #tpu.memory_space<vmem>>, %arg5: memref<1x128xf32, #tpu.memory_space<vmem>>, %arg6: memref<16x128xbf16, #tpu.memory_space<vmem>>, %arg7: memref<16x128xbf16, #tpu.memory_space<vmem>>, %arg8: memref<16x128xf32, #tpu.memory_space<vmem>>) attributes {dimension_semantics = [#tpu.dimension_semantics<parallel>, #tpu.dimension_semantics<parallel>, #tpu.dimension_semantics<arbitrary>], iteration_bounds = array<i64: 1, 2, 2>, scalar_prefetch = 0 : i64, scratch_operands = 1 : i64, tpu.core_type = #tpu.core_type<tc>, window_params = [{transform_indices = @transform_0, window_bounds = array<i64: 16, 1152>}, {transform_indices = @transform_1, window_bounds = array<i64: 1152, 128>}, {transform_indices = @transform_2, window_bounds = array<i64: 1, 128>}, {transform_indices = @transform_3, window_bounds = array<i64: 16, 128>}, {transform_indices = @transform_4, window_bounds = array<i64: 16, 128>}]} {
    %c0_i32 = arith.constant 0 : i32
    %0 = arith.cmpi eq, %arg2, %c0_i32 : i32
    %1 = arith.extui %0 : i1 to i32
    %c0_i32_0 = arith.constant 0 : i32
    %2 = arith.cmpi ne, %1, %c0_i32_0 : i32
    scf.if %2 {
      %cst_9 = arith.constant 0.000000e+00 : f32
      %12 = vector.broadcast %cst_9 : f32 to vector<16x128xf32>
      %c0_10 = arith.constant 0 : index
      %c0_11 = arith.constant 0 : index
      %13 = vector.load %arg8[%c0_10, %c0_11] : memref<16x128xf32, #tpu.memory_space<vmem>>, vector<16x128xf32>
      tpu.vector_store %arg8[%c0_10, %c0_11], %12 {strides = array<i32>} : memref<16x128xf32, #tpu.memory_space<vmem>>, vector<16x128xf32>,
    } else {
    }
    %c0 = arith.constant 0 : index
    %c0_1 = arith.constant 0 : index
    %3 = vector.load %arg8[%c0, %c0_1] : memref<16x128xf32, #tpu.memory_space<vmem>>, vector<16x128xf32>
    %c0_2 = arith.constant 0 : index
    %c0_3 = arith.constant 0 : index
    %4 = vector.load %arg3[%c0_2, %c0_3] : memref<16x1152xbf16, #tpu.memory_space<vmem>>, vector<16x1152xbf16>
    %c0_4 = arith.constant 0 : index
    %c0_5 = arith.constant 0 : index
    %5 = vector.load %arg4[%c0_4, %c0_5] : memref<1152x128xbf16, #tpu.memory_space<vmem>>, vector<1152x128xbf16>
    %cst = arith.constant dense<0.000000e+00> : vector<16x128xf32>
    %6 = tpu.matmul %4, %5, %cst {dimension_numbers = #tpu.dot_dimension_numbers<[1], [0], [0], [1], [0, 0, 1, 1], [], []>} : vector<16x1152xbf16>, vector<1152x128xbf16>, vector<16x128xf32> -> vector<16x128xf32>
    %7 = arith.addf %3, %6 : vector<16x128xf32>
    %c0_6 = arith.constant 0 : index
    %c0_7 = arith.constant 0 : index
    %8 = vector.load %arg8[%c0_6, %c0_7] : memref<16x128xf32, #tpu.memory_space<vmem>>, vector<16x128xf32>
    tpu.vector_store %arg8[%c0_6, %c0_7], %7 {strides = array<i32>} : memref<16x128xf32, #tpu.memory_space<vmem>>, vector<16x128xf32>,
    %c1_i32 = arith.constant 1 : i32
    %9 = arith.cmpi eq, %arg2, %c1_i32 : i32
    %10 = arith.extui %9 : i1 to i32
    %c0_i32_8 = arith.constant 0 : i32
    %11 = arith.cmpi ne, %10, %c0_i32_8 : i32
    scf.if %11 {
      %c0_9 = arith.constant 0 : index
      %c0_10 = arith.constant 0 : index
      %12 = vector.load %arg8[%c0_9, %c0_10] : memref<16x128xf32, #tpu.memory_space<vmem>>, vector<16x128xf32>
      %c0_11 = arith.constant 0 : index
      %c0_12 = arith.constant 0 : index
      %13 = vector.load %arg5[%c0_11, %c0_12] : memref<1x128xf32, #tpu.memory_space<vmem>>, vector<1x128xf32>
      %14 = vector.broadcast %13 : vector<1x128xf32> to vector<16x128xf32>
      %15 = arith.addf %12, %14 : vector<16x128xf32>
      %c0_13 = arith.constant 0 : index
      %c0_14 = arith.constant 0 : index
      %16 = vector.load %arg6[%c0_13, %c0_14] : memref<16x128xbf16, #tpu.memory_space<vmem>>, vector<16x128xbf16>
      %17 = arith.extf %16 : vector<16x128xbf16> to vector<16x128xf32>
      %18 = arith.addf %15, %17 : vector<16x128xf32>
      %cst_15 = arith.constant 0.000000e+00 : f32
      %19 = vector.broadcast %cst_15 : f32 to vector<16x128xf32>
      %20 = arith.maximumf %18, %19 : vector<16x128xf32>
      %21 = arith.truncf %20 : vector<16x128xf32> to vector<16x128xbf16>
      %c0_16 = arith.constant 0 : index
      %c0_17 = arith.constant 0 : index
      %22 = vector.load %arg7[%c0_16, %c0_17] : memref<16x128xbf16, #tpu.memory_space<vmem>>, vector<16x128xbf16>
      tpu.vector_store %arg7[%c0_16, %c0_17], %21 {strides = array<i32>} : memref<16x128xbf16, #tpu.memory_space<vmem>>, vector<16x128xbf16>,
    } else {
    }
    return
  }
  func.func @transform_0(%arg0: i32, %arg1: i32, %arg2: i32) -> (i32, i32) {
    %c0_i32 = arith.constant 0 : i32
    return %arg0, %arg2 : i32, i32
  }
  func.func @transform_1(%arg0: i32, %arg1: i32, %arg2: i32) -> (i32, i32) {
    %c0_i32 = arith.constant 0 : i32
    return %arg2, %arg1 : i32, i32
  }
  func.func @transform_2(%arg0: i32, %arg1: i32, %arg2: i32) -> (i32, i32) {
    %c0_i32 = arith.constant 0 : i32
    %c0_i32_0 = arith.constant 0 : i32
    return %c0_i32, %arg1 : i32, i32
  }
  func.func @transform_3(%arg0: i32, %arg1: i32, %arg2: i32) -> (i32, i32) {
    %c0_i32 = arith.constant 0 : i32
    return %arg0, %arg1 : i32, i32
  }
  func.func @transform_4(%arg0: i32, %arg1: i32, %arg2: i32) -> (i32, i32) {
    %c0_i32 = arith.constant 0 : i32
    return %arg0, %arg1 : i32, i32
  }
}

module attributes {stable_mosaic.version = 11 : i64} {
  func.func @_mm_kernel_single(%arg0: i32, %arg1: i32, %arg2: memref<16x1152xbf16, #tpu.memory_space<vmem>>, %arg3: memref<1152x128xbf16, #tpu.memory_space<vmem>>, %arg4: memref<1x128xf32, #tpu.memory_space<vmem>>, %arg5: memref<16x128xbf16, #tpu.memory_space<vmem>>) attributes {dimension_semantics = [#tpu.dimension_semantics<parallel>, #tpu.dimension_semantics<parallel>], iteration_bounds = array<i64: 1, 1>, scalar_prefetch = 0 : i64, scratch_operands = 0 : i64, tpu.core_type = #tpu.core_type<tc>, window_params = [{transform_indices = @transform_0, window_bounds = array<i64: 16, 1152>}, {transform_indices = @transform_1, window_bounds = array<i64: 1152, 128>}, {transform_indices = @transform_2, window_bounds = array<i64: 1, 128>}, {transform_indices = @transform_3, window_bounds = array<i64: 16, 128>}]} {
    %c0 = arith.constant 0 : index
    %c0_0 = arith.constant 0 : index
    %0 = vector.load %arg2[%c0, %c0_0] : memref<16x1152xbf16, #tpu.memory_space<vmem>>, vector<16x1152xbf16>
    %c0_1 = arith.constant 0 : index
    %c0_2 = arith.constant 0 : index
    %1 = vector.load %arg3[%c0_1, %c0_2] : memref<1152x128xbf16, #tpu.memory_space<vmem>>, vector<1152x128xbf16>
    %cst = arith.constant dense<0.000000e+00> : vector<16x128xf32>
    %2 = tpu.matmul %0, %1, %cst {dimension_numbers = #tpu.dot_dimension_numbers<[1], [0], [0], [1], [0, 0, 1, 1], [], []>} : vector<16x1152xbf16>, vector<1152x128xbf16>, vector<16x128xf32> -> vector<16x128xf32>
    %c0_3 = arith.constant 0 : index
    %c0_4 = arith.constant 0 : index
    %3 = vector.load %arg4[%c0_3, %c0_4] : memref<1x128xf32, #tpu.memory_space<vmem>>, vector<1x128xf32>
    %4 = vector.broadcast %3 : vector<1x128xf32> to vector<16x128xf32>
    %5 = arith.addf %2, %4 : vector<16x128xf32>
    %cst_5 = arith.constant 0.000000e+00 : f32
    %6 = vector.broadcast %cst_5 : f32 to vector<16x128xf32>
    %7 = arith.maximumf %5, %6 : vector<16x128xf32>
    %8 = arith.truncf %7 : vector<16x128xf32> to vector<16x128xbf16>
    %c0_6 = arith.constant 0 : index
    %c0_7 = arith.constant 0 : index
    %9 = vector.load %arg5[%c0_6, %c0_7] : memref<16x128xbf16, #tpu.memory_space<vmem>>, vector<16x128xbf16>
    tpu.vector_store %arg5[%c0_6, %c0_7], %8 {strides = array<i32>} : memref<16x128xbf16, #tpu.memory_space<vmem>>, vector<16x128xbf16>,
    return
  }
  func.func @transform_0(%arg0: i32, %arg1: i32) -> (i32, i32) {
    %c0_i32 = arith.constant 0 : i32
    %c0_i32_0 = arith.constant 0 : i32
    return %arg0, %c0_i32 : i32, i32
  }
  func.func @transform_1(%arg0: i32, %arg1: i32) -> (i32, i32) {
    %c0_i32 = arith.constant 0 : i32
    %c0_i32_0 = arith.constant 0 : i32
    return %c0_i32, %arg1 : i32, i32
  }
  func.func @transform_2(%arg0: i32, %arg1: i32) -> (i32, i32) {
    %c0_i32 = arith.constant 0 : i32
    %c0_i32_0 = arith.constant 0 : i32
    return %c0_i32, %arg1 : i32, i32
  }
  func.func @transform_3(%arg0: i32, %arg1: i32) -> (i32, i32) {
    %c0_i32 = arith.constant 0 : i32
    return %arg0, %arg1 : i32, i32
  }
}

module attributes {stable_mosaic.version = 11 : i64} {
  func.func @_mm_kernel_single(%arg0: i32, %arg1: i32, %arg2: memref<16x128xbf16, #tpu.memory_space<vmem>>, %arg3: memref<128x128xbf16, #tpu.memory_space<vmem>>, %arg4: memref<1x128xf32, #tpu.memory_space<vmem>>, %arg5: memref<16x128xf32, #tpu.memory_space<vmem>>) attributes {dimension_semantics = [#tpu.dimension_semantics<parallel>, #tpu.dimension_semantics<parallel>], iteration_bounds = array<i64: 1, 1>, scalar_prefetch = 0 : i64, scratch_operands = 0 : i64, tpu.core_type = #tpu.core_type<tc>, window_params = [{transform_indices = @transform_0, window_bounds = array<i64: 16, 128>}, {transform_indices = @transform_1, window_bounds = array<i64: 128, 128>}, {transform_indices = @transform_2, window_bounds = array<i64: 1, 128>}, {transform_indices = @transform_3, window_bounds = array<i64: 16, 128>}]} {
    %c0 = arith.constant 0 : index
    %c0_0 = arith.constant 0 : index
    %0 = vector.load %arg2[%c0, %c0_0] : memref<16x128xbf16, #tpu.memory_space<vmem>>, vector<16x128xbf16>
    %c0_1 = arith.constant 0 : index
    %c0_2 = arith.constant 0 : index
    %1 = vector.load %arg3[%c0_1, %c0_2] : memref<128x128xbf16, #tpu.memory_space<vmem>>, vector<128x128xbf16>
    %cst = arith.constant dense<0.000000e+00> : vector<16x128xf32>
    %2 = tpu.matmul %0, %1, %cst {dimension_numbers = #tpu.dot_dimension_numbers<[1], [0], [0], [1], [0, 0, 1, 1], [], []>} : vector<16x128xbf16>, vector<128x128xbf16>, vector<16x128xf32> -> vector<16x128xf32>
    %c0_3 = arith.constant 0 : index
    %c0_4 = arith.constant 0 : index
    %3 = vector.load %arg4[%c0_3, %c0_4] : memref<1x128xf32, #tpu.memory_space<vmem>>, vector<1x128xf32>
    %4 = vector.broadcast %3 : vector<1x128xf32> to vector<16x128xf32>
    %5 = arith.addf %2, %4 : vector<16x128xf32>
    %c0_5 = arith.constant 0 : index
    %c0_6 = arith.constant 0 : index
    %6 = vector.load %arg5[%c0_5, %c0_6] : memref<16x128xf32, #tpu.memory_space<vmem>>, vector<16x128xf32>
    tpu.vector_store %arg5[%c0_5, %c0_6], %5 {strides = array<i32>} : memref<16x128xf32, #tpu.memory_space<vmem>>, vector<16x128xf32>,
    return
  }
  func.func @transform_0(%arg0: i32, %arg1: i32) -> (i32, i32) {
    %c0_i32 = arith.constant 0 : i32
    %c0_i32_0 = arith.constant 0 : i32
    return %arg0, %c0_i32 : i32, i32
  }
  func.func @transform_1(%arg0: i32, %arg1: i32) -> (i32, i32) {
    %c0_i32 = arith.constant 0 : i32
    %c0_i32_0 = arith.constant 0 : i32
    return %c0_i32, %arg1 : i32, i32
  }
  func.func @transform_2(%arg0: i32, %arg1: i32) -> (i32, i32) {
    %c0_i32 = arith.constant 0 : i32
    %c0_i32_0 = arith.constant 0 : i32
    return %c0_i32, %arg1 : i32, i32
  }
  func.func @transform_3(%arg0: i32, %arg1: i32) -> (i32, i32) {
    %c0_i32 = arith.constant 0 : i32
    return %arg0, %arg1 : i32, i32
  }
}

module attributes {stable_mosaic.version = 11 : i64} {
  func.func @_mm_kernel_single(%arg0: i32, %arg1: i32, %arg2: memref<32x128xbf16, #tpu.memory_space<vmem>>, %arg3: memref<128x128xbf16, #tpu.memory_space<vmem>>, %arg4: memref<1x128xf32, #tpu.memory_space<vmem>>, %arg5: memref<32x128xf32, #tpu.memory_space<vmem>>) attributes {dimension_semantics = [#tpu.dimension_semantics<parallel>, #tpu.dimension_semantics<parallel>], iteration_bounds = array<i64: 1, 2>, scalar_prefetch = 0 : i64, scratch_operands = 0 : i64, tpu.core_type = #tpu.core_type<tc>, window_params = [{transform_indices = @transform_0, window_bounds = array<i64: 32, 128>}, {transform_indices = @transform_1, window_bounds = array<i64: 128, 128>}, {transform_indices = @transform_2, window_bounds = array<i64: 1, 128>}, {transform_indices = @transform_3, window_bounds = array<i64: 32, 128>}]} {
    %c0 = arith.constant 0 : index
    %c0_0 = arith.constant 0 : index
    %0 = vector.load %arg2[%c0, %c0_0] : memref<32x128xbf16, #tpu.memory_space<vmem>>, vector<32x128xbf16>
    %c0_1 = arith.constant 0 : index
    %c0_2 = arith.constant 0 : index
    %1 = vector.load %arg3[%c0_1, %c0_2] : memref<128x128xbf16, #tpu.memory_space<vmem>>, vector<128x128xbf16>
    %cst = arith.constant dense<0.000000e+00> : vector<32x128xf32>
    %2 = tpu.matmul %0, %1, %cst {dimension_numbers = #tpu.dot_dimension_numbers<[1], [0], [0], [1], [0, 0, 1, 1], [], []>} : vector<32x128xbf16>, vector<128x128xbf16>, vector<32x128xf32> -> vector<32x128xf32>
    %c0_3 = arith.constant 0 : index
    %c0_4 = arith.constant 0 : index
    %3 = vector.load %arg4[%c0_3, %c0_4] : memref<1x128xf32, #tpu.memory_space<vmem>>, vector<1x128xf32>
    %4 = vector.broadcast %3 : vector<1x128xf32> to vector<32x128xf32>
    %5 = arith.addf %2, %4 : vector<32x128xf32>
    %c0_5 = arith.constant 0 : index
    %c0_6 = arith.constant 0 : index
    %6 = vector.load %arg5[%c0_5, %c0_6] : memref<32x128xf32, #tpu.memory_space<vmem>>, vector<32x128xf32>
    tpu.vector_store %arg5[%c0_5, %c0_6], %5 {strides = array<i32>} : memref<32x128xf32, #tpu.memory_space<vmem>>, vector<32x128xf32>,
    return
  }
  func.func @transform_0(%arg0: i32, %arg1: i32) -> (i32, i32) {
    %c0_i32 = arith.constant 0 : i32
    %c0_i32_0 = arith.constant 0 : i32
    return %arg1, %c0_i32 : i32, i32
  }
  func.func @transform_1(%arg0: i32, %arg1: i32) -> (i32, i32) {
    %c0_i32 = arith.constant 0 : i32
    %c0_i32_0 = arith.constant 0 : i32
    return %c0_i32, %arg0 : i32, i32
  }
  func.func @transform_2(%arg0: i32, %arg1: i32) -> (i32, i32) {
    %c0_i32 = arith.constant 0 : i32
    %c0_i32_0 = arith.constant 0 : i32
    return %c0_i32, %arg0 : i32, i32
  }
  func.func @transform_3(%arg0: i32, %arg1: i32) -> (i32, i32) {
    %c0_i32 = arith.constant 0 : i32
    return %arg1, %arg0 : i32, i32
  }
}

module attributes {stable_mosaic.version = 11 : i64} {
  func.func @_mm_kernel_multik(%arg0: i32, %arg1: i32, %arg2: i32, %arg3: memref<16x1152xbf16, #tpu.memory_space<vmem>>, %arg4: memref<1152x128xbf16, #tpu.memory_space<vmem>>, %arg5: memref<1x128xf32, #tpu.memory_space<vmem>>, %arg6: memref<16x128xbf16, #tpu.memory_space<vmem>>, %arg7: memref<16x128xf32, #tpu.memory_space<vmem>>) attributes {dimension_semantics = [#tpu.dimension_semantics<parallel>, #tpu.dimension_semantics<parallel>, #tpu.dimension_semantics<arbitrary>], iteration_bounds = array<i64: 1, 1, 2>, scalar_prefetch = 0 : i64, scratch_operands = 1 : i64, tpu.core_type = #tpu.core_type<tc>, window_params = [{transform_indices = @transform_0, window_bounds = array<i64: 16, 1152>}, {transform_indices = @transform_1, window_bounds = array<i64: 1152, 128>}, {transform_indices = @transform_2, window_bounds = array<i64: 1, 128>}, {transform_indices = @transform_3, window_bounds = array<i64: 16, 128>}]} {
    %c0_i32 = arith.constant 0 : i32
    %0 = arith.cmpi eq, %arg2, %c0_i32 : i32
    %1 = arith.extui %0 : i1 to i32
    %c0_i32_0 = arith.constant 0 : i32
    %2 = arith.cmpi ne, %1, %c0_i32_0 : i32
    scf.if %2 {
      %cst_9 = arith.constant 0.000000e+00 : f32
      %12 = vector.broadcast %cst_9 : f32 to vector<16x128xf32>
      %c0_10 = arith.constant 0 : index
      %c0_11 = arith.constant 0 : index
      %13 = vector.load %arg7[%c0_10, %c0_11] : memref<16x128xf32, #tpu.memory_space<vmem>>, vector<16x128xf32>
      tpu.vector_store %arg7[%c0_10, %c0_11], %12 {strides = array<i32>} : memref<16x128xf32, #tpu.memory_space<vmem>>, vector<16x128xf32>,
    } else {
    }
    %c0 = arith.constant 0 : index
    %c0_1 = arith.constant 0 : index
    %3 = vector.load %arg7[%c0, %c0_1] : memref<16x128xf32, #tpu.memory_space<vmem>>, vector<16x128xf32>
    %c0_2 = arith.constant 0 : index
    %c0_3 = arith.constant 0 : index
    %4 = vector.load %arg3[%c0_2, %c0_3] : memref<16x1152xbf16, #tpu.memory_space<vmem>>, vector<16x1152xbf16>
    %c0_4 = arith.constant 0 : index
    %c0_5 = arith.constant 0 : index
    %5 = vector.load %arg4[%c0_4, %c0_5] : memref<1152x128xbf16, #tpu.memory_space<vmem>>, vector<1152x128xbf16>
    %cst = arith.constant dense<0.000000e+00> : vector<16x128xf32>
    %6 = tpu.matmul %4, %5, %cst {dimension_numbers = #tpu.dot_dimension_numbers<[1], [0], [0], [1], [0, 0, 1, 1], [], []>} : vector<16x1152xbf16>, vector<1152x128xbf16>, vector<16x128xf32> -> vector<16x128xf32>
    %7 = arith.addf %3, %6 : vector<16x128xf32>
    %c0_6 = arith.constant 0 : index
    %c0_7 = arith.constant 0 : index
    %8 = vector.load %arg7[%c0_6, %c0_7] : memref<16x128xf32, #tpu.memory_space<vmem>>, vector<16x128xf32>
    tpu.vector_store %arg7[%c0_6, %c0_7], %7 {strides = array<i32>} : memref<16x128xf32, #tpu.memory_space<vmem>>, vector<16x128xf32>,
    %c1_i32 = arith.constant 1 : i32
    %9 = arith.cmpi eq, %arg2, %c1_i32 : i32
    %10 = arith.extui %9 : i1 to i32
    %c0_i32_8 = arith.constant 0 : i32
    %11 = arith.cmpi ne, %10, %c0_i32_8 : i32
    scf.if %11 {
      %c0_9 = arith.constant 0 : index
      %c0_10 = arith.constant 0 : index
      %12 = vector.load %arg7[%c0_9, %c0_10] : memref<16x128xf32, #tpu.memory_space<vmem>>, vector<16x128xf32>
      %c0_11 = arith.constant 0 : index
      %c0_12 = arith.constant 0 : index
      %13 = vector.load %arg5[%c0_11, %c0_12] : memref<1x128xf32, #tpu.memory_space<vmem>>, vector<1x128xf32>
      %14 = vector.broadcast %13 : vector<1x128xf32> to vector<16x128xf32>
      %15 = arith.addf %12, %14 : vector<16x128xf32>
      %cst_13 = arith.constant 0.000000e+00 : f32
      %16 = vector.broadcast %cst_13 : f32 to vector<16x128xf32>
      %17 = arith.maximumf %15, %16 : vector<16x128xf32>
      %18 = arith.truncf %17 : vector<16x128xf32> to vector<16x128xbf16>
      %c0_14 = arith.constant 0 : index
      %c0_15 = arith.constant 0 : index
      %19 = vector.load %arg6[%c0_14, %c0_15] : memref<16x128xbf16, #tpu.memory_space<vmem>>, vector<16x128xbf16>
      tpu.vector_store %arg6[%c0_14, %c0_15], %18 {strides = array<i32>} : memref<16x128xbf16, #tpu.memory_space<vmem>>, vector<16x128xbf16>,
    } else {
    }
    return
  }
  func.func @transform_0(%arg0: i32, %arg1: i32, %arg2: i32) -> (i32, i32) {
    %c0_i32 = arith.constant 0 : i32
    return %arg0, %arg2 : i32, i32
  }
  func.func @transform_1(%arg0: i32, %arg1: i32, %arg2: i32) -> (i32, i32) {
    %c0_i32 = arith.constant 0 : i32
    return %arg2, %arg1 : i32, i32
  }
  func.func @transform_2(%arg0: i32, %arg1: i32, %arg2: i32) -> (i32, i32) {
    %c0_i32 = arith.constant 0 : i32
    %c0_i32_0 = arith.constant 0 : i32
    return %c0_i32, %arg1 : i32, i32
  }
  func.func @transform_3(%arg0: i32, %arg1: i32, %arg2: i32) -> (i32, i32) {
    %c0_i32 = arith.constant 0 : i32
    return %arg0, %arg1 : i32, i32
  }
}

module attributes {stable_mosaic.version = 11 : i64} {
  func.func @_mm_kernel_single(%arg0: i32, %arg1: i32, %arg2: memref<64x128xbf16, #tpu.memory_space<vmem>>, %arg3: memref<128x128xbf16, #tpu.memory_space<vmem>>, %arg4: memref<64x128xbf16, #tpu.memory_space<vmem>>, %arg5: memref<128x128xbf16, #tpu.memory_space<vmem>>, %arg6: memref<1x128xf32, #tpu.memory_space<vmem>>, %arg7: memref<64x128xbf16, #tpu.memory_space<vmem>>) attributes {dimension_semantics = [#tpu.dimension_semantics<parallel>, #tpu.dimension_semantics<parallel>], iteration_bounds = array<i64: 1, 2>, scalar_prefetch = 0 : i64, scratch_operands = 0 : i64, tpu.core_type = #tpu.core_type<tc>, window_params = [{transform_indices = @transform_0, window_bounds = array<i64: 64, 128>}, {transform_indices = @transform_1, window_bounds = array<i64: 128, 128>}, {transform_indices = @transform_2, window_bounds = array<i64: 64, 128>}, {transform_indices = @transform_3, window_bounds = array<i64: 128, 128>}, {transform_indices = @transform_4, window_bounds = array<i64: 1, 128>}, {transform_indices = @transform_5, window_bounds = array<i64: 64, 128>}]} {
    %c0 = arith.constant 0 : index
    %c0_0 = arith.constant 0 : index
    %0 = vector.load %arg2[%c0, %c0_0] : memref<64x128xbf16, #tpu.memory_space<vmem>>, vector<64x128xbf16>
    %c0_1 = arith.constant 0 : index
    %c0_2 = arith.constant 0 : index
    %1 = vector.load %arg3[%c0_1, %c0_2] : memref<128x128xbf16, #tpu.memory_space<vmem>>, vector<128x128xbf16>
    %cst = arith.constant dense<0.000000e+00> : vector<64x128xf32>
    %2 = tpu.matmul %0, %1, %cst {dimension_numbers = #tpu.dot_dimension_numbers<[1], [0], [0], [1], [0, 0, 1, 1], [], []>} : vector<64x128xbf16>, vector<128x128xbf16>, vector<64x128xf32> -> vector<64x128xf32>
    %c0_3 = arith.constant 0 : index
    %c0_4 = arith.constant 0 : index
    %3 = vector.load %arg4[%c0_3, %c0_4] : memref<64x128xbf16, #tpu.memory_space<vmem>>, vector<64x128xbf16>
    %c0_5 = arith.constant 0 : index
    %c0_6 = arith.constant 0 : index
    %4 = vector.load %arg5[%c0_5, %c0_6] : memref<128x128xbf16, #tpu.memory_space<vmem>>, vector<128x128xbf16>
    %cst_7 = arith.constant dense<0.000000e+00> : vector<64x128xf32>
    %5 = tpu.matmul %3, %4, %cst_7 {dimension_numbers = #tpu.dot_dimension_numbers<[1], [0], [0], [1], [0, 0, 1, 1], [], []>} : vector<64x128xbf16>, vector<128x128xbf16>, vector<64x128xf32> -> vector<64x128xf32>
    %6 = arith.addf %2, %5 : vector<64x128xf32>
    %c0_8 = arith.constant 0 : index
    %c0_9 = arith.constant 0 : index
    %7 = vector.load %arg6[%c0_8, %c0_9] : memref<1x128xf32, #tpu.memory_space<vmem>>, vector<1x128xf32>
    %8 = vector.broadcast %7 : vector<1x128xf32> to vector<64x128xf32>
    %9 = arith.addf %6, %8 : vector<64x128xf32>
    %cst_10 = arith.constant 0.000000e+00 : f32
    %10 = vector.broadcast %cst_10 : f32 to vector<64x128xf32>
    %11 = arith.maximumf %9, %10 : vector<64x128xf32>
    %12 = arith.truncf %11 : vector<64x128xf32> to vector<64x128xbf16>
    %c0_11 = arith.constant 0 : index
    %c0_12 = arith.constant 0 : index
    %13 = vector.load %arg7[%c0_11, %c0_12] : memref<64x128xbf16, #tpu.memory_space<vmem>>, vector<64x128xbf16>
    tpu.vector_store %arg7[%c0_11, %c0_12], %12 {strides = array<i32>} : memref<64x128xbf16, #tpu.memory_space<vmem>>, vector<64x128xbf16>,
    return
  }
  func.func @transform_0(%arg0: i32, %arg1: i32) -> (i32, i32) {
    %c0_i32 = arith.constant 0 : i32
    %c0_i32_0 = arith.constant 0 : i32
    return %arg0, %c0_i32 : i32, i32
  }
  func.func @transform_1(%arg0: i32, %arg1: i32) -> (i32, i32) {
    %c0_i32 = arith.constant 0 : i32
    %c0_i32_0 = arith.constant 0 : i32
    return %c0_i32, %arg1 : i32, i32
  }
  func.func @transform_2(%arg0: i32, %arg1: i32) -> (i32, i32) {
    %c0_i32 = arith.constant 0 : i32
    %c0_i32_0 = arith.constant 0 : i32
    return %arg0, %c0_i32 : i32, i32
  }
  func.func @transform_3(%arg0: i32, %arg1: i32) -> (i32, i32) {
    %c0_i32 = arith.constant 0 : i32
    %c0_i32_0 = arith.constant 0 : i32
    return %c0_i32, %arg1 : i32, i32
  }
  func.func @transform_4(%arg0: i32, %arg1: i32) -> (i32, i32) {
    %c0_i32 = arith.constant 0 : i32
    %c0_i32_0 = arith.constant 0 : i32
    return %c0_i32, %arg1 : i32, i32
  }
  func.func @transform_5(%arg0: i32, %arg1: i32) -> (i32, i32) {
    %c0_i32 = arith.constant 0 : i32
    return %arg0, %arg1 : i32, i32
  }
}

module attributes {stable_mosaic.version = 11 : i64} {
  func.func @_mm_kernel_single(%arg0: i32, %arg1: i32, %arg2: memref<32x256xbf16, #tpu.memory_space<vmem>>, %arg3: memref<256x128xbf16, #tpu.memory_space<vmem>>, %arg4: memref<1x128xf32, #tpu.memory_space<vmem>>, %arg5: memref<32x128xf32, #tpu.memory_space<vmem>>) attributes {dimension_semantics = [#tpu.dimension_semantics<parallel>, #tpu.dimension_semantics<parallel>], iteration_bounds = array<i64: 1, 2>, scalar_prefetch = 0 : i64, scratch_operands = 0 : i64, tpu.core_type = #tpu.core_type<tc>, window_params = [{transform_indices = @transform_0, window_bounds = array<i64: 32, 256>}, {transform_indices = @transform_1, window_bounds = array<i64: 256, 128>}, {transform_indices = @transform_2, window_bounds = array<i64: 1, 128>}, {transform_indices = @transform_3, window_bounds = array<i64: 32, 128>}]} {
    %c0 = arith.constant 0 : index
    %c0_0 = arith.constant 0 : index
    %0 = vector.load %arg2[%c0, %c0_0] : memref<32x256xbf16, #tpu.memory_space<vmem>>, vector<32x256xbf16>
    %c0_1 = arith.constant 0 : index
    %c0_2 = arith.constant 0 : index
    %1 = vector.load %arg3[%c0_1, %c0_2] : memref<256x128xbf16, #tpu.memory_space<vmem>>, vector<256x128xbf16>
    %cst = arith.constant dense<0.000000e+00> : vector<32x128xf32>
    %2 = tpu.matmul %0, %1, %cst {dimension_numbers = #tpu.dot_dimension_numbers<[1], [0], [0], [1], [0, 0, 1, 1], [], []>} : vector<32x256xbf16>, vector<256x128xbf16>, vector<32x128xf32> -> vector<32x128xf32>
    %c0_3 = arith.constant 0 : index
    %c0_4 = arith.constant 0 : index
    %3 = vector.load %arg4[%c0_3, %c0_4] : memref<1x128xf32, #tpu.memory_space<vmem>>, vector<1x128xf32>
    %4 = vector.broadcast %3 : vector<1x128xf32> to vector<32x128xf32>
    %5 = arith.addf %2, %4 : vector<32x128xf32>
    %c0_5 = arith.constant 0 : index
    %c0_6 = arith.constant 0 : index
    %6 = vector.load %arg5[%c0_5, %c0_6] : memref<32x128xf32, #tpu.memory_space<vmem>>, vector<32x128xf32>
    tpu.vector_store %arg5[%c0_5, %c0_6], %5 {strides = array<i32>} : memref<32x128xf32, #tpu.memory_space<vmem>>, vector<32x128xf32>,
    return
  }
  func.func @transform_0(%arg0: i32, %arg1: i32) -> (i32, i32) {
    %c0_i32 = arith.constant 0 : i32
    %c0_i32_0 = arith.constant 0 : i32
    return %arg1, %c0_i32 : i32, i32
  }
  func.func @transform_1(%arg0: i32, %arg1: i32) -> (i32, i32) {
    %c0_i32 = arith.constant 0 : i32
    %c0_i32_0 = arith.constant 0 : i32
    return %c0_i32, %arg0 : i32, i32
  }
  func.func @transform_2(%arg0: i32, %arg1: i32) -> (i32, i32) {
    %c0_i32 = arith.constant 0 : i32
    %c0_i32_0 = arith.constant 0 : i32
    return %c0_i32, %arg0 : i32, i32
  }
  func.func @transform_3(%arg0: i32, %arg1: i32) -> (i32, i32) {
    %c0_i32 = arith.constant 0 : i32
    return %arg1, %arg0 : i32, i32
  }
}

module attributes {stable_mosaic.version = 11 : i64} {
  func.func @_mm_kernel_multik(%arg0: i32, %arg1: i32, %arg2: i32, %arg3: memref<64x1152xbf16, #tpu.memory_space<vmem>>, %arg4: memref<1152x128xbf16, #tpu.memory_space<vmem>>, %arg5: memref<1x128xf32, #tpu.memory_space<vmem>>, %arg6: memref<64x128xbf16, #tpu.memory_space<vmem>>, %arg7: memref<64x128xf32, #tpu.memory_space<vmem>>) attributes {dimension_semantics = [#tpu.dimension_semantics<parallel>, #tpu.dimension_semantics<parallel>, #tpu.dimension_semantics<arbitrary>], iteration_bounds = array<i64: 1, 2, 2>, scalar_prefetch = 0 : i64, scratch_operands = 1 : i64, tpu.core_type = #tpu.core_type<tc>, window_params = [{transform_indices = @transform_0, window_bounds = array<i64: 64, 1152>}, {transform_indices = @transform_1, window_bounds = array<i64: 1152, 128>}, {transform_indices = @transform_2, window_bounds = array<i64: 1, 128>}, {transform_indices = @transform_3, window_bounds = array<i64: 64, 128>}]} {
    %c0_i32 = arith.constant 0 : i32
    %0 = arith.cmpi eq, %arg2, %c0_i32 : i32
    %1 = arith.extui %0 : i1 to i32
    %c0_i32_0 = arith.constant 0 : i32
    %2 = arith.cmpi ne, %1, %c0_i32_0 : i32
    scf.if %2 {
      %cst_9 = arith.constant 0.000000e+00 : f32
      %12 = vector.broadcast %cst_9 : f32 to vector<64x128xf32>
      %c0_10 = arith.constant 0 : index
      %c0_11 = arith.constant 0 : index
      %13 = vector.load %arg7[%c0_10, %c0_11] : memref<64x128xf32, #tpu.memory_space<vmem>>, vector<64x128xf32>
      tpu.vector_store %arg7[%c0_10, %c0_11], %12 {strides = array<i32>} : memref<64x128xf32, #tpu.memory_space<vmem>>, vector<64x128xf32>,
    } else {
    }
    %c0 = arith.constant 0 : index
    %c0_1 = arith.constant 0 : index
    %3 = vector.load %arg7[%c0, %c0_1] : memref<64x128xf32, #tpu.memory_space<vmem>>, vector<64x128xf32>
    %c0_2 = arith.constant 0 : index
    %c0_3 = arith.constant 0 : index
    %4 = vector.load %arg3[%c0_2, %c0_3] : memref<64x1152xbf16, #tpu.memory_space<vmem>>, vector<64x1152xbf16>
    %c0_4 = arith.constant 0 : index
    %c0_5 = arith.constant 0 : index
    %5 = vector.load %arg4[%c0_4, %c0_5] : memref<1152x128xbf16, #tpu.memory_space<vmem>>, vector<1152x128xbf16>
    %cst = arith.constant dense<0.000000e+00> : vector<64x128xf32>
    %6 = tpu.matmul %4, %5, %cst {dimension_numbers = #tpu.dot_dimension_numbers<[1], [0], [0], [1], [0, 0, 1, 1], [], []>} : vector<64x1152xbf16>, vector<1152x128xbf16>, vector<64x128xf32> -> vector<64x128xf32>
    %7 = arith.addf %3, %6 : vector<64x128xf32>
    %c0_6 = arith.constant 0 : index
    %c0_7 = arith.constant 0 : index
    %8 = vector.load %arg7[%c0_6, %c0_7] : memref<64x128xf32, #tpu.memory_space<vmem>>, vector<64x128xf32>
    tpu.vector_store %arg7[%c0_6, %c0_7], %7 {strides = array<i32>} : memref<64x128xf32, #tpu.memory_space<vmem>>, vector<64x128xf32>,
    %c1_i32 = arith.constant 1 : i32
    %9 = arith.cmpi eq, %arg2, %c1_i32 : i32
    %10 = arith.extui %9 : i1 to i32
    %c0_i32_8 = arith.constant 0 : i32
    %11 = arith.cmpi ne, %10, %c0_i32_8 : i32
    scf.if %11 {
      %c0_9 = arith.constant 0 : index
      %c0_10 = arith.constant 0 : index
      %12 = vector.load %arg7[%c0_9, %c0_10] : memref<64x128xf32, #tpu.memory_space<vmem>>, vector<64x128xf32>
      %c0_11 = arith.constant 0 : index
      %c0_12 = arith.constant 0 : index
      %13 = vector.load %arg5[%c0_11, %c0_12] : memref<1x128xf32, #tpu.memory_space<vmem>>, vector<1x128xf32>
      %14 = vector.broadcast %13 : vector<1x128xf32> to vector<64x128xf32>
      %15 = arith.addf %12, %14 : vector<64x128xf32>
      %cst_13 = arith.constant 0.000000e+00 : f32
      %16 = vector.broadcast %cst_13 : f32 to vector<64x128xf32>
      %17 = arith.maximumf %15, %16 : vector<64x128xf32>
      %18 = arith.truncf %17 : vector<64x128xf32> to vector<64x128xbf16>
      %c0_14 = arith.constant 0 : index
      %c0_15 = arith.constant 0 : index
      %19 = vector.load %arg6[%c0_14, %c0_15] : memref<64x128xbf16, #tpu.memory_space<vmem>>, vector<64x128xbf16>
      tpu.vector_store %arg6[%c0_14, %c0_15], %18 {strides = array<i32>} : memref<64x128xbf16, #tpu.memory_space<vmem>>, vector<64x128xbf16>,
    } else {
    }
    return
  }
  func.func @transform_0(%arg0: i32, %arg1: i32, %arg2: i32) -> (i32, i32) {
    %c0_i32 = arith.constant 0 : i32
    return %arg0, %arg2 : i32, i32
  }
  func.func @transform_1(%arg0: i32, %arg1: i32, %arg2: i32) -> (i32, i32) {
    %c0_i32 = arith.constant 0 : i32
    return %arg2, %arg1 : i32, i32
  }
  func.func @transform_2(%arg0: i32, %arg1: i32, %arg2: i32) -> (i32, i32) {
    %c0_i32 = arith.constant 0 : i32
    %c0_i32_0 = arith.constant 0 : i32
    return %c0_i32, %arg1 : i32, i32
  }
  func.func @transform_3(%arg0: i32, %arg1: i32, %arg2: i32) -> (i32, i32) {
    %c0_i32 = arith.constant 0 : i32
    return %arg0, %arg1 : i32, i32
  }
}

</mosaic_0001>

<bundles_post_ra>
// kernel: _lambda_.25
= control target key start
LH: loop header
LB: loop body
LE: loop exit
PB: predicated region body
PF: predicated region fallthrough
CT: control target
= control target key end

     0   :  { %s1011_s12 = smov 0   ;;  %s1013_s13 = smov 0   ;;  %s1164_s0 = inlined_call_operand.vmem [shape: bf16[1024,256], index: 0, kind: input, shape index: {}]   ;;  %s1165_s1 = inlined_call_operand.vmem [shape: bf16[256,128], index: 1, kind: input, shape index: {}]   ;;  %s1166_s2 = inlined_call_operand.vmem [shape: f32[1,128], index: 2, kind: input, shape index: {}]   ;;  %s1167_s3 = inlined_call_operand.vmem [shape: bf16[1024,128], index: 3, kind: output, shape index: {}]  }
   0x1   :  { %s1015_s14 = smov 0  }
   0x2 LB: > { %s22_s15 = sadd.s32 1, %s985_s13  ;;  %p710_p0 = scmp.ge.s32.totalorder %s989_s14, 1  ;;  %s989_s14 = sphi %s1015_s14, %s13_s14   ;;  %s985_s13 = sphi %s1013_s13, %s1169_s13   ;;  %s981_s12 = sphi %s1011_s12, %s1168_s12  }
   0x3   : > { %p23_p1 = scmp.ge.s32.totalorder %s22_s15, 8  ;;  %p170_p2 = scmp.lt.s32.totalorder %s989_s14, 9 }
   0x5   : > { %s1171_s15 = smov (%p23_p1, %s22_s15), 0  ;;  %p171_p3 = pnand %p710_p0, %p170_p2 }
   0x6   : > { %s711_s28 = sshll.u32 (!%p171_p3), %s981_s12, 4 }
   0x7   : > { %174 = sbr.rel (%p171_p3) target bundleno = 241 (0xf1), region = 32  ;;  %p206_p4 = scmp.lt.s32.totalorder (!%p171_p3), %s711_s28, 127 }
   0xc   : > { %v870_v0 = vld [vmem:[%s1165_s1 + $0x38] sm:$0xff]  ;;  %v869_v2 = vld [vmem:[%s1165_s1 + $0x30] sm:$0xff]  ;;  %v868_v4 = vld [vmem:[%s1165_s1 + $0x28] sm:$0xff]  ;;  %s1173_s28 = smov (!%p206_p4, %s711_s28), 127 }
   0xd   : > { %v878_v1 = vld [vmem:[%s1165_s1 + $0x78] sm:$0xff]  ;;  %456 = vmatpush.bf16.msra.mxu0 %v870_v0  ;;  %926 = vmatpush.bf16.msra.mxu2 %v870_v0  ;;  %v877_v3 = vld [vmem:[%s1165_s1 + $0x70] sm:$0xff]  ;;  %v876_v5 = vld [vmem:[%s1165_s1 + $0x68] sm:$0xff]  ;;  %s846_s17 = sshll.u32 %s1173_s28, 3  ;;  %s715_s5 = sshll.u32 %s1173_s28, 2 }
   0xe   : > { %505 = vmatpush.bf16.msra.mxu1 %v878_v1  ;;  %934 = vmatpush.bf16.msra.mxu3 %v878_v1  ;;  %v867_v6 = vld [vmem:[%s1165_s1 + $0x20] sm:$0xff]  ;;  %v866_v8 = vld [vmem:[%s1165_s1 + $0x18] sm:$0xff]  ;;  %v865_v10 = vld [vmem:[%s1165_s1 + $0x10] sm:$0xff]  ;;  %s1077_s22 = scalar_lea.vmem %s1164_s0, %s846_s17  ;;  %s1132_s8 = scalar_lea.vmem %s1167_s3, %s715_s5 }
   0xf   : > { %v875_v7 = vld [vmem:[%s1165_s1 + $0x60] sm:$0xff]  ;;  %v874_v9 = vld [vmem:[%s1165_s1 + $0x58] sm:$0xff]  ;;  %v873_v11 = vld [vmem:[%s1165_s1 + $0x50] sm:$0xff] }
  0x10   : > { %v864_v12 = vld [vmem:[%s1165_s1 + $0x8] sm:$0xff]  ;;  %v863_v14 = vld [vmem:[%s1165_s1] sm:$0xff]  ;;  %v726_v28 = vld [vmem:[%s1077_s22 + $0x10] sm:$0xf] }
  0x11   : > { %457 = vmatpush.bf16.msra.mxu0 %v869_v2  ;;  %927 = vmatpush.bf16.msra.mxu2 %v869_v2  ;;  %v872_v13 = vld [vmem:[%s1165_s1 + $0x48] sm:$0xff]  ;;  %v871_v15 = vld [vmem:[%s1165_s1 + $0x40] sm:$0xff]  ;;  %v850_v29 = vld [vmem:[%s1077_s22 + $0x14] sm:$0xf0] }
  0x12   : > { %506 = vmatpush.bf16.msra.mxu1 %v877_v3  ;;  %935 = vmatpush.bf16.msra.mxu3 %v877_v3  ;;  %v718_v16 = vld [vmem:[%s1077_s22] sm:$0xf]  ;;  %v848_v17 = vld [vmem:[%s1077_s22 + $0x4] sm:$0xf0]  ;;  %v847_v20 = vld [vmem:[%s1077_s22 + $0x4] sm:$0xf]  ;;  %v727_v36 = vor.u32 %v850_v29, %v726_v28 }
  0x13   : > { %v750_v18 = vld [vmem:[%s1077_s22 + $0x40] sm:$0xf]  ;;  %v856_v19 = vld [vmem:[%s1077_s22 + $0x44] sm:$0xf0]  ;;  %v720_v21 = vld [vmem:[%s1077_s22 + $0x8] sm:$0xf0]  ;;  %v719_v24 = vor.u32 %v848_v17, %v718_v16 }
  0x14   : > { %v855_v22 = vld [vmem:[%s1077_s22 + $0x44] sm:$0xf]  ;;  %v752_v23 = vld [vmem:[%s1077_s22 + $0x48] sm:$0xf0]  ;;  %v751_v25 = vor.u32 %v856_v19, %v750_v18  ;;  %v723_v26 = vor.u32 %v847_v20, %v720_v21  ;;  %v758_v30 = vld [vmem:[%s1077_s22 + $0x50] sm:$0xf] }
  0x15   : > { %458 = vmatpush.bf16.msra.mxu0 %v868_v4  ;;  %928 = vmatpush.bf16.msra.mxu2 %v868_v4  ;;  %v755_v27 = vor.u32 %v855_v22, %v752_v23  ;;  %v858_v31 = vld [vmem:[%s1077_s22 + $0x54] sm:$0xf0]  ;;  %v849_v32 = vld [vmem:[%s1077_s22 + $0x14] sm:$0xf]  ;;  %v728_v33 = vld [vmem:[%s1077_s22 + $0x18] sm:$0xf0] }
  0x16   : > { %507 = vmatpush.bf16.msra.mxu1 %v876_v5  ;;  %936 = vmatpush.bf16.msra.mxu3 %v876_v5  ;;  %v857_v34 = vld [vmem:[%s1077_s22 + $0x54] sm:$0xf]  ;;  %v760_v35 = vld [vmem:[%s1077_s22 + $0x58] sm:$0xf0]  ;;  %v759_v37 = vor.u32 %v858_v31, %v758_v30  ;;  %v731_v38 = vor.u32 %v849_v32, %v728_v33  ;;  %v734_v40 = vld [vmem:[%s1077_s22 + $0x20] sm:$0xf] }
  0x17   : > { %v763_v39 = vor.u32 %v857_v34, %v760_v35  ;;  %v852_v41 = vld [vmem:[%s1077_s22 + $0x24] sm:$0xf0]  ;;  %v766_v42 = vld [vmem:[%s1077_s22 + $0x60] sm:$0xf]  ;;  %v851_v44 = vld [vmem:[%s1077_s22 + $0x24] sm:$0xf] }
  0x18   : > { %v860_v43 = vld [vmem:[%s1077_s22 + $0x64] sm:$0xf0]  ;;  %v736_v45 = vld [vmem:[%s1077_s22 + $0x28] sm:$0xf0]  ;;  %v859_v46 = vld [vmem:[%s1077_s22 + $0x64] sm:$0xf]  ;;  %v735_v48 = vor.u32 %v852_v41, %v734_v40 }
  0x19   : > { %459 = vmatpush.bf16.msra.mxu0 %v867_v6  ;;  %929 = vmatpush.bf16.msra.mxu2 %v867_v6  ;;  %v768_v47 = vld [vmem:[%s1077_s22 + $0x68] sm:$0xf0]  ;;  %v767_v49 = vor.u32 %v860_v43, %v766_v42  ;;  %v739_v50 = vor.u32 %v851_v44, %v736_v45  ;;  %v742_v52 = vld [vmem:[%s1077_s22 + $0x30] sm:$0xf]  ;;  %v854_v53 = vld [vmem:[%s1077_s22 + $0x34] sm:$0xf0] }
  0x1a   : > { %508 = vmatpush.bf16.msra.mxu1 %v875_v7  ;;  %937 = vmatpush.bf16.msra.mxu3 %v875_v7  ;;  %v771_v51 = vor.u32 %v859_v46, %v768_v47  ;;  %v774_v54 = vld [vmem:[%s1077_s22 + $0x70] sm:$0xf]  ;;  %v862_v55 = vld [vmem:[%s1077_s22 + $0x74] sm:$0xf0]  ;;  %v853_v56 = vld [vmem:[%s1077_s22 + $0x34] sm:$0xf]  ;;  %v743_v60 = vor.u32 %v854_v53, %v742_v52 }
  0x1b   : > { %v744_v57 = vld [vmem:[%s1077_s22 + $0x38] sm:$0xf0]  ;;  %v861_v58 = vld [vmem:[%s1077_s22 + $0x74] sm:$0xf]  ;;  %v775_v61 = vor.u32 %v862_v55, %v774_v54  ;;  %v1123_v1 = vld [vmem:[%s1166_s2] ss:$0 sm:$0xff] }
  0x1c   : > { %v776_v59 = vld [vmem:[%s1077_s22 + $0x78] sm:$0xf0]  ;;  %v747_v62 = vor.u32 %v853_v56, %v744_v57 }
  0x1d   : > { %460 = vmatpush.bf16.msra.mxu0 %v866_v8  ;;  %930 = vmatpush.bf16.msra.mxu2 %v866_v8  ;;  %v779_v63 = vor.u32 %v861_v58, %v776_v59 }
  0x1e   : > { %509 = vmatpush.bf16.msra.mxu1 %v874_v9  ;;  %938 = vmatpush.bf16.msra.mxu3 %v874_v9 }
  0x21   : > { %461 = vmatpush.bf16.msra.mxu0 %v865_v10  ;;  %931 = vmatpush.bf16.msra.mxu2 %v865_v10 }
  0x22   : > { %510 = vmatpush.bf16.msra.mxu1 %v873_v11  ;;  %939 = vmatpush.bf16.msra.mxu3 %v873_v11 }
  0x25   : > { %462 = vmatpush.bf16.msra.mxu0 %v864_v12  ;;  %932 = vmatpush.bf16.msra.mxu2 %v864_v12 }
  0x26   : > { %511 = vmatpush.bf16.msra.mxu1 %v872_v13  ;;  %940 = vmatpush.bf16.msra.mxu3 %v872_v13 }
  0x29   : > { %463 = vmatpush.bf16.msra.mxu0 %v863_v14  ;;  %933 = vmatpush.bf16.msra.mxu2 %v863_v14 }
  0x2a   : > { %512 = vmatpush.bf16.msra.mxu1 %v871_v15  ;;  %941 = vmatpush.bf16.msra.mxu3 %v871_v15 }
  0x2c   : > { %464 = vmatmul.bf16.vlgmr.msra.gmra.mxu0 %v719_v24  ;;  %484 = vmatmul.bf16.vlgmr.msra.gmra.mxu2 %v751_v25 }
  0x2d   : > { %513 = vmatmul.bf16.vlgmr.msra.gmra.mxu1 %v723_v26  ;;  %533 = vmatmul.bf16.vlgmr.msra.gmra.mxu3 %v755_v27 }
  0x3c   : > { %469 = vmatmul.bf16.gmra.mxu0 %v727_v36  ;;  %489 = vmatmul.bf16.gmra.mxu2 %v759_v37 }
  0x3d   : > { %518 = vmatmul.bf16.gmra.mxu1 %v731_v38  ;;  %538 = vmatmul.bf16.gmra.mxu3 %v763_v39 }
  0x4c   : > { %474 = vmatmul.bf16.gmra.mxu0 %v735_v48  ;;  %494 = vmatmul.bf16.gmra.mxu2 %v767_v49 }
  0x4d   : > { %523 = vmatmul.bf16.gmra.mxu1 %v739_v50  ;;  %543 = vmatmul.bf16.gmra.mxu3 %v771_v51 }
  0x5c   : > { %479 = vmatmul.bf16.gmra.mxu0 %v743_v60  ;;  %499 = vmatmul.bf16.gmra.mxu2 %v775_v61 }
  0x5d   : > { %528 = vmatmul.bf16.gmra.mxu1 %v747_v62  ;;  %548 = vmatmul.bf16.gmra.mxu3 %v779_v63 }
  0xa9   : > { %v465_v0 = vpop.f32.mrf.mxu0 }
  0xaa   : > { %v514_v2 = vpop.f32.mrf.mxu1  ;;  %v466_v3 = vadd.f32 %v1123_v1, %v465_v0 }
  0xac   : > { %v515_v7 = vadd.f32 %v514_v2, %v466_v3 }
  0xae   : > { %v554_v12 = vmax.f32 %v515_v7, 0.0 }
  0xaf   : > { %v485_v4 = vpop.f32.mrf.mxu2 }
  0xb0   : > { %v534_v5 = vpop.f32.mrf.mxu3  ;;  %v486_v10 = vadd.f32 %v1123_v1, %v485_v4 }
  0xb1   : > { %v467_v6 = vpop.f32.mrf.mxu0 }
  0xb2   : > { %v468_v8 = vadd.f32 %v1123_v1, %v467_v6  ;;  %v516_v9 = vpop.f32.mrf.mxu1  ;;  %v535_v15 = vadd.f32 %v534_v5, %v486_v10 }
  0xb4   : > { %v517_v11 = vadd.f32 %v516_v9, %v468_v8  ;;  %v562_v22 = vmax.f32 %v535_v15, 0.0 }
  0xb6   : > { %v555_v13 = vmax.f32 %v517_v11, 0.0 }
  0xb7   : > { %v487_v14 = vpop.f32.mrf.mxu2 }
  0xb8   : > { %v882_v16 = vpack.c.bf16 %v555_v13, %v554_v12  ;;  %v488_v17 = vadd.f32 %v1123_v1, %v487_v14  ;;  %v536_v18 = vpop.f32.mrf.mxu3 }
  0xb9   : > { %v470_v19 = vpop.f32.mrf.mxu0 }
  0xba   : > { %883 = vst [vmem:[%s1132_s8] sm:$0xff] %v882_v16   ;;  %v537_v20 = vadd.f32 %v536_v18, %v488_v17  ;;  %v519_v21 = vpop.f32.mrf.mxu1  ;;  %v471_v25 = vadd.f32 %v1123_v1, %v470_v19 }
  0xbc   : > { %v563_v23 = vmax.f32 %v537_v20, 0.0  ;;  %v520_v29 = vadd.f32 %v519_v21, %v471_v25 }
  0xbe   : > { %v902_v24 = vpack.c.bf16 %v563_v23, %v562_v22  ;;  %v556_v34 = vmax.f32 %v520_v29, 0.0 }
  0xbf   : > { %v490_v26 = vpop.f32.mrf.mxu2 }
  0xc0   : > { %922 = vst [vmem:[%s1132_s8 + $0x20] sm:$0xff] %v902_v24   ;;  %v539_v27 = vpop.f32.mrf.mxu3  ;;  %v491_v32 = vadd.f32 %v1123_v1, %v490_v26 }
  0xc1   : > { %v472_v28 = vpop.f32.mrf.mxu0 }
  0xc2   : > { %v473_v30 = vadd.f32 %v1123_v1, %v472_v28  ;;  %v521_v31 = vpop.f32.mrf.mxu1  ;;  %v540_v37 = vadd.f32 %v539_v27, %v491_v32 }
  0xc4   : > { %v522_v33 = vadd.f32 %v521_v31, %v473_v30  ;;  %v564_v44 = vmax.f32 %v540_v37, 0.0 }
  0xc6   : > { %v557_v35 = vmax.f32 %v522_v33, 0.0 }
  0xc7   : > { %v492_v36 = vpop.f32.mrf.mxu2 }
  0xc8   : > { %v887_v38 = vpack.c.bf16 %v557_v35, %v556_v34  ;;  %v493_v39 = vadd.f32 %v1123_v1, %v492_v36  ;;  %v541_v40 = vpop.f32.mrf.mxu3 }
  0xc9   : > { %v475_v41 = vpop.f32.mrf.mxu0 }
  0xca   : > { %919 = vst [vmem:[%s1132_s8 + $0x8] sm:$0xff] %v887_v38   ;;  %v542_v42 = vadd.f32 %v541_v40, %v493_v39  ;;  %v524_v43 = vpop.f32.mrf.mxu1  ;;  %v476_v47 = vadd.f32 %v1123_v1, %v475_v41 }
  0xcc   : > { %v565_v45 = vmax.f32 %v542_v42, 0.0  ;;  %v525_v51 = vadd.f32 %v524_v43, %v476_v47 }
  0xce   : > { %v907_v46 = vpack.c.bf16 %v565_v45, %v564_v44  ;;  %v558_v56 = vmax.f32 %v525_v51, 0.0 }
  0xcf   : > { %v495_v48 = vpop.f32.mrf.mxu2 }
  0xd0   : > { %923 = vst [vmem:[%s1132_s8 + $0x28] sm:$0xff] %v907_v46   ;;  %v544_v49 = vpop.f32.mrf.mxu3  ;;  %v496_v54 = vadd.f32 %v1123_v1, %v495_v48 }
  0xd1   : > { %v477_v50 = vpop.f32.mrf.mxu0 }
  0xd2   : > { %v478_v52 = vadd.f32 %v1123_v1, %v477_v50  ;;  %v526_v53 = vpop.f32.mrf.mxu1  ;;  %v545_v59 = vadd.f32 %v544_v49, %v496_v54 }
  0xd4   : > { %v527_v55 = vadd.f32 %v526_v53, %v478_v52  ;;  %v566_v3 = vmax.f32 %v545_v59, 0.0 }
  0xd6   : > { %v559_v57 = vmax.f32 %v527_v55, 0.0 }
  0xd7   : > { %v497_v58 = vpop.f32.mrf.mxu2 }
  0xd8   : > { %v892_v60 = vpack.c.bf16 %v559_v57, %v558_v56  ;;  %v498_v61 = vadd.f32 %v1123_v1, %v497_v58  ;;  %v546_v62 = vpop.f32.mrf.mxu3 }
  0xd9   : > { %v480_v63 = vpop.f32.mrf.mxu0 }
  0xda   : > { %920 = vst [vmem:[%s1132_s8 + $0x10] sm:$0xff] %v892_v60   ;;  %v547_v0 = vadd.f32 %v546_v62, %v498_v61  ;;  %v529_v2 = vpop.f32.mrf.mxu1  ;;  %v481_v6 = vadd.f32 %v1123_v1, %v480_v63 }
  0xdc   : > { %v567_v4 = vmax.f32 %v547_v0, 0.0  ;;  %v530_v10 = vadd.f32 %v529_v2, %v481_v6 }
  0xde   : > { %v912_v5 = vpack.c.bf16 %v567_v4, %v566_v3  ;;  %v560_v15 = vmax.f32 %v530_v10, 0.0 }
  0xdf   : > { %v500_v7 = vpop.f32.mrf.mxu2 }
  0xe0   : > { %924 = vst [vmem:[%s1132_s8 + $0x30] sm:$0xff] %v912_v5   ;;  %v549_v8 = vpop.f32.mrf.mxu3  ;;  %v501_v13 = vadd.f32 %v1123_v1, %v500_v7 }
  0xe1   : > { %v482_v9 = vpop.f32.mrf.mxu0 }
  0xe2   : > { %v483_v11 = vadd.f32 %v1123_v1, %v482_v9  ;;  %v531_v12 = vpop.f32.mrf.mxu1  ;;  %v550_v18 = vadd.f32 %v549_v8, %v501_v13 }
  0xe4   : > { %v532_v14 = vadd.f32 %v531_v12, %v483_v11  ;;  %v568_v23 = vmax.f32 %v550_v18, 0.0 }
  0xe6   : > { %v561_v16 = vmax.f32 %v532_v14, 0.0 }
  0xe7   : > { %v502_v17 = vpop.f32.mrf.mxu2 }
  0xe8   : > { %v897_v19 = vpack.c.bf16 %v561_v16, %v560_v15  ;;  %v503_v20 = vadd.f32 %v1123_v1, %v502_v17  ;;  %v551_v21 = vpop.f32.mrf.mxu3 }
  0xea   : > { %921 = vst [vmem:[%s1132_s8 + $0x18] sm:$0xff] %v897_v19   ;;  %v552_v22 = vadd.f32 %v551_v21, %v503_v20 }
  0xec   : > { %v569_v24 = vmax.f32 %v552_v22, 0.0 }
  0xee   : > { %v917_v25 = vpack.c.bf16 %v569_v24, %v568_v23 }
  0xf0   : > { %925 = vst [vmem:[%s1132_s8 + $0x38] sm:$0xff] %v917_v25  }
  0xf1 PF: > { %s13_s14 = sadd.s32 1, %s989_s14   ;;  %s1168_s12 = smov %s985_s13 }
  0xf2   : > { %p10_p5 = scmp.ge.s32.totalorder %s13_s14, 10   ;;  %s1169_s13 = smov %s1171_s15 }
  0xf4   :  { %12 = sbr.rel (!%p10_p5) target bundleno = 2 (0x2), region = 68 }

// kernel: _lambda_.26
= control target key start
LH: loop header
LB: loop body
LE: loop exit
PB: predicated region body
PF: predicated region fallthrough
CT: control target
= control target key end

     0   :  { %s1757_s12 = smov 0   ;;  %s1759_s13 = smov 0   ;;  %s2066_s0 = inlined_call_operand.vmem [shape: bf16[256,640], index: 0, kind: input, shape index: {}]   ;;  %s2067_s1 = inlined_call_operand.vmem [shape: bf16[640,128], index: 1, kind: input, shape index: {}]   ;;  %s2068_s2 = inlined_call_operand.vmem [shape: f32[1,128], index: 2, kind: input, shape index: {}]   ;;  %s2069_s3 = inlined_call_operand.vmem [shape: bf16[256,128], index: 3, kind: output, shape index: {}]  }
   0x1   :  { %s1761_s14 = smov 0  }
   0x2 LB: > { %s22_s15 = sadd.s32 1, %s1731_s13  ;;  %p1209_p0 = scmp.ge.s32.totalorder %s1735_s14, 1  ;;  %s1735_s14 = sphi %s1761_s14, %s13_s14   ;;  %s1731_s13 = sphi %s1759_s13, %s2071_s13   ;;  %s1727_s12 = sphi %s1757_s12, %s2070_s12  }
   0x3   : > { %p23_p1 = scmp.ge.s32.totalorder %s22_s15, 2  ;;  %p170_p2 = scmp.lt.s32.totalorder %s1735_s14, 3 }
   0x5   : > { %s2073_s15 = smov (%p23_p1, %s22_s15), 0  ;;  %p171_p3 = pnand %p1209_p0, %p170_p2 }
   0x6   : > { %s1210_s22 = sshll.u32 (!%p171_p3), %s1727_s12, 4 }
   0x7   : > { %174 = sbr.rel (%p171_p3) target bundleno = 339 (0x153), region = 32  ;;  %p206_p4 = scmp.lt.s32.totalorder (!%p171_p3), %s1210_s22, 31 }
   0xc   : > { %v1583_v0 = vld [vmem:[%s2067_s1 + $0x38] sm:$0xff]  ;;  %v1582_v1 = vld [vmem:[%s2067_s1 + $0x30] sm:$0xff]  ;;  %v1581_v2 = vld [vmem:[%s2067_s1 + $0x28] sm:$0xff]  ;;  %s2075_s22 = smov (!%p206_p4, %s1210_s22), 31 }
   0xd   : > { %1663 = vmatpush.bf16.msra.mxu1 %v1583_v0  ;;  %1664 = vmatpush.bf16.msra.mxu2 %v1583_v0  ;;  %v1580_v3 = vld [vmem:[%s2067_s1 + $0x20] sm:$0xff]  ;;  %v1579_v4 = vld [vmem:[%s2067_s1 + $0x18] sm:$0xff]  ;;  %v1578_v5 = vld [vmem:[%s2067_s1 + $0x10] sm:$0xff]  ;;  %s1687_s29 = smul.u32 20, %s2075_s22 }
   0xe   : > { %1665 = vmatpush.bf16.msra.mxu3 %v1583_v0  ;;  %808 = vmatpush.bf16.msra.mxu0 %v1583_v0  ;;  %v1577_v6 = vld [vmem:[%s2067_s1 + $0x8] sm:$0xff]  ;;  %v1576_v7 = vld [vmem:[%s2067_s1] sm:$0xff]  ;;  %v1599_v16 = vld [vmem:[%s2067_s1 + $0xb8] sm:$0xff] }
   0xf   : > { %s1805_s7 = scalar_lea.vmem %s2066_s0, %s1687_s29  ;;  %v1591_v17 = vld [vmem:[%s2067_s1 + $0x78] sm:$0xff]  ;;  %v1598_v24 = vld [vmem:[%s2067_s1 + $0xb0] sm:$0xff]  ;;  %v1597_v28 = vld [vmem:[%s2067_s1 + $0xa8] sm:$0xff] }
  0x10   : > { %v1256_v8 = vld [vmem:[%s1805_s7 + $0x50] sm:$0xf]  ;;  %v1548_v9 = vld [vmem:[%s1805_s7 + $0x60] sm:$0xf0]  ;;  %v1296_v10 = vld [vmem:[%s1805_s7 + $0xa0] sm:$0xf] }
  0x11   : > { %1666 = vmatpush.bf16.msra.mxu1 %v1582_v1  ;;  %1667 = vmatpush.bf16.msra.mxu2 %v1582_v1  ;;  %v1558_v11 = vld [vmem:[%s1805_s7 + $0xb0] sm:$0xf0]  ;;  %v1336_v12 = vld [vmem:[%s1805_s7 + $0xf0] sm:$0xf]  ;;  %v1568_v13 = vld [vmem:[%s1805_s7 + $0x100] sm:$0xf0]  ;;  %v1257_v18 = vor.u32 %v1548_v9, %v1256_v8 }
  0x12   : > { %1668 = vmatpush.bf16.msra.mxu3 %v1582_v1  ;;  %809 = vmatpush.bf16.msra.mxu0 %v1582_v1  ;;  %v1216_v14 = vld [vmem:[%s1805_s7] sm:$0xf]  ;;  %v1538_v15 = vld [vmem:[%s1805_s7 + $0x10] sm:$0xf0]  ;;  %v1297_v19 = vor.u32 %v1558_v11, %v1296_v10  ;;  %v1337_v20 = vor.u32 %v1568_v13, %v1336_v12  ;;  %v1607_v22 = vld [vmem:[%s2067_s1 + $0xf8] sm:$0xff] }
  0x13   : > { %v1217_v21 = vor.u32 %v1538_v15, %v1216_v14  ;;  %v1615_v23 = vld [vmem:[%s2067_s1 + $0x138] sm:$0xff]  ;;  %v1590_v25 = vld [vmem:[%s2067_s1 + $0x70] sm:$0xff]  ;;  %v1589_v29 = vld [vmem:[%s2067_s1 + $0x68] sm:$0xff] }
  0x14   : > { %v1606_v26 = vld [vmem:[%s2067_s1 + $0xf0] sm:$0xff]  ;;  %v1605_v30 = vld [vmem:[%s2067_s1 + $0xe8] sm:$0xff]  ;;  %v1596_v32 = vld [vmem:[%s2067_s1 + $0xa0] sm:$0xff] }
  0x15   : > { %1669 = vmatpush.bf16.msra.mxu1 %v1581_v2  ;;  %1670 = vmatpush.bf16.msra.mxu2 %v1581_v2  ;;  %v1614_v27 = vld [vmem:[%s2067_s1 + $0x130] sm:$0xff]  ;;  %v1613_v31 = vld [vmem:[%s2067_s1 + $0x128] sm:$0xff]  ;;  %v1588_v33 = vld [vmem:[%s2067_s1 + $0x60] sm:$0xff] }
  0x16   : > { %1671 = vmatpush.bf16.msra.mxu3 %v1581_v2  ;;  %810 = vmatpush.bf16.msra.mxu0 %v1581_v2  ;;  %v1604_v34 = vld [vmem:[%s2067_s1 + $0xe0] sm:$0xff]  ;;  %v1276_v36 = vld [vmem:[%s1805_s7 + $0x78] sm:$0xf]  ;;  %v1553_v37 = vld [vmem:[%s1805_s7 + $0x88] sm:$0xf0] }
  0x17   : > { %v1612_v35 = vld [vmem:[%s2067_s1 + $0x120] sm:$0xff]  ;;  %v1316_v38 = vld [vmem:[%s1805_s7 + $0xc8] sm:$0xf]  ;;  %v1563_v39 = vld [vmem:[%s1805_s7 + $0xd8] sm:$0xf0]  ;;  %v1277_v46 = vor.u32 %v1553_v37, %v1276_v36 }
  0x18   : > { %v1356_v40 = vld [vmem:[%s1805_s7 + $0x118] sm:$0xf]  ;;  %v1573_v41 = vld [vmem:[%s1805_s7 + $0x128] sm:$0xf0]  ;;  %v1236_v42 = vld [vmem:[%s1805_s7 + $0x28] sm:$0xf]  ;;  %v1317_v47 = vor.u32 %v1563_v39, %v1316_v38 }
  0x19   : > { %1672 = vmatpush.bf16.msra.mxu1 %v1580_v3  ;;  %1673 = vmatpush.bf16.msra.mxu2 %v1580_v3  ;;  %v1543_v43 = vld [vmem:[%s1805_s7 + $0x38] sm:$0xf0]  ;;  %v1357_v48 = vor.u32 %v1573_v41, %v1356_v40  ;;  %v1594_v52 = vld [vmem:[%s2067_s1 + $0x90] sm:$0xff]  ;;  %v1593_v56 = vld [vmem:[%s2067_s1 + $0x88] sm:$0xff] }
  0x1a   : > { %1674 = vmatpush.bf16.msra.mxu3 %v1580_v3  ;;  %811 = vmatpush.bf16.msra.mxu0 %v1580_v3  ;;  %v1595_v44 = vld [vmem:[%s2067_s1 + $0x98] sm:$0xff]  ;;  %v1237_v49 = vor.u32 %v1543_v43, %v1236_v42  ;;  %v1586_v53 = vld [vmem:[%s2067_s1 + $0x50] sm:$0xff]  ;;  %v1585_v57 = vld [vmem:[%s2067_s1 + $0x48] sm:$0xff] }
  0x1b   : > { %v1587_v45 = vld [vmem:[%s2067_s1 + $0x58] sm:$0xff]  ;;  %v1602_v54 = vld [vmem:[%s2067_s1 + $0xd0] sm:$0xff]  ;;  %v1601_v58 = vld [vmem:[%s2067_s1 + $0xc8] sm:$0xff] }
  0x1c   : > { %v1603_v50 = vld [vmem:[%s2067_s1 + $0xd8] sm:$0xff]  ;;  %v1610_v55 = vld [vmem:[%s2067_s1 + $0x110] sm:$0xff]  ;;  %v1609_v59 = vld [vmem:[%s2067_s1 + $0x108] sm:$0xff] }
  0x1d   : > { %1675 = vmatpush.bf16.msra.mxu1 %v1579_v4  ;;  %1676 = vmatpush.bf16.msra.mxu2 %v1579_v4  ;;  %v1611_v51 = vld [vmem:[%s2067_s1 + $0x118] sm:$0xff]  ;;  %v1592_v60 = vld [vmem:[%s2067_s1 + $0x80] sm:$0xff]  ;;  %v1224_v2 = vld [vmem:[%s1805_s7 + $0x8] sm:$0xf] }
  0x1e   : > { %1677 = vmatpush.bf16.msra.mxu3 %v1579_v4  ;;  %812 = vmatpush.bf16.msra.mxu0 %v1579_v4  ;;  %v1584_v61 = vld [vmem:[%s2067_s1 + $0x40] sm:$0xff]  ;;  %v1218_v1 = vld [vmem:[%s1805_s7 + $0x14] sm:$0xf0]  ;;  %v1539_v3 = vld [vmem:[%s1805_s7 + $0x18] sm:$0xf0] }
  0x1f   : > { %v1600_v62 = vld [vmem:[%s2067_s1 + $0xc0] sm:$0xff]  ;;  %v1537_v4 = vld [vmem:[%s1805_s7 + $0xc] sm:$0xf]  ;;  %v1225_v9 = vor.u32 %v1539_v3, %v1224_v2  ;;  %v1244_v14 = vld [vmem:[%s1805_s7 + $0x30] sm:$0xf] }
  0x20   : > { %v1608_v63 = vld [vmem:[%s2067_s1 + $0x100] sm:$0xff]  ;;  %v1541_v12 = vld [vmem:[%s1805_s7 + $0x2c] sm:$0xf]  ;;  %v1551_v36 = vld [vmem:[%s1805_s7 + $0x7c] sm:$0xf] }
  0x21   : > { %1678 = vmatpush.bf16.msra.mxu1 %v1578_v5  ;;  %1679 = vmatpush.bf16.msra.mxu2 %v1578_v5  ;;  %v1536_v0 = vld [vmem:[%s1805_s7 + $0x4] sm:$0xf]  ;;  %v1238_v13 = vld [vmem:[%s1805_s7 + $0x3c] sm:$0xf0]  ;;  %v1278_v37 = vld [vmem:[%s1805_s7 + $0x8c] sm:$0xf0] }
  0x22   : > { %1680 = vmatpush.bf16.msra.mxu3 %v1578_v5  ;;  %813 = vmatpush.bf16.msra.mxu0 %v1578_v5  ;;  %v1226_v5 = vld [vmem:[%s1805_s7 + $0x1c] sm:$0xf0]  ;;  %v1221_v8 = vor.u32 %v1536_v0, %v1218_v1  ;;  %v1544_v15 = vld [vmem:[%s1805_s7 + $0x40] sm:$0xf0]  ;;  %v1554_v39 = vld [vmem:[%s1805_s7 + $0x90] sm:$0xf0] }
  0x23   : > { %v1229_v10 = vor.u32 %v1537_v4, %v1226_v5  ;;  %v1284_v38 = vld [vmem:[%s1805_s7 + $0x80] sm:$0xf]  ;;  %v1552_v40 = vld [vmem:[%s1805_s7 + $0x84] sm:$0xf]  ;;  %v1286_v41 = vld [vmem:[%s1805_s7 + $0x94] sm:$0xf0] }
  0x24   : > { %v1292_v42 = vld [vmem:[%s1805_s7 + $0x88] sm:$0xf]  ;;  %v1555_v43 = vld [vmem:[%s1805_s7 + $0x98] sm:$0xf0]  ;;  %v1562_v0 = vld [vmem:[%s1805_s7 + $0xd4] sm:$0xf] }
  0x25   : > { %1681 = vmatpush.bf16.msra.mxu1 %v1577_v6  ;;  %1682 = vmatpush.bf16.msra.mxu2 %v1577_v6  ;;  %v1326_v1 = vld [vmem:[%s1805_s7 + $0xe4] sm:$0xf0]  ;;  %v1332_v2 = vld [vmem:[%s1805_s7 + $0xd8] sm:$0xf]  ;;  %v1565_v3 = vld [vmem:[%s1805_s7 + $0xe8] sm:$0xf0] }
  0x26   : > { %1683 = vmatpush.bf16.msra.mxu3 %v1577_v6  ;;  %814 = vmatpush.bf16.msra.mxu0 %v1577_v6  ;;  %v1232_v6 = vld [vmem:[%s1805_s7 + $0x10] sm:$0xf] }
  0x29   : > { %1684 = vmatpush.bf16.msra.mxu1 %v1576_v7  ;;  %1685 = vmatpush.bf16.msra.mxu2 %v1576_v7 }
  0x2a   : > { %1686 = vmatpush.bf16.msra.mxu3 %v1576_v7  ;;  %815 = vmatpush.bf16.msra.mxu0 %v1576_v7  ;;  %v1540_v7 = vld [vmem:[%s1805_s7 + $0x20] sm:$0xf0] }
  0x2b   : > { %v1233_v11 = vor.u32 %v1540_v7, %v1232_v6  ;;  %v1329_v6 = vor.u32 %v1562_v0, %v1326_v1  ;;  %v1333_v7 = vor.u32 %v1565_v3, %v1332_v2 }
  0x2c   : > { %826 = vmatmul.bf16.vlgmr.msra.gmra.mxu1 %v1257_v18  ;;  %836 = vmatmul.bf16.vlgmr.msra.gmra.mxu2 %v1297_v19  ;;  %v1252_v18 = vld [vmem:[%s1805_s7 + $0x38] sm:$0xf]  ;;  %v1545_v19 = vld [vmem:[%s1805_s7 + $0x48] sm:$0xf0] }
  0x2d   : > { %906 = vmatpush.bf16.msrb.mxu2 %v1599_v16  ;;  %857 = vmatpush.bf16.msrb.mxu1 %v1591_v17  ;;  %v1542_v16 = vld [vmem:[%s1805_s7 + $0x34] sm:$0xf]  ;;  %v1246_v17 = vld [vmem:[%s1805_s7 + $0x44] sm:$0xf0] }
  0x2e   : > { %846 = vmatmul.bf16.vlgmr.msra.gmra.mxu3 %v1337_v20  ;;  %816 = vmatmul.bf16.vlgmr.msra.gmra.mxu0 %v1217_v21  ;;  %v1241_v20 = vor.u32 %v1541_v12, %v1238_v13  ;;  %v1245_v21 = vor.u32 %v1544_v15, %v1244_v14  ;;  %v1567_v12 = vld [vmem:[%s1805_s7 + $0xfc] sm:$0xf]  ;;  %v1346_v13 = vld [vmem:[%s1805_s7 + $0x10c] sm:$0xf0]  ;;  %v1352_v14 = vld [vmem:[%s1805_s7 + $0x100] sm:$0xf] }
  0x2f   : > { %955 = vmatpush.bf16.msrb.mxu3 %v1607_v22  ;;  %1004 = vmatpush.bf16.msrb.mxu0 %v1615_v23  ;;  %v1249_v22 = vor.u32 %v1542_v16, %v1246_v17  ;;  %v1253_v23 = vor.u32 %v1545_v19, %v1252_v18  ;;  %v1570_v15 = vld [vmem:[%s1805_s7 + $0x110] sm:$0xf0]  ;;  %v1349_v19 = vor.u32 %v1567_v12, %v1346_v13 }
  0x31   : > { %907 = vmatpush.bf16.msrb.mxu2 %v1598_v24  ;;  %858 = vmatpush.bf16.msrb.mxu1 %v1590_v25  ;;  %v1546_v24 = vld [vmem:[%s1805_s7 + $0x54] sm:$0xf]  ;;  %v1258_v25 = vld [vmem:[%s1805_s7 + $0x64] sm:$0xf0] }
  0x33   : > { %956 = vmatpush.bf16.msrb.mxu3 %v1606_v26  ;;  %1005 = vmatpush.bf16.msrb.mxu0 %v1614_v27  ;;  %v1264_v26 = vld [vmem:[%s1805_s7 + $0x58] sm:$0xf]  ;;  %v1549_v27 = vld [vmem:[%s1805_s7 + $0x68] sm:$0xf0] }
  0x35   : > { %908 = vmatpush.bf16.msrb.mxu2 %v1597_v28  ;;  %859 = vmatpush.bf16.msrb.mxu1 %v1589_v29  ;;  %v1547_v28 = vld [vmem:[%s1805_s7 + $0x5c] sm:$0xf]  ;;  %v1266_v29 = vld [vmem:[%s1805_s7 + $0x6c] sm:$0xf0] }
  0x37   : > { %957 = vmatpush.bf16.msrb.mxu3 %v1605_v30  ;;  %1006 = vmatpush.bf16.msrb.mxu0 %v1613_v31  ;;  %v1272_v30 = vld [vmem:[%s1805_s7 + $0x60] sm:$0xf]  ;;  %v1550_v31 = vld [vmem:[%s1805_s7 + $0x70] sm:$0xf0] }
  0x39   : > { %909 = vmatpush.bf16.msrb.mxu2 %v1596_v32  ;;  %860 = vmatpush.bf16.msrb.mxu1 %v1588_v33  ;;  %v1261_v32 = vor.u32 %v1546_v24, %v1258_v25  ;;  %v1265_v33 = vor.u32 %v1549_v27, %v1264_v26 }
  0x3b   : > { %958 = vmatpush.bf16.msrb.mxu3 %v1604_v34  ;;  %1007 = vmatpush.bf16.msrb.mxu0 %v1612_v35  ;;  %v1269_v34 = vor.u32 %v1547_v28, %v1266_v29  ;;  %v1273_v35 = vor.u32 %v1550_v31, %v1272_v30  ;;  %v1571_v29 = vld [vmem:[%s1805_s7 + $0x11c] sm:$0xf]  ;;  %v1358_v30 = vld [vmem:[%s1805_s7 + $0x12c] sm:$0xf0]  ;;  %v1364_v31 = vld [vmem:[%s1805_s7 + $0x120] sm:$0xf] }
  0x3c   : > { %831 = vmatmul.bf16.gmra.mxu1 %v1277_v46  ;;  %841 = vmatmul.bf16.gmra.mxu2 %v1317_v47  ;;  %v1289_v46 = vor.u32 %v1552_v40, %v1286_v41  ;;  %v1293_v47 = vor.u32 %v1555_v43, %v1292_v42  ;;  %v1361_v40 = vor.u32 %v1571_v29, %v1358_v30 }
  0x3d   : > { %910 = vmatpush.bf16.msrb.mxu2 %v1595_v44  ;;  %861 = vmatpush.bf16.msrb.mxu1 %v1587_v45  ;;  %v1281_v44 = vor.u32 %v1551_v36, %v1278_v37  ;;  %v1285_v45 = vor.u32 %v1554_v39, %v1284_v38  ;;  %v1575_v36 = vld [vmem:[%s1805_s7 + $0x138] sm:$0xf0] }
  0x3e   : > { %851 = vmatmul.bf16.gmra.mxu3 %v1357_v48  ;;  %821 = vmatmul.bf16.gmra.mxu0 %v1237_v49  ;;  %v1556_v48 = vld [vmem:[%s1805_s7 + $0xa4] sm:$0xf]  ;;  %v1298_v49 = vld [vmem:[%s1805_s7 + $0xb4] sm:$0xf0] }
  0x3f   : > { %959 = vmatpush.bf16.msrb.mxu3 %v1603_v50  ;;  %1008 = vmatpush.bf16.msrb.mxu0 %v1611_v51  ;;  %v1304_v50 = vld [vmem:[%s1805_s7 + $0xa8] sm:$0xf]  ;;  %v1559_v51 = vld [vmem:[%s1805_s7 + $0xb8] sm:$0xf0] }
  0x41   : > { %911 = vmatpush.bf16.msrb.mxu2 %v1594_v52  ;;  %862 = vmatpush.bf16.msrb.mxu1 %v1586_v53  ;;  %v1557_v52 = vld [vmem:[%s1805_s7 + $0xac] sm:$0xf]  ;;  %v1306_v53 = vld [vmem:[%s1805_s7 + $0xbc] sm:$0xf0] }
  0x43   : > { %960 = vmatpush.bf16.msrb.mxu3 %v1602_v54  ;;  %1009 = vmatpush.bf16.msrb.mxu0 %v1610_v55  ;;  %v1312_v54 = vld [vmem:[%s1805_s7 + $0xb0] sm:$0xf]  ;;  %v1560_v55 = vld [vmem:[%s1805_s7 + $0xc0] sm:$0xf0] }
  0x45   : > { %912 = vmatpush.bf16.msrb.mxu2 %v1593_v56  ;;  %863 = vmatpush.bf16.msrb.mxu1 %v1585_v57  ;;  %v1301_v56 = vor.u32 %v1556_v48, %v1298_v49  ;;  %v1305_v57 = vor.u32 %v1559_v51, %v1304_v50 }
  0x47   : > { %961 = vmatpush.bf16.msrb.mxu3 %v1601_v58  ;;  %1010 = vmatpush.bf16.msrb.mxu0 %v1609_v59  ;;  %v1309_v58 = vor.u32 %v1557_v52, %v1306_v53  ;;  %v1313_v59 = vor.u32 %v1560_v55, %v1312_v54 }
  0x49   : > { %913 = vmatpush.bf16.msrb.mxu2 %v1592_v60  ;;  %864 = vmatpush.bf16.msrb.mxu1 %v1584_v61  ;;  %v1561_v60 = vld [vmem:[%s1805_s7 + $0xcc] sm:$0xf]  ;;  %v1318_v61 = vld [vmem:[%s1805_s7 + $0xdc] sm:$0xf0] }
  0x4a   : > { %v1321_v4 = vor.u32 %v1561_v60, %v1318_v61 }
  0x4b   : > { %962 = vmatpush.bf16.msrb.mxu3 %v1600_v62  ;;  %1011 = vmatpush.bf16.msrb.mxu0 %v1608_v63  ;;  %v1324_v62 = vld [vmem:[%s1805_s7 + $0xd0] sm:$0xf]  ;;  %v1564_v63 = vld [vmem:[%s1805_s7 + $0xe0] sm:$0xf0] }
  0x4c   : > { %865 = vmatmul.bf16.vlgmr.msrb.gmra.mxu1 %v1221_v8  ;;  %914 = vmatmul.bf16.vlgmr.msrb.gmra.mxu2 %v1225_v9  ;;  %v1325_v5 = vor.u32 %v1564_v63, %v1324_v62  ;;  %v1566_v8 = vld [vmem:[%s1805_s7 + $0xf4] sm:$0xf]  ;;  %v1338_v9 = vld [vmem:[%s1805_s7 + $0x104] sm:$0xf0] }
  0x4d   : > { %v1341_v16 = vor.u32 %v1566_v8, %v1338_v9 }
  0x4e   : > { %963 = vmatmul.bf16.vlgmr.msrb.gmra.mxu3 %v1229_v10  ;;  %1012 = vmatmul.bf16.vlgmr.msrb.gmra.mxu0 %v1233_v11  ;;  %v1344_v10 = vld [vmem:[%s1805_s7 + $0xf8] sm:$0xf]  ;;  %v1569_v11 = vld [vmem:[%s1805_s7 + $0x108] sm:$0xf0] }
  0x4f   : > { %v1345_v17 = vor.u32 %v1569_v11, %v1344_v10 }
  0x5c   : > { %870 = vmatmul.bf16.gmra.mxu1 %v1241_v20  ;;  %919 = vmatmul.bf16.gmra.mxu2 %v1245_v21  ;;  %v1353_v20 = vor.u32 %v1570_v15, %v1352_v14 }
  0x5e   : > { %968 = vmatmul.bf16.gmra.mxu3 %v1249_v22  ;;  %1017 = vmatmul.bf16.gmra.mxu0 %v1253_v23  ;;  %v1983_v22 = vld [vmem:[%s2068_s2] ss:$0 sm:$0xff] }
  0x6c   : > { %875 = vmatmul.bf16.gmra.mxu1 %v1261_v32  ;;  %924 = vmatmul.bf16.gmra.mxu2 %v1265_v33  ;;  %v1574_v32 = vld [vmem:[%s1805_s7 + $0x130] sm:$0xf0]  ;;  %v1572_v33 = vld [vmem:[%s1805_s7 + $0x124] sm:$0xf] }
  0x6d   : > { %v1365_v41 = vor.u32 %v1574_v32, %v1364_v31 }
  0x6e   : > { %973 = vmatmul.bf16.gmra.mxu3 %v1269_v34  ;;  %1022 = vmatmul.bf16.gmra.mxu0 %v1273_v35  ;;  %v1366_v34 = vld [vmem:[%s1805_s7 + $0x134] sm:$0xf0]  ;;  %v1372_v35 = vld [vmem:[%s1805_s7 + $0x128] sm:$0xf]  ;;  %s1213_s7 = sshll.u32 %s2075_s22, 2 }
  0x6f   : > { %s2030_s12 = scalar_lea.vmem %s2069_s3, %s1213_s7 }
  0x7c   : > { %880 = vmatmul.bf16.gmra.mxu1 %v1281_v44  ;;  %929 = vmatmul.bf16.gmra.mxu2 %v1285_v45  ;;  %v1369_v44 = vor.u32 %v1572_v33, %v1366_v34  ;;  %v1373_v45 = vor.u32 %v1575_v36, %v1372_v35 }
  0x7e   : > { %978 = vmatmul.bf16.gmra.mxu3 %v1289_v46  ;;  %1027 = vmatmul.bf16.gmra.mxu0 %v1293_v47 }
  0x8c   : > { %885 = vmatmul.bf16.gmra.mxu1 %v1301_v56  ;;  %934 = vmatmul.bf16.gmra.mxu2 %v1305_v57 }
  0x8e   : > { %983 = vmatmul.bf16.gmra.mxu3 %v1309_v58  ;;  %1032 = vmatmul.bf16.gmra.mxu0 %v1313_v59 }
  0x9c   : > { %890 = vmatmul.bf16.gmra.mxu1 %v1321_v4  ;;  %939 = vmatmul.bf16.gmra.mxu2 %v1325_v5 }
  0x9e   : > { %988 = vmatmul.bf16.gmra.mxu3 %v1329_v6  ;;  %1037 = vmatmul.bf16.gmra.mxu0 %v1333_v7 }
  0xa9   : > { %v1978_v18 = vpop.f32.mrf.mxu1 }
  0xab   : > { %v817_v21 = vpop.f32.mrf.mxu0 }
  0xac   : > { %895 = vmatmul.bf16.gmra.mxu1 %v1341_v16  ;;  %944 = vmatmul.bf16.gmra.mxu2 %v1345_v17  ;;  %v818_v59 = vadd.f32 %v1983_v22, %v817_v21 }
  0xae   : > { %993 = vmatmul.bf16.gmra.mxu3 %v1349_v19  ;;  %1042 = vmatmul.bf16.gmra.mxu0 %v1353_v20 }
  0xaf   : > { %v837_v23 = vpop.f32.mrf.mxu2 }
  0xb0   : > { %v1986_v24 = vadd.f32 %v1983_v22, %v837_v23 }
  0xb1   : > { %v847_v25 = vpop.f32.mrf.mxu3  ;;  %v1991_v27 = vpop.f32.mrf.mxu1 }
  0xb2   : > { %v1989_v26 = vadd.f32 %v1983_v22, %v847_v25 }
  0xb3   : > { %v819_v28 = vpop.f32.mrf.mxu0 }
  0xb4   : > { %v820_v2 = vadd.f32 %v1983_v22, %v819_v28 }
  0xb7   : > { %v839_v37 = vpop.f32.mrf.mxu2 }
  0xb8   : > { %v2002_v38 = vadd.f32 %v1983_v22, %v839_v37 }
  0xb9   : > { %v849_v39 = vpop.f32.mrf.mxu3  ;;  %v2007_v43 = vpop.f32.mrf.mxu1 }
  0xba   : > { %v2005_v42 = vadd.f32 %v1983_v22, %v849_v39 }
  0xbb   : > { %v822_v46 = vpop.f32.mrf.mxu0 }
  0xbc   : > { %900 = vmatmul.bf16.gmra.mxu1 %v1361_v40  ;;  %949 = vmatmul.bf16.gmra.mxu2 %v1365_v41  ;;  %v823_v13 = vadd.f32 %v1983_v22, %v822_v46  ;;  %v828_v40 = vadd.f32 %v1983_v22, %v1978_v18 }
  0xbe   : > { %998 = vmatmul.bf16.gmra.mxu3 %v1369_v44  ;;  %1047 = vmatmul.bf16.gmra.mxu0 %v1373_v45 }
  0xbf   : > { %v842_v47 = vpop.f32.mrf.mxu2 }
  0xc0   : > { %v2010_v48 = vadd.f32 %v1983_v22, %v842_v47 }
  0xc1   : > { %v852_v49 = vpop.f32.mrf.mxu3  ;;  %v2015_v51 = vpop.f32.mrf.mxu1 }
  0xc2   : > { %v2013_v50 = vadd.f32 %v1983_v22, %v852_v49 }
  0xc3   : > { %v824_v52 = vpop.f32.mrf.mxu0 }
  0xc4   : > { %v825_v28 = vadd.f32 %v1983_v22, %v824_v52 }
  0xc7   : > { %v844_v53 = vpop.f32.mrf.mxu2 }
  0xc8   : > { %v2018_v54 = vadd.f32 %v1983_v22, %v844_v53 }
  0xc9   : > { %v854_v55 = vpop.f32.mrf.mxu3  ;;  %v866_v57 = vpop.f32.mrf.mxu1 }
  0xca   : > { %v2021_v56 = vadd.f32 %v1983_v22, %v854_v55  ;;  %v867_v61 = vadd.f32 %v866_v57, %v818_v59  ;;  %v830_v57 = vadd.f32 %v1983_v22, %v1991_v27 }
  0xcb   : > { %v1013_v58 = vpop.f32.mrf.mxu0 }
  0xcf   : > { %v915_v60 = vpop.f32.mrf.mxu2 }
  0xd0   : > { %v916_v0 = vadd.f32 %v915_v60, %v867_v61 }
  0xd1   : > { %v964_v62 = vpop.f32.mrf.mxu3  ;;  %v868_v63 = vpop.f32.mrf.mxu1 }
  0xd2   : > { %v965_v3 = vadd.f32 %v964_v62, %v916_v0  ;;  %v869_v4 = vadd.f32 %v868_v63, %v820_v2 }
  0xd3   : > { %v1015_v1 = vpop.f32.mrf.mxu0 }
  0xd4   : > { %v1014_v9 = vadd.f32 %v1013_v58, %v965_v3  ;;  %v833_v3 = vadd.f32 %v1983_v22, %v2007_v43 }
  0xd6   : > { %v1053_v14 = vmax.f32 %v1014_v9, 0.0 }
  0xd7   : > { %v917_v5 = vpop.f32.mrf.mxu2 }
  0xd8   : > { %v918_v6 = vadd.f32 %v917_v5, %v869_v4 }
  0xd9   : > { %v966_v7 = vpop.f32.mrf.mxu3  ;;  %v871_v8 = vpop.f32.mrf.mxu1 }
  0xda   : > { %v967_v10 = vadd.f32 %v966_v7, %v918_v6  ;;  %v872_v19 = vadd.f32 %v871_v8, %v823_v13 }
  0xdb   : > { %v1018_v11 = vpop.f32.mrf.mxu0 }
  0xdc   : > { %v1016_v12 = vadd.f32 %v1015_v1, %v967_v10 }
  0xde   : > { %v1054_v15 = vmax.f32 %v1016_v12, 0.0  ;;  %v835_v12 = vadd.f32 %v1983_v22, %v2015_v51 }
  0xdf   : > { %v920_v16 = vpop.f32.mrf.mxu2 }
  0xe0   : > { %v1619_v17 = vpack.c.bf16 %v1054_v15, %v1053_v14  ;;  %v921_v23 = vadd.f32 %v920_v16, %v872_v19 }
  0xe1   : > { %v969_v20 = vpop.f32.mrf.mxu3  ;;  %v873_v21 = vpop.f32.mrf.mxu1 }
  0xe2   : > { %1620 = vst [vmem:[%s2030_s12] sm:$0xff] %v1619_v17   ;;  %v970_v29 = vadd.f32 %v969_v20, %v921_v23  ;;  %v874_v30 = vadd.f32 %v873_v21, %v825_v28 }
  0xe3   : > { %v1020_v25 = vpop.f32.mrf.mxu0 }
  0xe4   : > { %v1019_v35 = vadd.f32 %v1018_v11, %v970_v29 }
  0xe6   : > { %v1055_v41 = vmax.f32 %v1019_v35, 0.0 }
  0xe7   : > { %v922_v31 = vpop.f32.mrf.mxu2 }
  0xe8   : > { %v923_v32 = vadd.f32 %v922_v31, %v874_v30 }
  0xe9   : > { %v971_v33 = vpop.f32.mrf.mxu3  ;;  %v876_v34 = vpop.f32.mrf.mxu1 }
  0xea   : > { %v972_v36 = vadd.f32 %v971_v33, %v923_v32  ;;  %v877_v47 = vadd.f32 %v876_v34, %v828_v40 }
  0xeb   : > { %v1023_v37 = vpop.f32.mrf.mxu0 }
  0xec   : > { %v1021_v39 = vadd.f32 %v1020_v25, %v972_v36 }
  0xee   : > { %v1056_v44 = vmax.f32 %v1021_v39, 0.0 }
  0xef   : > { %v925_v45 = vpop.f32.mrf.mxu2 }
  0xf0   : > { %v1624_v46 = vpack.c.bf16 %v1056_v44, %v1055_v41  ;;  %v926_v53 = vadd.f32 %v925_v45, %v877_v47 }
  0xf1   : > { %v974_v49 = vpop.f32.mrf.mxu3  ;;  %v878_v52 = vpop.f32.mrf.mxu1 }
  0xf2   : > { %1656 = vst [vmem:[%s2030_s12 + $0x8] sm:$0xff] %v1624_v46   ;;  %v975_v58 = vadd.f32 %v974_v49, %v926_v53  ;;  %v879_v59 = vadd.f32 %v878_v52, %v830_v57 }
  0xf3   : > { %v1025_v55 = vpop.f32.mrf.mxu0 }
  0xf4   : > { %v1024_v63 = vadd.f32 %v1023_v37, %v975_v58 }
  0xf6   : > { %v1057_v4 = vmax.f32 %v1024_v63, 0.0 }
  0xf7   : > { %v927_v60 = vpop.f32.mrf.mxu2 }
  0xf8   : > { %v928_v61 = vadd.f32 %v927_v60, %v879_v59 }
  0xf9   : > { %v976_v62 = vpop.f32.mrf.mxu3  ;;  %v881_v18 = vpop.f32.mrf.mxu1 }
  0xfa   : > { %v977_v0 = vadd.f32 %v976_v62, %v928_v61  ;;  %v882_v8 = vadd.f32 %v881_v18, %v833_v3 }
  0xfb   : > { %v1028_v1 = vpop.f32.mrf.mxu0 }
  0xfc   : > { %v1026_v2 = vadd.f32 %v1025_v55, %v977_v0 }
  0xfe   : > { %v1058_v5 = vmax.f32 %v1026_v2, 0.0 }
  0xff   : > { %v930_v6 = vpop.f32.mrf.mxu2 }
 0x100   : > { %v1629_v7 = vpack.c.bf16 %v1058_v5, %v1057_v4  ;;  %v931_v10 = vadd.f32 %v930_v6, %v882_v8 }
 0x101   : > { %v979_v27 = vpop.f32.mrf.mxu3  ;;  %v883_v9 = vpop.f32.mrf.mxu1 }
 0x102   : > { %1657 = vst [vmem:[%s2030_s12 + $0x10] sm:$0xff] %v1629_v7   ;;  %v980_v13 = vadd.f32 %v979_v27, %v931_v10  ;;  %v884_v14 = vadd.f32 %v883_v9, %v835_v12 }
 0x103   : > { %v1030_v11 = vpop.f32.mrf.mxu0 }
 0x104   : > { %v1029_v19 = vadd.f32 %v1028_v1, %v980_v13 }
 0x106   : > { %v1059_v25 = vmax.f32 %v1029_v19, 0.0 }
 0x107   : > { %v932_v15 = vpop.f32.mrf.mxu2 }
 0x108   : > { %v933_v16 = vadd.f32 %v932_v15, %v884_v14 }
 0x109   : > { %v981_v17 = vpop.f32.mrf.mxu3  ;;  %v886_v43 = vpop.f32.mrf.mxu1 }
 0x10a   : > { %v982_v20 = vadd.f32 %v981_v17, %v933_v16  ;;  %v887_v31 = vadd.f32 %v886_v43, %v1986_v24 }
 0x10b   : > { %v1033_v21 = vpop.f32.mrf.mxu0 }
 0x10c   : > { %v1031_v23 = vadd.f32 %v1030_v11, %v982_v20 }
 0x10e   : > { %v1060_v28 = vmax.f32 %v1031_v23, 0.0 }
 0x10f   : > { %v935_v29 = vpop.f32.mrf.mxu2 }
 0x110   : > { %v1634_v30 = vpack.c.bf16 %v1060_v28, %v1059_v25  ;;  %v936_v22 = vadd.f32 %v935_v29, %v887_v31 }
 0x111   : > { %v984_v32 = vpop.f32.mrf.mxu3  ;;  %v888_v33 = vpop.f32.mrf.mxu1 }
 0x112   : > { %1658 = vst [vmem:[%s2030_s12 + $0x18] sm:$0xff] %v1634_v30   ;;  %v985_v34 = vadd.f32 %v984_v32, %v936_v22  ;;  %v889_v35 = vadd.f32 %v888_v33, %v2002_v38 }
 0x113   : > { %v1035_v51 = vpop.f32.mrf.mxu0 }
 0x114   : > { %v1034_v41 = vadd.f32 %v1033_v21, %v985_v34 }
 0x116   : > { %v1061_v47 = vmax.f32 %v1034_v41, 0.0 }
 0x117   : > { %v937_v36 = vpop.f32.mrf.mxu2 }
 0x118   : > { %v938_v37 = vadd.f32 %v937_v36, %v889_v35 }
 0x119   : > { %v986_v39 = vpop.f32.mrf.mxu3  ;;  %v891_v40 = vpop.f32.mrf.mxu1 }
 0x11a   : > { %v987_v44 = vadd.f32 %v986_v39, %v938_v37  ;;  %v892_v53 = vadd.f32 %v891_v40, %v2010_v48 }
 0x11b   : > { %v1038_v45 = vpop.f32.mrf.mxu0 }
 0x11c   : > { %v1036_v46 = vadd.f32 %v1035_v51, %v987_v44 }
 0x11e   : > { %v1062_v49 = vmax.f32 %v1036_v46, 0.0 }
 0x11f   : > { %v940_v24 = vpop.f32.mrf.mxu2 }
 0x120   : > { %v1639_v52 = vpack.c.bf16 %v1062_v49, %v1061_v47  ;;  %v941_v58 = vadd.f32 %v940_v24, %v892_v53 }
 0x121   : > { %v989_v55 = vpop.f32.mrf.mxu3  ;;  %v893_v57 = vpop.f32.mrf.mxu1 }
 0x122   : > { %1659 = vst [vmem:[%s2030_s12 + $0x20] sm:$0xff] %v1639_v52   ;;  %v990_v59 = vadd.f32 %v989_v55, %v941_v58  ;;  %v894_v60 = vadd.f32 %v893_v57, %v2018_v54 }
 0x123   : > { %v1040_v38 = vpop.f32.mrf.mxu0 }
 0x124   : > { %v1039_v0 = vadd.f32 %v1038_v45, %v990_v59 }
 0x126   : > { %v1063_v4 = vmax.f32 %v1039_v0, 0.0 }
 0x127   : > { %v942_v61 = vpop.f32.mrf.mxu2 }
 0x128   : > { %v943_v62 = vadd.f32 %v942_v61, %v894_v60 }
 0x129   : > { %v991_v18 = vpop.f32.mrf.mxu3  ;;  %v896_v63 = vpop.f32.mrf.mxu1 }
 0x12a   : > { %v992_v1 = vadd.f32 %v991_v18, %v943_v62  ;;  %v897_v7 = vadd.f32 %v896_v63, %v1989_v26 }
 0x12b   : > { %v1043_v3 = vpop.f32.mrf.mxu0 }
 0x12c   : > { %v1041_v2 = vadd.f32 %v1040_v38, %v992_v1 }
 0x12e   : > { %v1064_v5 = vmax.f32 %v1041_v2, 0.0 }
 0x12f   : > { %v945_v48 = vpop.f32.mrf.mxu2 }
 0x130   : > { %v1644_v6 = vpack.c.bf16 %v1064_v5, %v1063_v4  ;;  %v946_v9 = vadd.f32 %v945_v48, %v897_v7 }
 0x131   : > { %v994_v8 = vpop.f32.mrf.mxu3  ;;  %v898_v27 = vpop.f32.mrf.mxu1 }
 0x132   : > { %1660 = vst [vmem:[%s2030_s12 + $0x28] sm:$0xff] %v1644_v6   ;;  %v995_v54 = vadd.f32 %v994_v8, %v946_v9  ;;  %v899_v10 = vadd.f32 %v898_v27, %v2005_v42 }
 0x133   : > { %v1045_v11 = vpop.f32.mrf.mxu0 }
 0x134   : > { %v1044_v16 = vadd.f32 %v1043_v3, %v995_v54 }
 0x136   : > { %v1065_v19 = vmax.f32 %v1044_v16, 0.0 }
 0x137   : > { %v947_v12 = vpop.f32.mrf.mxu2 }
 0x138   : > { %v948_v13 = vadd.f32 %v947_v12, %v899_v10 }
 0x139   : > { %v996_v14 = vpop.f32.mrf.mxu3  ;;  %v901_v15 = vpop.f32.mrf.mxu1 }
 0x13a   : > { %v997_v17 = vadd.f32 %v996_v14, %v948_v13  ;;  %v902_v23 = vadd.f32 %v901_v15, %v2013_v50 }
 0x13b   : > { %v1048_v28 = vpop.f32.mrf.mxu0 }
 0x13c   : > { %v1046_v43 = vadd.f32 %v1045_v11, %v997_v17 }
 0x13e   : > { %v1066_v20 = vmax.f32 %v1046_v43, 0.0 }
 0x13f   : > { %v950_v21 = vpop.f32.mrf.mxu2 }
 0x140   : > { %v1649_v26 = vpack.c.bf16 %v1066_v20, %v1065_v19  ;;  %v951_v42 = vadd.f32 %v950_v21, %v902_v23 }
 0x141   : > { %v999_v25 = vpop.f32.mrf.mxu3  ;;  %v903_v29 = vpop.f32.mrf.mxu1 }
 0x142   : > { %1661 = vst [vmem:[%s2030_s12 + $0x30] sm:$0xff] %v1649_v26   ;;  %v1000_v30 = vadd.f32 %v999_v25, %v951_v42  ;;  %v904_v31 = vadd.f32 %v903_v29, %v2021_v56 }
 0x143   : > { %v1050_v35 = vpop.f32.mrf.mxu0 }
 0x144   : > { %v1049_v51 = vadd.f32 %v1048_v28, %v1000_v30 }
 0x146   : > { %v1067_v37 = vmax.f32 %v1049_v51, 0.0 }
 0x147   : > { %v952_v32 = vpop.f32.mrf.mxu2 }
 0x148   : > { %v953_v33 = vadd.f32 %v952_v32, %v904_v31 }
 0x149   : > { %v1001_v22 = vpop.f32.mrf.mxu3 }
 0x14a   : > { %v1002_v34 = vadd.f32 %v1001_v22, %v953_v33 }
 0x14c   : > { %v1051_v36 = vadd.f32 %v1050_v35, %v1002_v34 }
 0x14e   : > { %v1068_v39 = vmax.f32 %v1051_v36, 0.0 }
 0x150   : > { %v1654_v40 = vpack.c.bf16 %v1068_v39, %v1067_v37 }
 0x152   : > { %1662 = vst [vmem:[%s2030_s12 + $0x38] sm:$0xff] %v1654_v40  }
 0x153 PF: > { %s13_s14 = sadd.s32 1, %s1735_s14   ;;  %s2070_s12 = smov %s1731_s13 }
 0x154   : > { %p10_p5 = scmp.ge.s32.totalorder %s13_s14, 4   ;;  %s2071_s13 = smov %s2073_s15 }
 0x156   :  { %12 = sbr.rel (!%p10_p5) target bundleno = 2 (0x2), region = 68 }

// kernel: _lambda_.27
= control target key start
LH: loop header
LB: loop body
LE: loop exit
PB: predicated region body
PF: predicated region fallthrough
CT: control target
= control target key end

     0   :  { %s1926_s15 = smov 0   ;;  %s1928_s16 = smov 0   ;;  %s2252_s0 = inlined_call_operand.vmem [shape: bf16[256,640], index: 0, kind: input, shape index: {}]   ;;  %s2253_s1 = inlined_call_operand.vmem [shape: bf16[640,128], index: 1, kind: input, shape index: {}]   ;;  %s2254_s2 = inlined_call_operand.vmem [shape: f32[1,128], index: 2, kind: input, shape index: {}]   ;;  %s2255_s3 = inlined_call_operand.vmem [shape: bf16[256,128], index: 3, kind: input, shape index: {}]   ;;  %s2256_s4 = inlined_call_operand.vmem [shape: bf16[256,128], index: 4, kind: output, shape index: {}]  }
   0x1   :  { %s1930_s17 = smov 0  }
   0x2 LB: > { %s23_s18 = sadd.s32 1, %s1895_s16  ;;  %p1332_p0 = scmp.ge.s32.totalorder %s1899_s17, 1  ;;  %s1899_s17 = sphi %s1930_s17, %s14_s17   ;;  %s1895_s16 = sphi %s1928_s16, %s2258_s16   ;;  %s1891_s15 = sphi %s1926_s15, %s2257_s15  }
   0x3   : > { %p24_p1 = scmp.ge.s32.totalorder %s23_s18, 2  ;;  %p211_p2 = scmp.lt.s32.totalorder %s1899_s17, 3 }
   0x5   : > { %s2260_s18 = smov (%p24_p1, %s23_s18), 0  ;;  %p212_p3 = pnand %p1332_p0, %p211_p2 }
   0x6   : > { %s1333_s25 = sshll.u32 (!%p212_p3), %s1891_s15, 4 }
   0x7   : > { %215 = sbr.rel (%p212_p3) target bundleno = 341 (0x155), region = 36  ;;  %p257_p4 = scmp.lt.s32.totalorder (!%p212_p3), %s1333_s25, 31 }
   0xc   : > { %v1708_v0 = vld [vmem:[%s2253_s1 + $0x38] sm:$0xff]  ;;  %v1707_v1 = vld [vmem:[%s2253_s1 + $0x30] sm:$0xff]  ;;  %v1706_v2 = vld [vmem:[%s2253_s1 + $0x28] sm:$0xff]  ;;  %s2262_s25 = smov (!%p257_p4, %s1333_s25), 31 }
   0xd   : > { %1827 = vmatpush.bf16.msra.mxu1 %v1708_v0  ;;  %1828 = vmatpush.bf16.msra.mxu2 %v1708_v0  ;;  %v1705_v3 = vld [vmem:[%s2253_s1 + $0x20] sm:$0xff]  ;;  %v1704_v4 = vld [vmem:[%s2253_s1 + $0x18] sm:$0xff]  ;;  %v1703_v5 = vld [vmem:[%s2253_s1 + $0x10] sm:$0xff]  ;;  %s1851_s6 = smul.u32 20, %s2262_s25 }
   0xe   : > { %1829 = vmatpush.bf16.msra.mxu3 %v1708_v0  ;;  %868 = vmatpush.bf16.msra.mxu0 %v1708_v0  ;;  %v1702_v6 = vld [vmem:[%s2253_s1 + $0x8] sm:$0xff]  ;;  %v1701_v7 = vld [vmem:[%s2253_s1] sm:$0xff]  ;;  %v1724_v16 = vld [vmem:[%s2253_s1 + $0xb8] sm:$0xff] }
   0xf   : > { %s1974_s11 = scalar_lea.vmem %s2252_s0, %s1851_s6  ;;  %v1716_v17 = vld [vmem:[%s2253_s1 + $0x78] sm:$0xff]  ;;  %v1723_v24 = vld [vmem:[%s2253_s1 + $0xb0] sm:$0xff]  ;;  %v1722_v28 = vld [vmem:[%s2253_s1 + $0xa8] sm:$0xff] }
  0x10   : > { %v1381_v8 = vld [vmem:[%s1974_s11 + $0x50] sm:$0xf]  ;;  %v1673_v9 = vld [vmem:[%s1974_s11 + $0x60] sm:$0xf0]  ;;  %v1421_v10 = vld [vmem:[%s1974_s11 + $0xa0] sm:$0xf] }
  0x11   : > { %1830 = vmatpush.bf16.msra.mxu1 %v1707_v1  ;;  %1831 = vmatpush.bf16.msra.mxu2 %v1707_v1  ;;  %v1683_v11 = vld [vmem:[%s1974_s11 + $0xb0] sm:$0xf0]  ;;  %v1461_v12 = vld [vmem:[%s1974_s11 + $0xf0] sm:$0xf]  ;;  %v1693_v13 = vld [vmem:[%s1974_s11 + $0x100] sm:$0xf0]  ;;  %v1382_v18 = vor.u32 %v1673_v9, %v1381_v8 }
  0x12   : > { %1832 = vmatpush.bf16.msra.mxu3 %v1707_v1  ;;  %869 = vmatpush.bf16.msra.mxu0 %v1707_v1  ;;  %v1341_v14 = vld [vmem:[%s1974_s11] sm:$0xf]  ;;  %v1663_v15 = vld [vmem:[%s1974_s11 + $0x10] sm:$0xf0]  ;;  %v1422_v19 = vor.u32 %v1683_v11, %v1421_v10  ;;  %v1462_v20 = vor.u32 %v1693_v13, %v1461_v12  ;;  %v1732_v22 = vld [vmem:[%s2253_s1 + $0xf8] sm:$0xff] }
  0x13   : > { %v1342_v21 = vor.u32 %v1663_v15, %v1341_v14  ;;  %v1740_v23 = vld [vmem:[%s2253_s1 + $0x138] sm:$0xff]  ;;  %v1715_v25 = vld [vmem:[%s2253_s1 + $0x70] sm:$0xff]  ;;  %v1714_v29 = vld [vmem:[%s2253_s1 + $0x68] sm:$0xff] }
  0x14   : > { %v1731_v26 = vld [vmem:[%s2253_s1 + $0xf0] sm:$0xff]  ;;  %v1730_v30 = vld [vmem:[%s2253_s1 + $0xe8] sm:$0xff]  ;;  %v1721_v32 = vld [vmem:[%s2253_s1 + $0xa0] sm:$0xff] }
  0x15   : > { %1833 = vmatpush.bf16.msra.mxu1 %v1706_v2  ;;  %1834 = vmatpush.bf16.msra.mxu2 %v1706_v2  ;;  %v1739_v27 = vld [vmem:[%s2253_s1 + $0x130] sm:$0xff]  ;;  %v1738_v31 = vld [vmem:[%s2253_s1 + $0x128] sm:$0xff]  ;;  %v1713_v33 = vld [vmem:[%s2253_s1 + $0x60] sm:$0xff] }
  0x16   : > { %1835 = vmatpush.bf16.msra.mxu3 %v1706_v2  ;;  %870 = vmatpush.bf16.msra.mxu0 %v1706_v2  ;;  %v1729_v34 = vld [vmem:[%s2253_s1 + $0xe0] sm:$0xff]  ;;  %v1401_v36 = vld [vmem:[%s1974_s11 + $0x78] sm:$0xf]  ;;  %v1678_v37 = vld [vmem:[%s1974_s11 + $0x88] sm:$0xf0] }
  0x17   : > { %v1737_v35 = vld [vmem:[%s2253_s1 + $0x120] sm:$0xff]  ;;  %v1441_v38 = vld [vmem:[%s1974_s11 + $0xc8] sm:$0xf]  ;;  %v1688_v39 = vld [vmem:[%s1974_s11 + $0xd8] sm:$0xf0]  ;;  %v1402_v46 = vor.u32 %v1678_v37, %v1401_v36 }
  0x18   : > { %v1481_v40 = vld [vmem:[%s1974_s11 + $0x118] sm:$0xf]  ;;  %v1698_v41 = vld [vmem:[%s1974_s11 + $0x128] sm:$0xf0]  ;;  %v1361_v42 = vld [vmem:[%s1974_s11 + $0x28] sm:$0xf]  ;;  %v1442_v47 = vor.u32 %v1688_v39, %v1441_v38 }
  0x19   : > { %1836 = vmatpush.bf16.msra.mxu1 %v1705_v3  ;;  %1837 = vmatpush.bf16.msra.mxu2 %v1705_v3  ;;  %v1668_v43 = vld [vmem:[%s1974_s11 + $0x38] sm:$0xf0]  ;;  %v1482_v48 = vor.u32 %v1698_v41, %v1481_v40  ;;  %v1719_v52 = vld [vmem:[%s2253_s1 + $0x90] sm:$0xff]  ;;  %v1718_v56 = vld [vmem:[%s2253_s1 + $0x88] sm:$0xff] }
  0x1a   : > { %1838 = vmatpush.bf16.msra.mxu3 %v1705_v3  ;;  %871 = vmatpush.bf16.msra.mxu0 %v1705_v3  ;;  %v1720_v44 = vld [vmem:[%s2253_s1 + $0x98] sm:$0xff]  ;;  %v1362_v49 = vor.u32 %v1668_v43, %v1361_v42  ;;  %v1711_v53 = vld [vmem:[%s2253_s1 + $0x50] sm:$0xff]  ;;  %v1710_v57 = vld [vmem:[%s2253_s1 + $0x48] sm:$0xff] }
  0x1b   : > { %v1712_v45 = vld [vmem:[%s2253_s1 + $0x58] sm:$0xff]  ;;  %v1727_v54 = vld [vmem:[%s2253_s1 + $0xd0] sm:$0xff]  ;;  %v1726_v58 = vld [vmem:[%s2253_s1 + $0xc8] sm:$0xff] }
  0x1c   : > { %v1728_v50 = vld [vmem:[%s2253_s1 + $0xd8] sm:$0xff]  ;;  %v1735_v55 = vld [vmem:[%s2253_s1 + $0x110] sm:$0xff]  ;;  %v1734_v59 = vld [vmem:[%s2253_s1 + $0x108] sm:$0xff] }
  0x1d   : > { %1839 = vmatpush.bf16.msra.mxu1 %v1704_v4  ;;  %1840 = vmatpush.bf16.msra.mxu2 %v1704_v4  ;;  %v1736_v51 = vld [vmem:[%s2253_s1 + $0x118] sm:$0xff]  ;;  %v1717_v60 = vld [vmem:[%s2253_s1 + $0x80] sm:$0xff]  ;;  %v1349_v2 = vld [vmem:[%s1974_s11 + $0x8] sm:$0xf] }
  0x1e   : > { %1841 = vmatpush.bf16.msra.mxu3 %v1704_v4  ;;  %872 = vmatpush.bf16.msra.mxu0 %v1704_v4  ;;  %v1709_v61 = vld [vmem:[%s2253_s1 + $0x40] sm:$0xff]  ;;  %v1343_v1 = vld [vmem:[%s1974_s11 + $0x14] sm:$0xf0]  ;;  %v1664_v3 = vld [vmem:[%s1974_s11 + $0x18] sm:$0xf0] }
  0x1f   : > { %v1725_v62 = vld [vmem:[%s2253_s1 + $0xc0] sm:$0xff]  ;;  %v1662_v4 = vld [vmem:[%s1974_s11 + $0xc] sm:$0xf]  ;;  %v1350_v9 = vor.u32 %v1664_v3, %v1349_v2  ;;  %v1369_v14 = vld [vmem:[%s1974_s11 + $0x30] sm:$0xf] }
  0x20   : > { %v1733_v63 = vld [vmem:[%s2253_s1 + $0x100] sm:$0xff]  ;;  %v1666_v12 = vld [vmem:[%s1974_s11 + $0x2c] sm:$0xf]  ;;  %v1676_v36 = vld [vmem:[%s1974_s11 + $0x7c] sm:$0xf] }
  0x21   : > { %1842 = vmatpush.bf16.msra.mxu1 %v1703_v5  ;;  %1843 = vmatpush.bf16.msra.mxu2 %v1703_v5  ;;  %v1661_v0 = vld [vmem:[%s1974_s11 + $0x4] sm:$0xf]  ;;  %v1363_v13 = vld [vmem:[%s1974_s11 + $0x3c] sm:$0xf0]  ;;  %v1403_v37 = vld [vmem:[%s1974_s11 + $0x8c] sm:$0xf0] }
  0x22   : > { %1844 = vmatpush.bf16.msra.mxu3 %v1703_v5  ;;  %873 = vmatpush.bf16.msra.mxu0 %v1703_v5  ;;  %v1351_v5 = vld [vmem:[%s1974_s11 + $0x1c] sm:$0xf0]  ;;  %v1346_v8 = vor.u32 %v1661_v0, %v1343_v1  ;;  %v1669_v15 = vld [vmem:[%s1974_s11 + $0x40] sm:$0xf0]  ;;  %v1679_v39 = vld [vmem:[%s1974_s11 + $0x90] sm:$0xf0] }
  0x23   : > { %v1354_v10 = vor.u32 %v1662_v4, %v1351_v5  ;;  %v1409_v38 = vld [vmem:[%s1974_s11 + $0x80] sm:$0xf]  ;;  %v1677_v40 = vld [vmem:[%s1974_s11 + $0x84] sm:$0xf]  ;;  %v1411_v41 = vld [vmem:[%s1974_s11 + $0x94] sm:$0xf0] }
  0x24   : > { %v1417_v42 = vld [vmem:[%s1974_s11 + $0x88] sm:$0xf]  ;;  %v1680_v43 = vld [vmem:[%s1974_s11 + $0x98] sm:$0xf0]  ;;  %v1687_v0 = vld [vmem:[%s1974_s11 + $0xd4] sm:$0xf] }
  0x25   : > { %1845 = vmatpush.bf16.msra.mxu1 %v1702_v6  ;;  %1846 = vmatpush.bf16.msra.mxu2 %v1702_v6  ;;  %v1451_v1 = vld [vmem:[%s1974_s11 + $0xe4] sm:$0xf0]  ;;  %v1457_v2 = vld [vmem:[%s1974_s11 + $0xd8] sm:$0xf]  ;;  %v1690_v3 = vld [vmem:[%s1974_s11 + $0xe8] sm:$0xf0] }
  0x26   : > { %1847 = vmatpush.bf16.msra.mxu3 %v1702_v6  ;;  %874 = vmatpush.bf16.msra.mxu0 %v1702_v6  ;;  %v1357_v6 = vld [vmem:[%s1974_s11 + $0x10] sm:$0xf] }
  0x29   : > { %1848 = vmatpush.bf16.msra.mxu1 %v1701_v7  ;;  %1849 = vmatpush.bf16.msra.mxu2 %v1701_v7 }
  0x2a   : > { %1850 = vmatpush.bf16.msra.mxu3 %v1701_v7  ;;  %875 = vmatpush.bf16.msra.mxu0 %v1701_v7  ;;  %v1665_v7 = vld [vmem:[%s1974_s11 + $0x20] sm:$0xf0] }
  0x2b   : > { %v1358_v11 = vor.u32 %v1665_v7, %v1357_v6  ;;  %v1454_v6 = vor.u32 %v1687_v0, %v1451_v1  ;;  %v1458_v7 = vor.u32 %v1690_v3, %v1457_v2 }
  0x2c   : > { %886 = vmatmul.bf16.vlgmr.msra.gmra.mxu1 %v1382_v18  ;;  %896 = vmatmul.bf16.vlgmr.msra.gmra.mxu2 %v1422_v19  ;;  %v1377_v18 = vld [vmem:[%s1974_s11 + $0x38] sm:$0xf]  ;;  %v1670_v19 = vld [vmem:[%s1974_s11 + $0x48] sm:$0xf0] }
  0x2d   : > { %966 = vmatpush.bf16.msrb.mxu2 %v1724_v16  ;;  %917 = vmatpush.bf16.msrb.mxu1 %v1716_v17  ;;  %v1667_v16 = vld [vmem:[%s1974_s11 + $0x34] sm:$0xf]  ;;  %v1371_v17 = vld [vmem:[%s1974_s11 + $0x44] sm:$0xf0] }
  0x2e   : > { %906 = vmatmul.bf16.vlgmr.msra.gmra.mxu3 %v1462_v20  ;;  %876 = vmatmul.bf16.vlgmr.msra.gmra.mxu0 %v1342_v21  ;;  %v1366_v20 = vor.u32 %v1666_v12, %v1363_v13  ;;  %v1370_v21 = vor.u32 %v1669_v15, %v1369_v14  ;;  %v1692_v12 = vld [vmem:[%s1974_s11 + $0xfc] sm:$0xf]  ;;  %v1471_v13 = vld [vmem:[%s1974_s11 + $0x10c] sm:$0xf0]  ;;  %v1477_v14 = vld [vmem:[%s1974_s11 + $0x100] sm:$0xf] }
  0x2f   : > { %1015 = vmatpush.bf16.msrb.mxu3 %v1732_v22  ;;  %1064 = vmatpush.bf16.msrb.mxu0 %v1740_v23  ;;  %v1374_v22 = vor.u32 %v1667_v16, %v1371_v17  ;;  %v1378_v23 = vor.u32 %v1670_v19, %v1377_v18  ;;  %v1695_v15 = vld [vmem:[%s1974_s11 + $0x110] sm:$0xf0]  ;;  %v1474_v19 = vor.u32 %v1692_v12, %v1471_v13 }
  0x31   : > { %967 = vmatpush.bf16.msrb.mxu2 %v1723_v24  ;;  %918 = vmatpush.bf16.msrb.mxu1 %v1715_v25  ;;  %v1671_v24 = vld [vmem:[%s1974_s11 + $0x54] sm:$0xf]  ;;  %v1383_v25 = vld [vmem:[%s1974_s11 + $0x64] sm:$0xf0] }
  0x33   : > { %1016 = vmatpush.bf16.msrb.mxu3 %v1731_v26  ;;  %1065 = vmatpush.bf16.msrb.mxu0 %v1739_v27  ;;  %v1389_v26 = vld [vmem:[%s1974_s11 + $0x58] sm:$0xf]  ;;  %v1674_v27 = vld [vmem:[%s1974_s11 + $0x68] sm:$0xf0] }
  0x35   : > { %968 = vmatpush.bf16.msrb.mxu2 %v1722_v28  ;;  %919 = vmatpush.bf16.msrb.mxu1 %v1714_v29  ;;  %v1672_v28 = vld [vmem:[%s1974_s11 + $0x5c] sm:$0xf]  ;;  %v1391_v29 = vld [vmem:[%s1974_s11 + $0x6c] sm:$0xf0] }
  0x37   : > { %1017 = vmatpush.bf16.msrb.mxu3 %v1730_v30  ;;  %1066 = vmatpush.bf16.msrb.mxu0 %v1738_v31  ;;  %v1397_v30 = vld [vmem:[%s1974_s11 + $0x60] sm:$0xf]  ;;  %v1675_v31 = vld [vmem:[%s1974_s11 + $0x70] sm:$0xf0] }
  0x39   : > { %969 = vmatpush.bf16.msrb.mxu2 %v1721_v32  ;;  %920 = vmatpush.bf16.msrb.mxu1 %v1713_v33  ;;  %v1386_v32 = vor.u32 %v1671_v24, %v1383_v25  ;;  %v1390_v33 = vor.u32 %v1674_v27, %v1389_v26 }
  0x3b   : > { %1018 = vmatpush.bf16.msrb.mxu3 %v1729_v34  ;;  %1067 = vmatpush.bf16.msrb.mxu0 %v1737_v35  ;;  %v1394_v34 = vor.u32 %v1672_v28, %v1391_v29  ;;  %v1398_v35 = vor.u32 %v1675_v31, %v1397_v30  ;;  %v1696_v29 = vld [vmem:[%s1974_s11 + $0x11c] sm:$0xf]  ;;  %v1483_v30 = vld [vmem:[%s1974_s11 + $0x12c] sm:$0xf0]  ;;  %v1489_v31 = vld [vmem:[%s1974_s11 + $0x120] sm:$0xf] }
  0x3c   : > { %891 = vmatmul.bf16.gmra.mxu1 %v1402_v46  ;;  %901 = vmatmul.bf16.gmra.mxu2 %v1442_v47  ;;  %v1414_v46 = vor.u32 %v1677_v40, %v1411_v41  ;;  %v1418_v47 = vor.u32 %v1680_v43, %v1417_v42  ;;  %v1486_v40 = vor.u32 %v1696_v29, %v1483_v30 }
  0x3d   : > { %970 = vmatpush.bf16.msrb.mxu2 %v1720_v44  ;;  %921 = vmatpush.bf16.msrb.mxu1 %v1712_v45  ;;  %v1406_v44 = vor.u32 %v1676_v36, %v1403_v37  ;;  %v1410_v45 = vor.u32 %v1679_v39, %v1409_v38  ;;  %v1700_v36 = vld [vmem:[%s1974_s11 + $0x138] sm:$0xf0] }
  0x3e   : > { %911 = vmatmul.bf16.gmra.mxu3 %v1482_v48  ;;  %881 = vmatmul.bf16.gmra.mxu0 %v1362_v49  ;;  %v1681_v48 = vld [vmem:[%s1974_s11 + $0xa4] sm:$0xf]  ;;  %v1423_v49 = vld [vmem:[%s1974_s11 + $0xb4] sm:$0xf0] }
  0x3f   : > { %1019 = vmatpush.bf16.msrb.mxu3 %v1728_v50  ;;  %1068 = vmatpush.bf16.msrb.mxu0 %v1736_v51  ;;  %v1429_v50 = vld [vmem:[%s1974_s11 + $0xa8] sm:$0xf]  ;;  %v1684_v51 = vld [vmem:[%s1974_s11 + $0xb8] sm:$0xf0] }
  0x41   : > { %971 = vmatpush.bf16.msrb.mxu2 %v1719_v52  ;;  %922 = vmatpush.bf16.msrb.mxu1 %v1711_v53  ;;  %v1682_v52 = vld [vmem:[%s1974_s11 + $0xac] sm:$0xf]  ;;  %v1431_v53 = vld [vmem:[%s1974_s11 + $0xbc] sm:$0xf0] }
  0x43   : > { %1020 = vmatpush.bf16.msrb.mxu3 %v1727_v54  ;;  %1069 = vmatpush.bf16.msrb.mxu0 %v1735_v55  ;;  %v1437_v54 = vld [vmem:[%s1974_s11 + $0xb0] sm:$0xf]  ;;  %v1685_v55 = vld [vmem:[%s1974_s11 + $0xc0] sm:$0xf0] }
  0x45   : > { %972 = vmatpush.bf16.msrb.mxu2 %v1718_v56  ;;  %923 = vmatpush.bf16.msrb.mxu1 %v1710_v57  ;;  %v1426_v56 = vor.u32 %v1681_v48, %v1423_v49  ;;  %v1430_v57 = vor.u32 %v1684_v51, %v1429_v50 }
  0x47   : > { %1021 = vmatpush.bf16.msrb.mxu3 %v1726_v58  ;;  %1070 = vmatpush.bf16.msrb.mxu0 %v1734_v59  ;;  %v1434_v58 = vor.u32 %v1682_v52, %v1431_v53  ;;  %v1438_v59 = vor.u32 %v1685_v55, %v1437_v54 }
  0x49   : > { %973 = vmatpush.bf16.msrb.mxu2 %v1717_v60  ;;  %924 = vmatpush.bf16.msrb.mxu1 %v1709_v61  ;;  %v1686_v60 = vld [vmem:[%s1974_s11 + $0xcc] sm:$0xf]  ;;  %v1443_v61 = vld [vmem:[%s1974_s11 + $0xdc] sm:$0xf0] }
  0x4a   : > { %v1446_v4 = vor.u32 %v1686_v60, %v1443_v61 }
  0x4b   : > { %1022 = vmatpush.bf16.msrb.mxu3 %v1725_v62  ;;  %1071 = vmatpush.bf16.msrb.mxu0 %v1733_v63  ;;  %v1449_v62 = vld [vmem:[%s1974_s11 + $0xd0] sm:$0xf]  ;;  %v1689_v63 = vld [vmem:[%s1974_s11 + $0xe0] sm:$0xf0] }
  0x4c   : > { %925 = vmatmul.bf16.vlgmr.msrb.gmra.mxu1 %v1346_v8  ;;  %974 = vmatmul.bf16.vlgmr.msrb.gmra.mxu2 %v1350_v9  ;;  %v1450_v5 = vor.u32 %v1689_v63, %v1449_v62  ;;  %v1691_v8 = vld [vmem:[%s1974_s11 + $0xf4] sm:$0xf]  ;;  %v1463_v9 = vld [vmem:[%s1974_s11 + $0x104] sm:$0xf0] }
  0x4d   : > { %v1466_v16 = vor.u32 %v1691_v8, %v1463_v9 }
  0x4e   : > { %1023 = vmatmul.bf16.vlgmr.msrb.gmra.mxu3 %v1354_v10  ;;  %1072 = vmatmul.bf16.vlgmr.msrb.gmra.mxu0 %v1358_v11  ;;  %v1469_v10 = vld [vmem:[%s1974_s11 + $0xf8] sm:$0xf]  ;;  %v1694_v11 = vld [vmem:[%s1974_s11 + $0x108] sm:$0xf0] }
  0x4f   : > { %v1470_v17 = vor.u32 %v1694_v11, %v1469_v10 }
  0x5c   : > { %930 = vmatmul.bf16.gmra.mxu1 %v1366_v20  ;;  %979 = vmatmul.bf16.gmra.mxu2 %v1370_v21  ;;  %v1478_v20 = vor.u32 %v1695_v15, %v1477_v14 }
  0x5e   : > { %1028 = vmatmul.bf16.gmra.mxu3 %v1374_v22  ;;  %1077 = vmatmul.bf16.gmra.mxu0 %v1378_v23  ;;  %v2152_v22 = vld [vmem:[%s2254_s2] ss:$0 sm:$0xff] }
  0x6c   : > { %935 = vmatmul.bf16.gmra.mxu1 %v1386_v32  ;;  %984 = vmatmul.bf16.gmra.mxu2 %v1390_v33  ;;  %v1699_v32 = vld [vmem:[%s1974_s11 + $0x130] sm:$0xf0]  ;;  %v1697_v33 = vld [vmem:[%s1974_s11 + $0x124] sm:$0xf] }
  0x6d   : > { %v1490_v41 = vor.u32 %v1699_v32, %v1489_v31 }
  0x6e   : > { %1033 = vmatmul.bf16.gmra.mxu3 %v1394_v34  ;;  %1082 = vmatmul.bf16.gmra.mxu0 %v1398_v35  ;;  %v1491_v34 = vld [vmem:[%s1974_s11 + $0x134] sm:$0xf0]  ;;  %v1497_v35 = vld [vmem:[%s1974_s11 + $0x128] sm:$0xf]  ;;  %s1336_s11 = sshll.u32 %s2262_s25, 2 }
  0x6f   : > { %s2199_s22 = scalar_lea.vmem %s2255_s3, %s1336_s11  ;;  %s2209_s26 = scalar_lea.vmem %s2256_s4, %s1336_s11 }
  0x7c   : > { %940 = vmatmul.bf16.gmra.mxu1 %v1406_v44  ;;  %989 = vmatmul.bf16.gmra.mxu2 %v1410_v45  ;;  %v1494_v44 = vor.u32 %v1697_v33, %v1491_v34  ;;  %v1498_v45 = vor.u32 %v1700_v36, %v1497_v35  ;;  %v1813_v35 = vld [vmem:[%s2199_s22 + $0x8] sm:$0xff]  }
  0x7e   : > { %1038 = vmatmul.bf16.gmra.mxu3 %v1414_v46  ;;  %1087 = vmatmul.bf16.gmra.mxu0 %v1418_v47 }
  0x8c   : > { %945 = vmatmul.bf16.gmra.mxu1 %v1426_v56  ;;  %994 = vmatmul.bf16.gmra.mxu2 %v1430_v57 }
  0x8e   : > { %1043 = vmatmul.bf16.gmra.mxu3 %v1434_v58  ;;  %1092 = vmatmul.bf16.gmra.mxu0 %v1438_v59 }
  0x9c   : > { %950 = vmatmul.bf16.gmra.mxu1 %v1446_v4  ;;  %999 = vmatmul.bf16.gmra.mxu2 %v1450_v5  ;;  %v1742_v4 = vld [vmem:[%s2199_s22] sm:$0xff]  }
  0x9d   : > { %v1743_v8 = vunpack.c.l.bf16 %v1742_v4  ;;  %v1744_v13 = vunpack.c.h.bf16 %v1742_v4 }
  0x9e   : > { %1048 = vmatmul.bf16.gmra.mxu3 %v1454_v6  ;;  %1097 = vmatmul.bf16.gmra.mxu0 %v1458_v7 }
  0xa9   : > { %v2147_v18 = vpop.f32.mrf.mxu1 }
  0xab   : > { %v877_v21 = vpop.f32.mrf.mxu0 }
  0xac   : > { %955 = vmatmul.bf16.gmra.mxu1 %v1466_v16  ;;  %1004 = vmatmul.bf16.gmra.mxu2 %v1470_v17  ;;  %v878_v59 = vadd.f32 %v2152_v22, %v877_v21 }
  0xae   : > { %1053 = vmatmul.bf16.gmra.mxu3 %v1474_v19  ;;  %1102 = vmatmul.bf16.gmra.mxu0 %v1478_v20 }
  0xaf   : > { %v897_v23 = vpop.f32.mrf.mxu2 }
  0xb0   : > { %v2155_v24 = vadd.f32 %v2152_v22, %v897_v23 }
  0xb1   : > { %v907_v25 = vpop.f32.mrf.mxu3  ;;  %v2160_v27 = vpop.f32.mrf.mxu1 }
  0xb2   : > { %v2158_v26 = vadd.f32 %v2152_v22, %v907_v25 }
  0xb3   : > { %v879_v28 = vpop.f32.mrf.mxu0 }
  0xb4   : > { %v880_v2 = vadd.f32 %v2152_v22, %v879_v28 }
  0xb7   : > { %v899_v37 = vpop.f32.mrf.mxu2 }
  0xb8   : > { %v2171_v38 = vadd.f32 %v2152_v22, %v899_v37 }
  0xb9   : > { %v909_v39 = vpop.f32.mrf.mxu3  ;;  %v2176_v43 = vpop.f32.mrf.mxu1 }
  0xba   : > { %v2174_v42 = vadd.f32 %v2152_v22, %v909_v39 }
  0xbb   : > { %v882_v46 = vpop.f32.mrf.mxu0 }
  0xbc   : > { %960 = vmatmul.bf16.gmra.mxu1 %v1486_v40  ;;  %1009 = vmatmul.bf16.gmra.mxu2 %v1490_v41  ;;  %v883_v15 = vadd.f32 %v2152_v22, %v882_v46  ;;  %v1747_v40 = vunpack.c.l.bf16 %v1813_v35 }
  0xbe   : > { %1058 = vmatmul.bf16.gmra.mxu3 %v1494_v44  ;;  %1107 = vmatmul.bf16.gmra.mxu0 %v1498_v45 }
  0xbf   : > { %v902_v47 = vpop.f32.mrf.mxu2 }
  0xc0   : > { %v2179_v48 = vadd.f32 %v2152_v22, %v902_v47  ;;  %v1748_v47 = vunpack.c.h.bf16 %v1813_v35 }
  0xc1   : > { %v912_v49 = vpop.f32.mrf.mxu3  ;;  %v2184_v51 = vpop.f32.mrf.mxu1 }
  0xc2   : > { %v2182_v50 = vadd.f32 %v2152_v22, %v912_v49 }
  0xc3   : > { %v884_v52 = vpop.f32.mrf.mxu0 }
  0xc4   : > { %v885_v33 = vadd.f32 %v2152_v22, %v884_v52 }
  0xc7   : > { %v904_v53 = vpop.f32.mrf.mxu2 }
  0xc8   : > { %v2187_v54 = vadd.f32 %v2152_v22, %v904_v53  ;;  %v888_v53 = vadd.f32 %v2152_v22, %v2147_v18 }
  0xc9   : > { %v914_v55 = vpop.f32.mrf.mxu3  ;;  %v926_v57 = vpop.f32.mrf.mxu1 }
  0xca   : > { %v2190_v56 = vadd.f32 %v2152_v22, %v914_v55  ;;  %v927_v60 = vadd.f32 %v926_v57, %v878_v59 }
  0xcb   : > { %v1073_v58 = vpop.f32.mrf.mxu0 }
  0xcf   : > { %v975_v61 = vpop.f32.mrf.mxu2 }
  0xd0   : > { %v976_v62 = vadd.f32 %v975_v61, %v927_v60 }
  0xd1   : > { %v1024_v63 = vpop.f32.mrf.mxu3  ;;  %v928_v0 = vpop.f32.mrf.mxu1 }
  0xd2   : > { %v1025_v3 = vadd.f32 %v1024_v63, %v976_v62  ;;  %v929_v5 = vadd.f32 %v928_v0, %v880_v2 }
  0xd3   : > { %v1075_v1 = vpop.f32.mrf.mxu0 }
  0xd4   : > { %v1074_v7 = vadd.f32 %v1073_v58, %v1025_v3  ;;  %v890_v3 = vadd.f32 %v2152_v22, %v2160_v27 }
  0xd6   : > { %v1145_v16 = vadd.f32 %v1743_v8, %v1074_v7 }
  0xd7   : > { %v977_v6 = vpop.f32.mrf.mxu2 }
  0xd8   : > { %v978_v9 = vadd.f32 %v977_v6, %v929_v5  ;;  %v1161_v23 = vmax.f32 %v1145_v16, 0.0  ;;  %v1814_v5 = vld [vmem:[%s2199_s22 + $0x10] sm:$0xff]  }
  0xd9   : > { %v1026_v10 = vpop.f32.mrf.mxu3  ;;  %v931_v11 = vpop.f32.mrf.mxu1  ;;  %v1751_v8 = vunpack.c.l.bf16 %v1814_v5 }
  0xda   : > { %v1027_v12 = vadd.f32 %v1026_v10, %v978_v9  ;;  %v932_v20 = vadd.f32 %v931_v11, %v883_v15  ;;  %v893_v15 = vadd.f32 %v2152_v22, %v2176_v43 }
  0xdb   : > { %v1078_v14 = vpop.f32.mrf.mxu0 }
  0xdc   : > { %v1076_v17 = vadd.f32 %v1075_v1, %v1027_v12 }
  0xde   : > { %v1146_v19 = vadd.f32 %v1744_v13, %v1076_v17  ;;  %v1752_v13 = vunpack.c.h.bf16 %v1814_v5 }
  0xdf   : > { %v980_v21 = vpop.f32.mrf.mxu2 }
  0xe0   : > { %v1162_v25 = vmax.f32 %v1146_v19, 0.0  ;;  %v981_v28 = vadd.f32 %v980_v21, %v932_v20 }
  0xe1   : > { %v1029_v29 = vpop.f32.mrf.mxu3  ;;  %v933_v30 = vpop.f32.mrf.mxu1 }
  0xe2   : > { %v1776_v31 = vpack.c.bf16 %v1162_v25, %v1161_v23  ;;  %v1030_v34 = vadd.f32 %v1029_v29, %v981_v28  ;;  %v934_v36 = vadd.f32 %v933_v30, %v885_v33 }
  0xe3   : > { %v1080_v32 = vpop.f32.mrf.mxu0 }
  0xe4   : > { %1777 = vst [vmem:[%s2209_s26] sm:$0xff] %v1776_v31   ;;  %v1079_v39 = vadd.f32 %v1078_v14, %v1030_v34  ;;  %v1815_v34 = vld [vmem:[%s2199_s22 + $0x18] sm:$0xff]  }
  0xe6   : > { %v1147_v55 = vadd.f32 %v1747_v40, %v1079_v39 }
  0xe7   : > { %v982_v37 = vpop.f32.mrf.mxu2 }
  0xe8   : > { %v983_v41 = vadd.f32 %v982_v37, %v934_v36  ;;  %v1163_v60 = vmax.f32 %v1147_v55, 0.0  ;;  %v1755_v37 = vunpack.c.l.bf16 %v1815_v34 }
  0xe9   : > { %v1031_v44 = vpop.f32.mrf.mxu3  ;;  %v936_v45 = vpop.f32.mrf.mxu1 }
  0xea   : > { %v1032_v46 = vadd.f32 %v1031_v44, %v983_v41  ;;  %v937_v58 = vadd.f32 %v936_v45, %v888_v53  ;;  %v1756_v45 = vunpack.c.h.bf16 %v1815_v34 }
  0xeb   : > { %v1083_v49 = vpop.f32.mrf.mxu0 }
  0xec   : > { %v1081_v52 = vadd.f32 %v1080_v32, %v1032_v46  ;;  %v895_v32 = vadd.f32 %v2152_v22, %v2184_v51 }
  0xee   : > { %v1148_v57 = vadd.f32 %v1748_v47, %v1081_v52 }
  0xef   : > { %v985_v59 = vpop.f32.mrf.mxu2 }
  0xf0   : > { %v1164_v61 = vmax.f32 %v1148_v57, 0.0  ;;  %v986_v62 = vadd.f32 %v985_v59, %v937_v58 }
  0xf1   : > { %v1034_v63 = vpop.f32.mrf.mxu3  ;;  %v938_v0 = vpop.f32.mrf.mxu1 }
  0xf2   : > { %v1781_v1 = vpack.c.bf16 %v1164_v61, %v1163_v60  ;;  %v1035_v4 = vadd.f32 %v1034_v63, %v986_v62  ;;  %v939_v18 = vadd.f32 %v938_v0, %v890_v3  ;;  %v1816_v63 = vld [vmem:[%s2199_s22 + $0x20] sm:$0xff]  }
  0xf3   : > { %v1085_v2 = vpop.f32.mrf.mxu0  ;;  %v1759_v3 = vunpack.c.l.bf16 %v1816_v63 }
  0xf4   : > { %1820 = vst [vmem:[%s2209_s26 + $0x8] sm:$0xff] %v1781_v1   ;;  %v1084_v7 = vadd.f32 %v1083_v49, %v1035_v4 }
  0xf6   : > { %v1149_v16 = vadd.f32 %v1751_v8, %v1084_v7 }
  0xf7   : > { %v987_v6 = vpop.f32.mrf.mxu2 }
  0xf8   : > { %v988_v9 = vadd.f32 %v987_v6, %v939_v18  ;;  %v1165_v21 = vmax.f32 %v1149_v16, 0.0  ;;  %v1760_v6 = vunpack.c.h.bf16 %v1816_v63 }
  0xf9   : > { %v1036_v10 = vpop.f32.mrf.mxu3  ;;  %v941_v11 = vpop.f32.mrf.mxu1 }
  0xfa   : > { %v1037_v12 = vadd.f32 %v1036_v10, %v988_v9  ;;  %v942_v19 = vadd.f32 %v941_v11, %v893_v15 }
  0xfb   : > { %v1088_v14 = vpop.f32.mrf.mxu0 }
  0xfc   : > { %v1086_v27 = vadd.f32 %v1085_v2, %v1037_v12 }
  0xfe   : > { %v1150_v17 = vadd.f32 %v1752_v13, %v1086_v27 }
  0xff   : > { %v990_v20 = vpop.f32.mrf.mxu2 }
 0x100   : > { %v1166_v23 = vmax.f32 %v1150_v17, 0.0  ;;  %v991_v25 = vadd.f32 %v990_v20, %v942_v19  ;;  %v1817_v20 = vld [vmem:[%s2199_s22 + $0x28] sm:$0xff]  }
 0x101   : > { %v1039_v28 = vpop.f32.mrf.mxu3  ;;  %v943_v29 = vpop.f32.mrf.mxu1 }
 0x102   : > { %v1786_v30 = vpack.c.bf16 %v1166_v23, %v1165_v21  ;;  %v1040_v33 = vadd.f32 %v1039_v28, %v991_v25  ;;  %v944_v43 = vadd.f32 %v943_v29, %v895_v32  ;;  %v1763_v28 = vunpack.c.l.bf16 %v1817_v20 }
 0x103   : > { %v1090_v31 = vpop.f32.mrf.mxu0  ;;  %v1764_v32 = vunpack.c.h.bf16 %v1817_v20 }
 0x104   : > { %1821 = vst [vmem:[%s2209_s26 + $0x10] sm:$0xff] %v1786_v30   ;;  %v1089_v36 = vadd.f32 %v1088_v14, %v1040_v33 }
 0x106   : > { %v1151_v47 = vadd.f32 %v1755_v37, %v1089_v36 }
 0x107   : > { %v992_v35 = vpop.f32.mrf.mxu2 }
 0x108   : > { %v993_v39 = vadd.f32 %v992_v35, %v944_v43  ;;  %v1167_v55 = vmax.f32 %v1151_v47, 0.0  ;;  %v1818_v47 = vld [vmem:[%s2199_s22 + $0x30] sm:$0xff]  }
 0x109   : > { %v1041_v40 = vpop.f32.mrf.mxu3  ;;  %v946_v41 = vpop.f32.mrf.mxu1 }
 0x10a   : > { %v1042_v44 = vadd.f32 %v1041_v40, %v993_v39  ;;  %v947_v22 = vadd.f32 %v946_v41, %v2155_v24 }
 0x10b   : > { %v1093_v46 = vpop.f32.mrf.mxu0 }
 0x10c   : > { %v1091_v49 = vadd.f32 %v1090_v31, %v1042_v44 }
 0x10e   : > { %v1152_v53 = vadd.f32 %v1756_v45, %v1091_v49 }
 0x10f   : > { %v995_v51 = vpop.f32.mrf.mxu2 }
 0x110   : > { %v1168_v52 = vmax.f32 %v1152_v53, 0.0  ;;  %v996_v57 = vadd.f32 %v995_v51, %v947_v22 }
 0x111   : > { %v1044_v58 = vpop.f32.mrf.mxu3  ;;  %v948_v59 = vpop.f32.mrf.mxu1 }
 0x112   : > { %v1791_v60 = vpack.c.bf16 %v1168_v52, %v1167_v55  ;;  %v1045_v62 = vadd.f32 %v1044_v58, %v996_v57  ;;  %v949_v0 = vadd.f32 %v948_v59, %v2171_v38  ;;  %v1767_v55 = vunpack.c.l.bf16 %v1818_v47 }
 0x113   : > { %v1095_v61 = vpop.f32.mrf.mxu0  ;;  %v1768_v59 = vunpack.c.h.bf16 %v1818_v47 }
 0x114   : > { %1822 = vst [vmem:[%s2209_s26 + $0x18] sm:$0xff] %v1791_v60   ;;  %v1094_v2 = vadd.f32 %v1093_v46, %v1045_v62 }
 0x116   : > { %v1153_v8 = vadd.f32 %v1759_v3, %v1094_v2 }
 0x117   : > { %v997_v1 = vpop.f32.mrf.mxu2 }
 0x118   : > { %v998_v4 = vadd.f32 %v997_v1, %v949_v0  ;;  %v1169_v13 = vmax.f32 %v1153_v8, 0.0 }
 0x119   : > { %v1046_v5 = vpop.f32.mrf.mxu3  ;;  %v951_v18 = vpop.f32.mrf.mxu1 }
 0x11a   : > { %v1047_v24 = vadd.f32 %v1046_v5, %v998_v4  ;;  %v952_v11 = vadd.f32 %v951_v18, %v2179_v48 }
 0x11b   : > { %v1098_v7 = vpop.f32.mrf.mxu0 }
 0x11c   : > { %v1096_v9 = vadd.f32 %v1095_v61, %v1047_v24 }
 0x11e   : > { %v1154_v10 = vadd.f32 %v1760_v6, %v1096_v9  ;;  %v1819_v6 = vld [vmem:[%s2199_s22 + $0x38] sm:$0xff]  }
 0x11f   : > { %v1000_v12 = vpop.f32.mrf.mxu2 }
 0x120   : > { %v1170_v14 = vmax.f32 %v1154_v10, 0.0  ;;  %v1001_v38 = vadd.f32 %v1000_v12, %v952_v11  ;;  %v1771_v10 = vunpack.c.l.bf16 %v1819_v6 }
 0x121   : > { %v1049_v15 = vpop.f32.mrf.mxu3  ;;  %v953_v16 = vpop.f32.mrf.mxu1 }
 0x122   : > { %v1796_v27 = vpack.c.bf16 %v1170_v14, %v1169_v13  ;;  %v1050_v19 = vadd.f32 %v1049_v15, %v1001_v38  ;;  %v954_v21 = vadd.f32 %v953_v16, %v2187_v54  ;;  %v1772_v13 = vunpack.c.h.bf16 %v1819_v6 }
 0x123   : > { %v1100_v17 = vpop.f32.mrf.mxu0 }
 0x124   : > { %1823 = vst [vmem:[%s2209_s26 + $0x20] sm:$0xff] %v1796_v27   ;;  %v1099_v25 = vadd.f32 %v1098_v7, %v1050_v19 }
 0x126   : > { %v1155_v33 = vadd.f32 %v1763_v28, %v1099_v25 }
 0x127   : > { %v1002_v23 = vpop.f32.mrf.mxu2 }
 0x128   : > { %v1003_v29 = vadd.f32 %v1002_v23, %v954_v21  ;;  %v1171_v39 = vmax.f32 %v1155_v33, 0.0 }
 0x129   : > { %v1051_v30 = vpop.f32.mrf.mxu3  ;;  %v956_v48 = vpop.f32.mrf.mxu1 }
 0x12a   : > { %v1052_v31 = vadd.f32 %v1051_v30, %v1003_v29  ;;  %v957_v36 = vadd.f32 %v956_v48, %v2158_v26 }
 0x12b   : > { %v1103_v43 = vpop.f32.mrf.mxu0 }
 0x12c   : > { %v1101_v34 = vadd.f32 %v1100_v17, %v1052_v31 }
 0x12e   : > { %v1156_v35 = vadd.f32 %v1764_v32, %v1101_v34 }
 0x12f   : > { %v1005_v37 = vpop.f32.mrf.mxu2 }
 0x130   : > { %v1172_v40 = vmax.f32 %v1156_v35, 0.0  ;;  %v1006_v54 = vadd.f32 %v1005_v37, %v957_v36 }
 0x131   : > { %v1054_v41 = vpop.f32.mrf.mxu3  ;;  %v958_v44 = vpop.f32.mrf.mxu1 }
 0x132   : > { %v1801_v45 = vpack.c.bf16 %v1172_v40, %v1171_v39  ;;  %v1055_v46 = vadd.f32 %v1054_v41, %v1006_v54  ;;  %v959_v49 = vadd.f32 %v958_v44, %v2174_v42 }
 0x133   : > { %v1105_v53 = vpop.f32.mrf.mxu0 }
 0x134   : > { %1824 = vst [vmem:[%s2209_s26 + $0x28] sm:$0xff] %v1801_v45   ;;  %v1104_v51 = vadd.f32 %v1103_v43, %v1055_v46 }
 0x136   : > { %v1157_v60 = vadd.f32 %v1767_v55, %v1104_v51 }
 0x137   : > { %v1007_v22 = vpop.f32.mrf.mxu2 }
 0x138   : > { %v1008_v52 = vadd.f32 %v1007_v22, %v959_v49  ;;  %v1173_v1 = vmax.f32 %v1157_v60, 0.0 }
 0x139   : > { %v1056_v57 = vpop.f32.mrf.mxu3  ;;  %v961_v26 = vpop.f32.mrf.mxu1 }
 0x13a   : > { %v1057_v58 = vadd.f32 %v1056_v57, %v1008_v52  ;;  %v962_v63 = vadd.f32 %v961_v26, %v2182_v50 }
 0x13b   : > { %v1108_v4 = vpop.f32.mrf.mxu0 }
 0x13c   : > { %v1106_v61 = vadd.f32 %v1105_v53, %v1057_v58 }
 0x13e   : > { %v1158_v62 = vadd.f32 %v1768_v59, %v1106_v61 }
 0x13f   : > { %v1010_v0 = vpop.f32.mrf.mxu2 }
 0x140   : > { %v1174_v2 = vmax.f32 %v1158_v62, 0.0  ;;  %v1011_v42 = vadd.f32 %v1010_v0, %v962_v63 }
 0x141   : > { %v1059_v3 = vpop.f32.mrf.mxu3  ;;  %v963_v18 = vpop.f32.mrf.mxu1 }
 0x142   : > { %v1806_v5 = vpack.c.bf16 %v1174_v2, %v1173_v1  ;;  %v1060_v24 = vadd.f32 %v1059_v3, %v1011_v42  ;;  %v964_v7 = vadd.f32 %v963_v18, %v2190_v56 }
 0x143   : > { %v1110_v14 = vpop.f32.mrf.mxu0 }
 0x144   : > { %1825 = vst [vmem:[%s2209_s26 + $0x30] sm:$0xff] %v1806_v5   ;;  %v1109_v9 = vadd.f32 %v1108_v4, %v1060_v24 }
 0x146   : > { %v1159_v38 = vadd.f32 %v1771_v10, %v1109_v9 }
 0x147   : > { %v1012_v8 = vpop.f32.mrf.mxu2 }
 0x148   : > { %v1013_v11 = vadd.f32 %v1012_v8, %v964_v7  ;;  %v1175_v27 = vmax.f32 %v1159_v38, 0.0 }
 0x149   : > { %v1061_v12 = vpop.f32.mrf.mxu3 }
 0x14a   : > { %v1062_v50 = vadd.f32 %v1061_v12, %v1013_v11 }
 0x14c   : > { %v1111_v15 = vadd.f32 %v1110_v14, %v1062_v50 }
 0x14e   : > { %v1160_v16 = vadd.f32 %v1772_v13, %v1111_v15 }
 0x150   : > { %v1176_v17 = vmax.f32 %v1160_v16, 0.0 }
 0x152   : > { %v1811_v19 = vpack.c.bf16 %v1176_v17, %v1175_v27 }
 0x154   : > { %1826 = vst [vmem:[%s2209_s26 + $0x38] sm:$0xff] %v1811_v19  }
 0x155 PF: > { %s14_s17 = sadd.s32 1, %s1899_s17   ;;  %s2257_s15 = smov %s1895_s16 }
 0x156   : > { %p11_p5 = scmp.ge.s32.totalorder %s14_s17, 4   ;;  %s2258_s16 = smov %s2260_s18 }
 0x158   :  { %13 = sbr.rel (!%p11_p5) target bundleno = 2 (0x2), region = 75 }

// kernel: _lambda_.30
= control target key start
LH: loop header
LB: loop body
LE: loop exit
PB: predicated region body
PF: predicated region fallthrough
CT: control target
= control target key end

     0   :  { %s1177_s12 = smov 0   ;;  %s1179_s13 = smov 0   ;;  %s1362_s0 = inlined_call_operand.vmem [shape: bf16[64,640], index: 0, kind: input, shape index: {}]   ;;  %s1363_s1 = inlined_call_operand.vmem [shape: bf16[640,128], index: 1, kind: input, shape index: {}]   ;;  %s1364_s2 = inlined_call_operand.vmem [shape: f32[1,128], index: 2, kind: input, shape index: {}]   ;;  %s1365_s3 = inlined_call_operand.vmem [shape: bf16[64,128], index: 3, kind: output, shape index: {}]  }
   0x1   :  { %s1181_s14 = smov 0  }
   0x2 LB: > { %s22_s15 = sadd.s32 1, %s1151_s13  ;;  %p831_p0 = scmp.ge.s32.totalorder %s1155_s14, 1  ;;  %s1155_s14 = sphi %s1181_s14, %s13_s14   ;;  %s1151_s13 = sphi %s1179_s13, %s1367_s13   ;;  %s1147_s12 = sphi %s1177_s12, %s1366_s12  }
   0x3   : > { %p23_p1 = scmp.ge.s32.totalorder %s22_s15, 2  ;;  %p170_p2 = scmp.lt.s32.totalorder %s1155_s14, 3 }
   0x5   : > { %s1369_s15 = smov (%p23_p1, %s22_s15), 0  ;;  %p171_p3 = pnand %p831_p0, %p170_p2 }
   0x6   : > { %s832_s17 = sshll.u32 (!%p171_p3), %s1147_s12, 2 }
   0x7   : > { %174 = sbr.rel (%p171_p3) target bundleno = 218 (0xda), region = 32  ;;  %p206_p4 = scmp.lt.s32.totalorder (!%p171_p3), %s832_s17, 7 }
   0xc   : > { %v1055_v0 = vld [vmem:[%s1363_s1 + $0x38] sm:$0xff]  ;;  %v1054_v4 = vld [vmem:[%s1363_s1 + $0x30] sm:$0xff]  ;;  %v1053_v8 = vld [vmem:[%s1363_s1 + $0x28] sm:$0xff]  ;;  %s1371_s17 = smov (!%p206_p4, %s832_s17), 7 }
   0xd   : > { %v1063_v1 = vld [vmem:[%s1363_s1 + $0x78] sm:$0xff]  ;;  %616 = vmatpush.bf16.msra.mxu0 %v1055_v0  ;;  %v1062_v5 = vld [vmem:[%s1363_s1 + $0x70] sm:$0xff]  ;;  %v1061_v9 = vld [vmem:[%s1363_s1 + $0x68] sm:$0xff]  ;;  %s1107_s10 = smul.u32 20, %s1371_s17 }
   0xe   : > { %v1071_v2 = vld [vmem:[%s1363_s1 + $0xb8] sm:$0xff]  ;;  %635 = vmatpush.bf16.msra.mxu1 %v1063_v1  ;;  %v1070_v6 = vld [vmem:[%s1363_s1 + $0xb0] sm:$0xff]  ;;  %v1069_v10 = vld [vmem:[%s1363_s1 + $0xa8] sm:$0xff] }
   0xf   : > { %v1079_v3 = vld [vmem:[%s1363_s1 + $0xf8] sm:$0xff]  ;;  %654 = vmatpush.bf16.msra.mxu2 %v1071_v2  ;;  %v1078_v7 = vld [vmem:[%s1363_s1 + $0xf0] sm:$0xff]  ;;  %v1077_v11 = vld [vmem:[%s1363_s1 + $0xe8] sm:$0xff]  ;;  %s1282_s12 = scalar_lea.vmem %s1362_s0, %s1107_s10 }
  0x10   : > { %673 = vmatpush.bf16.msra.mxu3 %v1079_v3  ;;  %v1052_v12 = vld [vmem:[%s1363_s1 + $0x20] sm:$0xff]  ;;  %v1051_v16 = vld [vmem:[%s1363_s1 + $0x18] sm:$0xff]  ;;  %v1050_v20 = vld [vmem:[%s1363_s1 + $0x10] sm:$0xff] }
  0x11   : > { %617 = vmatpush.bf16.msra.mxu0 %v1054_v4  ;;  %v1060_v13 = vld [vmem:[%s1363_s1 + $0x60] sm:$0xff]  ;;  %v1059_v17 = vld [vmem:[%s1363_s1 + $0x58] sm:$0xff]  ;;  %v1058_v21 = vld [vmem:[%s1363_s1 + $0x50] sm:$0xff] }
  0x12   : > { %636 = vmatpush.bf16.msra.mxu1 %v1062_v5  ;;  %v1068_v14 = vld [vmem:[%s1363_s1 + $0xa0] sm:$0xff]  ;;  %v1067_v18 = vld [vmem:[%s1363_s1 + $0x98] sm:$0xff]  ;;  %v1066_v22 = vld [vmem:[%s1363_s1 + $0x90] sm:$0xff] }
  0x13   : > { %655 = vmatpush.bf16.msra.mxu2 %v1070_v6  ;;  %v1076_v15 = vld [vmem:[%s1363_s1 + $0xe0] sm:$0xff]  ;;  %v1075_v19 = vld [vmem:[%s1363_s1 + $0xd8] sm:$0xff]  ;;  %v1074_v23 = vld [vmem:[%s1363_s1 + $0xd0] sm:$0xff] }
  0x14   : > { %674 = vmatpush.bf16.msra.mxu3 %v1078_v7  ;;  %v1049_v24 = vld [vmem:[%s1363_s1 + $0x8] sm:$0xff]  ;;  %v1048_v28 = vld [vmem:[%s1363_s1] sm:$0xff]  ;;  %v1040_v33 = vld [vmem:[%s1282_s12 + $0x10] sm:$0xf0] }
  0x15   : > { %618 = vmatpush.bf16.msra.mxu0 %v1053_v8  ;;  %v1057_v25 = vld [vmem:[%s1363_s1 + $0x48] sm:$0xff]  ;;  %v1056_v29 = vld [vmem:[%s1363_s1 + $0x40] sm:$0xff]  ;;  %v840_v35 = vld [vmem:[%s1282_s12 + $0x14] sm:$0xf0] }
  0x16   : > { %637 = vmatpush.bf16.msra.mxu1 %v1061_v9  ;;  %v1065_v26 = vld [vmem:[%s1363_s1 + $0x88] sm:$0xff]  ;;  %v1064_v30 = vld [vmem:[%s1363_s1 + $0x80] sm:$0xff]  ;;  %v1041_v37 = vld [vmem:[%s1282_s12 + $0x18] sm:$0xf0] }
  0x17   : > { %656 = vmatpush.bf16.msra.mxu2 %v1069_v10  ;;  %v1073_v27 = vld [vmem:[%s1363_s1 + $0xc8] sm:$0xff]  ;;  %v1072_v31 = vld [vmem:[%s1363_s1 + $0xc0] sm:$0xff]  ;;  %v1087_v40 = vld [vmem:[%s1363_s1 + $0x138] sm:$0xff] }
  0x18   : > { %675 = vmatpush.bf16.msra.mxu3 %v1077_v11  ;;  %v838_v32 = vld [vmem:[%s1282_s12] sm:$0xf]  ;;  %v1038_v34 = vld [vmem:[%s1282_s12 + $0x4] sm:$0xf]  ;;  %v846_v36 = vld [vmem:[%s1282_s12 + $0x8] sm:$0xf] }
  0x19   : > { %619 = vmatpush.bf16.msra.mxu0 %v1052_v12  ;;  %v1039_v38 = vld [vmem:[%s1282_s12 + $0xc] sm:$0xf]  ;;  %v848_v39 = vld [vmem:[%s1282_s12 + $0x1c] sm:$0xf0]  ;;  %v839_v41 = vor.u32 %v1040_v33, %v838_v32  ;;  %v843_v42 = vor.u32 %v1038_v34, %v840_v35  ;;  %v847_v43 = vor.u32 %v1041_v37, %v846_v36  ;;  %v1086_v45 = vld [vmem:[%s1363_s1 + $0x130] sm:$0xff] }
  0x1a   : > { %638 = vmatpush.bf16.msra.mxu1 %v1060_v13  ;;  %v851_v44 = vor.u32 %v1039_v38, %v848_v39  ;;  %v1085_v46 = vld [vmem:[%s1363_s1 + $0x128] sm:$0xff]  ;;  %v1084_v47 = vld [vmem:[%s1363_s1 + $0x120] sm:$0xff]  ;;  %v1045_v49 = vld [vmem:[%s1282_s12 + $0x38] sm:$0xf0] }
  0x1b   : > { %657 = vmatpush.bf16.msra.mxu2 %v1068_v14  ;;  %v858_v48 = vld [vmem:[%s1282_s12 + $0x28] sm:$0xf]  ;;  %v1043_v50 = vld [vmem:[%s1282_s12 + $0x2c] sm:$0xf]  ;;  %v860_v51 = vld [vmem:[%s1282_s12 + $0x3c] sm:$0xf0] }
  0x1c   : > { %676 = vmatpush.bf16.msra.mxu3 %v1076_v15  ;;  %v866_v52 = vld [vmem:[%s1282_s12 + $0x30] sm:$0xf]  ;;  %v1046_v53 = vld [vmem:[%s1282_s12 + $0x40] sm:$0xf0]  ;;  %v1044_v54 = vld [vmem:[%s1282_s12 + $0x34] sm:$0xf]  ;;  %v859_v57 = vor.u32 %v1045_v49, %v858_v48  ;;  %v863_v58 = vor.u32 %v1043_v50, %v860_v51 }
  0x1d   : > { %620 = vmatpush.bf16.msra.mxu0 %v1051_v16  ;;  %v868_v55 = vld [vmem:[%s1282_s12 + $0x44] sm:$0xf0]  ;;  %v1083_v56 = vld [vmem:[%s1363_s1 + $0x118] sm:$0xff]  ;;  %v867_v59 = vor.u32 %v1046_v53, %v866_v52  ;;  %v1082_v61 = vld [vmem:[%s1363_s1 + $0x110] sm:$0xff] }
  0x1e   : > { %639 = vmatpush.bf16.msra.mxu1 %v1059_v17  ;;  %v871_v60 = vor.u32 %v1044_v54, %v868_v55  ;;  %v1081_v62 = vld [vmem:[%s1363_s1 + $0x108] sm:$0xff]  ;;  %v1080_v63 = vld [vmem:[%s1363_s1 + $0x100] sm:$0xff]  ;;  %v854_v0 = vld [vmem:[%s1282_s12 + $0x10] sm:$0xf] }
  0x1f   : > { %658 = vmatpush.bf16.msra.mxu2 %v1067_v18  ;;  %v1042_v1 = vld [vmem:[%s1282_s12 + $0x20] sm:$0xf0]  ;;  %v874_v2 = vld [vmem:[%s1282_s12 + $0x38] sm:$0xf]  ;;  %v1047_v3 = vld [vmem:[%s1282_s12 + $0x48] sm:$0xf0] }
  0x20   : > { %677 = vmatpush.bf16.msra.mxu3 %v1075_v19  ;;  %v855_v4 = vor.u32 %v1042_v1, %v854_v0  ;;  %v875_v5 = vor.u32 %v1047_v3, %v874_v2  ;;  %v1132_v16 = vld [vmem:[%s1364_s2] ss:$0 sm:$0xff]  ;;  %s835_s12 = sshll.u32 %s1371_s17, 2 }
  0x21   : > { %621 = vmatpush.bf16.msra.mxu0 %v1050_v20  ;;  %s226_s9 = scalar_lea.vmem %s1365_s3, %s835_s12 }
  0x22   : > { %640 = vmatpush.bf16.msra.mxu1 %v1058_v21 }
  0x23   : > { %659 = vmatpush.bf16.msra.mxu2 %v1066_v22 }
  0x24   : > { %678 = vmatpush.bf16.msra.mxu3 %v1074_v23 }
  0x25   : > { %622 = vmatpush.bf16.msra.mxu0 %v1049_v24 }
  0x26   : > { %641 = vmatpush.bf16.msra.mxu1 %v1057_v25 }
  0x27   : > { %660 = vmatpush.bf16.msra.mxu2 %v1065_v26 }
  0x28   : > { %679 = vmatpush.bf16.msra.mxu3 %v1073_v27 }
  0x29   : > { %623 = vmatpush.bf16.msra.mxu0 %v1048_v28 }
  0x2a   : > { %642 = vmatpush.bf16.msra.mxu1 %v1056_v29 }
  0x2b   : > { %661 = vmatpush.bf16.msra.mxu2 %v1064_v30 }
  0x2c   : > { %680 = vmatpush.bf16.msra.mxu3 %v1072_v31  ;;  %624 = vmatmul.bf16.vlgmr.msra.gmra.mxu0 %v839_v41 }
  0x2d   : > { %692 = vmatpush.bf16.msrb.mxu0 %v1087_v40  ;;  %643 = vmatmul.bf16.vlgmr.msra.gmra.mxu1 %v843_v42 }
  0x2e   : > { %1099 = vmatpush.bf16.msrb.mxu1 %v1087_v40  ;;  %662 = vmatmul.bf16.vlgmr.msra.gmra.mxu2 %v847_v43 }
  0x2f   : > { %681 = vmatmul.bf16.vlgmr.msra.gmra.mxu3 %v851_v44 }
  0x31   : > { %693 = vmatpush.bf16.msrb.mxu0 %v1086_v45 }
  0x32   : > { %1100 = vmatpush.bf16.msrb.mxu1 %v1086_v45 }
  0x35   : > { %694 = vmatpush.bf16.msrb.mxu0 %v1085_v46 }
  0x36   : > { %1101 = vmatpush.bf16.msrb.mxu1 %v1085_v46 }
  0x39   : > { %695 = vmatpush.bf16.msrb.mxu0 %v1084_v47 }
  0x3a   : > { %1102 = vmatpush.bf16.msrb.mxu1 %v1084_v47 }
  0x3c   : > { %629 = vmatmul.bf16.gmra.mxu0 %v859_v57 }
  0x3d   : > { %696 = vmatpush.bf16.msrb.mxu0 %v1083_v56  ;;  %648 = vmatmul.bf16.gmra.mxu1 %v863_v58 }
  0x3e   : > { %1103 = vmatpush.bf16.msrb.mxu1 %v1083_v56  ;;  %667 = vmatmul.bf16.gmra.mxu2 %v867_v59 }
  0x3f   : > { %686 = vmatmul.bf16.gmra.mxu3 %v871_v60 }
  0x41   : > { %697 = vmatpush.bf16.msrb.mxu0 %v1082_v61 }
  0x42   : > { %1104 = vmatpush.bf16.msrb.mxu1 %v1082_v61 }
  0x45   : > { %698 = vmatpush.bf16.msrb.mxu0 %v1081_v62 }
  0x46   : > { %1105 = vmatpush.bf16.msrb.mxu1 %v1081_v62 }
  0x49   : > { %699 = vmatpush.bf16.msrb.mxu0 %v1080_v63 }
  0x4a   : > { %1106 = vmatpush.bf16.msrb.mxu1 %v1080_v63 }
  0x4c   : > { %700 = vmatmul.bf16.vlgmr.msrb.gmra.mxu0 %v855_v4 }
  0x4d   : > { %705 = vmatmul.bf16.vlgmr.msrb.gmra.mxu1 %v875_v5 }
  0xa9   : > { %v625_v6 = vpop.f32.mrf.mxu0 }
  0xaa   : > { %v644_v7 = vpop.f32.mrf.mxu1  ;;  %v626_v21 = vadd.f32 %v1132_v16, %v625_v6 }
  0xac   : > { %v645_v25 = vadd.f32 %v644_v7, %v626_v21 }
  0xb1   : > { %v663_v8 = vpop.f32.mrf.mxu2  ;;  %v627_v10 = vpop.f32.mrf.mxu0 }
  0xb2   : > { %v682_v9 = vpop.f32.mrf.mxu3  ;;  %v646_v11 = vpop.f32.mrf.mxu1  ;;  %v628_v23 = vadd.f32 %v1132_v16, %v627_v10  ;;  %v664_v30 = vadd.f32 %v663_v8, %v645_v25 }
  0xb4   : > { %v647_v31 = vadd.f32 %v646_v11, %v628_v23  ;;  %v683_v37 = vadd.f32 %v682_v9, %v664_v30 }
  0xb9   : > { %v665_v12 = vpop.f32.mrf.mxu2  ;;  %v630_v14 = vpop.f32.mrf.mxu0 }
  0xba   : > { %v684_v13 = vpop.f32.mrf.mxu3  ;;  %v649_v15 = vpop.f32.mrf.mxu1  ;;  %v631_v22 = vadd.f32 %v1132_v16, %v630_v14  ;;  %v666_v34 = vadd.f32 %v665_v12, %v647_v31 }
  0xbc   : > { %v650_v26 = vadd.f32 %v649_v15, %v631_v22  ;;  %v685_v39 = vadd.f32 %v684_v13, %v666_v34 }
  0xc1   : > { %v668_v17 = vpop.f32.mrf.mxu2  ;;  %v632_v18 = vpop.f32.mrf.mxu0 }
  0xc2   : > { %v651_v19 = vpop.f32.mrf.mxu1  ;;  %v687_v20 = vpop.f32.mrf.mxu3  ;;  %v633_v24 = vadd.f32 %v1132_v16, %v632_v18  ;;  %v669_v32 = vadd.f32 %v668_v17, %v650_v26 }
  0xc4   : > { %v652_v33 = vadd.f32 %v651_v19, %v633_v24  ;;  %v688_v38 = vadd.f32 %v687_v20, %v669_v32 }
  0xc9   : > { %v670_v27 = vpop.f32.mrf.mxu2  ;;  %v701_v28 = vpop.f32.mrf.mxu0 }
  0xca   : > { %v706_v29 = vpop.f32.mrf.mxu1  ;;  %v671_v35 = vadd.f32 %v670_v27, %v652_v33  ;;  %v689_v36 = vpop.f32.mrf.mxu3  ;;  %v702_v41 = vadd.f32 %v701_v28, %v683_v37 }
  0xcb   : > { %v707_v42 = vadd.f32 %v706_v29, %v688_v38 }
  0xcc   : > { %v690_v40 = vadd.f32 %v689_v36, %v671_v35  ;;  %v711_v47 = vmax.f32 %v702_v41, 0.0 }
  0xcd   : > { %v713_v48 = vmax.f32 %v707_v42, 0.0 }
  0xd1   : > { %v703_v43 = vpop.f32.mrf.mxu0 }
  0xd2   : > { %v708_v44 = vpop.f32.mrf.mxu1  ;;  %v704_v45 = vadd.f32 %v703_v43, %v685_v39 }
  0xd3   : > { %v709_v46 = vadd.f32 %v708_v44, %v690_v40 }
  0xd4   : > { %v712_v49 = vmax.f32 %v704_v45, 0.0 }
  0xd5   : > { %v714_v50 = vmax.f32 %v709_v46, 0.0 }
  0xd6   : > { %v1091_v51 = vpack.c.bf16 %v712_v49, %v711_v47 }
  0xd7   : > { %v1096_v52 = vpack.c.bf16 %v714_v50, %v713_v48 }
  0xd8   : > { %1092 = vst [vmem:[%s226_s9] sm:$0xff] %v1091_v51  }
  0xd9   : > { %1098 = vst [vmem:[%s226_s9 + $0x8] sm:$0xff] %v1096_v52  }
  0xda PF: > { %s13_s14 = sadd.s32 1, %s1155_s14   ;;  %s1366_s12 = smov %s1151_s13 }
  0xdb   : > { %p10_p5 = scmp.ge.s32.totalorder %s13_s14, 4   ;;  %s1367_s13 = smov %s1369_s15 }
  0xdd   :  { %12 = sbr.rel (!%p10_p5) target bundleno = 2 (0x2), region = 68 }

// kernel: _lambda_.31
= control target key start
LH: loop header
LB: loop body
LE: loop exit
PB: predicated region body
PF: predicated region fallthrough
CT: control target
= control target key end

     0   :  { %s589_s12 = smov 0   ;;  %s591_s13 = smov 0   ;;  %s649_s0 = inlined_call_operand.vmem [shape: bf16[64,128], index: 0, kind: input, shape index: {}]   ;;  %s650_s1 = inlined_call_operand.vmem [shape: bf16[128,128], index: 1, kind: input, shape index: {}]   ;;  %s651_s2 = inlined_call_operand.vmem [shape: f32[1,128], index: 2, kind: input, shape index: {}]   ;;  %s652_s3 = inlined_call_operand.vmem [shape: bf16[64,128], index: 3, kind: output, shape index: {}]  }
   0x1   :  { %s593_s14 = smov 0  }
   0x2 LB: > { %s22_s15 = sadd.s32 1, %s563_s13  ;;  %p444_p0 = scmp.ge.s32.totalorder %s567_s14, 1  ;;  %s567_s14 = sphi %s593_s14, %s13_s14   ;;  %s563_s13 = sphi %s591_s13, %s654_s13   ;;  %s559_s12 = sphi %s589_s12, %s653_s12  }
   0x3   : > { %p23_p1 = scmp.ge.s32.totalorder %s22_s15, 2  ;;  %p169_p2 = scmp.lt.s32.totalorder %s567_s14, 3 }
   0x5   : > { %s656_s15 = smov (%p23_p1, %s22_s15), 0  ;;  %p170_p3 = pnand %p444_p0, %p169_p2 }
   0x6   : > { %s445_s24 = sshll.u32 (!%p170_p3), %s559_s12, 2 }
   0x7   : > { %173 = sbr.rel (%p170_p3) target bundleno = 184 (0xb8), region = 32  ;;  %p204_p4 = scmp.lt.s32.totalorder (!%p170_p3), %s445_s24, 7 }
   0xc   : > { %v500_v0 = vld [vmem:[%s650_s1 + $0x38] sm:$0xff]  ;;  %v499_v1 = vld [vmem:[%s650_s1 + $0x30] sm:$0xff]  ;;  %v498_v2 = vld [vmem:[%s650_s1 + $0x28] sm:$0xff]  ;;  %s658_s24 = smov (!%p204_p4, %s445_s24), 7 }
   0xd   : > { %309 = vmatpush.bf16.msra.mxu0 %v500_v0  ;;  %512 = vmatpush.bf16.msra.mxu1 %v500_v0  ;;  %v497_v3 = vld [vmem:[%s650_s1 + $0x20] sm:$0xff]  ;;  %v496_v4 = vld [vmem:[%s650_s1 + $0x18] sm:$0xff]  ;;  %v495_v5 = vld [vmem:[%s650_s1 + $0x10] sm:$0xff]  ;;  %s446_s4 = sshll.u32 %s658_s24, 2 }
   0xe   : > { %v494_v6 = vld [vmem:[%s650_s1 + $0x8] sm:$0xff]  ;;  %v493_v7 = vld [vmem:[%s650_s1] sm:$0xff]  ;;  %s207_s9 = scalar_lea.vmem %s649_s0, %s446_s4  ;;  %s223_s17 = scalar_lea.vmem %s652_s3, %s446_s4 }
   0xf   : > { %v491_v8 = vld [vmem:[%s207_s9] sm:$0xff]  ;;  %v492_v9 = vld [vmem:[%s207_s9 + $0x8] sm:$0xff] }
  0x10   : > { %v544_v12 = vld [vmem:[%s651_s2] ss:$0 sm:$0xff] }
  0x11   : > { %310 = vmatpush.bf16.msra.mxu0 %v499_v1  ;;  %513 = vmatpush.bf16.msra.mxu1 %v499_v1 }
  0x15   : > { %311 = vmatpush.bf16.msra.mxu0 %v498_v2  ;;  %514 = vmatpush.bf16.msra.mxu1 %v498_v2 }
  0x19   : > { %312 = vmatpush.bf16.msra.mxu0 %v497_v3  ;;  %515 = vmatpush.bf16.msra.mxu1 %v497_v3 }
  0x1d   : > { %313 = vmatpush.bf16.msra.mxu0 %v496_v4  ;;  %516 = vmatpush.bf16.msra.mxu1 %v496_v4 }
  0x21   : > { %314 = vmatpush.bf16.msra.mxu0 %v495_v5  ;;  %517 = vmatpush.bf16.msra.mxu1 %v495_v5 }
  0x25   : > { %315 = vmatpush.bf16.msra.mxu0 %v494_v6  ;;  %518 = vmatpush.bf16.msra.mxu1 %v494_v6 }
  0x29   : > { %316 = vmatpush.bf16.msra.mxu0 %v493_v7  ;;  %519 = vmatpush.bf16.msra.mxu1 %v493_v7 }
  0x2c   : > { %317 = vmatmul.bf16.vlgmr.msra.gmra.mxu0 %v491_v8  ;;  %322 = vmatmul.bf16.vlgmr.msra.gmra.mxu1 %v492_v9 }
  0xa9   : > { %v318_v10 = vpop.f32.mrf.mxu0  ;;  %v323_v11 = vpop.f32.mrf.mxu1 }
  0xaa   : > { %v319_v15 = vadd.f32 %v544_v12, %v318_v10  ;;  %v324_v16 = vadd.f32 %v544_v12, %v323_v11 }
  0xb1   : > { %v320_v13 = vpop.f32.mrf.mxu0  ;;  %v325_v14 = vpop.f32.mrf.mxu1 }
  0xb2   : > { %v321_v17 = vadd.f32 %v544_v12, %v320_v13  ;;  %v326_v18 = vadd.f32 %v544_v12, %v325_v14 }
  0xb4   : > { %v504_v19 = vpack.c.bf16 %v321_v17, %v319_v15  ;;  %v509_v20 = vpack.c.bf16 %v326_v18, %v324_v16 }
  0xb6   : > { %505 = vst [vmem:[%s223_s17] sm:$0xff] %v504_v19  }
  0xb7   : > { %511 = vst [vmem:[%s223_s17 + $0x8] sm:$0xff] %v509_v20  }
  0xb8 PF: > { %s13_s14 = sadd.s32 1, %s567_s14   ;;  %s653_s12 = smov %s563_s13 }
  0xb9   : > { %p10_p5 = scmp.ge.s32.totalorder %s13_s14, 4   ;;  %s654_s13 = smov %s656_s15 }
  0xbb   :  { %12 = sbr.rel (!%p10_p5) target bundleno = 2 (0x2), region = 68 }

// kernel: _lambda_.32
= control target key start
LH: loop header
LB: loop body
LE: loop exit
PB: predicated region body
PF: predicated region fallthrough
CT: control target
= control target key end

     0   :  { %s1860_s15 = smov 0   ;;  %s1862_s16 = smov 0   ;;  %s2164_s0 = inlined_call_operand.vmem [shape: bf16[64,1152], index: 0, kind: input, shape index: {}]   ;;  %s2165_s1 = inlined_call_operand.vmem [shape: bf16[1152,128], index: 1, kind: input, shape index: {}]   ;;  %s2166_s2 = inlined_call_operand.vmem [shape: f32[1,128], index: 2, kind: input, shape index: {}]   ;;  %s2167_s3 = inlined_call_operand.vmem [shape: bf16[64,128], index: 3, kind: input, shape index: {}]   ;;  %s2168_s4 = inlined_call_operand.vmem [shape: bf16[64,128], index: 4, kind: output, shape index: {}]  }
   0x1   :  { %s1864_s17 = smov 0  }
   0x2 LB: > { %s23_s18 = sadd.s32 1, %s1829_s16  ;;  %p1298_p0 = scmp.ge.s32.totalorder %s1833_s17, 1  ;;  %s1833_s17 = sphi %s1864_s17, %s14_s17   ;;  %s1829_s16 = sphi %s1862_s16, %s2170_s16   ;;  %s1825_s15 = sphi %s1860_s15, %s2169_s15  }
   0x3   : > { %p24_p1 = scmp.ge.s32.totalorder %s23_s18, 2  ;;  %p211_p2 = scmp.lt.s32.totalorder %s1833_s17, 3 }
   0x5   : > { %s2172_s18 = smov (%p24_p1, %s23_s18), 0  ;;  %p212_p3 = pnand %p1298_p0, %p211_p2 }
   0x6   : > { %s1299_s21 = sshll.u32 (!%p212_p3), %s1825_s15, 2 }
   0x7   : > { %215 = sbr.rel (%p212_p3) target bundleno = 252 (0xfc), region = 36  ;;  %p257_p4 = scmp.lt.s32.totalorder (!%p212_p3), %s1299_s21, 7 }
   0xc   : > { %v1692_v0 = vld [vmem:[%s2165_s1 + $0x38] sm:$0xff]  ;;  %v1691_v4 = vld [vmem:[%s2165_s1 + $0x30] sm:$0xff]  ;;  %v1690_v8 = vld [vmem:[%s2165_s1 + $0x28] sm:$0xff]  ;;  %s2174_s21 = smov (!%p257_p4, %s1299_s21), 7 }
   0xd   : > { %v1700_v1 = vld [vmem:[%s2165_s1 + $0x78] sm:$0xff]  ;;  %980 = vmatpush.bf16.msra.mxu0 %v1692_v0  ;;  %v1699_v5 = vld [vmem:[%s2165_s1 + $0x70] sm:$0xff]  ;;  %v1698_v9 = vld [vmem:[%s2165_s1 + $0x68] sm:$0xff]  ;;  %s1785_s19 = smul.u32 36, %s2174_s21  ;;  %s1302_s14 = sshll.u32 %s2174_s21, 2 }
   0xe   : > { %v1708_v2 = vld [vmem:[%s2165_s1 + $0xb8] sm:$0xff]  ;;  %999 = vmatpush.bf16.msra.mxu1 %v1700_v1  ;;  %v1707_v6 = vld [vmem:[%s2165_s1 + $0xb0] sm:$0xff]  ;;  %v1706_v10 = vld [vmem:[%s2165_s1 + $0xa8] sm:$0xff]  ;;  %s277_s22 = scalar_lea.vmem %s2167_s3, %s1302_s14  ;;  %s286_s25 = scalar_lea.vmem %s2168_s4, %s1302_s14 }
   0xf   : > { %v1716_v3 = vld [vmem:[%s2165_s1 + $0xf8] sm:$0xff]  ;;  %1018 = vmatpush.bf16.msra.mxu2 %v1708_v2  ;;  %v1715_v7 = vld [vmem:[%s2165_s1 + $0xf0] sm:$0xff]  ;;  %v1714_v11 = vld [vmem:[%s2165_s1 + $0xe8] sm:$0xff]  ;;  %s1965_s30 = scalar_lea.vmem %s2164_s0, %s1785_s19 }
  0x10   : > { %1037 = vmatpush.bf16.msra.mxu3 %v1716_v3  ;;  %v1689_v12 = vld [vmem:[%s2165_s1 + $0x20] sm:$0xff]  ;;  %v1688_v16 = vld [vmem:[%s2165_s1 + $0x18] sm:$0xff]  ;;  %v1687_v20 = vld [vmem:[%s2165_s1 + $0x10] sm:$0xff] }
  0x11   : > { %981 = vmatpush.bf16.msra.mxu0 %v1691_v4  ;;  %v1697_v13 = vld [vmem:[%s2165_s1 + $0x60] sm:$0xff]  ;;  %v1696_v17 = vld [vmem:[%s2165_s1 + $0x58] sm:$0xff]  ;;  %v1695_v21 = vld [vmem:[%s2165_s1 + $0x50] sm:$0xff] }
  0x12   : > { %1000 = vmatpush.bf16.msra.mxu1 %v1699_v5  ;;  %v1705_v14 = vld [vmem:[%s2165_s1 + $0xa0] sm:$0xff]  ;;  %v1704_v18 = vld [vmem:[%s2165_s1 + $0x98] sm:$0xff]  ;;  %v1703_v22 = vld [vmem:[%s2165_s1 + $0x90] sm:$0xff] }
  0x13   : > { %1019 = vmatpush.bf16.msra.mxu2 %v1707_v6  ;;  %v1713_v15 = vld [vmem:[%s2165_s1 + $0xe0] sm:$0xff]  ;;  %v1712_v19 = vld [vmem:[%s2165_s1 + $0xd8] sm:$0xff]  ;;  %v1711_v23 = vld [vmem:[%s2165_s1 + $0xd0] sm:$0xff] }
  0x14   : > { %1038 = vmatpush.bf16.msra.mxu3 %v1715_v7  ;;  %v1686_v24 = vld [vmem:[%s2165_s1 + $0x8] sm:$0xff]  ;;  %v1685_v28 = vld [vmem:[%s2165_s1] sm:$0xff]  ;;  %v1317_v39 = vld [vmem:[%s1965_s30 + $0x2c] sm:$0xf0] }
  0x15   : > { %982 = vmatpush.bf16.msra.mxu0 %v1690_v8  ;;  %v1694_v25 = vld [vmem:[%s2165_s1 + $0x48] sm:$0xff]  ;;  %v1693_v29 = vld [vmem:[%s2165_s1 + $0x40] sm:$0xff]  ;;  %v1724_v40 = vld [vmem:[%s2165_s1 + $0x138] sm:$0xff] }
  0x16   : > { %1001 = vmatpush.bf16.msra.mxu1 %v1698_v9  ;;  %v1702_v26 = vld [vmem:[%s2165_s1 + $0x88] sm:$0xff]  ;;  %v1701_v30 = vld [vmem:[%s2165_s1 + $0x80] sm:$0xff]  ;;  %v1732_v41 = vld [vmem:[%s2165_s1 + $0x178] sm:$0xff] }
  0x17   : > { %1020 = vmatpush.bf16.msra.mxu2 %v1706_v10  ;;  %v1710_v27 = vld [vmem:[%s2165_s1 + $0xc8] sm:$0xff]  ;;  %v1709_v31 = vld [vmem:[%s2165_s1 + $0xc0] sm:$0xff]  ;;  %v1740_v46 = vld [vmem:[%s2165_s1 + $0x1b8] sm:$0xff] }
  0x18   : > { %1039 = vmatpush.bf16.msra.mxu3 %v1714_v11  ;;  %v1307_v32 = vld [vmem:[%s1965_s30] sm:$0xf]  ;;  %v1671_v33 = vld [vmem:[%s1965_s30 + $0x20] sm:$0xf0]  ;;  %v1309_v35 = vld [vmem:[%s1965_s30 + $0x24] sm:$0xf0] }
  0x19   : > { %983 = vmatpush.bf16.msra.mxu0 %v1689_v12  ;;  %v1667_v34 = vld [vmem:[%s1965_s30 + $0x4] sm:$0xf]  ;;  %v1315_v36 = vld [vmem:[%s1965_s30 + $0x8] sm:$0xf]  ;;  %v1672_v37 = vld [vmem:[%s1965_s30 + $0x28] sm:$0xf0]  ;;  %v1308_v42 = vor.u32 %v1671_v33, %v1307_v32 }
  0x1a   : > { %1002 = vmatpush.bf16.msra.mxu1 %v1697_v13  ;;  %v1668_v38 = vld [vmem:[%s1965_s30 + $0xc] sm:$0xf]  ;;  %v1312_v43 = vor.u32 %v1667_v34, %v1309_v35  ;;  %v1316_v44 = vor.u32 %v1672_v37, %v1315_v36  ;;  %v1748_v47 = vld [vmem:[%s2165_s1 + $0x1f8] sm:$0xff]  ;;  %v1723_v48 = vld [vmem:[%s2165_s1 + $0x130] sm:$0xff] }
  0x1b   : > { %1021 = vmatpush.bf16.msra.mxu2 %v1705_v14  ;;  %v1320_v45 = vor.u32 %v1668_v38, %v1317_v39  ;;  %v1731_v49 = vld [vmem:[%s2165_s1 + $0x170] sm:$0xff]  ;;  %v1722_v52 = vld [vmem:[%s2165_s1 + $0x128] sm:$0xff]  ;;  %v1721_v56 = vld [vmem:[%s2165_s1 + $0x120] sm:$0xff] }
  0x1c   : > { %1040 = vmatpush.bf16.msra.mxu3 %v1713_v15  ;;  %v1739_v50 = vld [vmem:[%s2165_s1 + $0x1b0] sm:$0xff]  ;;  %v1730_v53 = vld [vmem:[%s2165_s1 + $0x168] sm:$0xff]  ;;  %v1729_v57 = vld [vmem:[%s2165_s1 + $0x160] sm:$0xff] }
  0x1d   : > { %984 = vmatpush.bf16.msra.mxu0 %v1688_v16  ;;  %v1747_v51 = vld [vmem:[%s2165_s1 + $0x1f0] sm:$0xff]  ;;  %v1738_v54 = vld [vmem:[%s2165_s1 + $0x1a8] sm:$0xff]  ;;  %v1737_v58 = vld [vmem:[%s2165_s1 + $0x1a0] sm:$0xff] }
  0x1e   : > { %1003 = vmatpush.bf16.msra.mxu1 %v1696_v17  ;;  %v1746_v55 = vld [vmem:[%s2165_s1 + $0x1e8] sm:$0xff]  ;;  %v1745_v59 = vld [vmem:[%s2165_s1 + $0x1e0] sm:$0xff]  ;;  %v1345_v63 = vld [vmem:[%s1965_s30 + $0x6c] sm:$0xf0] }
  0x1f   : > { %1022 = vmatpush.bf16.msra.mxu2 %v1704_v18  ;;  %v1343_v60 = vld [vmem:[%s1965_s30 + $0x48] sm:$0xf]  ;;  %v1680_v61 = vld [vmem:[%s1965_s30 + $0x68] sm:$0xf0]  ;;  %v1351_v0 = vld [vmem:[%s1965_s30 + $0x50] sm:$0xf] }
  0x20   : > { %1041 = vmatpush.bf16.msra.mxu3 %v1712_v19  ;;  %v1676_v62 = vld [vmem:[%s1965_s30 + $0x4c] sm:$0xf]  ;;  %v1681_v1 = vld [vmem:[%s1965_s30 + $0x70] sm:$0xf0]  ;;  %v1353_v3 = vld [vmem:[%s1965_s30 + $0x74] sm:$0xf0]  ;;  %v1344_v6 = vor.u32 %v1680_v61, %v1343_v60 }
  0x21   : > { %985 = vmatpush.bf16.msra.mxu0 %v1687_v20  ;;  %v1677_v2 = vld [vmem:[%s1965_s30 + $0x54] sm:$0xf]  ;;  %v1720_v4 = vld [vmem:[%s2165_s1 + $0x118] sm:$0xff]  ;;  %v1348_v7 = vor.u32 %v1676_v62, %v1345_v63  ;;  %v1352_v8 = vor.u32 %v1681_v1, %v1351_v0  ;;  %v1718_v16 = vld [vmem:[%s2165_s1 + $0x108] sm:$0xff] }
  0x22   : > { %1004 = vmatpush.bf16.msra.mxu1 %v1695_v21  ;;  %v1728_v5 = vld [vmem:[%s2165_s1 + $0x158] sm:$0xff]  ;;  %v1356_v9 = vor.u32 %v1677_v2, %v1353_v3  ;;  %v1719_v12 = vld [vmem:[%s2165_s1 + $0x110] sm:$0xff]  ;;  %v1726_v17 = vld [vmem:[%s2165_s1 + $0x148] sm:$0xff] }
  0x23   : > { %1023 = vmatpush.bf16.msra.mxu2 %v1703_v22  ;;  %v1736_v10 = vld [vmem:[%s2165_s1 + $0x198] sm:$0xff]  ;;  %v1727_v13 = vld [vmem:[%s2165_s1 + $0x150] sm:$0xff]  ;;  %v1734_v18 = vld [vmem:[%s2165_s1 + $0x188] sm:$0xff] }
  0x24   : > { %1042 = vmatpush.bf16.msra.mxu3 %v1711_v23  ;;  %v1744_v11 = vld [vmem:[%s2165_s1 + $0x1d8] sm:$0xff]  ;;  %v1735_v14 = vld [vmem:[%s2165_s1 + $0x190] sm:$0xff]  ;;  %v1742_v19 = vld [vmem:[%s2165_s1 + $0x1c8] sm:$0xff] }
  0x25   : > { %986 = vmatpush.bf16.msra.mxu0 %v1686_v24  ;;  %v1743_v15 = vld [vmem:[%s2165_s1 + $0x1d0] sm:$0xff]  ;;  %v1717_v20 = vld [vmem:[%s2165_s1 + $0x100] sm:$0xff]  ;;  %v1754_v38 = vld [vmem:[%s2165_s1 + $0x228] sm:$0xff] }
  0x26   : > { %1005 = vmatpush.bf16.msra.mxu1 %v1694_v25  ;;  %v1725_v21 = vld [vmem:[%s2165_s1 + $0x140] sm:$0xff]  ;;  %v1323_v24 = vld [vmem:[%s1965_s30 + $0x10] sm:$0xf]  ;;  %v1673_v25 = vld [vmem:[%s1965_s30 + $0x30] sm:$0xf0] }
  0x27   : > { %1024 = vmatpush.bf16.msra.mxu2 %v1702_v26  ;;  %v1733_v22 = vld [vmem:[%s2165_s1 + $0x180] sm:$0xff]  ;;  %v1756_v26 = vld [vmem:[%s2165_s1 + $0x238] sm:$0xff]  ;;  %v1324_v33 = vor.u32 %v1673_v25, %v1323_v24  ;;  %v1755_v37 = vld [vmem:[%s2165_s1 + $0x230] sm:$0xff] }
  0x28   : > { %1043 = vmatpush.bf16.msra.mxu3 %v1710_v27  ;;  %v1741_v23 = vld [vmem:[%s2165_s1 + $0x1c0] sm:$0xff]  ;;  %v1669_v27 = vld [vmem:[%s1965_s30 + $0x14] sm:$0xf] }
  0x29   : > { %987 = vmatpush.bf16.msra.mxu0 %v1685_v28  ;;  %v1325_v28 = vld [vmem:[%s1965_s30 + $0x34] sm:$0xf0]  ;;  %v1333_v32 = vld [vmem:[%s1965_s30 + $0x3c] sm:$0xf0] }
  0x2a   : > { %1006 = vmatpush.bf16.msra.mxu1 %v1693_v29  ;;  %v1331_v29 = vld [vmem:[%s1965_s30 + $0x18] sm:$0xf]  ;;  %v1328_v34 = vor.u32 %v1669_v27, %v1325_v28  ;;  %v1753_v39 = vld [vmem:[%s2165_s1 + $0x220] sm:$0xff] }
  0x2b   : > { %1025 = vmatpush.bf16.msra.mxu2 %v1701_v30  ;;  %v1674_v30 = vld [vmem:[%s1965_s30 + $0x38] sm:$0xf0] }
  0x2c   : > { %1044 = vmatpush.bf16.msra.mxu3 %v1709_v31  ;;  %988 = vmatmul.bf16.vlgmr.msra.gmra.mxu0 %v1308_v42  ;;  %v1670_v31 = vld [vmem:[%s1965_s30 + $0x1c] sm:$0xf]  ;;  %v1332_v35 = vor.u32 %v1674_v30, %v1331_v29 }
  0x2d   : > { %1056 = vmatpush.bf16.msrb.mxu0 %v1724_v40  ;;  %1007 = vmatmul.bf16.vlgmr.msra.gmra.mxu1 %v1312_v43  ;;  %v1336_v36 = vor.u32 %v1670_v31, %v1333_v32  ;;  %v1359_v40 = vld [vmem:[%s1965_s30 + $0x58] sm:$0xf]  ;;  %v1678_v42 = vld [vmem:[%s1965_s30 + $0x5c] sm:$0xf]  ;;  %v1361_v43 = vld [vmem:[%s1965_s30 + $0x7c] sm:$0xf0] }
  0x2e   : > { %1075 = vmatpush.bf16.msrb.mxu1 %v1732_v41  ;;  %1026 = vmatmul.bf16.vlgmr.msra.gmra.mxu2 %v1316_v44  ;;  %v1682_v41 = vld [vmem:[%s1965_s30 + $0x78] sm:$0xf0]  ;;  %v1367_v44 = vld [vmem:[%s1965_s30 + $0x60] sm:$0xf] }
  0x2f   : > { %1045 = vmatmul.bf16.vlgmr.msra.gmra.mxu3 %v1320_v45  ;;  %1094 = vmatpush.bf16.msrb.mxu2 %v1740_v46  ;;  %v1683_v45 = vld [vmem:[%s1965_s30 + $0x80] sm:$0xf0]  ;;  %v1752_v46 = vld [vmem:[%s2165_s1 + $0x218] sm:$0xff] }
  0x30   : > { %1113 = vmatpush.bf16.msrb.mxu3 %v1748_v47  ;;  %v1679_v47 = vld [vmem:[%s1965_s30 + $0x64] sm:$0xf] }
  0x31   : > { %1057 = vmatpush.bf16.msrb.mxu0 %v1723_v48  ;;  %v1369_v48 = vld [vmem:[%s1965_s30 + $0x84] sm:$0xf0] }
  0x32   : > { %1076 = vmatpush.bf16.msrb.mxu1 %v1731_v49  ;;  %v1360_v49 = vor.u32 %v1682_v41, %v1359_v40 }
  0x33   : > { %1095 = vmatpush.bf16.msrb.mxu2 %v1739_v50  ;;  %v1364_v50 = vor.u32 %v1678_v42, %v1361_v43 }
  0x34   : > { %1114 = vmatpush.bf16.msrb.mxu3 %v1747_v51  ;;  %v1368_v51 = vor.u32 %v1683_v45, %v1367_v44 }
  0x35   : > { %1058 = vmatpush.bf16.msrb.mxu0 %v1722_v52  ;;  %v1372_v52 = vor.u32 %v1679_v47, %v1369_v48 }
  0x36   : > { %1077 = vmatpush.bf16.msrb.mxu1 %v1730_v53  ;;  %v1751_v53 = vld [vmem:[%s2165_s1 + $0x210] sm:$0xff] }
  0x37   : > { %1096 = vmatpush.bf16.msrb.mxu2 %v1738_v54  ;;  %v1750_v54 = vld [vmem:[%s2165_s1 + $0x208] sm:$0xff] }
  0x38   : > { %1115 = vmatpush.bf16.msrb.mxu3 %v1746_v55  ;;  %v1749_v55 = vld [vmem:[%s2165_s1 + $0x200] sm:$0xff] }
  0x39   : > { %1059 = vmatpush.bf16.msrb.mxu0 %v1721_v56  ;;  %v1339_v56 = vld [vmem:[%s1965_s30 + $0x20] sm:$0xf] }
  0x3a   : > { %1078 = vmatpush.bf16.msrb.mxu1 %v1729_v57  ;;  %v1675_v57 = vld [vmem:[%s1965_s30 + $0x40] sm:$0xf0] }
  0x3b   : > { %1097 = vmatpush.bf16.msrb.mxu2 %v1737_v58  ;;  %v1375_v58 = vld [vmem:[%s1965_s30 + $0x68] sm:$0xf]  ;;  %v1340_v60 = vor.u32 %v1675_v57, %v1339_v56 }
  0x3c   : > { %1116 = vmatpush.bf16.msrb.mxu3 %v1745_v59  ;;  %993 = vmatmul.bf16.gmra.mxu0 %v1344_v6  ;;  %v1684_v59 = vld [vmem:[%s1965_s30 + $0x88] sm:$0xf0] }
  0x3d   : > { %1060 = vmatpush.bf16.msrb.mxu0 %v1720_v4  ;;  %1012 = vmatmul.bf16.gmra.mxu1 %v1348_v7  ;;  %v1376_v61 = vor.u32 %v1684_v59, %v1375_v58  ;;  %v1758_v58 = vld [vmem:[%s277_s22] sm:$0xff]   ;;  %v1775_v59 = vld [vmem:[%s277_s22 + $0x8] sm:$0xff]  }
  0x3e   : > { %1079 = vmatpush.bf16.msrb.mxu1 %v1728_v5  ;;  %1031 = vmatmul.bf16.gmra.mxu2 %v1352_v8 }
  0x3f   : > { %1050 = vmatmul.bf16.gmra.mxu3 %v1356_v9  ;;  %1098 = vmatpush.bf16.msrb.mxu2 %v1736_v10 }
  0x40   : > { %1117 = vmatpush.bf16.msrb.mxu3 %v1744_v11 }
  0x41   : > { %1061 = vmatpush.bf16.msrb.mxu0 %v1719_v12 }
  0x42   : > { %1080 = vmatpush.bf16.msrb.mxu1 %v1727_v13 }
  0x43   : > { %1099 = vmatpush.bf16.msrb.mxu2 %v1735_v14 }
  0x44   : > { %1118 = vmatpush.bf16.msrb.mxu3 %v1743_v15 }
  0x45   : > { %1062 = vmatpush.bf16.msrb.mxu0 %v1718_v16 }
  0x46   : > { %1081 = vmatpush.bf16.msrb.mxu1 %v1726_v17 }
  0x47   : > { %1100 = vmatpush.bf16.msrb.mxu2 %v1734_v18 }
  0x48   : > { %1119 = vmatpush.bf16.msrb.mxu3 %v1742_v19 }
  0x49   : > { %1063 = vmatpush.bf16.msrb.mxu0 %v1717_v20  ;;  %v1810_v20 = vld [vmem:[%s2166_s2] ss:$0 sm:$0xff] }
  0x4a   : > { %1082 = vmatpush.bf16.msrb.mxu1 %v1725_v21 }
  0x4b   : > { %1101 = vmatpush.bf16.msrb.mxu2 %v1733_v22 }
  0x4c   : > { %1120 = vmatpush.bf16.msrb.mxu3 %v1741_v23  ;;  %1064 = vmatmul.bf16.vlgmr.msrb.gmra.mxu0 %v1324_v33 }
  0x4d   : > { %1132 = vmatpush.bf16.msra.mxu0 %v1756_v26  ;;  %1083 = vmatmul.bf16.vlgmr.msrb.gmra.mxu1 %v1328_v34 }
  0x4e   : > { %1777 = vmatpush.bf16.msra.mxu1 %v1756_v26  ;;  %1102 = vmatmul.bf16.vlgmr.msrb.gmra.mxu2 %v1332_v35 }
  0x4f   : > { %1121 = vmatmul.bf16.vlgmr.msrb.gmra.mxu3 %v1336_v36 }
  0x51   : > { %1133 = vmatpush.bf16.msra.mxu0 %v1755_v37 }
  0x52   : > { %1778 = vmatpush.bf16.msra.mxu1 %v1755_v37 }
  0x55   : > { %1134 = vmatpush.bf16.msra.mxu0 %v1754_v38 }
  0x56   : > { %1779 = vmatpush.bf16.msra.mxu1 %v1754_v38 }
  0x59   : > { %1135 = vmatpush.bf16.msra.mxu0 %v1753_v39 }
  0x5a   : > { %1780 = vmatpush.bf16.msra.mxu1 %v1753_v39 }
  0x5c   : > { %1069 = vmatmul.bf16.gmra.mxu0 %v1360_v49 }
  0x5d   : > { %1136 = vmatpush.bf16.msra.mxu0 %v1752_v46  ;;  %1088 = vmatmul.bf16.gmra.mxu1 %v1364_v50 }
  0x5e   : > { %1781 = vmatpush.bf16.msra.mxu1 %v1752_v46  ;;  %1107 = vmatmul.bf16.gmra.mxu2 %v1368_v51 }
  0x5f   : > { %1126 = vmatmul.bf16.gmra.mxu3 %v1372_v52 }
  0x61   : > { %1137 = vmatpush.bf16.msra.mxu0 %v1751_v53 }
  0x62   : > { %1782 = vmatpush.bf16.msra.mxu1 %v1751_v53 }
  0x65   : > { %1138 = vmatpush.bf16.msra.mxu0 %v1750_v54 }
  0x66   : > { %1783 = vmatpush.bf16.msra.mxu1 %v1750_v54 }
  0x69   : > { %1139 = vmatpush.bf16.msra.mxu0 %v1749_v55 }
  0x6a   : > { %1784 = vmatpush.bf16.msra.mxu1 %v1749_v55 }
  0x6c   : > { %1140 = vmatmul.bf16.vlgmr.msra.gmra.mxu0 %v1340_v60 }
  0x6d   : > { %1145 = vmatmul.bf16.vlgmr.msra.gmra.mxu1 %v1376_v61 }
  0xa9   : > { %v989_v62 = vpop.f32.mrf.mxu0 }
  0xaa   : > { %v1008_v63 = vpop.f32.mrf.mxu1  ;;  %v990_v21 = vadd.f32 %v1810_v20, %v989_v62 }
  0xac   : > { %v1009_v27 = vadd.f32 %v1008_v63, %v990_v21 }
  0xb1   : > { %v1027_v0 = vpop.f32.mrf.mxu2  ;;  %v991_v2 = vpop.f32.mrf.mxu0 }
  0xb2   : > { %v1046_v1 = vpop.f32.mrf.mxu3  ;;  %v1010_v3 = vpop.f32.mrf.mxu1  ;;  %v992_v28 = vadd.f32 %v1810_v20, %v991_v2  ;;  %v1028_v31 = vadd.f32 %v1027_v0, %v1009_v27  ;;  %v1759_v2 = vunpack.c.l.bf16 %v1758_v58 }
  0xb4   : > { %v1011_v33 = vadd.f32 %v1010_v3, %v992_v28  ;;  %v1047_v35 = vadd.f32 %v1046_v1, %v1028_v31 }
  0xb9   : > { %v1029_v4 = vpop.f32.mrf.mxu2  ;;  %v994_v6 = vpop.f32.mrf.mxu0 }
  0xba   : > { %v1048_v5 = vpop.f32.mrf.mxu3  ;;  %v1013_v7 = vpop.f32.mrf.mxu1  ;;  %v995_v22 = vadd.f32 %v1810_v20, %v994_v6  ;;  %v1030_v36 = vadd.f32 %v1029_v4, %v1011_v33  ;;  %v1763_v4 = vunpack.c.l.bf16 %v1775_v59 }
  0xbc   : > { %v1014_v29 = vadd.f32 %v1013_v7, %v995_v22  ;;  %v1049_v45 = vadd.f32 %v1048_v5, %v1030_v36  ;;  %v1760_v7 = vunpack.c.h.bf16 %v1758_v58 }
  0xc1   : > { %v1032_v8 = vpop.f32.mrf.mxu2  ;;  %v996_v10 = vpop.f32.mrf.mxu0 }
  0xc2   : > { %v1051_v9 = vpop.f32.mrf.mxu3  ;;  %v1015_v11 = vpop.f32.mrf.mxu1  ;;  %v997_v30 = vadd.f32 %v1810_v20, %v996_v10  ;;  %v1033_v32 = vadd.f32 %v1032_v8, %v1014_v29  ;;  %v1764_v8 = vunpack.c.h.bf16 %v1775_v59 }
  0xc4   : > { %v1016_v34 = vadd.f32 %v1015_v11, %v997_v30  ;;  %v1052_v37 = vadd.f32 %v1051_v9, %v1033_v32 }
  0xc9   : > { %v1034_v12 = vpop.f32.mrf.mxu2  ;;  %v1065_v14 = vpop.f32.mrf.mxu0 }
  0xca   : > { %v1053_v13 = vpop.f32.mrf.mxu3  ;;  %v1084_v15 = vpop.f32.mrf.mxu1  ;;  %v1035_v38 = vadd.f32 %v1034_v12, %v1016_v34  ;;  %v1066_v42 = vadd.f32 %v1065_v14, %v1047_v35 }
  0xcc   : > { %v1054_v46 = vadd.f32 %v1053_v13, %v1035_v38  ;;  %v1085_v47 = vadd.f32 %v1084_v15, %v1066_v42 }
  0xd1   : > { %v1103_v16 = vpop.f32.mrf.mxu2  ;;  %v1067_v18 = vpop.f32.mrf.mxu0 }
  0xd2   : > { %v1122_v17 = vpop.f32.mrf.mxu3  ;;  %v1086_v19 = vpop.f32.mrf.mxu1  ;;  %v1068_v48 = vadd.f32 %v1067_v18, %v1049_v45  ;;  %v1104_v51 = vadd.f32 %v1103_v16, %v1085_v47 }
  0xd4   : > { %v1087_v56 = vadd.f32 %v1086_v19, %v1068_v48  ;;  %v1123_v60 = vadd.f32 %v1122_v17, %v1104_v51 }
  0xd9   : > { %v1105_v23 = vpop.f32.mrf.mxu2  ;;  %v1070_v25 = vpop.f32.mrf.mxu0 }
  0xda   : > { %v1124_v24 = vpop.f32.mrf.mxu3  ;;  %v1089_v26 = vpop.f32.mrf.mxu1  ;;  %v1071_v43 = vadd.f32 %v1070_v25, %v1052_v37  ;;  %v1106_v61 = vadd.f32 %v1105_v23, %v1087_v56 }
  0xdc   : > { %v1090_v49 = vadd.f32 %v1089_v26, %v1071_v43  ;;  %v1125_v5 = vadd.f32 %v1124_v24, %v1106_v61 }
  0xe1   : > { %v1108_v39 = vpop.f32.mrf.mxu2  ;;  %v1072_v40 = vpop.f32.mrf.mxu0 }
  0xe2   : > { %v1091_v41 = vpop.f32.mrf.mxu1  ;;  %v1127_v44 = vpop.f32.mrf.mxu3  ;;  %v1073_v50 = vadd.f32 %v1072_v40, %v1054_v46  ;;  %v1109_v52 = vadd.f32 %v1108_v39, %v1090_v49 }
  0xe4   : > { %v1092_v57 = vadd.f32 %v1091_v41, %v1073_v50  ;;  %v1128_v62 = vadd.f32 %v1127_v44, %v1109_v52 }
  0xe9   : > { %v1110_v53 = vpop.f32.mrf.mxu2  ;;  %v1141_v54 = vpop.f32.mrf.mxu0 }
  0xea   : > { %v1146_v55 = vpop.f32.mrf.mxu1  ;;  %v1111_v63 = vadd.f32 %v1110_v53, %v1092_v57  ;;  %v1129_v0 = vpop.f32.mrf.mxu3  ;;  %v1142_v1 = vadd.f32 %v1141_v54, %v1123_v60 }
  0xeb   : > { %v1147_v3 = vadd.f32 %v1146_v55, %v1128_v62 }
  0xec   : > { %v1130_v6 = vadd.f32 %v1129_v0, %v1111_v63  ;;  %v1159_v11 = vadd.f32 %v1759_v2, %v1142_v1 }
  0xed   : > { %v1161_v12 = vadd.f32 %v1763_v4, %v1147_v3 }
  0xee   : > { %v1163_v17 = vmax.f32 %v1159_v11, 0.0 }
  0xef   : > { %v1165_v18 = vmax.f32 %v1161_v12, 0.0 }
  0xf1   : > { %v1143_v9 = vpop.f32.mrf.mxu0 }
  0xf2   : > { %v1148_v10 = vpop.f32.mrf.mxu1  ;;  %v1144_v13 = vadd.f32 %v1143_v9, %v1125_v5 }
  0xf3   : > { %v1149_v14 = vadd.f32 %v1148_v10, %v1130_v6 }
  0xf4   : > { %v1160_v15 = vadd.f32 %v1760_v7, %v1144_v13 }
  0xf5   : > { %v1162_v16 = vadd.f32 %v1764_v8, %v1149_v14 }
  0xf6   : > { %v1164_v19 = vmax.f32 %v1160_v15, 0.0 }
  0xf7   : > { %v1166_v20 = vmax.f32 %v1162_v16, 0.0 }
  0xf8   : > { %v1768_v21 = vpack.c.bf16 %v1164_v19, %v1163_v17 }
  0xf9   : > { %v1773_v22 = vpack.c.bf16 %v1166_v20, %v1165_v18 }
  0xfa   : > { %1769 = vst [vmem:[%s286_s25] sm:$0xff] %v1768_v21  }
  0xfb   : > { %1776 = vst [vmem:[%s286_s25 + $0x8] sm:$0xff] %v1773_v22  }
  0xfc PF: > { %s14_s17 = sadd.s32 1, %s1833_s17   ;;  %s2169_s15 = smov %s1829_s16 }
  0xfd   : > { %p11_p5 = scmp.ge.s32.totalorder %s14_s17, 4   ;;  %s2170_s16 = smov %s2172_s18 }
  0xff   :  { %13 = sbr.rel (!%p11_p5) target bundleno = 2 (0x2), region = 75 }

// kernel: _lambda_.33
= control target key start
LH: loop header
LB: loop body
LE: loop exit
PB: predicated region body
PF: predicated region fallthrough
CT: control target
= control target key end

     0   :  { %s1757_s12 = smov 0   ;;  %s1759_s13 = smov 0   ;;  %s2054_s0 = inlined_call_operand.vmem [shape: bf16[64,1152], index: 0, kind: input, shape index: {}]   ;;  %s2055_s1 = inlined_call_operand.vmem [shape: bf16[1152,128], index: 1, kind: input, shape index: {}]   ;;  %s2056_s2 = inlined_call_operand.vmem [shape: f32[1,128], index: 2, kind: input, shape index: {}]   ;;  %s2057_s3 = inlined_call_operand.vmem [shape: bf16[64,128], index: 3, kind: output, shape index: {}]  }
   0x1   :  { %s1761_s14 = smov 0  }
   0x2 LB: > { %s22_s15 = sadd.s32 1, %s1731_s13  ;;  %p1211_p0 = scmp.ge.s32.totalorder %s1735_s14, 1  ;;  %s1735_s14 = sphi %s1761_s14, %s13_s14   ;;  %s1731_s13 = sphi %s1759_s13, %s2059_s13   ;;  %s1727_s12 = sphi %s1757_s12, %s2058_s12  }
   0x3   : > { %p23_p1 = scmp.ge.s32.totalorder %s22_s15, 2  ;;  %p170_p2 = scmp.lt.s32.totalorder %s1735_s14, 3 }
   0x5   : > { %s2061_s15 = smov (%p23_p1, %s22_s15), 0  ;;  %p171_p3 = pnand %p1211_p0, %p170_p2 }
   0x6   : > { %s1212_s17 = sshll.u32 (!%p171_p3), %s1727_s12, 2 }
   0x7   : > { %174 = sbr.rel (%p171_p3) target bundleno = 250 (0xfa), region = 32  ;;  %p206_p4 = scmp.lt.s32.totalorder (!%p171_p3), %s1212_s17, 7 }
   0xc   : > { %v1603_v0 = vld [vmem:[%s2055_s1 + $0x38] sm:$0xff]  ;;  %v1602_v4 = vld [vmem:[%s2055_s1 + $0x30] sm:$0xff]  ;;  %v1601_v8 = vld [vmem:[%s2055_s1 + $0x28] sm:$0xff]  ;;  %s2063_s17 = smov (!%p206_p4, %s1212_s17), 7 }
   0xd   : > { %v1611_v1 = vld [vmem:[%s2055_s1 + $0x78] sm:$0xff]  ;;  %920 = vmatpush.bf16.msra.mxu0 %v1603_v0  ;;  %v1610_v5 = vld [vmem:[%s2055_s1 + $0x70] sm:$0xff]  ;;  %v1609_v9 = vld [vmem:[%s2055_s1 + $0x68] sm:$0xff]  ;;  %s1687_s10 = smul.u32 36, %s2063_s17  ;;  %s1215_s4 = sshll.u32 %s2063_s17, 2 }
   0xe   : > { %v1619_v2 = vld [vmem:[%s2055_s1 + $0xb8] sm:$0xff]  ;;  %939 = vmatpush.bf16.msra.mxu1 %v1611_v1  ;;  %v1618_v6 = vld [vmem:[%s2055_s1 + $0xb0] sm:$0xff]  ;;  %v1617_v10 = vld [vmem:[%s2055_s1 + $0xa8] sm:$0xff]  ;;  %s226_s7 = scalar_lea.vmem %s2057_s3, %s1215_s4 }
   0xf   : > { %v1627_v3 = vld [vmem:[%s2055_s1 + $0xf8] sm:$0xff]  ;;  %958 = vmatpush.bf16.msra.mxu2 %v1619_v2  ;;  %v1626_v7 = vld [vmem:[%s2055_s1 + $0xf0] sm:$0xff]  ;;  %v1625_v11 = vld [vmem:[%s2055_s1 + $0xe8] sm:$0xff]  ;;  %s1862_s12 = scalar_lea.vmem %s2054_s0, %s1687_s10 }
  0x10   : > { %977 = vmatpush.bf16.msra.mxu3 %v1627_v3  ;;  %v1600_v12 = vld [vmem:[%s2055_s1 + $0x20] sm:$0xff]  ;;  %v1599_v16 = vld [vmem:[%s2055_s1 + $0x18] sm:$0xff]  ;;  %v1598_v20 = vld [vmem:[%s2055_s1 + $0x10] sm:$0xff] }
  0x11   : > { %921 = vmatpush.bf16.msra.mxu0 %v1602_v4  ;;  %v1608_v13 = vld [vmem:[%s2055_s1 + $0x60] sm:$0xff]  ;;  %v1607_v17 = vld [vmem:[%s2055_s1 + $0x58] sm:$0xff]  ;;  %v1606_v21 = vld [vmem:[%s2055_s1 + $0x50] sm:$0xff] }
  0x12   : > { %940 = vmatpush.bf16.msra.mxu1 %v1610_v5  ;;  %v1616_v14 = vld [vmem:[%s2055_s1 + $0xa0] sm:$0xff]  ;;  %v1615_v18 = vld [vmem:[%s2055_s1 + $0x98] sm:$0xff]  ;;  %v1614_v22 = vld [vmem:[%s2055_s1 + $0x90] sm:$0xff] }
  0x13   : > { %959 = vmatpush.bf16.msra.mxu2 %v1618_v6  ;;  %v1624_v15 = vld [vmem:[%s2055_s1 + $0xe0] sm:$0xff]  ;;  %v1623_v19 = vld [vmem:[%s2055_s1 + $0xd8] sm:$0xff]  ;;  %v1622_v23 = vld [vmem:[%s2055_s1 + $0xd0] sm:$0xff] }
  0x14   : > { %978 = vmatpush.bf16.msra.mxu3 %v1626_v7  ;;  %v1597_v24 = vld [vmem:[%s2055_s1 + $0x8] sm:$0xff]  ;;  %v1596_v28 = vld [vmem:[%s2055_s1] sm:$0xff]  ;;  %v1228_v39 = vld [vmem:[%s1862_s12 + $0x2c] sm:$0xf0] }
  0x15   : > { %922 = vmatpush.bf16.msra.mxu0 %v1601_v8  ;;  %v1605_v25 = vld [vmem:[%s2055_s1 + $0x48] sm:$0xff]  ;;  %v1604_v29 = vld [vmem:[%s2055_s1 + $0x40] sm:$0xff]  ;;  %v1635_v40 = vld [vmem:[%s2055_s1 + $0x138] sm:$0xff] }
  0x16   : > { %941 = vmatpush.bf16.msra.mxu1 %v1609_v9  ;;  %v1613_v26 = vld [vmem:[%s2055_s1 + $0x88] sm:$0xff]  ;;  %v1612_v30 = vld [vmem:[%s2055_s1 + $0x80] sm:$0xff]  ;;  %v1643_v41 = vld [vmem:[%s2055_s1 + $0x178] sm:$0xff] }
  0x17   : > { %960 = vmatpush.bf16.msra.mxu2 %v1617_v10  ;;  %v1621_v27 = vld [vmem:[%s2055_s1 + $0xc8] sm:$0xff]  ;;  %v1620_v31 = vld [vmem:[%s2055_s1 + $0xc0] sm:$0xff]  ;;  %v1651_v46 = vld [vmem:[%s2055_s1 + $0x1b8] sm:$0xff] }
  0x18   : > { %979 = vmatpush.bf16.msra.mxu3 %v1625_v11  ;;  %v1218_v32 = vld [vmem:[%s1862_s12] sm:$0xf]  ;;  %v1582_v33 = vld [vmem:[%s1862_s12 + $0x20] sm:$0xf0]  ;;  %v1220_v35 = vld [vmem:[%s1862_s12 + $0x24] sm:$0xf0] }
  0x19   : > { %923 = vmatpush.bf16.msra.mxu0 %v1600_v12  ;;  %v1578_v34 = vld [vmem:[%s1862_s12 + $0x4] sm:$0xf]  ;;  %v1226_v36 = vld [vmem:[%s1862_s12 + $0x8] sm:$0xf]  ;;  %v1583_v37 = vld [vmem:[%s1862_s12 + $0x28] sm:$0xf0]  ;;  %v1219_v42 = vor.u32 %v1582_v33, %v1218_v32 }
  0x1a   : > { %942 = vmatpush.bf16.msra.mxu1 %v1608_v13  ;;  %v1579_v38 = vld [vmem:[%s1862_s12 + $0xc] sm:$0xf]  ;;  %v1223_v43 = vor.u32 %v1578_v34, %v1220_v35  ;;  %v1227_v44 = vor.u32 %v1583_v37, %v1226_v36  ;;  %v1659_v47 = vld [vmem:[%s2055_s1 + $0x1f8] sm:$0xff]  ;;  %v1634_v48 = vld [vmem:[%s2055_s1 + $0x130] sm:$0xff] }
  0x1b   : > { %961 = vmatpush.bf16.msra.mxu2 %v1616_v14  ;;  %v1231_v45 = vor.u32 %v1579_v38, %v1228_v39  ;;  %v1642_v49 = vld [vmem:[%s2055_s1 + $0x170] sm:$0xff]  ;;  %v1633_v52 = vld [vmem:[%s2055_s1 + $0x128] sm:$0xff]  ;;  %v1632_v56 = vld [vmem:[%s2055_s1 + $0x120] sm:$0xff] }
  0x1c   : > { %980 = vmatpush.bf16.msra.mxu3 %v1624_v15  ;;  %v1650_v50 = vld [vmem:[%s2055_s1 + $0x1b0] sm:$0xff]  ;;  %v1641_v53 = vld [vmem:[%s2055_s1 + $0x168] sm:$0xff]  ;;  %v1640_v57 = vld [vmem:[%s2055_s1 + $0x160] sm:$0xff] }
  0x1d   : > { %924 = vmatpush.bf16.msra.mxu0 %v1599_v16  ;;  %v1658_v51 = vld [vmem:[%s2055_s1 + $0x1f0] sm:$0xff]  ;;  %v1649_v54 = vld [vmem:[%s2055_s1 + $0x1a8] sm:$0xff]  ;;  %v1648_v58 = vld [vmem:[%s2055_s1 + $0x1a0] sm:$0xff] }
  0x1e   : > { %943 = vmatpush.bf16.msra.mxu1 %v1607_v17  ;;  %v1657_v55 = vld [vmem:[%s2055_s1 + $0x1e8] sm:$0xff]  ;;  %v1656_v59 = vld [vmem:[%s2055_s1 + $0x1e0] sm:$0xff]  ;;  %v1256_v63 = vld [vmem:[%s1862_s12 + $0x6c] sm:$0xf0] }
  0x1f   : > { %962 = vmatpush.bf16.msra.mxu2 %v1615_v18  ;;  %v1254_v60 = vld [vmem:[%s1862_s12 + $0x48] sm:$0xf]  ;;  %v1591_v61 = vld [vmem:[%s1862_s12 + $0x68] sm:$0xf0]  ;;  %v1262_v0 = vld [vmem:[%s1862_s12 + $0x50] sm:$0xf] }
  0x20   : > { %981 = vmatpush.bf16.msra.mxu3 %v1623_v19  ;;  %v1587_v62 = vld [vmem:[%s1862_s12 + $0x4c] sm:$0xf]  ;;  %v1592_v1 = vld [vmem:[%s1862_s12 + $0x70] sm:$0xf0]  ;;  %v1264_v3 = vld [vmem:[%s1862_s12 + $0x74] sm:$0xf0]  ;;  %v1255_v6 = vor.u32 %v1591_v61, %v1254_v60 }
  0x21   : > { %925 = vmatpush.bf16.msra.mxu0 %v1598_v20  ;;  %v1588_v2 = vld [vmem:[%s1862_s12 + $0x54] sm:$0xf]  ;;  %v1631_v4 = vld [vmem:[%s2055_s1 + $0x118] sm:$0xff]  ;;  %v1259_v7 = vor.u32 %v1587_v62, %v1256_v63  ;;  %v1263_v8 = vor.u32 %v1592_v1, %v1262_v0  ;;  %v1629_v16 = vld [vmem:[%s2055_s1 + $0x108] sm:$0xff] }
  0x22   : > { %944 = vmatpush.bf16.msra.mxu1 %v1606_v21  ;;  %v1639_v5 = vld [vmem:[%s2055_s1 + $0x158] sm:$0xff]  ;;  %v1267_v9 = vor.u32 %v1588_v2, %v1264_v3  ;;  %v1630_v12 = vld [vmem:[%s2055_s1 + $0x110] sm:$0xff]  ;;  %v1637_v17 = vld [vmem:[%s2055_s1 + $0x148] sm:$0xff] }
  0x23   : > { %963 = vmatpush.bf16.msra.mxu2 %v1614_v22  ;;  %v1647_v10 = vld [vmem:[%s2055_s1 + $0x198] sm:$0xff]  ;;  %v1638_v13 = vld [vmem:[%s2055_s1 + $0x150] sm:$0xff]  ;;  %v1645_v18 = vld [vmem:[%s2055_s1 + $0x188] sm:$0xff] }
  0x24   : > { %982 = vmatpush.bf16.msra.mxu3 %v1622_v23  ;;  %v1655_v11 = vld [vmem:[%s2055_s1 + $0x1d8] sm:$0xff]  ;;  %v1646_v14 = vld [vmem:[%s2055_s1 + $0x190] sm:$0xff]  ;;  %v1653_v19 = vld [vmem:[%s2055_s1 + $0x1c8] sm:$0xff] }
  0x25   : > { %926 = vmatpush.bf16.msra.mxu0 %v1597_v24  ;;  %v1654_v15 = vld [vmem:[%s2055_s1 + $0x1d0] sm:$0xff]  ;;  %v1628_v20 = vld [vmem:[%s2055_s1 + $0x100] sm:$0xff]  ;;  %v1665_v38 = vld [vmem:[%s2055_s1 + $0x228] sm:$0xff] }
  0x26   : > { %945 = vmatpush.bf16.msra.mxu1 %v1605_v25  ;;  %v1636_v21 = vld [vmem:[%s2055_s1 + $0x140] sm:$0xff]  ;;  %v1234_v24 = vld [vmem:[%s1862_s12 + $0x10] sm:$0xf]  ;;  %v1584_v25 = vld [vmem:[%s1862_s12 + $0x30] sm:$0xf0] }
  0x27   : > { %964 = vmatpush.bf16.msra.mxu2 %v1613_v26  ;;  %v1644_v22 = vld [vmem:[%s2055_s1 + $0x180] sm:$0xff]  ;;  %v1667_v26 = vld [vmem:[%s2055_s1 + $0x238] sm:$0xff]  ;;  %v1235_v33 = vor.u32 %v1584_v25, %v1234_v24  ;;  %v1666_v37 = vld [vmem:[%s2055_s1 + $0x230] sm:$0xff] }
  0x28   : > { %983 = vmatpush.bf16.msra.mxu3 %v1621_v27  ;;  %v1652_v23 = vld [vmem:[%s2055_s1 + $0x1c0] sm:$0xff]  ;;  %v1580_v27 = vld [vmem:[%s1862_s12 + $0x14] sm:$0xf] }
  0x29   : > { %927 = vmatpush.bf16.msra.mxu0 %v1596_v28  ;;  %v1236_v28 = vld [vmem:[%s1862_s12 + $0x34] sm:$0xf0]  ;;  %v1244_v32 = vld [vmem:[%s1862_s12 + $0x3c] sm:$0xf0] }
  0x2a   : > { %946 = vmatpush.bf16.msra.mxu1 %v1604_v29  ;;  %v1242_v29 = vld [vmem:[%s1862_s12 + $0x18] sm:$0xf]  ;;  %v1239_v34 = vor.u32 %v1580_v27, %v1236_v28  ;;  %v1664_v39 = vld [vmem:[%s2055_s1 + $0x220] sm:$0xff] }
  0x2b   : > { %965 = vmatpush.bf16.msra.mxu2 %v1612_v30  ;;  %v1585_v30 = vld [vmem:[%s1862_s12 + $0x38] sm:$0xf0] }
  0x2c   : > { %984 = vmatpush.bf16.msra.mxu3 %v1620_v31  ;;  %928 = vmatmul.bf16.vlgmr.msra.gmra.mxu0 %v1219_v42  ;;  %v1581_v31 = vld [vmem:[%s1862_s12 + $0x1c] sm:$0xf]  ;;  %v1243_v35 = vor.u32 %v1585_v30, %v1242_v29 }
  0x2d   : > { %996 = vmatpush.bf16.msrb.mxu0 %v1635_v40  ;;  %947 = vmatmul.bf16.vlgmr.msra.gmra.mxu1 %v1223_v43  ;;  %v1247_v36 = vor.u32 %v1581_v31, %v1244_v32  ;;  %v1270_v40 = vld [vmem:[%s1862_s12 + $0x58] sm:$0xf]  ;;  %v1589_v42 = vld [vmem:[%s1862_s12 + $0x5c] sm:$0xf]  ;;  %v1272_v43 = vld [vmem:[%s1862_s12 + $0x7c] sm:$0xf0] }
  0x2e   : > { %1015 = vmatpush.bf16.msrb.mxu1 %v1643_v41  ;;  %966 = vmatmul.bf16.vlgmr.msra.gmra.mxu2 %v1227_v44  ;;  %v1593_v41 = vld [vmem:[%s1862_s12 + $0x78] sm:$0xf0]  ;;  %v1278_v44 = vld [vmem:[%s1862_s12 + $0x60] sm:$0xf] }
  0x2f   : > { %985 = vmatmul.bf16.vlgmr.msra.gmra.mxu3 %v1231_v45  ;;  %1034 = vmatpush.bf16.msrb.mxu2 %v1651_v46  ;;  %v1594_v45 = vld [vmem:[%s1862_s12 + $0x80] sm:$0xf0]  ;;  %v1663_v46 = vld [vmem:[%s2055_s1 + $0x218] sm:$0xff] }
  0x30   : > { %1053 = vmatpush.bf16.msrb.mxu3 %v1659_v47  ;;  %v1590_v47 = vld [vmem:[%s1862_s12 + $0x64] sm:$0xf] }
  0x31   : > { %997 = vmatpush.bf16.msrb.mxu0 %v1634_v48  ;;  %v1280_v48 = vld [vmem:[%s1862_s12 + $0x84] sm:$0xf0] }
  0x32   : > { %1016 = vmatpush.bf16.msrb.mxu1 %v1642_v49  ;;  %v1271_v49 = vor.u32 %v1593_v41, %v1270_v40 }
  0x33   : > { %1035 = vmatpush.bf16.msrb.mxu2 %v1650_v50  ;;  %v1275_v50 = vor.u32 %v1589_v42, %v1272_v43 }
  0x34   : > { %1054 = vmatpush.bf16.msrb.mxu3 %v1658_v51  ;;  %v1279_v51 = vor.u32 %v1594_v45, %v1278_v44 }
  0x35   : > { %998 = vmatpush.bf16.msrb.mxu0 %v1633_v52  ;;  %v1283_v52 = vor.u32 %v1590_v47, %v1280_v48 }
  0x36   : > { %1017 = vmatpush.bf16.msrb.mxu1 %v1641_v53  ;;  %v1662_v53 = vld [vmem:[%s2055_s1 + $0x210] sm:$0xff] }
  0x37   : > { %1036 = vmatpush.bf16.msrb.mxu2 %v1649_v54  ;;  %v1661_v54 = vld [vmem:[%s2055_s1 + $0x208] sm:$0xff] }
  0x38   : > { %1055 = vmatpush.bf16.msrb.mxu3 %v1657_v55  ;;  %v1660_v55 = vld [vmem:[%s2055_s1 + $0x200] sm:$0xff] }
  0x39   : > { %999 = vmatpush.bf16.msrb.mxu0 %v1632_v56  ;;  %v1250_v56 = vld [vmem:[%s1862_s12 + $0x20] sm:$0xf] }
  0x3a   : > { %1018 = vmatpush.bf16.msrb.mxu1 %v1640_v57  ;;  %v1586_v57 = vld [vmem:[%s1862_s12 + $0x40] sm:$0xf0] }
  0x3b   : > { %1037 = vmatpush.bf16.msrb.mxu2 %v1648_v58  ;;  %v1286_v58 = vld [vmem:[%s1862_s12 + $0x68] sm:$0xf]  ;;  %v1251_v60 = vor.u32 %v1586_v57, %v1250_v56 }
  0x3c   : > { %1056 = vmatpush.bf16.msrb.mxu3 %v1656_v59  ;;  %933 = vmatmul.bf16.gmra.mxu0 %v1255_v6  ;;  %v1595_v59 = vld [vmem:[%s1862_s12 + $0x88] sm:$0xf0] }
  0x3d   : > { %1000 = vmatpush.bf16.msrb.mxu0 %v1631_v4  ;;  %952 = vmatmul.bf16.gmra.mxu1 %v1259_v7  ;;  %v1287_v61 = vor.u32 %v1595_v59, %v1286_v58 }
  0x3e   : > { %1019 = vmatpush.bf16.msrb.mxu1 %v1639_v5  ;;  %971 = vmatmul.bf16.gmra.mxu2 %v1263_v8 }
  0x3f   : > { %990 = vmatmul.bf16.gmra.mxu3 %v1267_v9  ;;  %1038 = vmatpush.bf16.msrb.mxu2 %v1647_v10 }
  0x40   : > { %1057 = vmatpush.bf16.msrb.mxu3 %v1655_v11 }
  0x41   : > { %1001 = vmatpush.bf16.msrb.mxu0 %v1630_v12 }
  0x42   : > { %1020 = vmatpush.bf16.msrb.mxu1 %v1638_v13 }
  0x43   : > { %1039 = vmatpush.bf16.msrb.mxu2 %v1646_v14 }
  0x44   : > { %1058 = vmatpush.bf16.msrb.mxu3 %v1654_v15 }
  0x45   : > { %1002 = vmatpush.bf16.msrb.mxu0 %v1629_v16 }
  0x46   : > { %1021 = vmatpush.bf16.msrb.mxu1 %v1637_v17 }
  0x47   : > { %1040 = vmatpush.bf16.msrb.mxu2 %v1645_v18 }
  0x48   : > { %1059 = vmatpush.bf16.msrb.mxu3 %v1653_v19 }
  0x49   : > { %1003 = vmatpush.bf16.msrb.mxu0 %v1628_v20  ;;  %v1712_v20 = vld [vmem:[%s2056_s2] ss:$0 sm:$0xff] }
  0x4a   : > { %1022 = vmatpush.bf16.msrb.mxu1 %v1636_v21 }
  0x4b   : > { %1041 = vmatpush.bf16.msrb.mxu2 %v1644_v22 }
  0x4c   : > { %1060 = vmatpush.bf16.msrb.mxu3 %v1652_v23  ;;  %1004 = vmatmul.bf16.vlgmr.msrb.gmra.mxu0 %v1235_v33 }
  0x4d   : > { %1072 = vmatpush.bf16.msra.mxu0 %v1667_v26  ;;  %1023 = vmatmul.bf16.vlgmr.msrb.gmra.mxu1 %v1239_v34 }
  0x4e   : > { %1679 = vmatpush.bf16.msra.mxu1 %v1667_v26  ;;  %1042 = vmatmul.bf16.vlgmr.msrb.gmra.mxu2 %v1243_v35 }
  0x4f   : > { %1061 = vmatmul.bf16.vlgmr.msrb.gmra.mxu3 %v1247_v36 }
  0x51   : > { %1073 = vmatpush.bf16.msra.mxu0 %v1666_v37 }
  0x52   : > { %1680 = vmatpush.bf16.msra.mxu1 %v1666_v37 }
  0x55   : > { %1074 = vmatpush.bf16.msra.mxu0 %v1665_v38 }
  0x56   : > { %1681 = vmatpush.bf16.msra.mxu1 %v1665_v38 }
  0x59   : > { %1075 = vmatpush.bf16.msra.mxu0 %v1664_v39 }
  0x5a   : > { %1682 = vmatpush.bf16.msra.mxu1 %v1664_v39 }
  0x5c   : > { %1009 = vmatmul.bf16.gmra.mxu0 %v1271_v49 }
  0x5d   : > { %1076 = vmatpush.bf16.msra.mxu0 %v1663_v46  ;;  %1028 = vmatmul.bf16.gmra.mxu1 %v1275_v50 }
  0x5e   : > { %1683 = vmatpush.bf16.msra.mxu1 %v1663_v46  ;;  %1047 = vmatmul.bf16.gmra.mxu2 %v1279_v51 }
  0x5f   : > { %1066 = vmatmul.bf16.gmra.mxu3 %v1283_v52 }
  0x61   : > { %1077 = vmatpush.bf16.msra.mxu0 %v1662_v53 }
  0x62   : > { %1684 = vmatpush.bf16.msra.mxu1 %v1662_v53 }
  0x65   : > { %1078 = vmatpush.bf16.msra.mxu0 %v1661_v54 }
  0x66   : > { %1685 = vmatpush.bf16.msra.mxu1 %v1661_v54 }
  0x69   : > { %1079 = vmatpush.bf16.msra.mxu0 %v1660_v55 }
  0x6a   : > { %1686 = vmatpush.bf16.msra.mxu1 %v1660_v55 }
  0x6c   : > { %1080 = vmatmul.bf16.vlgmr.msra.gmra.mxu0 %v1251_v60 }
  0x6d   : > { %1085 = vmatmul.bf16.vlgmr.msra.gmra.mxu1 %v1287_v61 }
  0xa9   : > { %v929_v62 = vpop.f32.mrf.mxu0 }
  0xaa   : > { %v948_v63 = vpop.f32.mrf.mxu1  ;;  %v930_v21 = vadd.f32 %v1712_v20, %v929_v62 }
  0xac   : > { %v949_v29 = vadd.f32 %v948_v63, %v930_v21 }
  0xb1   : > { %v967_v0 = vpop.f32.mrf.mxu2  ;;  %v931_v2 = vpop.f32.mrf.mxu0 }
  0xb2   : > { %v986_v1 = vpop.f32.mrf.mxu3  ;;  %v950_v3 = vpop.f32.mrf.mxu1  ;;  %v932_v27 = vadd.f32 %v1712_v20, %v931_v2  ;;  %v968_v31 = vadd.f32 %v967_v0, %v949_v29 }
  0xb4   : > { %v951_v32 = vadd.f32 %v950_v3, %v932_v27  ;;  %v987_v40 = vadd.f32 %v986_v1, %v968_v31 }
  0xb9   : > { %v969_v4 = vpop.f32.mrf.mxu2  ;;  %v934_v6 = vpop.f32.mrf.mxu0 }
  0xba   : > { %v988_v5 = vpop.f32.mrf.mxu3  ;;  %v953_v7 = vpop.f32.mrf.mxu1  ;;  %v935_v22 = vadd.f32 %v1712_v20, %v934_v6  ;;  %v970_v35 = vadd.f32 %v969_v4, %v951_v32 }
  0xbc   : > { %v954_v30 = vadd.f32 %v953_v7, %v935_v22  ;;  %v989_v43 = vadd.f32 %v988_v5, %v970_v35 }
  0xc1   : > { %v972_v8 = vpop.f32.mrf.mxu2  ;;  %v936_v10 = vpop.f32.mrf.mxu0 }
  0xc2   : > { %v991_v9 = vpop.f32.mrf.mxu3  ;;  %v955_v11 = vpop.f32.mrf.mxu1  ;;  %v937_v28 = vadd.f32 %v1712_v20, %v936_v10  ;;  %v973_v33 = vadd.f32 %v972_v8, %v954_v30 }
  0xc4   : > { %v956_v34 = vadd.f32 %v955_v11, %v937_v28  ;;  %v992_v41 = vadd.f32 %v991_v9, %v973_v33 }
  0xc9   : > { %v974_v12 = vpop.f32.mrf.mxu2  ;;  %v1005_v14 = vpop.f32.mrf.mxu0 }
  0xca   : > { %v993_v13 = vpop.f32.mrf.mxu3  ;;  %v1024_v15 = vpop.f32.mrf.mxu1  ;;  %v975_v36 = vadd.f32 %v974_v12, %v956_v34  ;;  %v1006_v45 = vadd.f32 %v1005_v14, %v987_v40 }
  0xcc   : > { %v994_v44 = vadd.f32 %v993_v13, %v975_v36  ;;  %v1025_v49 = vadd.f32 %v1024_v15, %v1006_v45 }
  0xd1   : > { %v1043_v16 = vpop.f32.mrf.mxu2  ;;  %v1007_v18 = vpop.f32.mrf.mxu0 }
  0xd2   : > { %v1062_v17 = vpop.f32.mrf.mxu3  ;;  %v1026_v19 = vpop.f32.mrf.mxu1  ;;  %v1008_v47 = vadd.f32 %v1007_v18, %v989_v43  ;;  %v1044_v54 = vadd.f32 %v1043_v16, %v1025_v49 }
  0xd4   : > { %v1027_v55 = vadd.f32 %v1026_v19, %v1008_v47  ;;  %v1063_v61 = vadd.f32 %v1062_v17, %v1044_v54 }
  0xd9   : > { %v1045_v23 = vpop.f32.mrf.mxu2  ;;  %v1010_v25 = vpop.f32.mrf.mxu0 }
  0xda   : > { %v1064_v24 = vpop.f32.mrf.mxu3  ;;  %v1029_v26 = vpop.f32.mrf.mxu1  ;;  %v1011_v46 = vadd.f32 %v1010_v25, %v992_v41  ;;  %v1046_v58 = vadd.f32 %v1045_v23, %v1027_v55 }
  0xdc   : > { %v1030_v50 = vadd.f32 %v1029_v26, %v1011_v46  ;;  %v1065_v63 = vadd.f32 %v1064_v24, %v1046_v58 }
  0xe1   : > { %v1048_v37 = vpop.f32.mrf.mxu2  ;;  %v1012_v38 = vpop.f32.mrf.mxu0 }
  0xe2   : > { %v1031_v39 = vpop.f32.mrf.mxu1  ;;  %v1067_v42 = vpop.f32.mrf.mxu3  ;;  %v1013_v48 = vadd.f32 %v1012_v38, %v994_v44  ;;  %v1049_v56 = vadd.f32 %v1048_v37, %v1030_v50 }
  0xe4   : > { %v1032_v57 = vadd.f32 %v1031_v39, %v1013_v48  ;;  %v1068_v62 = vadd.f32 %v1067_v42, %v1049_v56 }
  0xe9   : > { %v1050_v51 = vpop.f32.mrf.mxu2  ;;  %v1081_v52 = vpop.f32.mrf.mxu0 }
  0xea   : > { %v1086_v53 = vpop.f32.mrf.mxu1  ;;  %v1051_v59 = vadd.f32 %v1050_v51, %v1032_v57  ;;  %v1069_v60 = vpop.f32.mrf.mxu3  ;;  %v1082_v1 = vadd.f32 %v1081_v52, %v1063_v61 }
  0xeb   : > { %v1087_v2 = vadd.f32 %v1086_v53, %v1068_v62 }
  0xec   : > { %v1070_v0 = vadd.f32 %v1069_v60, %v1051_v59  ;;  %v1091_v7 = vmax.f32 %v1082_v1, 0.0 }
  0xed   : > { %v1093_v8 = vmax.f32 %v1087_v2, 0.0 }
  0xf1   : > { %v1083_v3 = vpop.f32.mrf.mxu0 }
  0xf2   : > { %v1088_v4 = vpop.f32.mrf.mxu1  ;;  %v1084_v5 = vadd.f32 %v1083_v3, %v1065_v63 }
  0xf3   : > { %v1089_v6 = vadd.f32 %v1088_v4, %v1070_v0 }
  0xf4   : > { %v1092_v9 = vmax.f32 %v1084_v5, 0.0 }
  0xf5   : > { %v1094_v10 = vmax.f32 %v1089_v6, 0.0 }
  0xf6   : > { %v1671_v11 = vpack.c.bf16 %v1092_v9, %v1091_v7 }
  0xf7   : > { %v1676_v12 = vpack.c.bf16 %v1094_v10, %v1093_v8 }
  0xf8   : > { %1672 = vst [vmem:[%s226_s7] sm:$0xff] %v1671_v11  }
  0xf9   : > { %1678 = vst [vmem:[%s226_s7 + $0x8] sm:$0xff] %v1676_v12  }
  0xfa PF: > { %s13_s14 = sadd.s32 1, %s1735_s14   ;;  %s2058_s12 = smov %s1731_s13 }
  0xfb   : > { %p10_p5 = scmp.ge.s32.totalorder %s13_s14, 4   ;;  %s2059_s13 = smov %s2061_s15 }
  0xfd   :  { %12 = sbr.rel (!%p10_p5) target bundleno = 2 (0x2), region = 68 }

// kernel: _lambda_.35
= control target key start
LH: loop header
LB: loop body
LE: loop exit
PB: predicated region body
PF: predicated region fallthrough
CT: control target
= control target key end

     0   :  { %s2275_s12 = smov 0   ;;  %s2277_s13 = smov 0   ;;  %s2784_s0 = inlined_call_operand.vmem [shape: bf16[16,1152], index: 0, kind: input, shape index: {}]   ;;  %s2785_s1 = inlined_call_operand.vmem [shape: bf16[1152,256], index: 1, kind: input, shape index: {}]   ;;  %s2786_s2 = inlined_call_operand.vmem [shape: f32[1,256], index: 2, kind: input, shape index: {}]   ;;  %s2787_s3 = inlined_call_operand.vmem [shape: bf16[16,256], index: 3, kind: output, shape index: {}]  }
   0x1   :  { %s2279_s14 = smov 0   ;;  %s2281_s15 = smov 0  }
   0x2   :  { %s2283_s16 = smov 0  }
   0x3 LB: > { %s22_s17 = sadd.s32 1, %s2249_s15  ;;  %s1750_s18 = sadd.s32 4294967295, %s2253_s16   ;;  %s2253_s16 = sphi %s2283_s16, %s13_s16   ;;  %s2249_s15 = sphi %s2281_s15, %s2792_s15   ;;  %s2245_s14 = sphi %s2279_s14, %s2791_s14   ;;  %s2241_s13 = sphi %s2277_s13, %s2790_s13   ;;  %s2237_s12 = sphi %s2275_s12, %s2789_s12  }
   0x4   : > { %p23_p0 = scmp.ge.s32.totalorder %s22_s17, 2  ;;  %p65_p1 = scmp.ne.s32.totalorder %s2241_s13, %s2237_s12 }
   0x5   : > { %p66_p2 = scmp.eq.s32.totalorder %s2253_s16, 0  ;;  %p123_p4 = scmp.eq.s32.totalorder %s1750_s18, 1 }
   0x6   : > { %s2794_s17 = smov (%p23_p0, %s22_s17), 0  ;;  %s58_s20 = sadd.s32 1, %s2241_s13 }
   0x7   : > { %p67_p3 = por %p66_p2, %p65_p1  ;;  %s55_s19 = ssub.s32 %s2249_s15, %s2794_s17 }
   0x8   : > { %p56_p5 = scmp.eq.s32.totalorder %s55_s19, 0  ;;  %p2310_p6 = por %p123_p4, %p65_p1 }
   0x9   : > { %p1754_p7 = scmp.ge.s32.totalorder %s2253_s16, 2 }
   0xa   : > { %s2315_s22 = scalar_select %p56_p5, %s2241_s13, %s58_s20  }
   0xb   : > { %155 = sbr.rel (%p1754_p7) target bundleno = 165 (0xa5), region = 20 }
  0x10   : > { %158 = sbr.rel (!%p67_p3) target bundleno = 165 (0xa5), region = 24  ;;  %s160_s23 = sand.u32 (%p67_p3), 1, %s2241_s13  }
  0x11   : > { %s1755_s24 = sshll.u32 (%p67_p3), %s2249_s15, 2  ;;  %s2172_s25 = smul.u32 (%p67_p3), 576, %s160_s23 }
  0x12   : > { %s2323_s28 = scalar_lea.vmem (%p67_p3), %s2785_s1, %s1755_s24 }
  0x13   : > { %v181_v0 = vld [vmem:[%s2323_s28] sm:$0xf] (%p67_p3)  ;;  %v183_v1 = vld [vmem:[%s2323_s28 + $0x8] sm:$0xf] (%p67_p3)  ;;  %v185_v2 = vld [vmem:[%s2323_s28 + $0x10] sm:$0xf] (%p67_p3) }
  0x14   : > { %s2328_s29 = scalar_lea.vmem (%p67_p3), [#allocation2], %s2172_s25  ;;  %v187_v3 = vld [vmem:[%s2323_s28 + $0x18] sm:$0xf] (%p67_p3)  ;;  %v189_v4 = vld [vmem:[%s2323_s28 + $0x20] sm:$0xf] (%p67_p3) }
  0x15   : > { %182 = vst [vmem:[%s2328_s29] sm:$0xf] %v181_v0  ;;  %v191_v5 = vld [vmem:[%s2323_s28 + $0x28] sm:$0xf]  ;;  %v193_v6 = vld [vmem:[%s2323_s28 + $0x30] sm:$0xf] }
  0x16   : > { %184 = vst [vmem:[%s2328_s29 + $0x4] sm:$0xf] %v183_v1  ;;  %v195_v7 = vld [vmem:[%s2323_s28 + $0x38] sm:$0xf]  ;;  %v197_v8 = vld [vmem:[%s2323_s28 + $0x40] sm:$0xf] }
  0x17   : > { %186 = vst [vmem:[%s2328_s29 + $0x8] sm:$0xf] %v185_v2  ;;  %v199_v9 = vld [vmem:[%s2323_s28 + $0x48] sm:$0xf]  ;;  %v201_v10 = vld [vmem:[%s2323_s28 + $0x50] sm:$0xf] }
  0x18   : > { %188 = vst [vmem:[%s2328_s29 + $0xc] sm:$0xf] %v187_v3  ;;  %v203_v11 = vld [vmem:[%s2323_s28 + $0x58] sm:$0xf]  ;;  %v205_v12 = vld [vmem:[%s2323_s28 + $0x60] sm:$0xf] }
  0x19   : > { %190 = vst [vmem:[%s2328_s29 + $0x10] sm:$0xf] %v189_v4  ;;  %v207_v13 = vld [vmem:[%s2323_s28 + $0x68] sm:$0xf]  ;;  %v209_v14 = vld [vmem:[%s2323_s28 + $0x70] sm:$0xf] }
  0x1a   : > { %192 = vst [vmem:[%s2328_s29 + $0x14] sm:$0xf] %v191_v5  ;;  %v211_v15 = vld [vmem:[%s2323_s28 + $0x78] sm:$0xf]  ;;  %v213_v16 = vld [vmem:[%s2323_s28 + $0x80] sm:$0xf] }
  0x1b   : > { %194 = vst [vmem:[%s2328_s29 + $0x18] sm:$0xf] %v193_v6  ;;  %v215_v17 = vld [vmem:[%s2323_s28 + $0x88] sm:$0xf]  ;;  %v217_v18 = vld [vmem:[%s2323_s28 + $0x90] sm:$0xf] }
  0x1c   : > { %196 = vst [vmem:[%s2328_s29 + $0x1c] sm:$0xf] %v195_v7  ;;  %v219_v19 = vld [vmem:[%s2323_s28 + $0x98] sm:$0xf]  ;;  %v221_v20 = vld [vmem:[%s2323_s28 + $0xa0] sm:$0xf] }
  0x1d   : > { %198 = vst [vmem:[%s2328_s29 + $0x20] sm:$0xf] %v197_v8  ;;  %v223_v21 = vld [vmem:[%s2323_s28 + $0xa8] sm:$0xf]  ;;  %v225_v22 = vld [vmem:[%s2323_s28 + $0xb0] sm:$0xf] }
  0x1e   : > { %200 = vst [vmem:[%s2328_s29 + $0x24] sm:$0xf] %v199_v9  ;;  %v227_v23 = vld [vmem:[%s2323_s28 + $0xb8] sm:$0xf]  ;;  %v229_v24 = vld [vmem:[%s2323_s28 + $0xc0] sm:$0xf] }
  0x1f   : > { %202 = vst [vmem:[%s2328_s29 + $0x28] sm:$0xf] %v201_v10  ;;  %v231_v25 = vld [vmem:[%s2323_s28 + $0xc8] sm:$0xf]  ;;  %v233_v26 = vld [vmem:[%s2323_s28 + $0xd0] sm:$0xf] }
  0x20   : > { %204 = vst [vmem:[%s2328_s29 + $0x2c] sm:$0xf] %v203_v11  ;;  %v235_v27 = vld [vmem:[%s2323_s28 + $0xd8] sm:$0xf]  ;;  %v237_v28 = vld [vmem:[%s2323_s28 + $0xe0] sm:$0xf] }
  0x21   : > { %206 = vst [vmem:[%s2328_s29 + $0x30] sm:$0xf] %v205_v12  ;;  %v239_v29 = vld [vmem:[%s2323_s28 + $0xe8] sm:$0xf]  ;;  %v241_v30 = vld [vmem:[%s2323_s28 + $0xf0] sm:$0xf] }
  0x22   : > { %208 = vst [vmem:[%s2328_s29 + $0x34] sm:$0xf] %v207_v13  ;;  %v243_v31 = vld [vmem:[%s2323_s28 + $0xf8] sm:$0xf]  ;;  %v245_v32 = vld [vmem:[%s2323_s28 + $0x100] sm:$0xf] }
  0x23   : > { %210 = vst [vmem:[%s2328_s29 + $0x38] sm:$0xf] %v209_v14  ;;  %v247_v33 = vld [vmem:[%s2323_s28 + $0x108] sm:$0xf]  ;;  %v249_v34 = vld [vmem:[%s2323_s28 + $0x110] sm:$0xf] }
  0x24   : > { %212 = vst [vmem:[%s2328_s29 + $0x3c] sm:$0xf] %v211_v15  ;;  %v251_v35 = vld [vmem:[%s2323_s28 + $0x118] sm:$0xf]  ;;  %v253_v36 = vld [vmem:[%s2323_s28 + $0x120] sm:$0xf] }
  0x25   : > { %214 = vst [vmem:[%s2328_s29 + $0x40] sm:$0xf] %v213_v16  ;;  %v255_v37 = vld [vmem:[%s2323_s28 + $0x128] sm:$0xf]  ;;  %v257_v38 = vld [vmem:[%s2323_s28 + $0x130] sm:$0xf] }
  0x26   : > { %216 = vst [vmem:[%s2328_s29 + $0x44] sm:$0xf] %v215_v17  ;;  %v259_v39 = vld [vmem:[%s2323_s28 + $0x138] sm:$0xf]  ;;  %v261_v40 = vld [vmem:[%s2323_s28 + $0x140] sm:$0xf] }
  0x27   : > { %218 = vst [vmem:[%s2328_s29 + $0x48] sm:$0xf] %v217_v18  ;;  %v263_v41 = vld [vmem:[%s2323_s28 + $0x148] sm:$0xf]  ;;  %v265_v42 = vld [vmem:[%s2323_s28 + $0x150] sm:$0xf] }
  0x28   : > { %220 = vst [vmem:[%s2328_s29 + $0x4c] sm:$0xf] %v219_v19  ;;  %v267_v43 = vld [vmem:[%s2323_s28 + $0x158] sm:$0xf]  ;;  %v269_v44 = vld [vmem:[%s2323_s28 + $0x160] sm:$0xf] }
  0x29   : > { %222 = vst [vmem:[%s2328_s29 + $0x50] sm:$0xf] %v221_v20  ;;  %v271_v45 = vld [vmem:[%s2323_s28 + $0x168] sm:$0xf]  ;;  %v273_v46 = vld [vmem:[%s2323_s28 + $0x170] sm:$0xf] }
  0x2a   : > { %224 = vst [vmem:[%s2328_s29 + $0x54] sm:$0xf] %v223_v21  ;;  %v275_v47 = vld [vmem:[%s2323_s28 + $0x178] sm:$0xf]  ;;  %v277_v48 = vld [vmem:[%s2323_s28 + $0x180] sm:$0xf] }
  0x2b   : > { %226 = vst [vmem:[%s2328_s29 + $0x58] sm:$0xf] %v225_v22  ;;  %v279_v49 = vld [vmem:[%s2323_s28 + $0x188] sm:$0xf]  ;;  %v281_v50 = vld [vmem:[%s2323_s28 + $0x190] sm:$0xf] }
  0x2c   : > { %228 = vst [vmem:[%s2328_s29 + $0x5c] sm:$0xf] %v227_v23  ;;  %v283_v51 = vld [vmem:[%s2323_s28 + $0x198] sm:$0xf]  ;;  %v285_v52 = vld [vmem:[%s2323_s28 + $0x1a0] sm:$0xf] }
  0x2d   : > { %230 = vst [vmem:[%s2328_s29 + $0x60] sm:$0xf] %v229_v24  ;;  %v287_v53 = vld [vmem:[%s2323_s28 + $0x1a8] sm:$0xf]  ;;  %v289_v54 = vld [vmem:[%s2323_s28 + $0x1b0] sm:$0xf] }
  0x2e   : > { %232 = vst [vmem:[%s2328_s29 + $0x64] sm:$0xf] %v231_v25  ;;  %v291_v55 = vld [vmem:[%s2323_s28 + $0x1b8] sm:$0xf]  ;;  %v293_v56 = vld [vmem:[%s2323_s28 + $0x1c0] sm:$0xf] }
  0x2f   : > { %234 = vst [vmem:[%s2328_s29 + $0x68] sm:$0xf] %v233_v26  ;;  %v295_v57 = vld [vmem:[%s2323_s28 + $0x1c8] sm:$0xf]  ;;  %v297_v58 = vld [vmem:[%s2323_s28 + $0x1d0] sm:$0xf] }
  0x30   : > { %236 = vst [vmem:[%s2328_s29 + $0x6c] sm:$0xf] %v235_v27  ;;  %v299_v59 = vld [vmem:[%s2323_s28 + $0x1d8] sm:$0xf]  ;;  %v301_v60 = vld [vmem:[%s2323_s28 + $0x1e0] sm:$0xf] }
  0x31   : > { %238 = vst [vmem:[%s2328_s29 + $0x70] sm:$0xf] %v237_v28  ;;  %v303_v61 = vld [vmem:[%s2323_s28 + $0x1e8] sm:$0xf]  ;;  %v305_v62 = vld [vmem:[%s2323_s28 + $0x1f0] sm:$0xf] }
  0x32   : > { %240 = vst [vmem:[%s2328_s29 + $0x74] sm:$0xf] %v239_v29  ;;  %v307_v63 = vld [vmem:[%s2323_s28 + $0x1f8] sm:$0xf]  ;;  %v309_v0 = vld [vmem:[%s2323_s28 + $0x200] sm:$0xf] }
  0x33   : > { %242 = vst [vmem:[%s2328_s29 + $0x78] sm:$0xf] %v241_v30  ;;  %v311_v1 = vld [vmem:[%s2323_s28 + $0x208] sm:$0xf]  ;;  %v313_v2 = vld [vmem:[%s2323_s28 + $0x210] sm:$0xf] }
  0x34   : > { %244 = vst [vmem:[%s2328_s29 + $0x7c] sm:$0xf] %v243_v31  ;;  %v315_v3 = vld [vmem:[%s2323_s28 + $0x218] sm:$0xf]  ;;  %v317_v4 = vld [vmem:[%s2323_s28 + $0x220] sm:$0xf] }
  0x35   : > { %246 = vst [vmem:[%s2328_s29 + $0x80] sm:$0xf] %v245_v32  ;;  %v319_v5 = vld [vmem:[%s2323_s28 + $0x228] sm:$0xf]  ;;  %v321_v6 = vld [vmem:[%s2323_s28 + $0x230] sm:$0xf] }
  0x36   : > { %248 = vst [vmem:[%s2328_s29 + $0x84] sm:$0xf] %v247_v33  ;;  %v323_v7 = vld [vmem:[%s2323_s28 + $0x238] sm:$0xf]  ;;  %v325_v8 = vld [vmem:[%s2323_s28 + $0x240] sm:$0xf] }
  0x37   : > { %250 = vst [vmem:[%s2328_s29 + $0x88] sm:$0xf] %v249_v34  ;;  %v327_v9 = vld [vmem:[%s2323_s28 + $0x248] sm:$0xf]  ;;  %v329_v10 = vld [vmem:[%s2323_s28 + $0x250] sm:$0xf] }
  0x38   : > { %252 = vst [vmem:[%s2328_s29 + $0x8c] sm:$0xf] %v251_v35  ;;  %v331_v11 = vld [vmem:[%s2323_s28 + $0x258] sm:$0xf]  ;;  %v333_v12 = vld [vmem:[%s2323_s28 + $0x260] sm:$0xf] }
  0x39   : > { %254 = vst [vmem:[%s2328_s29 + $0x90] sm:$0xf] %v253_v36  ;;  %v335_v13 = vld [vmem:[%s2323_s28 + $0x268] sm:$0xf]  ;;  %v337_v14 = vld [vmem:[%s2323_s28 + $0x270] sm:$0xf] }
  0x3a   : > { %256 = vst [vmem:[%s2328_s29 + $0x94] sm:$0xf] %v255_v37  ;;  %v339_v15 = vld [vmem:[%s2323_s28 + $0x278] sm:$0xf]  ;;  %v341_v16 = vld [vmem:[%s2323_s28 + $0x280] sm:$0xf] }
  0x3b   : > { %258 = vst [vmem:[%s2328_s29 + $0x98] sm:$0xf] %v257_v38  ;;  %v343_v17 = vld [vmem:[%s2323_s28 + $0x288] sm:$0xf]  ;;  %v345_v18 = vld [vmem:[%s2323_s28 + $0x290] sm:$0xf] }
  0x3c   : > { %260 = vst [vmem:[%s2328_s29 + $0x9c] sm:$0xf] %v259_v39  ;;  %v347_v19 = vld [vmem:[%s2323_s28 + $0x298] sm:$0xf]  ;;  %v349_v20 = vld [vmem:[%s2323_s28 + $0x2a0] sm:$0xf] }
  0x3d   : > { %262 = vst [vmem:[%s2328_s29 + $0xa0] sm:$0xf] %v261_v40  ;;  %v351_v21 = vld [vmem:[%s2323_s28 + $0x2a8] sm:$0xf]  ;;  %v353_v22 = vld [vmem:[%s2323_s28 + $0x2b0] sm:$0xf] }
  0x3e   : > { %264 = vst [vmem:[%s2328_s29 + $0xa4] sm:$0xf] %v263_v41  ;;  %v355_v23 = vld [vmem:[%s2323_s28 + $0x2b8] sm:$0xf]  ;;  %v357_v24 = vld [vmem:[%s2323_s28 + $0x2c0] sm:$0xf] }
  0x3f   : > { %266 = vst [vmem:[%s2328_s29 + $0xa8] sm:$0xf] %v265_v42  ;;  %v359_v25 = vld [vmem:[%s2323_s28 + $0x2c8] sm:$0xf]  ;;  %v361_v26 = vld [vmem:[%s2323_s28 + $0x2d0] sm:$0xf] }
  0x40   : > { %268 = vst [vmem:[%s2328_s29 + $0xac] sm:$0xf] %v267_v43  ;;  %v363_v27 = vld [vmem:[%s2323_s28 + $0x2d8] sm:$0xf]  ;;  %v365_v28 = vld [vmem:[%s2323_s28 + $0x2e0] sm:$0xf] }
  0x41   : > { %270 = vst [vmem:[%s2328_s29 + $0xb0] sm:$0xf] %v269_v44  ;;  %v367_v29 = vld [vmem:[%s2323_s28 + $0x2e8] sm:$0xf]  ;;  %v369_v30 = vld [vmem:[%s2323_s28 + $0x2f0] sm:$0xf] }
  0x42   : > { %272 = vst [vmem:[%s2328_s29 + $0xb4] sm:$0xf] %v271_v45  ;;  %v371_v31 = vld [vmem:[%s2323_s28 + $0x2f8] sm:$0xf]  ;;  %v373_v32 = vld [vmem:[%s2323_s28 + $0x300] sm:$0xf] }
  0x43   : > { %274 = vst [vmem:[%s2328_s29 + $0xb8] sm:$0xf] %v273_v46  ;;  %v375_v33 = vld [vmem:[%s2323_s28 + $0x308] sm:$0xf]  ;;  %v377_v34 = vld [vmem:[%s2323_s28 + $0x310] sm:$0xf] }
  0x44   : > { %276 = vst [vmem:[%s2328_s29 + $0xbc] sm:$0xf] %v275_v47  ;;  %v379_v35 = vld [vmem:[%s2323_s28 + $0x318] sm:$0xf]  ;;  %v381_v36 = vld [vmem:[%s2323_s28 + $0x320] sm:$0xf] }
  0x45   : > { %278 = vst [vmem:[%s2328_s29 + $0xc0] sm:$0xf] %v277_v48  ;;  %v383_v37 = vld [vmem:[%s2323_s28 + $0x328] sm:$0xf]  ;;  %v385_v38 = vld [vmem:[%s2323_s28 + $0x330] sm:$0xf] }
  0x46   : > { %280 = vst [vmem:[%s2328_s29 + $0xc4] sm:$0xf] %v279_v49  ;;  %v387_v39 = vld [vmem:[%s2323_s28 + $0x338] sm:$0xf]  ;;  %v389_v40 = vld [vmem:[%s2323_s28 + $0x340] sm:$0xf] }
  0x47   : > { %282 = vst [vmem:[%s2328_s29 + $0xc8] sm:$0xf] %v281_v50  ;;  %v391_v41 = vld [vmem:[%s2323_s28 + $0x348] sm:$0xf]  ;;  %v393_v42 = vld [vmem:[%s2323_s28 + $0x350] sm:$0xf] }
  0x48   : > { %284 = vst [vmem:[%s2328_s29 + $0xcc] sm:$0xf] %v283_v51  ;;  %v395_v43 = vld [vmem:[%s2323_s28 + $0x358] sm:$0xf]  ;;  %v397_v44 = vld [vmem:[%s2323_s28 + $0x360] sm:$0xf] }
  0x49   : > { %286 = vst [vmem:[%s2328_s29 + $0xd0] sm:$0xf] %v285_v52  ;;  %v399_v45 = vld [vmem:[%s2323_s28 + $0x368] sm:$0xf]  ;;  %v401_v46 = vld [vmem:[%s2323_s28 + $0x370] sm:$0xf] }
  0x4a   : > { %288 = vst [vmem:[%s2328_s29 + $0xd4] sm:$0xf] %v287_v53  ;;  %v403_v47 = vld [vmem:[%s2323_s28 + $0x378] sm:$0xf]  ;;  %v405_v48 = vld [vmem:[%s2323_s28 + $0x380] sm:$0xf] }
  0x4b   : > { %290 = vst [vmem:[%s2328_s29 + $0xd8] sm:$0xf] %v289_v54  ;;  %v407_v49 = vld [vmem:[%s2323_s28 + $0x388] sm:$0xf]  ;;  %v409_v50 = vld [vmem:[%s2323_s28 + $0x390] sm:$0xf] }
  0x4c   : > { %292 = vst [vmem:[%s2328_s29 + $0xdc] sm:$0xf] %v291_v55  ;;  %v411_v51 = vld [vmem:[%s2323_s28 + $0x398] sm:$0xf]  ;;  %v413_v52 = vld [vmem:[%s2323_s28 + $0x3a0] sm:$0xf] }
  0x4d   : > { %294 = vst [vmem:[%s2328_s29 + $0xe0] sm:$0xf] %v293_v56  ;;  %v415_v53 = vld [vmem:[%s2323_s28 + $0x3a8] sm:$0xf]  ;;  %v417_v54 = vld [vmem:[%s2323_s28 + $0x3b0] sm:$0xf] }
  0x4e   : > { %296 = vst [vmem:[%s2328_s29 + $0xe4] sm:$0xf] %v295_v57  ;;  %v419_v55 = vld [vmem:[%s2323_s28 + $0x3b8] sm:$0xf]  ;;  %v421_v56 = vld [vmem:[%s2323_s28 + $0x3c0] sm:$0xf] }
  0x4f   : > { %298 = vst [vmem:[%s2328_s29 + $0xe8] sm:$0xf] %v297_v58  ;;  %v423_v57 = vld [vmem:[%s2323_s28 + $0x3c8] sm:$0xf]  ;;  %v425_v58 = vld [vmem:[%s2323_s28 + $0x3d0] sm:$0xf] }
  0x50   : > { %300 = vst [vmem:[%s2328_s29 + $0xec] sm:$0xf] %v299_v59  ;;  %v427_v59 = vld [vmem:[%s2323_s28 + $0x3d8] sm:$0xf] }
  0x51   : > { %302 = vst [vmem:[%s2328_s29 + $0xf0] sm:$0xf] %v301_v60  ;;  %v429_v60 = vld [vmem:[%s2323_s28 + $0x3e0] sm:$0xf] }
  0x52   : > { %304 = vst [vmem:[%s2328_s29 + $0xf4] sm:$0xf] %v303_v61  ;;  %v431_v61 = vld [vmem:[%s2323_s28 + $0x3e8] sm:$0xf] }
  0x53   : > { %306 = vst [vmem:[%s2328_s29 + $0xf8] sm:$0xf] %v305_v62  ;;  %v433_v62 = vld [vmem:[%s2323_s28 + $0x3f0] sm:$0xf] }
  0x54   : > { %308 = vst [vmem:[%s2328_s29 + $0xfc] sm:$0xf] %v307_v63  ;;  %v435_v63 = vld [vmem:[%s2323_s28 + $0x3f8] sm:$0xf] }
  0x55   : > { %310 = vst [vmem:[%s2328_s29 + $0x100] sm:$0xf] %v309_v0  ;;  %v437_v0 = vld [vmem:[%s2323_s28 + $0x400] sm:$0xf] }
  0x56   : > { %312 = vst [vmem:[%s2328_s29 + $0x104] sm:$0xf] %v311_v1  ;;  %v439_v1 = vld [vmem:[%s2323_s28 + $0x408] sm:$0xf] }
  0x57   : > { %314 = vst [vmem:[%s2328_s29 + $0x108] sm:$0xf] %v313_v2  ;;  %v441_v2 = vld [vmem:[%s2323_s28 + $0x410] sm:$0xf] }
  0x58   : > { %316 = vst [vmem:[%s2328_s29 + $0x10c] sm:$0xf] %v315_v3  ;;  %v443_v3 = vld [vmem:[%s2323_s28 + $0x418] sm:$0xf] }
  0x59   : > { %318 = vst [vmem:[%s2328_s29 + $0x110] sm:$0xf] %v317_v4  ;;  %v445_v4 = vld [vmem:[%s2323_s28 + $0x420] sm:$0xf] }
  0x5a   : > { %320 = vst [vmem:[%s2328_s29 + $0x114] sm:$0xf] %v319_v5  ;;  %v447_v5 = vld [vmem:[%s2323_s28 + $0x428] sm:$0xf] }
  0x5b   : > { %322 = vst [vmem:[%s2328_s29 + $0x118] sm:$0xf] %v321_v6  ;;  %v449_v6 = vld [vmem:[%s2323_s28 + $0x430] sm:$0xf] }
  0x5c   : > { %324 = vst [vmem:[%s2328_s29 + $0x11c] sm:$0xf] %v323_v7  ;;  %v451_v7 = vld [vmem:[%s2323_s28 + $0x438] sm:$0xf] }
  0x5d   : > { %326 = vst [vmem:[%s2328_s29 + $0x120] sm:$0xf] %v325_v8  ;;  %v453_v8 = vld [vmem:[%s2323_s28 + $0x440] sm:$0xf] }
  0x5e   : > { %328 = vst [vmem:[%s2328_s29 + $0x124] sm:$0xf] %v327_v9  ;;  %v455_v9 = vld [vmem:[%s2323_s28 + $0x448] sm:$0xf] }
  0x5f   : > { %330 = vst [vmem:[%s2328_s29 + $0x128] sm:$0xf] %v329_v10  ;;  %v457_v10 = vld [vmem:[%s2323_s28 + $0x450] sm:$0xf] }
  0x60   : > { %332 = vst [vmem:[%s2328_s29 + $0x12c] sm:$0xf] %v331_v11  ;;  %v459_v11 = vld [vmem:[%s2323_s28 + $0x458] sm:$0xf] }
  0x61   : > { %334 = vst [vmem:[%s2328_s29 + $0x130] sm:$0xf] %v333_v12  ;;  %v461_v12 = vld [vmem:[%s2323_s28 + $0x460] sm:$0xf] }
  0x62   : > { %336 = vst [vmem:[%s2328_s29 + $0x134] sm:$0xf] %v335_v13  ;;  %v463_v13 = vld [vmem:[%s2323_s28 + $0x468] sm:$0xf] }
  0x63   : > { %338 = vst [vmem:[%s2328_s29 + $0x138] sm:$0xf] %v337_v14  ;;  %v465_v14 = vld [vmem:[%s2323_s28 + $0x470] sm:$0xf] }
  0x64   : > { %340 = vst [vmem:[%s2328_s29 + $0x13c] sm:$0xf] %v339_v15  ;;  %v467_v15 = vld [vmem:[%s2323_s28 + $0x478] sm:$0xf] }
  0x65   : > { %342 = vst [vmem:[%s2328_s29 + $0x140] sm:$0xf] %v341_v16 }
  0x66   : > { %344 = vst [vmem:[%s2328_s29 + $0x144] sm:$0xf] %v343_v17 }
  0x67   : > { %346 = vst [vmem:[%s2328_s29 + $0x148] sm:$0xf] %v345_v18 }
  0x68   : > { %348 = vst [vmem:[%s2328_s29 + $0x14c] sm:$0xf] %v347_v19 }
  0x69   : > { %350 = vst [vmem:[%s2328_s29 + $0x150] sm:$0xf] %v349_v20 }
  0x6a   : > { %352 = vst [vmem:[%s2328_s29 + $0x154] sm:$0xf] %v351_v21 }
  0x6b   : > { %354 = vst [vmem:[%s2328_s29 + $0x158] sm:$0xf] %v353_v22 }
  0x6c   : > { %356 = vst [vmem:[%s2328_s29 + $0x15c] sm:$0xf] %v355_v23 }
  0x6d   : > { %358 = vst [vmem:[%s2328_s29 + $0x160] sm:$0xf] %v357_v24 }
  0x6e   : > { %360 = vst [vmem:[%s2328_s29 + $0x164] sm:$0xf] %v359_v25 }
  0x6f   : > { %362 = vst [vmem:[%s2328_s29 + $0x168] sm:$0xf] %v361_v26 }
  0x70   : > { %364 = vst [vmem:[%s2328_s29 + $0x16c] sm:$0xf] %v363_v27 }
  0x71   : > { %366 = vst [vmem:[%s2328_s29 + $0x170] sm:$0xf] %v365_v28 }
  0x72   : > { %368 = vst [vmem:[%s2328_s29 + $0x174] sm:$0xf] %v367_v29 }
  0x73   : > { %370 = vst [vmem:[%s2328_s29 + $0x178] sm:$0xf] %v369_v30 }
  0x74   : > { %372 = vst [vmem:[%s2328_s29 + $0x17c] sm:$0xf] %v371_v31 }
  0x75   : > { %374 = vst [vmem:[%s2328_s29 + $0x180] sm:$0xf] %v373_v32 }
  0x76   : > { %376 = vst [vmem:[%s2328_s29 + $0x184] sm:$0xf] %v375_v33 }
  0x77   : > { %378 = vst [vmem:[%s2328_s29 + $0x188] sm:$0xf] %v377_v34 }
  0x78   : > { %380 = vst [vmem:[%s2328_s29 + $0x18c] sm:$0xf] %v379_v35 }
  0x79   : > { %382 = vst [vmem:[%s2328_s29 + $0x190] sm:$0xf] %v381_v36 }
  0x7a   : > { %384 = vst [vmem:[%s2328_s29 + $0x194] sm:$0xf] %v383_v37 }
  0x7b   : > { %386 = vst [vmem:[%s2328_s29 + $0x198] sm:$0xf] %v385_v38 }
  0x7c   : > { %388 = vst [vmem:[%s2328_s29 + $0x19c] sm:$0xf] %v387_v39 }
  0x7d   : > { %390 = vst [vmem:[%s2328_s29 + $0x1a0] sm:$0xf] %v389_v40 }
  0x7e   : > { %392 = vst [vmem:[%s2328_s29 + $0x1a4] sm:$0xf] %v391_v41 }
  0x7f   : > { %394 = vst [vmem:[%s2328_s29 + $0x1a8] sm:$0xf] %v393_v42 }
  0x80   : > { %396 = vst [vmem:[%s2328_s29 + $0x1ac] sm:$0xf] %v395_v43 }
  0x81   : > { %398 = vst [vmem:[%s2328_s29 + $0x1b0] sm:$0xf] %v397_v44 }
  0x82   : > { %400 = vst [vmem:[%s2328_s29 + $0x1b4] sm:$0xf] %v399_v45 }
  0x83   : > { %402 = vst [vmem:[%s2328_s29 + $0x1b8] sm:$0xf] %v401_v46 }
  0x84   : > { %404 = vst [vmem:[%s2328_s29 + $0x1bc] sm:$0xf] %v403_v47 }
  0x85   : > { %406 = vst [vmem:[%s2328_s29 + $0x1c0] sm:$0xf] %v405_v48 }
  0x86   : > { %408 = vst [vmem:[%s2328_s29 + $0x1c4] sm:$0xf] %v407_v49 }
  0x87   : > { %410 = vst [vmem:[%s2328_s29 + $0x1c8] sm:$0xf] %v409_v50 }
  0x88   : > { %412 = vst [vmem:[%s2328_s29 + $0x1cc] sm:$0xf] %v411_v51 }
  0x89   : > { %414 = vst [vmem:[%s2328_s29 + $0x1d0] sm:$0xf] %v413_v52 }
  0x8a   : > { %416 = vst [vmem:[%s2328_s29 + $0x1d4] sm:$0xf] %v415_v53 }
  0x8b   : > { %418 = vst [vmem:[%s2328_s29 + $0x1d8] sm:$0xf] %v417_v54 }
  0x8c   : > { %420 = vst [vmem:[%s2328_s29 + $0x1dc] sm:$0xf] %v419_v55 }
  0x8d   : > { %422 = vst [vmem:[%s2328_s29 + $0x1e0] sm:$0xf] %v421_v56 }
  0x8e   : > { %424 = vst [vmem:[%s2328_s29 + $0x1e4] sm:$0xf] %v423_v57 }
  0x8f   : > { %426 = vst [vmem:[%s2328_s29 + $0x1e8] sm:$0xf] %v425_v58 }
  0x90   : > { %428 = vst [vmem:[%s2328_s29 + $0x1ec] sm:$0xf] %v427_v59 }
  0x91   : > { %430 = vst [vmem:[%s2328_s29 + $0x1f0] sm:$0xf] %v429_v60 }
  0x92   : > { %432 = vst [vmem:[%s2328_s29 + $0x1f4] sm:$0xf] %v431_v61 }
  0x93   : > { %434 = vst [vmem:[%s2328_s29 + $0x1f8] sm:$0xf] %v433_v62 }
  0x94   : > { %436 = vst [vmem:[%s2328_s29 + $0x1fc] sm:$0xf] %v435_v63 }
  0x95   : > { %438 = vst [vmem:[%s2328_s29 + $0x200] sm:$0xf] %v437_v0 }
  0x96   : > { %440 = vst [vmem:[%s2328_s29 + $0x204] sm:$0xf] %v439_v1 }
  0x97   : > { %442 = vst [vmem:[%s2328_s29 + $0x208] sm:$0xf] %v441_v2 }
  0x98   : > { %444 = vst [vmem:[%s2328_s29 + $0x20c] sm:$0xf] %v443_v3 }
  0x99   : > { %446 = vst [vmem:[%s2328_s29 + $0x210] sm:$0xf] %v445_v4 }
  0x9a   : > { %448 = vst [vmem:[%s2328_s29 + $0x214] sm:$0xf] %v447_v5 }
  0x9b   : > { %450 = vst [vmem:[%s2328_s29 + $0x218] sm:$0xf] %v449_v6 }
  0x9c   : > { %452 = vst [vmem:[%s2328_s29 + $0x21c] sm:$0xf] %v451_v7 }
  0x9d   : > { %454 = vst [vmem:[%s2328_s29 + $0x220] sm:$0xf] %v453_v8 }
  0x9e   : > { %456 = vst [vmem:[%s2328_s29 + $0x224] sm:$0xf] %v455_v9 }
  0x9f   : > { %458 = vst [vmem:[%s2328_s29 + $0x228] sm:$0xf] %v457_v10 }
  0xa0   : > { %460 = vst [vmem:[%s2328_s29 + $0x22c] sm:$0xf] %v459_v11 }
  0xa1   : > { %462 = vst [vmem:[%s2328_s29 + $0x230] sm:$0xf] %v461_v12 }
  0xa2   : > { %464 = vst [vmem:[%s2328_s29 + $0x234] sm:$0xf] %v463_v13 }
  0xa3   : > { %466 = vst [vmem:[%s2328_s29 + $0x238] sm:$0xf] %v465_v14 }
  0xa4   : > { %468 = vst [vmem:[%s2328_s29 + $0x23c] sm:$0xf] %v467_v15 }
  0xa5 PF: > { %p1756_p8 = scmp.ge.s32.totalorder %s2253_s16, 1  ;;  %p785_p9 = scmp.lt.s32.totalorder %s2253_s16, 3 }
  0xa7   : > { %p786_p10 = pnand %p1756_p8, %p785_p9 }
  0xa8   : > { %s792_s30 = sand.u32 (!%p786_p10), 1, %s2237_s12   ;;  %p830_p11 = scmp.lt.s32.totalorder (!%p786_p10), %s2245_s14, 1 }
  0xa9   : > { %789 = sbr.rel (%p786_p10) target bundleno = 420 (0x1a4), region = 69 }
  0xaa   : > { %s2173_s4 = smul.u32 (!%p786_p10), 576, %s792_s30 }
  0xac   : > { %s2620_s5 = scalar_lea.vmem (!%p786_p10), [#allocation2], %s2173_s4 }
  0xae   : > { %v2102_v16 = vld [vmem:[%s2620_s5 + $0x38] sm:$0xff]  ;;  %v2101_v20 = vld [vmem:[%s2620_s5 + $0x30] sm:$0xff]  ;;  %v2100_v24 = vld [vmem:[%s2620_s5 + $0x28] sm:$0xff]  ;;  %s2644_s6 = scalar_select %p830_p11, %s2245_s14, 1 }
  0xaf   : > { %v2118_v17 = vld [vmem:[%s2620_s5 + $0xb8] sm:$0xff]  ;;  %1470 = vmatpush.bf16.msra.mxu0 %v2102_v16  ;;  %v2117_v21 = vld [vmem:[%s2620_s5 + $0xb0] sm:$0xff]  ;;  %v2116_v25 = vld [vmem:[%s2620_s5 + $0xa8] sm:$0xff] }
  0xb0   : > { %v2110_v18 = vld [vmem:[%s2620_s5 + $0x78] sm:$0xff]  ;;  %1498 = vmatpush.bf16.msra.mxu2 %v2118_v17  ;;  %v2109_v22 = vld [vmem:[%s2620_s5 + $0x70] sm:$0xff]  ;;  %v2108_v26 = vld [vmem:[%s2620_s5 + $0x68] sm:$0xff]  ;;  %s832_s9 = scalar_lea.vmem %s2786_s2, %s2644_s6 }
  0xb1   : > { %v2126_v19 = vld [vmem:[%s2620_s5 + $0xf8] sm:$0xff]  ;;  %1484 = vmatpush.bf16.msra.mxu1 %v2110_v18  ;;  %v2125_v23 = vld [vmem:[%s2620_s5 + $0xf0] sm:$0xff]  ;;  %v2124_v27 = vld [vmem:[%s2620_s5 + $0xe8] sm:$0xff] }
  0xb2   : > { %1512 = vmatpush.bf16.msra.mxu3 %v2126_v19  ;;  %v2099_v28 = vld [vmem:[%s2620_s5 + $0x20] sm:$0xff]  ;;  %v2098_v32 = vld [vmem:[%s2620_s5 + $0x18] sm:$0xff]  ;;  %v2097_v36 = vld [vmem:[%s2620_s5 + $0x10] sm:$0xff] }
  0xb3   : > { %1471 = vmatpush.bf16.msra.mxu0 %v2101_v20  ;;  %v2115_v29 = vld [vmem:[%s2620_s5 + $0xa0] sm:$0xff]  ;;  %v2114_v33 = vld [vmem:[%s2620_s5 + $0x98] sm:$0xff]  ;;  %v2113_v37 = vld [vmem:[%s2620_s5 + $0x90] sm:$0xff] }
  0xb4   : > { %1499 = vmatpush.bf16.msra.mxu2 %v2117_v21  ;;  %v2107_v30 = vld [vmem:[%s2620_s5 + $0x60] sm:$0xff]  ;;  %v2106_v34 = vld [vmem:[%s2620_s5 + $0x58] sm:$0xff]  ;;  %v2105_v38 = vld [vmem:[%s2620_s5 + $0x50] sm:$0xff] }
  0xb5   : > { %1485 = vmatpush.bf16.msra.mxu1 %v2109_v22  ;;  %v2123_v31 = vld [vmem:[%s2620_s5 + $0xe0] sm:$0xff]  ;;  %v2122_v35 = vld [vmem:[%s2620_s5 + $0xd8] sm:$0xff]  ;;  %v2121_v39 = vld [vmem:[%s2620_s5 + $0xd0] sm:$0xff] }
  0xb6   : > { %1513 = vmatpush.bf16.msra.mxu3 %v2125_v23  ;;  %v2096_v40 = vld [vmem:[%s2620_s5 + $0x8] sm:$0xff]  ;;  %v2095_v44 = vld [vmem:[%s2620_s5] sm:$0xff]  ;;  %v2134_v46 = vld [vmem:[%s2620_s5 + $0x138] sm:$0xff] }
  0xb7   : > { %1472 = vmatpush.bf16.msra.mxu0 %v2100_v24  ;;  %v2112_v41 = vld [vmem:[%s2620_s5 + $0x88] sm:$0xff]  ;;  %v2111_v45 = vld [vmem:[%s2620_s5 + $0x80] sm:$0xff]  ;;  %v2150_v47 = vld [vmem:[%s2620_s5 + $0x1b8] sm:$0xff] }
  0xb8   : > { %1500 = vmatpush.bf16.msra.mxu2 %v2116_v25  ;;  %v2104_v42 = vld [vmem:[%s2620_s5 + $0x48] sm:$0xff]  ;;  %v2103_v48 = vld [vmem:[%s2620_s5 + $0x40] sm:$0xff]  ;;  %v2142_v54 = vld [vmem:[%s2620_s5 + $0x178] sm:$0xff] }
  0xb9   : > { %1486 = vmatpush.bf16.msra.mxu1 %v2108_v26  ;;  %v2120_v43 = vld [vmem:[%s2620_s5 + $0xc8] sm:$0xff]  ;;  %v2119_v49 = vld [vmem:[%s2620_s5 + $0xc0] sm:$0xff]  ;;  %v2158_v55 = vld [vmem:[%s2620_s5 + $0x1f8] sm:$0xff] }
  0xba   : > { %1514 = vmatpush.bf16.msra.mxu3 %v2124_v27  ;;  %v1760_v50 = vld [vmem:[%s2784_s0] sm:$0xf]  ;;  %v2090_v51 = vld [vmem:[%s2784_s0 + $0x20] sm:$0xf0]  ;;  %v1768_v52 = vld [vmem:[%s2784_s0 + $0x8] sm:$0xf] }
  0xbb   : > { %1473 = vmatpush.bf16.msra.mxu0 %v2099_v28  ;;  %v2091_v53 = vld [vmem:[%s2784_s0 + $0x28] sm:$0xf0]  ;;  %v2086_v56 = vld [vmem:[%s2784_s0 + $0x4] sm:$0xf]  ;;  %v1762_v57 = vld [vmem:[%s2784_s0 + $0x24] sm:$0xf0]  ;;  %v1761_v60 = vor.u32 %v2090_v51, %v1760_v50 }
  0xbc   : > { %1501 = vmatpush.bf16.msra.mxu2 %v2115_v29  ;;  %v2087_v58 = vld [vmem:[%s2784_s0 + $0xc] sm:$0xf]  ;;  %v1770_v59 = vld [vmem:[%s2784_s0 + $0x2c] sm:$0xf0]  ;;  %v1769_v61 = vor.u32 %v2091_v53, %v1768_v52  ;;  %v1765_v0 = vor.u32 %v2086_v56, %v1762_v57  ;;  %v2131_v8 = vld [vmem:[%s2620_s5 + $0x120] sm:$0xff] }
  0xbd   : > { %1487 = vmatpush.bf16.msra.mxu1 %v2107_v30  ;;  %v2133_v62 = vld [vmem:[%s2620_s5 + $0x130] sm:$0xff]  ;;  %v1773_v1 = vor.u32 %v2087_v58, %v1770_v59  ;;  %v2132_v4 = vld [vmem:[%s2620_s5 + $0x128] sm:$0xff]  ;;  %v2147_v9 = vld [vmem:[%s2620_s5 + $0x1a0] sm:$0xff] }
  0xbe   : > { %1515 = vmatpush.bf16.msra.mxu3 %v2123_v31  ;;  %v2149_v63 = vld [vmem:[%s2620_s5 + $0x1b0] sm:$0xff]  ;;  %v2148_v5 = vld [vmem:[%s2620_s5 + $0x1a8] sm:$0xff]  ;;  %v2139_v10 = vld [vmem:[%s2620_s5 + $0x160] sm:$0xff] }
  0xbf   : > { %1474 = vmatpush.bf16.msra.mxu0 %v2098_v32  ;;  %v2141_v2 = vld [vmem:[%s2620_s5 + $0x170] sm:$0xff]  ;;  %v2140_v6 = vld [vmem:[%s2620_s5 + $0x168] sm:$0xff]  ;;  %v2155_v11 = vld [vmem:[%s2620_s5 + $0x1e0] sm:$0xff] }
  0xc0   : > { %1502 = vmatpush.bf16.msra.mxu2 %v2114_v33  ;;  %v2157_v3 = vld [vmem:[%s2620_s5 + $0x1f0] sm:$0xff]  ;;  %v2156_v7 = vld [vmem:[%s2620_s5 + $0x1e8] sm:$0xff]  ;;  %v2130_v12 = vld [vmem:[%s2620_s5 + $0x118] sm:$0xff] }
  0xc1   : > { %1488 = vmatpush.bf16.msra.mxu1 %v2106_v34  ;;  %v2146_v13 = vld [vmem:[%s2620_s5 + $0x198] sm:$0xff]  ;;  %v2129_v16 = vld [vmem:[%s2620_s5 + $0x110] sm:$0xff]  ;;  %v2128_v20 = vld [vmem:[%s2620_s5 + $0x108] sm:$0xff] }
  0xc2   : > { %1516 = vmatpush.bf16.msra.mxu3 %v2122_v35  ;;  %v2138_v14 = vld [vmem:[%s2620_s5 + $0x158] sm:$0xff]  ;;  %v2145_v17 = vld [vmem:[%s2620_s5 + $0x190] sm:$0xff]  ;;  %v2144_v21 = vld [vmem:[%s2620_s5 + $0x188] sm:$0xff] }
  0xc3   : > { %1475 = vmatpush.bf16.msra.mxu0 %v2097_v36  ;;  %v2154_v15 = vld [vmem:[%s2620_s5 + $0x1d8] sm:$0xff]  ;;  %v2137_v18 = vld [vmem:[%s2620_s5 + $0x150] sm:$0xff]  ;;  %v2136_v22 = vld [vmem:[%s2620_s5 + $0x148] sm:$0xff] }
  0xc4   : > { %1503 = vmatpush.bf16.msra.mxu2 %v2113_v37  ;;  %v2153_v19 = vld [vmem:[%s2620_s5 + $0x1d0] sm:$0xff]  ;;  %v2152_v23 = vld [vmem:[%s2620_s5 + $0x1c8] sm:$0xff]  ;;  %v2127_v24 = vld [vmem:[%s2620_s5 + $0x100] sm:$0xff] }
  0xc5   : > { %1489 = vmatpush.bf16.msra.mxu1 %v2105_v38  ;;  %v2143_v25 = vld [vmem:[%s2620_s5 + $0x180] sm:$0xff]  ;;  %v2166_v26 = vld [vmem:[%s2620_s5 + $0x238] sm:$0xff]  ;;  %v1776_v27 = vld [vmem:[%s2784_s0 + $0x10] sm:$0xf] }
  0xc6   : > { %1517 = vmatpush.bf16.msra.mxu3 %v2121_v39  ;;  %v2092_v28 = vld [vmem:[%s2784_s0 + $0x30] sm:$0xf0]  ;;  %v1784_v29 = vld [vmem:[%s2784_s0 + $0x18] sm:$0xf]  ;;  %v2093_v30 = vld [vmem:[%s2784_s0 + $0x38] sm:$0xf0] }
  0xc7   : > { %1476 = vmatpush.bf16.msra.mxu0 %v2096_v40  ;;  %v2135_v31 = vld [vmem:[%s2620_s5 + $0x140] sm:$0xff]  ;;  %v2088_v33 = vld [vmem:[%s2784_s0 + $0x14] sm:$0xf]  ;;  %v1778_v34 = vld [vmem:[%s2784_s0 + $0x34] sm:$0xf0]  ;;  %v1777_v37 = vor.u32 %v2092_v28, %v1776_v27  ;;  %v1785_v38 = vor.u32 %v2093_v30, %v1784_v29 }
  0xc8   : > { %1504 = vmatpush.bf16.msra.mxu2 %v2112_v41  ;;  %v2151_v32 = vld [vmem:[%s2620_s5 + $0x1c0] sm:$0xff]  ;;  %v2089_v35 = vld [vmem:[%s2784_s0 + $0x1c] sm:$0xf]  ;;  %v1781_v39 = vor.u32 %v2088_v33, %v1778_v34  ;;  %v2165_v41 = vld [vmem:[%s2620_s5 + $0x230] sm:$0xff] }
  0xc9   : > { %1490 = vmatpush.bf16.msra.mxu1 %v2104_v42  ;;  %v1786_v36 = vld [vmem:[%s2784_s0 + $0x3c] sm:$0xf0]  ;;  %v2164_v42 = vld [vmem:[%s2620_s5 + $0x228] sm:$0xff] }
  0xca   : > { %1518 = vmatpush.bf16.msra.mxu3 %v2120_v43  ;;  %v1789_v40 = vor.u32 %v2089_v35, %v1786_v36  ;;  %v2163_v43 = vld [vmem:[%s2620_s5 + $0x220] sm:$0xff] }
  0xcb   : > { %1477 = vmatpush.bf16.msra.mxu0 %v2095_v44  ;;  %v2162_v44 = vld [vmem:[%s2620_s5 + $0x218] sm:$0xff] }
  0xcc   : > { %1505 = vmatpush.bf16.msra.mxu2 %v2111_v45  ;;  %v2161_v45 = vld [vmem:[%s2620_s5 + $0x210] sm:$0xff] }
  0xcd   : > { %1491 = vmatpush.bf16.msra.mxu1 %v2103_v48  ;;  %v1792_v48 = vld [vmem:[%s2784_s0 + $0x20] sm:$0xf] }
  0xce   : > { %1519 = vmatpush.bf16.msra.mxu3 %v2119_v49  ;;  %1478 = vmatmul.bf16.vlgmr.msra.gmra.mxu0 %v1761_v60  ;;  %v2094_v49 = vld [vmem:[%s2784_s0 + $0x40] sm:$0xf0] }
  0xcf   : > { %1526 = vmatpush.bf16.msrb.mxu0 %v2134_v46  ;;  %1506 = vmatmul.bf16.vlgmr.msra.gmra.mxu2 %v1769_v61  ;;  %v2160_v46 = vld [vmem:[%s2620_s5 + $0x208] sm:$0xff]  ;;  %v1793_v50 = vor.u32 %v2094_v49, %v1792_v48 }
  0xd0   : > { %1554 = vmatpush.bf16.msrb.mxu2 %v2150_v47  ;;  %1492 = vmatmul.bf16.vlgmr.msra.gmra.mxu1 %v1765_v0  ;;  %v2159_v47 = vld [vmem:[%s2620_s5 + $0x200] sm:$0xff]  ;;  %s1757_s5 = sshll.u32 %s792_s30, 3 }
  0xd1   : > { %1540 = vmatpush.bf16.msrb.mxu1 %v2142_v54  ;;  %1520 = vmatmul.bf16.vlgmr.msra.gmra.mxu3 %v1773_v1  ;;  %s822_s6 = scalar_lea.vmem [#allocation3], %s1757_s5 }
  0xd2   : > { %1568 = vmatpush.bf16.msrb.mxu3 %v2158_v55  ;;  %v2214_v55 = vld [vmem:[%s832_s9] ss:$0 sm:$0xff]  ;;  %s2083_s9 = sshll.u32 (%p2310_p6), %s2245_s14, 2 }
  0xd3   : > { %1527 = vmatpush.bf16.msrb.mxu0 %v2133_v62  ;;  %s1613_s28 = scalar_lea.vmem (%p2310_p6), %s2787_s3, %s2083_s9 }
  0xd4   : > { %1555 = vmatpush.bf16.msrb.mxu2 %v2149_v63 }
  0xd5   : > { %1541 = vmatpush.bf16.msrb.mxu1 %v2141_v2 }
  0xd6   : > { %1569 = vmatpush.bf16.msrb.mxu3 %v2157_v3 }
  0xd7   : > { %1528 = vmatpush.bf16.msrb.mxu0 %v2132_v4 }
  0xd8   : > { %1556 = vmatpush.bf16.msrb.mxu2 %v2148_v5 }
  0xd9   : > { %1542 = vmatpush.bf16.msrb.mxu1 %v2140_v6 }
  0xda   : > { %1570 = vmatpush.bf16.msrb.mxu3 %v2156_v7 }
  0xdb   : > { %1529 = vmatpush.bf16.msrb.mxu0 %v2131_v8 }
  0xdc   : > { %1557 = vmatpush.bf16.msrb.mxu2 %v2147_v9 }
  0xdd   : > { %1543 = vmatpush.bf16.msrb.mxu1 %v2139_v10 }
  0xde   : > { %1571 = vmatpush.bf16.msrb.mxu3 %v2155_v11 }
  0xdf   : > { %1530 = vmatpush.bf16.msrb.mxu0 %v2130_v12 }
  0xe0   : > { %1558 = vmatpush.bf16.msrb.mxu2 %v2146_v13 }
  0xe1   : > { %1544 = vmatpush.bf16.msrb.mxu1 %v2138_v14 }
  0xe2   : > { %1572 = vmatpush.bf16.msrb.mxu3 %v2154_v15 }
  0xe3   : > { %1531 = vmatpush.bf16.msrb.mxu0 %v2129_v16 }
  0xe4   : > { %1559 = vmatpush.bf16.msrb.mxu2 %v2145_v17 }
  0xe5   : > { %1545 = vmatpush.bf16.msrb.mxu1 %v2137_v18 }
  0xe6   : > { %1573 = vmatpush.bf16.msrb.mxu3 %v2153_v19 }
  0xe7   : > { %1532 = vmatpush.bf16.msrb.mxu0 %v2128_v20 }
  0xe8   : > { %1560 = vmatpush.bf16.msrb.mxu2 %v2144_v21 }
  0xe9   : > { %1546 = vmatpush.bf16.msrb.mxu1 %v2136_v22 }
  0xea   : > { %1574 = vmatpush.bf16.msrb.mxu3 %v2152_v23 }
  0xeb   : > { %1533 = vmatpush.bf16.msrb.mxu0 %v2127_v24 }
  0xec   : > { %1561 = vmatpush.bf16.msrb.mxu2 %v2143_v25 }
  0xed   : > { %1547 = vmatpush.bf16.msrb.mxu1 %v2135_v31 }
  0xee   : > { %1575 = vmatpush.bf16.msrb.mxu3 %v2151_v32  ;;  %1534 = vmatmul.bf16.vlgmr.msrb.gmra.mxu0 %v1777_v37 }
  0xef   : > { %1582 = vmatpush.bf16.msra.mxu0 %v2166_v26  ;;  %1562 = vmatmul.bf16.vlgmr.msrb.gmra.mxu2 %v1785_v38 }
  0xf0   : > { %1548 = vmatmul.bf16.vlgmr.msrb.gmra.mxu1 %v1781_v39 }
  0xf1   : > { %1576 = vmatmul.bf16.vlgmr.msrb.gmra.mxu3 %v1789_v40 }
  0xf3   : > { %1583 = vmatpush.bf16.msra.mxu0 %v2165_v41 }
  0xf7   : > { %1584 = vmatpush.bf16.msra.mxu0 %v2164_v42 }
  0xfb   : > { %1585 = vmatpush.bf16.msra.mxu0 %v2163_v43 }
  0xff   : > { %1586 = vmatpush.bf16.msra.mxu0 %v2162_v44 }
 0x103   : > { %1587 = vmatpush.bf16.msra.mxu0 %v2161_v45 }
 0x107   : > { %1588 = vmatpush.bf16.msra.mxu0 %v2160_v46 }
 0x10b   : > { %1589 = vmatpush.bf16.msra.mxu0 %v2159_v47 }
 0x10e   : > { %1590 = vmatmul.bf16.vlgmr.msra.gmra.mxu0 %v1793_v50 }
 0x14b   : > { %v1479_v51 = vpop.f32.mrf.mxu0 }
 0x14c   : > { %v1480_v57 = vadd.f32 %v2214_v55, %v1479_v51 }
 0x14d   : > { %v1493_v52 = vpop.f32.mrf.mxu1 }
 0x14e   : > { %v1494_v60 = vadd.f32 %v1493_v52, %v1480_v57 }
 0x152   : > { %v1507_v53 = vpop.f32.mrf.mxu2 }
 0x153   : > { %v1481_v54 = vpop.f32.mrf.mxu0  ;;  %v1508_v0 = vadd.f32 %v1507_v53, %v1494_v60 }
 0x154   : > { %v1521_v56 = vpop.f32.mrf.mxu3  ;;  %v1482_v62 = vadd.f32 %v2214_v55, %v1481_v54 }
 0x155   : > { %v1495_v58 = vpop.f32.mrf.mxu1  ;;  %v1522_v3 = vadd.f32 %v1521_v56, %v1508_v0 }
 0x156   : > { %v1496_v1 = vadd.f32 %v1495_v58, %v1482_v62 }
 0x15a   : > { %v1509_v59 = vpop.f32.mrf.mxu2 }
 0x15b   : > { %v1510_v5 = vadd.f32 %v1509_v59, %v1496_v1 }
 0x15c   : > { %v1523_v63 = vpop.f32.mrf.mxu3 }
 0x15d   : > { %v1524_v9 = vadd.f32 %v1523_v63, %v1510_v5 }
 0x16b   : > { %v1535_v61 = vpop.f32.mrf.mxu0 }
 0x16c   : > { %v1536_v7 = vadd.f32 %v1535_v61, %v1522_v3 }
 0x16d   : > { %v1549_v2 = vpop.f32.mrf.mxu1 }
 0x16e   : > { %v1550_v10 = vadd.f32 %v1549_v2, %v1536_v7 }
 0x172   : > { %v1563_v4 = vpop.f32.mrf.mxu2 }
 0x173   : > { %v1537_v6 = vpop.f32.mrf.mxu0  ;;  %v1564_v15 = vadd.f32 %v1563_v4, %v1550_v10 }
 0x174   : > { %v1577_v8 = vpop.f32.mrf.mxu3  ;;  %v1538_v11 = vadd.f32 %v1537_v6, %v1524_v9 }
 0x175   : > { %v1551_v12 = vpop.f32.mrf.mxu1  ;;  %v1578_v19 = vadd.f32 %v1577_v8, %v1564_v15 }
 0x176   : > { %v1552_v16 = vadd.f32 %v1551_v12, %v1538_v11 }
 0x17a   : > { %v1565_v13 = vpop.f32.mrf.mxu2 }
 0x17b   : > { %v1566_v17 = vadd.f32 %v1565_v13, %v1552_v16 }
 0x17c   : > { %v1579_v18 = vpop.f32.mrf.mxu3 }
 0x17d   : > { %v1580_v20 = vadd.f32 %v1579_v18, %v1566_v17 }
 0x18b   : > { %v1591_v14 = vpop.f32.mrf.mxu0 }
 0x18c   : > { %v1592_v21 = vadd.f32 %v1591_v14, %v1578_v19 }
 0x18e   : > { %v1596_v24 = vmax.f32 %v1592_v21, 0.0 }
 0x193   : > { %v1593_v22 = vpop.f32.mrf.mxu0 }
 0x194   : > { %v1594_v23 = vadd.f32 %v1593_v22, %v1580_v20 }
 0x196   : > { %v1597_v25 = vmax.f32 %v1594_v23, 0.0  ;;  %1608 = sbr.rel (!%p2310_p6) target bundleno = 420 (0x1a4), region = 77 }
 0x198   : > { %v2170_v26 = vpack.c.bf16 %v1597_v25, %v1596_v24 }
 0x19a   : > { %2171 = vst [vmem:[%s822_s6] sm:$0xff] %v2170_v26  }
 0x1a1   : > { %v1630_v27 = vld [vmem:[%s822_s6] sm:$0xf]  ;;  %v1632_v28 = vld [vmem:[%s822_s6 + $0x4] sm:$0xf] }
 0x1a2   : > { %1631 = vst [vmem:[%s1613_s28] sm:$0xf] %v1630_v27 }
 0x1a3   : > { %1633 = vst [vmem:[%s1613_s28 + $0x8] sm:$0xf] %v1632_v28 }
 0x1a4 PF: > { %s13_s16 = sadd.s32 1, %s2253_s16   ;;  %s2789_s12 = smov %s2241_s13 }
 0x1a5   : > { %p10_p12 = scmp.ge.s32.totalorder %s13_s16, 4   ;;  %s2790_s13 = smov %s2315_s22 }
 0x1a6   : > { %s2791_s14 = smov %s2249_s15  ;;  %s2792_s15 = smov %s2794_s17 }
 0x1a7   :  { %12 = sbr.rel (!%p10_p12) target bundleno = 3 (0x3), region = 155 }

// kernel: _lambda_.36
= control target key start
LH: loop header
LB: loop body
LE: loop exit
PB: predicated region body
PF: predicated region fallthrough
CT: control target
= control target key end

     0   :  { %s726_s12 = smov 0   ;;  %s728_s13 = smov 0   ;;  %s824_s0 = inlined_call_operand.vmem [shape: bf16[16,128], index: 0, kind: input, shape index: {}]   ;;  %s825_s1 = inlined_call_operand.vmem [shape: bf16[128,256], index: 1, kind: input, shape index: {}]   ;;  %s826_s2 = inlined_call_operand.vmem [shape: f32[1,256], index: 2, kind: input, shape index: {}]   ;;  %s827_s3 = inlined_call_operand.vmem [shape: bf16[16,256], index: 3, kind: output, shape index: {}]  }
   0x1   :  { %s730_s14 = smov 0   ;;  %s732_s15 = smov 0  }
   0x2   :  { %s734_s16 = smov 0  }
   0x3 LB: > { %s22_s17 = sadd.s32 1, %s700_s15  ;;  %s561_s18 = sadd.s32 4294967295, %s704_s16   ;;  %s704_s16 = sphi %s734_s16, %s13_s16   ;;  %s700_s15 = sphi %s732_s15, %s832_s15   ;;  %s696_s14 = sphi %s730_s14, %s831_s14   ;;  %s692_s13 = sphi %s728_s13, %s830_s13   ;;  %s688_s12 = sphi %s726_s12, %s829_s12  }
   0x4   : > { %p23_p0 = scmp.ge.s32.totalorder %s22_s17, 2  ;;  %p65_p1 = scmp.ne.s32.totalorder %s692_s13, %s688_s12 }
   0x5   : > { %p66_p2 = scmp.eq.s32.totalorder %s704_s16, 0  ;;  %p123_p4 = scmp.eq.s32.totalorder %s561_s18, 1 }
   0x6   : > { %s834_s17 = smov (%p23_p0, %s22_s17), 0  ;;  %s58_s20 = sadd.s32 1, %s692_s13 }
   0x7   : > { %p67_p3 = por %p66_p2, %p65_p1  ;;  %s55_s19 = ssub.s32 %s700_s15, %s834_s17 }
   0x8   : > { %p56_p5 = scmp.eq.s32.totalorder %s55_s19, 0  ;;  %p761_p6 = por %p123_p4, %p65_p1 }
   0x9   : > { %p565_p7 = scmp.ge.s32.totalorder %s704_s16, 2 }
   0xa   : > { %s766_s22 = scalar_select %p56_p5, %s692_s13, %s58_s20  }
   0xb   : > { %154 = sbr.rel (%p565_p7) target bundleno = 36 (0x24), region = 20 }
  0x10   : > { %157 = sbr.rel (!%p67_p3) target bundleno = 36 (0x24), region = 24  ;;  %s159_s23 = sand.u32 (%p67_p3), 1, %s692_s13  }
  0x11   : > { %s567_s24 = sshll.u32 (%p67_p3), %s700_s15, 2  ;;  %s566_s25 = sshll.u32 (%p67_p3), %s159_s23, 6 }
  0x12   : > { %s774_s28 = scalar_lea.vmem (%p67_p3), %s825_s1, %s567_s24  ;;  %s161_s29 = scalar_lea.vmem (%p67_p3), [#allocation2], %s566_s25 }
  0x13   : > { %v180_v0 = vld [vmem:[%s774_s28] sm:$0xf] (%p67_p3)  ;;  %v182_v1 = vld [vmem:[%s774_s28 + $0x8] sm:$0xf] (%p67_p3)  ;;  %v184_v2 = vld [vmem:[%s774_s28 + $0x10] sm:$0xf] (%p67_p3) }
  0x14   : > { %181 = vst [vmem:[%s161_s29] sm:$0xf] (%p67_p3), %v180_v0  ;;  %v186_v3 = vld [vmem:[%s774_s28 + $0x18] sm:$0xf] (%p67_p3)  ;;  %v188_v4 = vld [vmem:[%s774_s28 + $0x20] sm:$0xf] (%p67_p3) }
  0x15   : > { %183 = vst [vmem:[%s161_s29 + $0x4] sm:$0xf] %v182_v1  ;;  %v190_v5 = vld [vmem:[%s774_s28 + $0x28] sm:$0xf]  ;;  %v192_v6 = vld [vmem:[%s774_s28 + $0x30] sm:$0xf] }
  0x16   : > { %185 = vst [vmem:[%s161_s29 + $0x8] sm:$0xf] %v184_v2  ;;  %v194_v7 = vld [vmem:[%s774_s28 + $0x38] sm:$0xf]  ;;  %v196_v8 = vld [vmem:[%s774_s28 + $0x40] sm:$0xf] }
  0x17   : > { %187 = vst [vmem:[%s161_s29 + $0xc] sm:$0xf] %v186_v3  ;;  %v198_v9 = vld [vmem:[%s774_s28 + $0x48] sm:$0xf]  ;;  %v200_v10 = vld [vmem:[%s774_s28 + $0x50] sm:$0xf] }
  0x18   : > { %189 = vst [vmem:[%s161_s29 + $0x10] sm:$0xf] %v188_v4  ;;  %v202_v11 = vld [vmem:[%s774_s28 + $0x58] sm:$0xf]  ;;  %v204_v12 = vld [vmem:[%s774_s28 + $0x60] sm:$0xf] }
  0x19   : > { %191 = vst [vmem:[%s161_s29 + $0x14] sm:$0xf] %v190_v5  ;;  %v206_v13 = vld [vmem:[%s774_s28 + $0x68] sm:$0xf]  ;;  %v208_v14 = vld [vmem:[%s774_s28 + $0x70] sm:$0xf] }
  0x1a   : > { %193 = vst [vmem:[%s161_s29 + $0x18] sm:$0xf] %v192_v6  ;;  %v210_v15 = vld [vmem:[%s774_s28 + $0x78] sm:$0xf] }
  0x1b   : > { %195 = vst [vmem:[%s161_s29 + $0x1c] sm:$0xf] %v194_v7 }
  0x1c   : > { %197 = vst [vmem:[%s161_s29 + $0x20] sm:$0xf] %v196_v8 }
  0x1d   : > { %199 = vst [vmem:[%s161_s29 + $0x24] sm:$0xf] %v198_v9 }
  0x1e   : > { %201 = vst [vmem:[%s161_s29 + $0x28] sm:$0xf] %v200_v10 }
  0x1f   : > { %203 = vst [vmem:[%s161_s29 + $0x2c] sm:$0xf] %v202_v11 }
  0x20   : > { %205 = vst [vmem:[%s161_s29 + $0x30] sm:$0xf] %v204_v12 }
  0x21   : > { %207 = vst [vmem:[%s161_s29 + $0x34] sm:$0xf] %v206_v13 }
  0x22   : > { %209 = vst [vmem:[%s161_s29 + $0x38] sm:$0xf] %v208_v14 }
  0x23   : > { %211 = vst [vmem:[%s161_s29 + $0x3c] sm:$0xf] %v210_v15 }
  0x24 PF: > { %p568_p8 = scmp.ge.s32.totalorder %s704_s16, 1  ;;  %p272_p9 = scmp.lt.s32.totalorder %s704_s16, 3 }
  0x26   : > { %p273_p10 = pnand %p568_p8, %p272_p9 }
  0x27   : > { %s279_s30 = sand.u32 (!%p273_p10), 1, %s688_s12   ;;  %p315_p11 = scmp.lt.s32.totalorder (!%p273_p10), %s696_s14, 1 }
  0x28   : > { %276 = sbr.rel (%p273_p10) target bundleno = 225 (0xe1), region = 69  ;;  %s569_s4 = sshll.u32 (!%p273_p10), %s279_s30, 6 }
  0x29   : > { %s281_s5 = scalar_lea.vmem (!%p273_p10), [#allocation2], %s569_s4  ;;  %s570_s12 = sshll.u32 (!%p273_p10), %s279_s30, 3 }
  0x2a   : > { %s308_s18 = scalar_lea.vmem (!%p273_p10), [#allocation3], %s570_s12 }
  0x2d   : > { %v619_v16 = vld [vmem:[%s281_s5 + $0x38] sm:$0xff]  ;;  %s316_s6 = scalar_select %p315_p11, %s696_s14, 1  ;;  %v618_v17 = vld [vmem:[%s281_s5 + $0x30] sm:$0xff]  ;;  %v617_v18 = vld [vmem:[%s281_s5 + $0x28] sm:$0xff] }
  0x2e   : > { %395 = vmatpush.bf16.msra.mxu0 %v619_v16  ;;  %v616_v19 = vld [vmem:[%s281_s5 + $0x20] sm:$0xff]  ;;  %v615_v20 = vld [vmem:[%s281_s5 + $0x18] sm:$0xff]  ;;  %v614_v21 = vld [vmem:[%s281_s5 + $0x10] sm:$0xff]  ;;  %s608_s19 = sshll.u32 (%p761_p6), %s696_s14, 2 }
  0x2f   : > { %s317_s9 = scalar_lea.vmem %s826_s2, %s316_s6  ;;  %v613_v22 = vld [vmem:[%s281_s5 + $0x8] sm:$0xff]  ;;  %v612_v23 = vld [vmem:[%s281_s5] sm:$0xff]  ;;  %s424_s24 = scalar_lea.vmem (%p761_p6), %s827_s3, %s608_s19 }
  0x30   : > { %v611_v24 = vld [vmem:[%s824_s0] sm:$0xff] }
  0x31   : > { %v665_v26 = vld [vmem:[%s317_s9] ss:$0 sm:$0xff] }
  0x32   : > { %396 = vmatpush.bf16.msra.mxu0 %v618_v17 }
  0x36   : > { %397 = vmatpush.bf16.msra.mxu0 %v617_v18 }
  0x3a   : > { %398 = vmatpush.bf16.msra.mxu0 %v616_v19 }
  0x3e   : > { %399 = vmatpush.bf16.msra.mxu0 %v615_v20 }
  0x42   : > { %400 = vmatpush.bf16.msra.mxu0 %v614_v21 }
  0x46   : > { %401 = vmatpush.bf16.msra.mxu0 %v613_v22 }
  0x4a   : > { %402 = vmatpush.bf16.msra.mxu0 %v612_v23 }
  0x4d   : > { %403 = vmatmul.bf16.vlgmr.msra.gmra.mxu0 %v611_v24 }
  0xca   : > { %v404_v25 = vpop.f32.mrf.mxu0 }
  0xcb   : > { %v405_v28 = vadd.f32 %v665_v26, %v404_v25 }
  0xd2   : > { %v406_v27 = vpop.f32.mrf.mxu0 }
  0xd3   : > { %v407_v29 = vadd.f32 %v665_v26, %v406_v27  ;;  %419 = sbr.rel (!%p761_p6) target bundleno = 225 (0xe1), region = 77 }
  0xd5   : > { %v623_v30 = vpack.c.bf16 %v407_v29, %v405_v28 }
  0xd7   : > { %624 = vst [vmem:[%s308_s18] sm:$0xff] %v623_v30  }
  0xde   : > { %v441_v31 = vld [vmem:[%s308_s18] sm:$0xf]  ;;  %v443_v32 = vld [vmem:[%s308_s18 + $0x4] sm:$0xf] }
  0xdf   : > { %442 = vst [vmem:[%s424_s24] sm:$0xf] %v441_v31 }
  0xe0   : > { %444 = vst [vmem:[%s424_s24 + $0x8] sm:$0xf] %v443_v32 }
  0xe1 PF: > { %s13_s16 = sadd.s32 1, %s704_s16   ;;  %s829_s12 = smov %s692_s13 }
  0xe2   : > { %p10_p12 = scmp.ge.s32.totalorder %s13_s16, 4   ;;  %s830_s13 = smov %s766_s22 }
  0xe3   : > { %s831_s14 = smov %s700_s15  ;;  %s832_s15 = smov %s834_s17 }
  0xe4   :  { %12 = sbr.rel (!%p10_p12) target bundleno = 3 (0x3), region = 155 }

// kernel: _lambda_.38
= control target key start
LH: loop header
LB: loop body
LE: loop exit
PB: predicated region body
PF: predicated region fallthrough
CT: control target
= control target key end

     0   :  { %s3049_s0 = inlined_call_operand.vmem [shape: bf16[16,2304], index: 0, kind: input, shape index: {}]   ;;  %s3050_s1 = inlined_call_operand.vmem [shape: bf16[2304,256], index: 1, kind: input, shape index: {}]   ;;  %s3051_s2 = inlined_call_operand.vmem [shape: f32[1,256], index: 2, kind: input, shape index: {}]   ;;  %s3052_s3 = inlined_call_operand.vmem [shape: bf16[16,256], index: 3, kind: output, shape index: {}]  }
   0x1   :  { %3054 = sst [smem:[#allocation7_spill]] %s3049_s0 }
   0x2   :  { %3055 = sst [smem:[#allocation8_spill]] %s3050_s1 }
   0x3   :  { %s2485_s12 = smov 0   ;;  %s2487_s13 = smov 0  }
   0x4   :  { %s2489_s14 = smov 0   ;;  %s2491_s15 = smov 0  }
   0x5   :  { %s2493_s16 = smov 0   ;;  %s2495_s17 = smov 0  }
   0x6   :  { %s2497_s18 = smov 0   ;;  %s2499_s19 = smov 0  }
   0x7   :  { %s2501_s20 = smov 0   ;;  %s2503_s21 = smov 0  }
   0x8   :  { %s2505_s22 = smov 0  }
   0x9 LB: > { %s1851_s23 = sadd.s32 4294967295, %s2462_s22   ;;  %s25_s24 = sadd.s32 1, %s2454_s20  ;;  %s2462_s22 = sphi %s2505_s22, %s13_s22   ;;  %s2458_s21 = sphi %s2503_s21, %s3072_s21   ;;  %s2454_s20 = sphi %s2501_s20, %s3071_s20   ;;  %s2450_s19 = sphi %s2499_s19, %s3070_s19   ;;  %s2446_s18 = sphi %s2497_s18, %s3069_s18   ;;  %s2442_s17 = sphi %s2495_s17, %s3068_s17   ;;  %s2438_s16 = sphi %s2493_s16, %s3067_s16   ;;  %s2434_s15 = sphi %s2491_s15, %s3066_s15   ;;  %s2430_s14 = sphi %s2489_s14, %s3065_s14   ;;  %s2426_s13 = sphi %s2487_s13, %s3064_s13   ;;  %s2422_s12 = sphi %s2485_s12, %s3063_s12  }
   0xa   : > { %p26_p0 = scmp.ge.s32.totalorder %s25_s24, 2  ;;  %s28_s25 = sadd.s32 1, %s2458_s21 }
   0xb   : > { %s41_s26 = sadd.s32 1, %s2442_s17  ;;  %p48_p1 = scmp.ne.s32.totalorder %s2442_s17, %s2438_s16 }
   0xc   : > { %s3074_s24 = smov (%p26_p0, %s25_s24), 0  ;;  %s3076_s25 = smov (!%p26_p0, %s28_s25), %s2458_s21 }
   0xd   : > { %s37_s27 = ssub.s32 %s2454_s20, %s3074_s24  ;;  %p49_p2 = scmp.eq.s32.totalorder %s2462_s22, 0 }
   0xe   : > { %p30_p3 = scmp.ge.s32.totalorder %s3076_s25, 2  ;;  %p39_p4 = scmp.eq.s32.totalorder %s37_s27, 0 }
   0xf   : > { %p2552_p5 = por %p49_p2, %p48_p1  ;;  %s69_s29 = sadd.s32 1, %s2434_s15 }
  0x10   : > { %s3078_s25 = smov (%p30_p3, %s3076_s25), 0  ;;  %p76_p6 = scmp.ne.s32.totalorder %s2434_s15, %s2430_s14 }
  0x11   : > { %3057 = sst [smem:[#allocation6_spill]] %s3078_s25  ;;  %s65_s4 = ssub.s32 %s2458_s21, %s3078_s25 }
  0x12   : > { %s2560_s30 = scalar_select %p39_p4, %s2442_s17, %s41_s26  }
  0x13   : > { %s66_s5 = sor.u32 %s65_s4, %s37_s27  ;;  %p121_p7 = scmp.eq.s32.totalorder %s65_s4, 0 }
  0x14   : > { %p67_p8 = scmp.eq.s32.totalorder %s66_s5, 0  ;;  %p2566_p9 = por %p76_p6, %p49_p2 }
  0x15   : > { %s123_s7 = sadd.s32 1, %s2426_s13  ;;  %p133_p10 = scmp.ne.s32.totalorder %s2426_s13, %s2422_s12 }
  0x16   : > { %s2574_s8 = scalar_select %p67_p8, %s2434_s15, %s69_s29  }
  0x17   : > { %s2577_s9 = scalar_select %p121_p7, %s2426_s13, %s123_s7  }
  0x18   : > { %p134_p11 = scmp.eq.s32.totalorder %s1851_s23, 3  ;;  %p1854_p13 = scmp.ge.s32.totalorder %s2462_s22, 4 }
  0x1a   : > { %p2579_p12 = por %p134_p11, %p133_p10  ;;  %156 = sbr.rel (%p1854_p13) target bundleno = 203 (0xcb), region = 16 }
  0x1f   : > { %159 = sbr.rel (!%p2552_p5) target bundleno = 50 (0x32), region = 20  ;;  %s161_s11 = sand.u32 (%p2552_p5), 1, %s2442_s17  }
  0x20   : > { %s2194_s26 = smul.u32 (%p2552_p5), 36, %s2454_s20  ;;  %s3060_s0 = sld [smem:[#allocation7_spill]] (%p2552_p5) }
  0x21   : > { %s2282_s27 = smul.u32 (%p2552_p5), 72, %s161_s11 }
  0x23   : > { %s163_s23 = scalar_lea.vmem (%p2552_p5), [#allocation3], %s2282_s27 }
  0x26   : > { %s169_s5 = scalar_lea.vmem %s3060_s0, %s2194_s26 }
  0x27   : > { %v184_v0 = vld [vmem:[%s169_s5] sm:$0xff]  ;;  %v186_v1 = vld [vmem:[%s169_s5 + $0x8] sm:$0xff]  ;;  %v188_v2 = vld [vmem:[%s169_s5 + $0x10] sm:$0xff] }
  0x28   : > { %185 = vst [vmem:[%s163_s23] sm:$0xff] %v184_v0  ;;  %v190_v3 = vld [vmem:[%s169_s5 + $0x18] sm:$0xff]  ;;  %v192_v4 = vld [vmem:[%s169_s5 + $0x48] sm:$0xff]  ;;  %v194_v5 = vld [vmem:[%s169_s5 + $0x50] sm:$0xff] }
  0x29   : > { %187 = vst [vmem:[%s163_s23 + $0x8] sm:$0xff] %v186_v1  ;;  %v196_v6 = vld [vmem:[%s169_s5 + $0x58] sm:$0xff]  ;;  %v198_v7 = vld [vmem:[%s169_s5 + $0x60] sm:$0xff]  ;;  %v1858_v9 = vld [vmem:[%s169_s5 + $0x68] sm:$0xf] }
  0x2a   : > { %189 = vst [vmem:[%s163_s23 + $0x10] sm:$0xff] %v188_v2  ;;  %v1856_v8 = vld [vmem:[%s169_s5 + $0x20] sm:$0xf] }
  0x2b   : > { %191 = vst [vmem:[%s163_s23 + $0x18] sm:$0xff] %v190_v3 }
  0x2c   : > { %193 = vst [vmem:[%s163_s23 + $0x24] sm:$0xff] %v192_v4 }
  0x2d   : > { %195 = vst [vmem:[%s163_s23 + $0x2c] sm:$0xff] %v194_v5 }
  0x2e   : > { %197 = vst [vmem:[%s163_s23 + $0x34] sm:$0xff] %v196_v6 }
  0x2f   : > { %199 = vst [vmem:[%s163_s23 + $0x3c] sm:$0xff] %v198_v7 }
  0x30   : > { %1857 = vst [vmem:[%s163_s23 + $0x20] sm:$0xf] %v1856_v8 }
  0x31   : > { %1859 = vst [vmem:[%s163_s23 + $0x44] sm:$0xf] %v1858_v9 }
  0x32 PF: > { %217 = sbr.rel (!%p2566_p9) target bundleno = 203 (0xcb), region = 46  ;;  %s219_s28 = sand.u32 (%p2566_p9), 1, %s2434_s15  }
  0x33   : > { %s2195_s7 = smul.u32 (%p2566_p9), 288, %s2454_s20  ;;  %s3061_s1 = sld [smem:[#allocation8_spill]] (%p2566_p9) }
  0x34   : > { %s2283_s11 = smul.u32 (%p2566_p9), 576, %s219_s28 }
  0x35   : > { %s224_s26 = sadd.s32 (%p2566_p9), %s2458_s21, %s2195_s7 }
  0x36   : > { %s1861_s27 = sshll.u32 (%p2566_p9), %s224_s26, 2  ;;  %s2604_s6 = scalar_lea.vmem (%p2566_p9), [#allocation4], %s2283_s11 }
  0x39   : > { %s2599_s0 = scalar_lea.vmem %s3061_s1, %s1861_s27 }
  0x3a   : > { %v243_v10 = vld [vmem:[%s2599_s0] sm:$0xf]  ;;  %v245_v11 = vld [vmem:[%s2599_s0 + $0x8] sm:$0xf]  ;;  %v247_v12 = vld [vmem:[%s2599_s0 + $0x10] sm:$0xf] }
  0x3b   : > { %244 = vst [vmem:[%s2604_s6] sm:$0xf] %v243_v10  ;;  %v249_v13 = vld [vmem:[%s2599_s0 + $0x18] sm:$0xf]  ;;  %v251_v14 = vld [vmem:[%s2599_s0 + $0x20] sm:$0xf] }
  0x3c   : > { %246 = vst [vmem:[%s2604_s6 + $0x4] sm:$0xf] %v245_v11  ;;  %v253_v15 = vld [vmem:[%s2599_s0 + $0x28] sm:$0xf]  ;;  %v255_v16 = vld [vmem:[%s2599_s0 + $0x30] sm:$0xf] }
  0x3d   : > { %248 = vst [vmem:[%s2604_s6 + $0x8] sm:$0xf] %v247_v12  ;;  %v257_v17 = vld [vmem:[%s2599_s0 + $0x38] sm:$0xf]  ;;  %v259_v18 = vld [vmem:[%s2599_s0 + $0x40] sm:$0xf] }
  0x3e   : > { %250 = vst [vmem:[%s2604_s6 + $0xc] sm:$0xf] %v249_v13  ;;  %v261_v19 = vld [vmem:[%s2599_s0 + $0x48] sm:$0xf]  ;;  %v263_v20 = vld [vmem:[%s2599_s0 + $0x50] sm:$0xf] }
  0x3f   : > { %252 = vst [vmem:[%s2604_s6 + $0x10] sm:$0xf] %v251_v14  ;;  %v265_v21 = vld [vmem:[%s2599_s0 + $0x58] sm:$0xf]  ;;  %v267_v22 = vld [vmem:[%s2599_s0 + $0x60] sm:$0xf] }
  0x40   : > { %254 = vst [vmem:[%s2604_s6 + $0x14] sm:$0xf] %v253_v15  ;;  %v269_v23 = vld [vmem:[%s2599_s0 + $0x68] sm:$0xf]  ;;  %v271_v24 = vld [vmem:[%s2599_s0 + $0x70] sm:$0xf] }
  0x41   : > { %256 = vst [vmem:[%s2604_s6 + $0x18] sm:$0xf] %v255_v16  ;;  %v273_v25 = vld [vmem:[%s2599_s0 + $0x78] sm:$0xf]  ;;  %v275_v26 = vld [vmem:[%s2599_s0 + $0x80] sm:$0xf] }
  0x42   : > { %258 = vst [vmem:[%s2604_s6 + $0x1c] sm:$0xf] %v257_v17  ;;  %v277_v27 = vld [vmem:[%s2599_s0 + $0x88] sm:$0xf]  ;;  %v279_v28 = vld [vmem:[%s2599_s0 + $0x90] sm:$0xf] }
  0x43   : > { %260 = vst [vmem:[%s2604_s6 + $0x20] sm:$0xf] %v259_v18  ;;  %v281_v29 = vld [vmem:[%s2599_s0 + $0x98] sm:$0xf]  ;;  %v283_v30 = vld [vmem:[%s2599_s0 + $0xa0] sm:$0xf] }
  0x44   : > { %262 = vst [vmem:[%s2604_s6 + $0x24] sm:$0xf] %v261_v19  ;;  %v285_v31 = vld [vmem:[%s2599_s0 + $0xa8] sm:$0xf]  ;;  %v287_v32 = vld [vmem:[%s2599_s0 + $0xb0] sm:$0xf] }
  0x45   : > { %264 = vst [vmem:[%s2604_s6 + $0x28] sm:$0xf] %v263_v20  ;;  %v289_v33 = vld [vmem:[%s2599_s0 + $0xb8] sm:$0xf]  ;;  %v291_v34 = vld [vmem:[%s2599_s0 + $0xc0] sm:$0xf] }
  0x46   : > { %266 = vst [vmem:[%s2604_s6 + $0x2c] sm:$0xf] %v265_v21  ;;  %v293_v35 = vld [vmem:[%s2599_s0 + $0xc8] sm:$0xf]  ;;  %v295_v36 = vld [vmem:[%s2599_s0 + $0xd0] sm:$0xf] }
  0x47   : > { %268 = vst [vmem:[%s2604_s6 + $0x30] sm:$0xf] %v267_v22  ;;  %v297_v37 = vld [vmem:[%s2599_s0 + $0xd8] sm:$0xf]  ;;  %v299_v38 = vld [vmem:[%s2599_s0 + $0xe0] sm:$0xf] }
  0x48   : > { %270 = vst [vmem:[%s2604_s6 + $0x34] sm:$0xf] %v269_v23  ;;  %v301_v39 = vld [vmem:[%s2599_s0 + $0xe8] sm:$0xf]  ;;  %v303_v40 = vld [vmem:[%s2599_s0 + $0xf0] sm:$0xf] }
  0x49   : > { %272 = vst [vmem:[%s2604_s6 + $0x38] sm:$0xf] %v271_v24  ;;  %v305_v41 = vld [vmem:[%s2599_s0 + $0xf8] sm:$0xf]  ;;  %v307_v42 = vld [vmem:[%s2599_s0 + $0x100] sm:$0xf] }
  0x4a   : > { %274 = vst [vmem:[%s2604_s6 + $0x3c] sm:$0xf] %v273_v25  ;;  %v309_v43 = vld [vmem:[%s2599_s0 + $0x108] sm:$0xf]  ;;  %v311_v44 = vld [vmem:[%s2599_s0 + $0x110] sm:$0xf] }
  0x4b   : > { %276 = vst [vmem:[%s2604_s6 + $0x40] sm:$0xf] %v275_v26  ;;  %v313_v45 = vld [vmem:[%s2599_s0 + $0x118] sm:$0xf]  ;;  %v315_v46 = vld [vmem:[%s2599_s0 + $0x120] sm:$0xf] }
  0x4c   : > { %278 = vst [vmem:[%s2604_s6 + $0x44] sm:$0xf] %v277_v27  ;;  %v317_v47 = vld [vmem:[%s2599_s0 + $0x128] sm:$0xf]  ;;  %v319_v48 = vld [vmem:[%s2599_s0 + $0x130] sm:$0xf] }
  0x4d   : > { %280 = vst [vmem:[%s2604_s6 + $0x48] sm:$0xf] %v279_v28  ;;  %v321_v49 = vld [vmem:[%s2599_s0 + $0x138] sm:$0xf]  ;;  %v323_v50 = vld [vmem:[%s2599_s0 + $0x140] sm:$0xf] }
  0x4e   : > { %282 = vst [vmem:[%s2604_s6 + $0x4c] sm:$0xf] %v281_v29  ;;  %v325_v51 = vld [vmem:[%s2599_s0 + $0x148] sm:$0xf]  ;;  %v327_v52 = vld [vmem:[%s2599_s0 + $0x150] sm:$0xf] }
  0x4f   : > { %284 = vst [vmem:[%s2604_s6 + $0x50] sm:$0xf] %v283_v30  ;;  %v329_v53 = vld [vmem:[%s2599_s0 + $0x158] sm:$0xf]  ;;  %v331_v54 = vld [vmem:[%s2599_s0 + $0x160] sm:$0xf] }
  0x50   : > { %286 = vst [vmem:[%s2604_s6 + $0x54] sm:$0xf] %v285_v31  ;;  %v333_v55 = vld [vmem:[%s2599_s0 + $0x168] sm:$0xf]  ;;  %v335_v56 = vld [vmem:[%s2599_s0 + $0x170] sm:$0xf] }
  0x51   : > { %288 = vst [vmem:[%s2604_s6 + $0x58] sm:$0xf] %v287_v32  ;;  %v337_v57 = vld [vmem:[%s2599_s0 + $0x178] sm:$0xf]  ;;  %v339_v58 = vld [vmem:[%s2599_s0 + $0x180] sm:$0xf] }
  0x52   : > { %290 = vst [vmem:[%s2604_s6 + $0x5c] sm:$0xf] %v289_v33  ;;  %v341_v59 = vld [vmem:[%s2599_s0 + $0x188] sm:$0xf]  ;;  %v343_v60 = vld [vmem:[%s2599_s0 + $0x190] sm:$0xf] }
  0x53   : > { %292 = vst [vmem:[%s2604_s6 + $0x60] sm:$0xf] %v291_v34  ;;  %v345_v61 = vld [vmem:[%s2599_s0 + $0x198] sm:$0xf]  ;;  %v347_v62 = vld [vmem:[%s2599_s0 + $0x1a0] sm:$0xf] }
  0x54   : > { %294 = vst [vmem:[%s2604_s6 + $0x64] sm:$0xf] %v293_v35  ;;  %v349_v63 = vld [vmem:[%s2599_s0 + $0x1a8] sm:$0xf]  ;;  %v351_v0 = vld [vmem:[%s2599_s0 + $0x1b0] sm:$0xf] }
  0x55   : > { %296 = vst [vmem:[%s2604_s6 + $0x68] sm:$0xf] %v295_v36  ;;  %v353_v1 = vld [vmem:[%s2599_s0 + $0x1b8] sm:$0xf]  ;;  %v355_v2 = vld [vmem:[%s2599_s0 + $0x1c0] sm:$0xf] }
  0x56   : > { %298 = vst [vmem:[%s2604_s6 + $0x6c] sm:$0xf] %v297_v37  ;;  %v357_v3 = vld [vmem:[%s2599_s0 + $0x1c8] sm:$0xf]  ;;  %v359_v4 = vld [vmem:[%s2599_s0 + $0x1d0] sm:$0xf] }
  0x57   : > { %300 = vst [vmem:[%s2604_s6 + $0x70] sm:$0xf] %v299_v38  ;;  %v361_v5 = vld [vmem:[%s2599_s0 + $0x1d8] sm:$0xf]  ;;  %v363_v6 = vld [vmem:[%s2599_s0 + $0x1e0] sm:$0xf] }
  0x58   : > { %302 = vst [vmem:[%s2604_s6 + $0x74] sm:$0xf] %v301_v39  ;;  %v365_v7 = vld [vmem:[%s2599_s0 + $0x1e8] sm:$0xf]  ;;  %v367_v8 = vld [vmem:[%s2599_s0 + $0x1f0] sm:$0xf] }
  0x59   : > { %304 = vst [vmem:[%s2604_s6 + $0x78] sm:$0xf] %v303_v40  ;;  %v369_v9 = vld [vmem:[%s2599_s0 + $0x1f8] sm:$0xf]  ;;  %v371_v10 = vld [vmem:[%s2599_s0 + $0x200] sm:$0xf] }
  0x5a   : > { %306 = vst [vmem:[%s2604_s6 + $0x7c] sm:$0xf] %v305_v41  ;;  %v373_v11 = vld [vmem:[%s2599_s0 + $0x208] sm:$0xf]  ;;  %v375_v12 = vld [vmem:[%s2599_s0 + $0x210] sm:$0xf] }
  0x5b   : > { %308 = vst [vmem:[%s2604_s6 + $0x80] sm:$0xf] %v307_v42  ;;  %v377_v13 = vld [vmem:[%s2599_s0 + $0x218] sm:$0xf]  ;;  %v379_v14 = vld [vmem:[%s2599_s0 + $0x220] sm:$0xf] }
  0x5c   : > { %310 = vst [vmem:[%s2604_s6 + $0x84] sm:$0xf] %v309_v43  ;;  %v381_v15 = vld [vmem:[%s2599_s0 + $0x228] sm:$0xf]  ;;  %v383_v16 = vld [vmem:[%s2599_s0 + $0x230] sm:$0xf] }
  0x5d   : > { %312 = vst [vmem:[%s2604_s6 + $0x88] sm:$0xf] %v311_v44  ;;  %v385_v17 = vld [vmem:[%s2599_s0 + $0x238] sm:$0xf]  ;;  %v387_v18 = vld [vmem:[%s2599_s0 + $0x240] sm:$0xf] }
  0x5e   : > { %314 = vst [vmem:[%s2604_s6 + $0x8c] sm:$0xf] %v313_v45  ;;  %v389_v19 = vld [vmem:[%s2599_s0 + $0x248] sm:$0xf]  ;;  %v391_v20 = vld [vmem:[%s2599_s0 + $0x250] sm:$0xf] }
  0x5f   : > { %316 = vst [vmem:[%s2604_s6 + $0x90] sm:$0xf] %v315_v46  ;;  %v393_v21 = vld [vmem:[%s2599_s0 + $0x258] sm:$0xf]  ;;  %v395_v22 = vld [vmem:[%s2599_s0 + $0x260] sm:$0xf] }
  0x60   : > { %318 = vst [vmem:[%s2604_s6 + $0x94] sm:$0xf] %v317_v47  ;;  %v397_v23 = vld [vmem:[%s2599_s0 + $0x268] sm:$0xf]  ;;  %v399_v24 = vld [vmem:[%s2599_s0 + $0x270] sm:$0xf] }
  0x61   : > { %320 = vst [vmem:[%s2604_s6 + $0x98] sm:$0xf] %v319_v48  ;;  %v401_v25 = vld [vmem:[%s2599_s0 + $0x278] sm:$0xf]  ;;  %v403_v26 = vld [vmem:[%s2599_s0 + $0x280] sm:$0xf] }
  0x62   : > { %322 = vst [vmem:[%s2604_s6 + $0x9c] sm:$0xf] %v321_v49  ;;  %v405_v27 = vld [vmem:[%s2599_s0 + $0x288] sm:$0xf]  ;;  %v407_v28 = vld [vmem:[%s2599_s0 + $0x290] sm:$0xf] }
  0x63   : > { %324 = vst [vmem:[%s2604_s6 + $0xa0] sm:$0xf] %v323_v50  ;;  %v409_v29 = vld [vmem:[%s2599_s0 + $0x298] sm:$0xf]  ;;  %v411_v30 = vld [vmem:[%s2599_s0 + $0x2a0] sm:$0xf] }
  0x64   : > { %326 = vst [vmem:[%s2604_s6 + $0xa4] sm:$0xf] %v325_v51  ;;  %v413_v31 = vld [vmem:[%s2599_s0 + $0x2a8] sm:$0xf]  ;;  %v415_v32 = vld [vmem:[%s2599_s0 + $0x2b0] sm:$0xf] }
  0x65   : > { %328 = vst [vmem:[%s2604_s6 + $0xa8] sm:$0xf] %v327_v52  ;;  %v417_v33 = vld [vmem:[%s2599_s0 + $0x2b8] sm:$0xf]  ;;  %v419_v34 = vld [vmem:[%s2599_s0 + $0x2c0] sm:$0xf] }
  0x66   : > { %330 = vst [vmem:[%s2604_s6 + $0xac] sm:$0xf] %v329_v53  ;;  %v421_v35 = vld [vmem:[%s2599_s0 + $0x2c8] sm:$0xf]  ;;  %v423_v36 = vld [vmem:[%s2599_s0 + $0x2d0] sm:$0xf] }
  0x67   : > { %332 = vst [vmem:[%s2604_s6 + $0xb0] sm:$0xf] %v331_v54  ;;  %v425_v37 = vld [vmem:[%s2599_s0 + $0x2d8] sm:$0xf]  ;;  %v427_v38 = vld [vmem:[%s2599_s0 + $0x2e0] sm:$0xf] }
  0x68   : > { %334 = vst [vmem:[%s2604_s6 + $0xb4] sm:$0xf] %v333_v55  ;;  %v429_v39 = vld [vmem:[%s2599_s0 + $0x2e8] sm:$0xf]  ;;  %v431_v40 = vld [vmem:[%s2599_s0 + $0x2f0] sm:$0xf] }
  0x69   : > { %336 = vst [vmem:[%s2604_s6 + $0xb8] sm:$0xf] %v335_v56  ;;  %v433_v41 = vld [vmem:[%s2599_s0 + $0x2f8] sm:$0xf]  ;;  %v435_v42 = vld [vmem:[%s2599_s0 + $0x300] sm:$0xf] }
  0x6a   : > { %338 = vst [vmem:[%s2604_s6 + $0xbc] sm:$0xf] %v337_v57  ;;  %v437_v43 = vld [vmem:[%s2599_s0 + $0x308] sm:$0xf]  ;;  %v439_v44 = vld [vmem:[%s2599_s0 + $0x310] sm:$0xf] }
  0x6b   : > { %340 = vst [vmem:[%s2604_s6 + $0xc0] sm:$0xf] %v339_v58  ;;  %v441_v45 = vld [vmem:[%s2599_s0 + $0x318] sm:$0xf]  ;;  %v443_v46 = vld [vmem:[%s2599_s0 + $0x320] sm:$0xf] }
  0x6c   : > { %342 = vst [vmem:[%s2604_s6 + $0xc4] sm:$0xf] %v341_v59  ;;  %v445_v47 = vld [vmem:[%s2599_s0 + $0x328] sm:$0xf]  ;;  %v447_v48 = vld [vmem:[%s2599_s0 + $0x330] sm:$0xf] }
  0x6d   : > { %344 = vst [vmem:[%s2604_s6 + $0xc8] sm:$0xf] %v343_v60  ;;  %v449_v49 = vld [vmem:[%s2599_s0 + $0x338] sm:$0xf]  ;;  %v451_v50 = vld [vmem:[%s2599_s0 + $0x340] sm:$0xf] }
  0x6e   : > { %346 = vst [vmem:[%s2604_s6 + $0xcc] sm:$0xf] %v345_v61  ;;  %v453_v51 = vld [vmem:[%s2599_s0 + $0x348] sm:$0xf]  ;;  %v455_v52 = vld [vmem:[%s2599_s0 + $0x350] sm:$0xf] }
  0x6f   : > { %348 = vst [vmem:[%s2604_s6 + $0xd0] sm:$0xf] %v347_v62  ;;  %v457_v53 = vld [vmem:[%s2599_s0 + $0x358] sm:$0xf]  ;;  %v459_v54 = vld [vmem:[%s2599_s0 + $0x360] sm:$0xf] }
  0x70   : > { %350 = vst [vmem:[%s2604_s6 + $0xd4] sm:$0xf] %v349_v63  ;;  %v461_v55 = vld [vmem:[%s2599_s0 + $0x368] sm:$0xf]  ;;  %v463_v56 = vld [vmem:[%s2599_s0 + $0x370] sm:$0xf] }
  0x71   : > { %352 = vst [vmem:[%s2604_s6 + $0xd8] sm:$0xf] %v351_v0  ;;  %v465_v57 = vld [vmem:[%s2599_s0 + $0x378] sm:$0xf]  ;;  %v467_v58 = vld [vmem:[%s2599_s0 + $0x380] sm:$0xf] }
  0x72   : > { %354 = vst [vmem:[%s2604_s6 + $0xdc] sm:$0xf] %v353_v1  ;;  %v469_v59 = vld [vmem:[%s2599_s0 + $0x388] sm:$0xf]  ;;  %v471_v60 = vld [vmem:[%s2599_s0 + $0x390] sm:$0xf] }
  0x73   : > { %356 = vst [vmem:[%s2604_s6 + $0xe0] sm:$0xf] %v355_v2  ;;  %v473_v61 = vld [vmem:[%s2599_s0 + $0x398] sm:$0xf]  ;;  %v475_v62 = vld [vmem:[%s2599_s0 + $0x3a0] sm:$0xf] }
  0x74   : > { %358 = vst [vmem:[%s2604_s6 + $0xe4] sm:$0xf] %v357_v3  ;;  %v477_v63 = vld [vmem:[%s2599_s0 + $0x3a8] sm:$0xf]  ;;  %v479_v0 = vld [vmem:[%s2599_s0 + $0x3b0] sm:$0xf] }
  0x75   : > { %360 = vst [vmem:[%s2604_s6 + $0xe8] sm:$0xf] %v359_v4  ;;  %v481_v1 = vld [vmem:[%s2599_s0 + $0x3b8] sm:$0xf]  ;;  %v483_v2 = vld [vmem:[%s2599_s0 + $0x3c0] sm:$0xf] }
  0x76   : > { %362 = vst [vmem:[%s2604_s6 + $0xec] sm:$0xf] %v361_v5  ;;  %v485_v3 = vld [vmem:[%s2599_s0 + $0x3c8] sm:$0xf]  ;;  %v487_v4 = vld [vmem:[%s2599_s0 + $0x3d0] sm:$0xf] }
  0x77   : > { %364 = vst [vmem:[%s2604_s6 + $0xf0] sm:$0xf] %v363_v6  ;;  %v489_v5 = vld [vmem:[%s2599_s0 + $0x3d8] sm:$0xf]  ;;  %v491_v6 = vld [vmem:[%s2599_s0 + $0x3e0] sm:$0xf] }
  0x78   : > { %366 = vst [vmem:[%s2604_s6 + $0xf4] sm:$0xf] %v365_v7  ;;  %v493_v7 = vld [vmem:[%s2599_s0 + $0x3e8] sm:$0xf] }
  0x79   : > { %368 = vst [vmem:[%s2604_s6 + $0xf8] sm:$0xf] %v367_v8  ;;  %v495_v8 = vld [vmem:[%s2599_s0 + $0x3f0] sm:$0xf] }
  0x7a   : > { %370 = vst [vmem:[%s2604_s6 + $0xfc] sm:$0xf] %v369_v9  ;;  %v497_v9 = vld [vmem:[%s2599_s0 + $0x3f8] sm:$0xf] }
  0x7b   : > { %372 = vst [vmem:[%s2604_s6 + $0x100] sm:$0xf] %v371_v10  ;;  %v499_v10 = vld [vmem:[%s2599_s0 + $0x400] sm:$0xf] }
  0x7c   : > { %374 = vst [vmem:[%s2604_s6 + $0x104] sm:$0xf] %v373_v11  ;;  %v501_v11 = vld [vmem:[%s2599_s0 + $0x408] sm:$0xf] }
  0x7d   : > { %376 = vst [vmem:[%s2604_s6 + $0x108] sm:$0xf] %v375_v12  ;;  %v503_v12 = vld [vmem:[%s2599_s0 + $0x410] sm:$0xf] }
  0x7e   : > { %378 = vst [vmem:[%s2604_s6 + $0x10c] sm:$0xf] %v377_v13  ;;  %v505_v13 = vld [vmem:[%s2599_s0 + $0x418] sm:$0xf] }
  0x7f   : > { %380 = vst [vmem:[%s2604_s6 + $0x110] sm:$0xf] %v379_v14  ;;  %v507_v14 = vld [vmem:[%s2599_s0 + $0x420] sm:$0xf] }
  0x80   : > { %382 = vst [vmem:[%s2604_s6 + $0x114] sm:$0xf] %v381_v15  ;;  %v509_v15 = vld [vmem:[%s2599_s0 + $0x428] sm:$0xf] }
  0x81   : > { %384 = vst [vmem:[%s2604_s6 + $0x118] sm:$0xf] %v383_v16  ;;  %v511_v16 = vld [vmem:[%s2599_s0 + $0x430] sm:$0xf] }
  0x82   : > { %386 = vst [vmem:[%s2604_s6 + $0x11c] sm:$0xf] %v385_v17  ;;  %v513_v17 = vld [vmem:[%s2599_s0 + $0x438] sm:$0xf] }
  0x83   : > { %388 = vst [vmem:[%s2604_s6 + $0x120] sm:$0xf] %v387_v18  ;;  %v515_v18 = vld [vmem:[%s2599_s0 + $0x440] sm:$0xf] }
  0x84   : > { %390 = vst [vmem:[%s2604_s6 + $0x124] sm:$0xf] %v389_v19  ;;  %v517_v19 = vld [vmem:[%s2599_s0 + $0x448] sm:$0xf] }
  0x85   : > { %392 = vst [vmem:[%s2604_s6 + $0x128] sm:$0xf] %v391_v20  ;;  %v519_v20 = vld [vmem:[%s2599_s0 + $0x450] sm:$0xf] }
  0x86   : > { %394 = vst [vmem:[%s2604_s6 + $0x12c] sm:$0xf] %v393_v21  ;;  %v521_v21 = vld [vmem:[%s2599_s0 + $0x458] sm:$0xf] }
  0x87   : > { %396 = vst [vmem:[%s2604_s6 + $0x130] sm:$0xf] %v395_v22  ;;  %v523_v22 = vld [vmem:[%s2599_s0 + $0x460] sm:$0xf] }
  0x88   : > { %398 = vst [vmem:[%s2604_s6 + $0x134] sm:$0xf] %v397_v23  ;;  %v525_v23 = vld [vmem:[%s2599_s0 + $0x468] sm:$0xf] }
  0x89   : > { %400 = vst [vmem:[%s2604_s6 + $0x138] sm:$0xf] %v399_v24  ;;  %v527_v24 = vld [vmem:[%s2599_s0 + $0x470] sm:$0xf] }
  0x8a   : > { %402 = vst [vmem:[%s2604_s6 + $0x13c] sm:$0xf] %v401_v25  ;;  %v529_v25 = vld [vmem:[%s2599_s0 + $0x478] sm:$0xf] }
  0x8b   : > { %404 = vst [vmem:[%s2604_s6 + $0x140] sm:$0xf] %v403_v26 }
  0x8c   : > { %406 = vst [vmem:[%s2604_s6 + $0x144] sm:$0xf] %v405_v27 }
  0x8d   : > { %408 = vst [vmem:[%s2604_s6 + $0x148] sm:$0xf] %v407_v28 }
  0x8e   : > { %410 = vst [vmem:[%s2604_s6 + $0x14c] sm:$0xf] %v409_v29 }
  0x8f   : > { %412 = vst [vmem:[%s2604_s6 + $0x150] sm:$0xf] %v411_v30 }
  0x90   : > { %414 = vst [vmem:[%s2604_s6 + $0x154] sm:$0xf] %v413_v31 }
  0x91   : > { %416 = vst [vmem:[%s2604_s6 + $0x158] sm:$0xf] %v415_v32 }
  0x92   : > { %418 = vst [vmem:[%s2604_s6 + $0x15c] sm:$0xf] %v417_v33 }
  0x93   : > { %420 = vst [vmem:[%s2604_s6 + $0x160] sm:$0xf] %v419_v34 }
  0x94   : > { %422 = vst [vmem:[%s2604_s6 + $0x164] sm:$0xf] %v421_v35 }
  0x95   : > { %424 = vst [vmem:[%s2604_s6 + $0x168] sm:$0xf] %v423_v36 }
  0x96   : > { %426 = vst [vmem:[%s2604_s6 + $0x16c] sm:$0xf] %v425_v37 }
  0x97   : > { %428 = vst [vmem:[%s2604_s6 + $0x170] sm:$0xf] %v427_v38 }
  0x98   : > { %430 = vst [vmem:[%s2604_s6 + $0x174] sm:$0xf] %v429_v39 }
  0x99   : > { %432 = vst [vmem:[%s2604_s6 + $0x178] sm:$0xf] %v431_v40 }
  0x9a   : > { %434 = vst [vmem:[%s2604_s6 + $0x17c] sm:$0xf] %v433_v41 }
  0x9b   : > { %436 = vst [vmem:[%s2604_s6 + $0x180] sm:$0xf] %v435_v42 }
  0x9c   : > { %438 = vst [vmem:[%s2604_s6 + $0x184] sm:$0xf] %v437_v43 }
  0x9d   : > { %440 = vst [vmem:[%s2604_s6 + $0x188] sm:$0xf] %v439_v44 }
  0x9e   : > { %442 = vst [vmem:[%s2604_s6 + $0x18c] sm:$0xf] %v441_v45 }
  0x9f   : > { %444 = vst [vmem:[%s2604_s6 + $0x190] sm:$0xf] %v443_v46 }
  0xa0   : > { %446 = vst [vmem:[%s2604_s6 + $0x194] sm:$0xf] %v445_v47 }
  0xa1   : > { %448 = vst [vmem:[%s2604_s6 + $0x198] sm:$0xf] %v447_v48 }
  0xa2   : > { %450 = vst [vmem:[%s2604_s6 + $0x19c] sm:$0xf] %v449_v49 }
  0xa3   : > { %452 = vst [vmem:[%s2604_s6 + $0x1a0] sm:$0xf] %v451_v50 }
  0xa4   : > { %454 = vst [vmem:[%s2604_s6 + $0x1a4] sm:$0xf] %v453_v51 }
  0xa5   : > { %456 = vst [vmem:[%s2604_s6 + $0x1a8] sm:$0xf] %v455_v52 }
  0xa6   : > { %458 = vst [vmem:[%s2604_s6 + $0x1ac] sm:$0xf] %v457_v53 }
  0xa7   : > { %460 = vst [vmem:[%s2604_s6 + $0x1b0] sm:$0xf] %v459_v54 }
  0xa8   : > { %462 = vst [vmem:[%s2604_s6 + $0x1b4] sm:$0xf] %v461_v55 }
  0xa9   : > { %464 = vst [vmem:[%s2604_s6 + $0x1b8] sm:$0xf] %v463_v56 }
  0xaa   : > { %466 = vst [vmem:[%s2604_s6 + $0x1bc] sm:$0xf] %v465_v57 }
  0xab   : > { %468 = vst [vmem:[%s2604_s6 + $0x1c0] sm:$0xf] %v467_v58 }
  0xac   : > { %470 = vst [vmem:[%s2604_s6 + $0x1c4] sm:$0xf] %v469_v59 }
  0xad   : > { %472 = vst [vmem:[%s2604_s6 + $0x1c8] sm:$0xf] %v471_v60 }
  0xae   : > { %474 = vst [vmem:[%s2604_s6 + $0x1cc] sm:$0xf] %v473_v61 }
  0xaf   : > { %476 = vst [vmem:[%s2604_s6 + $0x1d0] sm:$0xf] %v475_v62 }
  0xb0   : > { %478 = vst [vmem:[%s2604_s6 + $0x1d4] sm:$0xf] %v477_v63 }
  0xb1   : > { %480 = vst [vmem:[%s2604_s6 + $0x1d8] sm:$0xf] %v479_v0 }
  0xb2   : > { %482 = vst [vmem:[%s2604_s6 + $0x1dc] sm:$0xf] %v481_v1 }
  0xb3   : > { %484 = vst [vmem:[%s2604_s6 + $0x1e0] sm:$0xf] %v483_v2 }
  0xb4   : > { %486 = vst [vmem:[%s2604_s6 + $0x1e4] sm:$0xf] %v485_v3 }
  0xb5   : > { %488 = vst [vmem:[%s2604_s6 + $0x1e8] sm:$0xf] %v487_v4 }
  0xb6   : > { %490 = vst [vmem:[%s2604_s6 + $0x1ec] sm:$0xf] %v489_v5 }
  0xb7   : > { %492 = vst [vmem:[%s2604_s6 + $0x1f0] sm:$0xf] %v491_v6 }
  0xb8   : > { %494 = vst [vmem:[%s2604_s6 + $0x1f4] sm:$0xf] %v493_v7 }
  0xb9   : > { %496 = vst [vmem:[%s2604_s6 + $0x1f8] sm:$0xf] %v495_v8 }
  0xba   : > { %498 = vst [vmem:[%s2604_s6 + $0x1fc] sm:$0xf] %v497_v9 }
  0xbb   : > { %500 = vst [vmem:[%s2604_s6 + $0x200] sm:$0xf] %v499_v10 }
  0xbc   : > { %502 = vst [vmem:[%s2604_s6 + $0x204] sm:$0xf] %v501_v11 }
  0xbd   : > { %504 = vst [vmem:[%s2604_s6 + $0x208] sm:$0xf] %v503_v12 }
  0xbe   : > { %506 = vst [vmem:[%s2604_s6 + $0x20c] sm:$0xf] %v505_v13 }
  0xbf   : > { %508 = vst [vmem:[%s2604_s6 + $0x210] sm:$0xf] %v507_v14 }
  0xc0   : > { %510 = vst [vmem:[%s2604_s6 + $0x214] sm:$0xf] %v509_v15 }
  0xc1   : > { %512 = vst [vmem:[%s2604_s6 + $0x218] sm:$0xf] %v511_v16 }
  0xc2   : > { %514 = vst [vmem:[%s2604_s6 + $0x21c] sm:$0xf] %v513_v17 }
  0xc3   : > { %516 = vst [vmem:[%s2604_s6 + $0x220] sm:$0xf] %v515_v18 }
  0xc4   : > { %518 = vst [vmem:[%s2604_s6 + $0x224] sm:$0xf] %v517_v19 }
  0xc5   : > { %520 = vst [vmem:[%s2604_s6 + $0x228] sm:$0xf] %v519_v20 }
  0xc6   : > { %522 = vst [vmem:[%s2604_s6 + $0x22c] sm:$0xf] %v521_v21 }
  0xc7   : > { %524 = vst [vmem:[%s2604_s6 + $0x230] sm:$0xf] %v523_v22 }
  0xc8   : > { %526 = vst [vmem:[%s2604_s6 + $0x234] sm:$0xf] %v525_v23 }
  0xc9   : > { %528 = vst [vmem:[%s2604_s6 + $0x238] sm:$0xf] %v527_v24 }
  0xca   : > { %530 = vst [vmem:[%s2604_s6 + $0x23c] sm:$0xf] %v529_v25 }
  0xcb PF: > { %p1862_p0 = scmp.ge.s32.totalorder %s2462_s22, 1  ;;  %p847_p1 = scmp.lt.s32.totalorder %s2462_s22, 5 }
  0xcd   : > { %p848_p2 = pnand %p1862_p0, %p847_p1 }
  0xce   : > { %s854_s5 = sand.u32 (!%p848_p2), 1, %s2438_s16   ;;  %s861_s23 = sand.u32 (!%p848_p2), 1, %s2430_s14  }
  0xcf   : > { %851 = sbr.rel (%p848_p2) target bundleno = 479 (0x1df), region = 91  ;;  %s887_s0 = sand.u32 (!%p848_p2), 1, %s2422_s12  }
  0xd0   : > { %s2284_s28 = smul.u32 (!%p848_p2), 72, %s854_s5  ;;  %s1863_s11 = sshll.u32 (!%p848_p2), %s887_s0, 3 }
  0xd1   : > { %s2285_s7 = smul.u32 (!%p848_p2), 576, %s861_s23  ;;  %p893_p3 = scmp.lt.s32.totalorder (!%p848_p2), %s2450_s19, 1 }
  0xd2   : > { %s2904_s6 = scalar_lea.vmem (!%p848_p2), [#allocation3], %s2284_s28  ;;  %s2908_s25 = scalar_lea.vmem (!%p848_p2), [#allocation5], %s1863_s11 }
  0xd3   : > { %s2906_s1 = scalar_lea.vmem (!%p848_p2), [#allocation4], %s2285_s7  ;;  %p1864_p4 = scmp.ne.s32.totalorder (!%p848_p2), %s2446_s18, 0 }
  0xd4   : > { %s2898_s26 = scalar_select %p893_p3, %s2450_s19, 1 }
  0xd5   : > { %900 = sbr.rel (%p1864_p4) target bundleno = 221 (0xdd), region = 103 }
  0xd6   : > { %s895_s4 = scalar_lea.vmem %s3051_s2, %s2898_s26 }
  0xda   : > { %v2464_v26 = vmov 0.0  }
  0xdb   : > { %901 = vst [vmem:[#allocation2] sm:$0xff] %v2464_v26 }
  0xdc   : > { %902 = vst [vmem:[#allocation2 + $0x8] sm:$0xff] %v2464_v26 }
  0xdd PF: > { %v2212_v27 = vld [vmem:[%s2906_s1 + $0x38] sm:$0xff]  ;;  %v2211_v31 = vld [vmem:[%s2906_s1 + $0x30] sm:$0xff]  ;;  %v2210_v35 = vld [vmem:[%s2906_s1 + $0x28] sm:$0xff]  ;;  %p2189_p5 = scmp.ne.s32.totalorder %s2446_s18, 1 }
  0xde   : > { %v2228_v28 = vld [vmem:[%s2906_s1 + $0xb8] sm:$0xff]  ;;  %1537 = vmatpush.bf16.msra.mxu0 %v2212_v27  ;;  %v2227_v32 = vld [vmem:[%s2906_s1 + $0xb0] sm:$0xff]  ;;  %v2226_v36 = vld [vmem:[%s2906_s1 + $0xa8] sm:$0xff] }
  0xdf   : > { %v2220_v29 = vld [vmem:[%s2906_s1 + $0x78] sm:$0xff]  ;;  %1565 = vmatpush.bf16.msra.mxu2 %v2228_v28  ;;  %v2219_v33 = vld [vmem:[%s2906_s1 + $0x70] sm:$0xff]  ;;  %v2218_v37 = vld [vmem:[%s2906_s1 + $0x68] sm:$0xff] }
  0xe0   : > { %v2236_v30 = vld [vmem:[%s2906_s1 + $0xf8] sm:$0xff]  ;;  %1551 = vmatpush.bf16.msra.mxu1 %v2220_v29  ;;  %v2235_v34 = vld [vmem:[%s2906_s1 + $0xf0] sm:$0xff]  ;;  %v2234_v38 = vld [vmem:[%s2906_s1 + $0xe8] sm:$0xff] }
  0xe1   : > { %1579 = vmatpush.bf16.msra.mxu3 %v2236_v30  ;;  %v2209_v39 = vld [vmem:[%s2906_s1 + $0x20] sm:$0xff]  ;;  %v2208_v43 = vld [vmem:[%s2906_s1 + $0x18] sm:$0xff]  ;;  %v2207_v47 = vld [vmem:[%s2906_s1 + $0x10] sm:$0xff] }
  0xe2   : > { %1538 = vmatpush.bf16.msra.mxu0 %v2211_v31  ;;  %v2225_v40 = vld [vmem:[%s2906_s1 + $0xa0] sm:$0xff]  ;;  %v2224_v44 = vld [vmem:[%s2906_s1 + $0x98] sm:$0xff]  ;;  %v2223_v48 = vld [vmem:[%s2906_s1 + $0x90] sm:$0xff] }
  0xe3   : > { %1566 = vmatpush.bf16.msra.mxu2 %v2227_v32  ;;  %v2217_v41 = vld [vmem:[%s2906_s1 + $0x60] sm:$0xff]  ;;  %v2216_v45 = vld [vmem:[%s2906_s1 + $0x58] sm:$0xff]  ;;  %v2215_v49 = vld [vmem:[%s2906_s1 + $0x50] sm:$0xff] }
  0xe4   : > { %1552 = vmatpush.bf16.msra.mxu1 %v2219_v33  ;;  %v2233_v42 = vld [vmem:[%s2906_s1 + $0xe0] sm:$0xff]  ;;  %v2232_v46 = vld [vmem:[%s2906_s1 + $0xd8] sm:$0xff]  ;;  %v2231_v50 = vld [vmem:[%s2906_s1 + $0xd0] sm:$0xff] }
  0xe5   : > { %1580 = vmatpush.bf16.msra.mxu3 %v2235_v34  ;;  %v2206_v51 = vld [vmem:[%s2906_s1 + $0x8] sm:$0xff]  ;;  %v2205_v55 = vld [vmem:[%s2906_s1] sm:$0xff]  ;;  %v2244_v57 = vld [vmem:[%s2906_s1 + $0x138] sm:$0xff] }
  0xe6   : > { %1539 = vmatpush.bf16.msra.mxu0 %v2210_v35  ;;  %v2222_v52 = vld [vmem:[%s2906_s1 + $0x88] sm:$0xff]  ;;  %v2221_v56 = vld [vmem:[%s2906_s1 + $0x80] sm:$0xff]  ;;  %v2260_v58 = vld [vmem:[%s2906_s1 + $0x1b8] sm:$0xff] }
  0xe7   : > { %1567 = vmatpush.bf16.msra.mxu2 %v2226_v36  ;;  %v2214_v53 = vld [vmem:[%s2906_s1 + $0x48] sm:$0xff]  ;;  %v2213_v59 = vld [vmem:[%s2906_s1 + $0x40] sm:$0xff]  ;;  %v1867_v61 = vld [vmem:[%s2904_s6] sm:$0xf] }
  0xe8   : > { %1553 = vmatpush.bf16.msra.mxu1 %v2218_v37  ;;  %v2230_v54 = vld [vmem:[%s2906_s1 + $0xc8] sm:$0xff]  ;;  %v2229_v60 = vld [vmem:[%s2906_s1 + $0xc0] sm:$0xff]  ;;  %v2200_v62 = vld [vmem:[%s2904_s6 + $0x20] sm:$0xf0] }
  0xe9   : > { %1581 = vmatpush.bf16.msra.mxu3 %v2234_v38  ;;  %v1875_v63 = vld [vmem:[%s2904_s6 + $0x8] sm:$0xf]  ;;  %v2201_v0 = vld [vmem:[%s2904_s6 + $0x28] sm:$0xf0]  ;;  %v2196_v3 = vld [vmem:[%s2904_s6 + $0x4] sm:$0xf]  ;;  %v1868_v7 = vor.u32 %v2200_v62, %v1867_v61 }
  0xea   : > { %1540 = vmatpush.bf16.msra.mxu0 %v2209_v39  ;;  %v2252_v1 = vld [vmem:[%s2906_s1 + $0x178] sm:$0xff]  ;;  %v1877_v6 = vld [vmem:[%s2904_s6 + $0x2c] sm:$0xf0]  ;;  %v1876_v8 = vor.u32 %v2201_v0, %v1875_v63  ;;  %v2243_v9 = vld [vmem:[%s2906_s1 + $0x130] sm:$0xff] }
  0xeb   : > { %1568 = vmatpush.bf16.msra.mxu2 %v2225_v40  ;;  %v2268_v2 = vld [vmem:[%s2906_s1 + $0x1f8] sm:$0xff]  ;;  %v2259_v10 = vld [vmem:[%s2906_s1 + $0x1b0] sm:$0xff]  ;;  %v2242_v15 = vld [vmem:[%s2906_s1 + $0x128] sm:$0xff] }
  0xec   : > { %1554 = vmatpush.bf16.msra.mxu1 %v2217_v41  ;;  %v1869_v4 = vld [vmem:[%s2904_s6 + $0x24] sm:$0xf0]  ;;  %v2197_v5 = vld [vmem:[%s2904_s6 + $0xc] sm:$0xf]  ;;  %v2251_v13 = vld [vmem:[%s2906_s1 + $0x170] sm:$0xff] }
  0xed   : > { %1582 = vmatpush.bf16.msra.mxu3 %v2233_v42  ;;  %v1872_v11 = vor.u32 %v2196_v3, %v1869_v4  ;;  %v1880_v12 = vor.u32 %v2197_v5, %v1877_v6  ;;  %v2267_v14 = vld [vmem:[%s2906_s1 + $0x1f0] sm:$0xff]  ;;  %v2258_v16 = vld [vmem:[%s2906_s1 + $0x1a8] sm:$0xff]  ;;  %v2241_v19 = vld [vmem:[%s2906_s1 + $0x120] sm:$0xff] }
  0xee   : > { %1541 = vmatpush.bf16.msra.mxu0 %v2208_v43  ;;  %v2250_v17 = vld [vmem:[%s2906_s1 + $0x168] sm:$0xff]  ;;  %v2257_v20 = vld [vmem:[%s2906_s1 + $0x1a0] sm:$0xff]  ;;  %v2240_v23 = vld [vmem:[%s2906_s1 + $0x118] sm:$0xff] }
  0xef   : > { %1569 = vmatpush.bf16.msra.mxu2 %v2224_v44  ;;  %v2266_v18 = vld [vmem:[%s2906_s1 + $0x1e8] sm:$0xff]  ;;  %v2249_v21 = vld [vmem:[%s2906_s1 + $0x160] sm:$0xff]  ;;  %v2256_v24 = vld [vmem:[%s2906_s1 + $0x198] sm:$0xff] }
  0xf0   : > { %1555 = vmatpush.bf16.msra.mxu1 %v2216_v45  ;;  %v2265_v22 = vld [vmem:[%s2906_s1 + $0x1e0] sm:$0xff]  ;;  %v2248_v25 = vld [vmem:[%s2906_s1 + $0x158] sm:$0xff]  ;;  %v2239_v27 = vld [vmem:[%s2906_s1 + $0x110] sm:$0xff] }
  0xf1   : > { %1583 = vmatpush.bf16.msra.mxu3 %v2232_v46  ;;  %v2264_v26 = vld [vmem:[%s2906_s1 + $0x1d8] sm:$0xff]  ;;  %v2255_v28 = vld [vmem:[%s2906_s1 + $0x190] sm:$0xff]  ;;  %v2238_v31 = vld [vmem:[%s2906_s1 + $0x108] sm:$0xff] }
  0xf2   : > { %1542 = vmatpush.bf16.msra.mxu0 %v2207_v47  ;;  %v2247_v29 = vld [vmem:[%s2906_s1 + $0x150] sm:$0xff]  ;;  %v2254_v32 = vld [vmem:[%s2906_s1 + $0x188] sm:$0xff]  ;;  %v2237_v35 = vld [vmem:[%s2906_s1 + $0x100] sm:$0xff] }
  0xf3   : > { %1570 = vmatpush.bf16.msra.mxu2 %v2223_v48  ;;  %v2263_v30 = vld [vmem:[%s2906_s1 + $0x1d0] sm:$0xff]  ;;  %v2246_v33 = vld [vmem:[%s2906_s1 + $0x148] sm:$0xff]  ;;  %v2253_v36 = vld [vmem:[%s2906_s1 + $0x180] sm:$0xff] }
  0xf4   : > { %1556 = vmatpush.bf16.msra.mxu1 %v2215_v49  ;;  %v2262_v34 = vld [vmem:[%s2906_s1 + $0x1c8] sm:$0xff]  ;;  %v2276_v37 = vld [vmem:[%s2906_s1 + $0x238] sm:$0xff]  ;;  %v2245_v42 = vld [vmem:[%s2906_s1 + $0x140] sm:$0xff] }
  0xf5   : > { %1584 = vmatpush.bf16.msra.mxu3 %v2231_v50  ;;  %v1883_v38 = vld [vmem:[%s2904_s6 + $0x10] sm:$0xf]  ;;  %v2202_v39 = vld [vmem:[%s2904_s6 + $0x30] sm:$0xf0]  ;;  %v1891_v40 = vld [vmem:[%s2904_s6 + $0x18] sm:$0xf] }
  0xf6   : > { %1543 = vmatpush.bf16.msra.mxu0 %v2206_v51  ;;  %v2203_v41 = vld [vmem:[%s2904_s6 + $0x38] sm:$0xf0]  ;;  %v2261_v43 = vld [vmem:[%s2906_s1 + $0x1c0] sm:$0xff]  ;;  %v1885_v45 = vld [vmem:[%s2904_s6 + $0x34] sm:$0xf0]  ;;  %v1884_v48 = vor.u32 %v2202_v39, %v1883_v38 }
  0xf7   : > { %1571 = vmatpush.bf16.msra.mxu2 %v2222_v52  ;;  %v2198_v44 = vld [vmem:[%s2904_s6 + $0x14] sm:$0xf]  ;;  %v2199_v46 = vld [vmem:[%s2904_s6 + $0x1c] sm:$0xf]  ;;  %v1893_v47 = vld [vmem:[%s2904_s6 + $0x3c] sm:$0xf0]  ;;  %v1892_v49 = vor.u32 %v2203_v41, %v1891_v40 }
  0xf8   : > { %1557 = vmatpush.bf16.msra.mxu1 %v2214_v53  ;;  %v1888_v50 = vor.u32 %v2198_v44, %v1885_v45  ;;  %v1896_v51 = vor.u32 %v2199_v46, %v1893_v47  ;;  %v2275_v52 = vld [vmem:[%s2906_s1 + $0x230] sm:$0xff]  ;;  %v2274_v53 = vld [vmem:[%s2906_s1 + $0x228] sm:$0xff] }
  0xf9   : > { %1585 = vmatpush.bf16.msra.mxu3 %v2230_v54  ;;  %v2273_v54 = vld [vmem:[%s2906_s1 + $0x220] sm:$0xff] }
  0xfa   : > { %1544 = vmatpush.bf16.msra.mxu0 %v2205_v55  ;;  %v2272_v55 = vld [vmem:[%s2906_s1 + $0x218] sm:$0xff] }
  0xfb   : > { %1572 = vmatpush.bf16.msra.mxu2 %v2221_v56  ;;  %v2271_v56 = vld [vmem:[%s2906_s1 + $0x210] sm:$0xff] }
  0xfc   : > { %1558 = vmatpush.bf16.msra.mxu1 %v2213_v59  ;;  %v1899_v59 = vld [vmem:[%s2904_s6 + $0x20] sm:$0xf] }
  0xfd   : > { %1586 = vmatpush.bf16.msra.mxu3 %v2229_v60  ;;  %1545 = vmatmul.bf16.vlgmr.msra.gmra.mxu0 %v1868_v7  ;;  %v2204_v60 = vld [vmem:[%s2904_s6 + $0x40] sm:$0xf0] }
  0xfe   : > { %1593 = vmatpush.bf16.msrb.mxu0 %v2244_v57  ;;  %1573 = vmatmul.bf16.vlgmr.msra.gmra.mxu2 %v1876_v8  ;;  %v2270_v57 = vld [vmem:[%s2906_s1 + $0x208] sm:$0xff]  ;;  %v1900_v61 = vor.u32 %v2204_v60, %v1899_v59 }
  0xff   : > { %1621 = vmatpush.bf16.msrb.mxu2 %v2260_v58  ;;  %1559 = vmatmul.bf16.vlgmr.msra.gmra.mxu1 %v1872_v11  ;;  %v2269_v58 = vld [vmem:[%s2906_s1 + $0x200] sm:$0xff] }
 0x100   : > { %1607 = vmatpush.bf16.msrb.mxu1 %v2252_v1  ;;  %1587 = vmatmul.bf16.vlgmr.msra.gmra.mxu3 %v1880_v12 }
 0x101   : > { %1635 = vmatpush.bf16.msrb.mxu3 %v2268_v2 }
 0x102   : > { %1594 = vmatpush.bf16.msrb.mxu0 %v2243_v9 }
 0x103   : > { %1622 = vmatpush.bf16.msrb.mxu2 %v2259_v10 }
 0x104   : > { %1608 = vmatpush.bf16.msrb.mxu1 %v2251_v13 }
 0x105   : > { %1636 = vmatpush.bf16.msrb.mxu3 %v2267_v14 }
 0x106   : > { %1595 = vmatpush.bf16.msrb.mxu0 %v2242_v15 }
 0x107   : > { %1623 = vmatpush.bf16.msrb.mxu2 %v2258_v16 }
 0x108   : > { %1609 = vmatpush.bf16.msrb.mxu1 %v2250_v17 }
 0x109   : > { %1637 = vmatpush.bf16.msrb.mxu3 %v2266_v18 }
 0x10a   : > { %1596 = vmatpush.bf16.msrb.mxu0 %v2241_v19 }
 0x10b   : > { %1624 = vmatpush.bf16.msrb.mxu2 %v2257_v20 }
 0x10c   : > { %1610 = vmatpush.bf16.msrb.mxu1 %v2249_v21 }
 0x10d   : > { %1638 = vmatpush.bf16.msrb.mxu3 %v2265_v22 }
 0x10e   : > { %1597 = vmatpush.bf16.msrb.mxu0 %v2240_v23 }
 0x10f   : > { %1625 = vmatpush.bf16.msrb.mxu2 %v2256_v24  ;;  %v903_v24 = vld [vmem:[#allocation2] sm:$0xff] }
 0x110   : > { %1611 = vmatpush.bf16.msrb.mxu1 %v2248_v25 }
 0x111   : > { %1639 = vmatpush.bf16.msrb.mxu3 %v2264_v26 }
 0x112   : > { %1598 = vmatpush.bf16.msrb.mxu0 %v2239_v27 }
 0x113   : > { %1626 = vmatpush.bf16.msrb.mxu2 %v2255_v28 }
 0x114   : > { %1612 = vmatpush.bf16.msrb.mxu1 %v2247_v29 }
 0x115   : > { %1640 = vmatpush.bf16.msrb.mxu3 %v2263_v30 }
 0x116   : > { %1599 = vmatpush.bf16.msrb.mxu0 %v2238_v31 }
 0x117   : > { %1627 = vmatpush.bf16.msrb.mxu2 %v2254_v32  ;;  %v904_v32 = vld [vmem:[#allocation2 + $0x8] sm:$0xff] }
 0x118   : > { %1613 = vmatpush.bf16.msrb.mxu1 %v2246_v33 }
 0x119   : > { %1641 = vmatpush.bf16.msrb.mxu3 %v2262_v34 }
 0x11a   : > { %1600 = vmatpush.bf16.msrb.mxu0 %v2237_v35 }
 0x11b   : > { %1628 = vmatpush.bf16.msrb.mxu2 %v2253_v36 }
 0x11c   : > { %1614 = vmatpush.bf16.msrb.mxu1 %v2245_v42 }
 0x11d   : > { %1642 = vmatpush.bf16.msrb.mxu3 %v2261_v43  ;;  %1601 = vmatmul.bf16.vlgmr.msrb.gmra.mxu0 %v1884_v48 }
 0x11e   : > { %1649 = vmatpush.bf16.msra.mxu0 %v2276_v37  ;;  %1629 = vmatmul.bf16.vlgmr.msrb.gmra.mxu2 %v1892_v49 }
 0x11f   : > { %1615 = vmatmul.bf16.vlgmr.msrb.gmra.mxu1 %v1888_v50 }
 0x120   : > { %1643 = vmatmul.bf16.vlgmr.msrb.gmra.mxu3 %v1896_v51 }
 0x122   : > { %1650 = vmatpush.bf16.msra.mxu0 %v2275_v52 }
 0x126   : > { %1651 = vmatpush.bf16.msra.mxu0 %v2274_v53 }
 0x12a   : > { %1652 = vmatpush.bf16.msra.mxu0 %v2273_v54 }
 0x12e   : > { %1653 = vmatpush.bf16.msra.mxu0 %v2272_v55 }
 0x132   : > { %1654 = vmatpush.bf16.msra.mxu0 %v2271_v56 }
 0x136   : > { %1655 = vmatpush.bf16.msra.mxu0 %v2270_v57 }
 0x13a   : > { %1656 = vmatpush.bf16.msra.mxu0 %v2269_v58 }
 0x13d   : > { %1657 = vmatmul.bf16.vlgmr.msra.gmra.mxu0 %v1900_v61 }
 0x17a   : > { %v1546_v62 = vpop.f32.mrf.mxu0 }
 0x17c   : > { %v1560_v63 = vpop.f32.mrf.mxu1 }
 0x17d   : > { %v1561_v3 = vadd.f32 %v1560_v63, %v1546_v62 }
 0x181   : > { %v1574_v0 = vpop.f32.mrf.mxu2 }
 0x182   : > { %v1548_v1 = vpop.f32.mrf.mxu0  ;;  %v1575_v5 = vadd.f32 %v1574_v0, %v1561_v3 }
 0x183   : > { %v1588_v2 = vpop.f32.mrf.mxu3 }
 0x184   : > { %v1562_v4 = vpop.f32.mrf.mxu1  ;;  %v1589_v8 = vadd.f32 %v1588_v2, %v1575_v5 }
 0x185   : > { %v1563_v10 = vadd.f32 %v1562_v4, %v1548_v1 }
 0x189   : > { %v1576_v6 = vpop.f32.mrf.mxu2 }
 0x18a   : > { %v1577_v14 = vadd.f32 %v1576_v6, %v1563_v10 }
 0x18b   : > { %v1590_v9 = vpop.f32.mrf.mxu3 }
 0x18c   : > { %v1591_v18 = vadd.f32 %v1590_v9, %v1577_v14 }
 0x19a   : > { %v1602_v7 = vpop.f32.mrf.mxu0 }
 0x19b   : > { %v1603_v11 = vadd.f32 %v1602_v7, %v1589_v8 }
 0x19c   : > { %v1616_v12 = vpop.f32.mrf.mxu1 }
 0x19d   : > { %v1617_v15 = vadd.f32 %v1616_v12, %v1603_v11 }
 0x1a1   : > { %v1630_v13 = vpop.f32.mrf.mxu2 }
 0x1a2   : > { %v1604_v16 = vpop.f32.mrf.mxu0  ;;  %v1631_v19 = vadd.f32 %v1630_v13, %v1617_v15 }
 0x1a3   : > { %v1644_v17 = vpop.f32.mrf.mxu3  ;;  %v1605_v20 = vadd.f32 %v1604_v16, %v1591_v18 }
 0x1a4   : > { %v1618_v21 = vpop.f32.mrf.mxu1  ;;  %v1645_v22 = vadd.f32 %v1644_v17, %v1631_v19 }
 0x1a5   : > { %v1619_v26 = vadd.f32 %v1618_v21, %v1605_v20 }
 0x1a9   : > { %v1632_v23 = vpop.f32.mrf.mxu2 }
 0x1aa   : > { %v1633_v28 = vadd.f32 %v1632_v23, %v1619_v26 }
 0x1ab   : > { %v1646_v30 = vpop.f32.mrf.mxu3 }
 0x1ac   : > { %v1647_v31 = vadd.f32 %v1646_v30, %v1633_v28 }
 0x1ba   : > { %v1658_v25 = vpop.f32.mrf.mxu0 }
 0x1bb   : > { %v1659_v27 = vadd.f32 %v1658_v25, %v1645_v22 }
 0x1bd   : > { %v1663_v29 = vadd.f32 %v1659_v27, %v903_v24 }
 0x1bf   : > { %1665 = vst [vmem:[#allocation2] sm:$0xff] %v1663_v29 }
 0x1c2   : > { %v1660_v33 = vpop.f32.mrf.mxu0 }
 0x1c3   : > { %v1661_v34 = vadd.f32 %v1660_v33, %v1647_v31  ;;  %1670 = sbr.rel (%p2189_p5) target bundleno = 470 (0x1d6), region = 107 }
 0x1c5   : > { %v1664_v35 = vadd.f32 %v1661_v34, %v904_v32 }
 0x1c7   : > { %1666 = vst [vmem:[#allocation2 + $0x8] sm:$0xff] %v1664_v35 }
 0x1c8   : > { %v1671_v36 = vld [vmem:[#allocation2] sm:$0xff] }
 0x1c9   : > { %v2375_v38 = vld [vmem:[%s895_s4] ss:$0 sm:$0xff] }
 0x1ca   : > { %v1677_v39 = vadd.f32 %v2375_v38, %v1671_v36 }
 0x1cc   : > { %v1679_v41 = vmax.f32 %v1677_v39, 0.0 }
 0x1ce   : > { %v1672_v37 = vld [vmem:[#allocation2 + $0x8] sm:$0xff] }
 0x1cf   : > { %v1678_v40 = vadd.f32 %v2375_v38, %v1672_v37 }
 0x1d1   : > { %v1680_v42 = vmax.f32 %v1678_v40, 0.0 }
 0x1d3   : > { %v2280_v43 = vpack.c.bf16 %v1680_v42, %v1679_v41 }
 0x1d5   : > { %2281 = vst [vmem:[%s2908_s25] sm:$0xff] %v2280_v43  }
 0x1d6 PF: > { %1691 = sbr.rel (!%p2579_p12) target bundleno = 479 (0x1df), region = 111  ;;  %s2191_s14 = sshll.u32 (%p2579_p12), %s2450_s19, 2 }
 0x1d7   : > { %s1696_s5 = scalar_lea.vmem (%p2579_p12), %s3052_s3, %s2191_s14 }
 0x1dc   : > { %v1713_v44 = vld [vmem:[%s2908_s25] sm:$0xf]  ;;  %v1715_v45 = vld [vmem:[%s2908_s25 + $0x4] sm:$0xf] }
 0x1dd   : > { %1714 = vst [vmem:[%s1696_s5] sm:$0xf] %v1713_v44 }
 0x1de   : > { %1716 = vst [vmem:[%s1696_s5 + $0x8] sm:$0xf] %v1715_v45 }
 0x1df PF: > { %s13_s22 = sadd.s32 1, %s2462_s22   ;;  %s3062_s25 = sld [smem:[#allocation6_spill]] }
 0x1e0   : > { %p10_p6 = scmp.ge.s32.totalorder %s13_s22, 6   ;;  %s3063_s12 = smov %s2426_s13 }
 0x1e1   : > { %s3064_s13 = smov %s2577_s9  ;;  %s3065_s14 = smov %s2434_s15 }
 0x1e2   : > { %s3066_s15 = smov %s2574_s8  ;;  %s3067_s16 = smov %s2442_s17 }
 0x1e3   : > { %s3068_s17 = smov %s2560_s30  ;;  %s3069_s18 = smov %s2454_s20 }
 0x1e4   : > { %s3070_s19 = smov %s2458_s21  ;;  %s3071_s20 = smov %s3074_s24 }
 0x1e5   : > { %s3072_s21 = smov %s3062_s25  ;;  %12 = sbr.rel (!%p10_p6) target bundleno = 9 (0x9), region = 200 }

// kernel: _lambda_.37
= control target key start
LH: loop header
LB: loop body
LE: loop exit
PB: predicated region body
PF: predicated region fallthrough
CT: control target
= control target key end

     0   :  { %s3210_s0 = inlined_call_operand.vmem [shape: bf16[16,2304], index: 0, kind: input, shape index: {}]   ;;  %s3211_s1 = inlined_call_operand.vmem [shape: bf16[2304,256], index: 1, kind: input, shape index: {}]   ;;  %s3212_s2 = inlined_call_operand.vmem [shape: f32[1,256], index: 2, kind: input, shape index: {}]   ;;  %s3213_s3 = inlined_call_operand.vmem [shape: bf16[16,256], index: 3, kind: input, shape index: {}]   ;;  %s3214_s4 = inlined_call_operand.vmem [shape: bf16[16,256], index: 4, kind: output, shape index: {}]  }
   0x1   :  { %3217 = sst [smem:[#allocation9_spill]] %s3210_s0 }
   0x2   :  { %s2623_s15 = smov 0   ;;  %s2625_s16 = smov 0  }
   0x3   :  { %s2627_s17 = smov 0   ;;  %s2629_s18 = smov 0  }
   0x4   :  { %s2631_s19 = smov 0   ;;  %s2633_s20 = smov 0  }
   0x5   :  { %s2635_s21 = smov 0   ;;  %s2637_s22 = smov 0  }
   0x6   :  { %s2639_s23 = smov 0   ;;  %s2641_s24 = smov 0  }
   0x7   :  { %s2643_s25 = smov 0  }
   0x8 LB: > { %s1977_s26 = sadd.s32 4294967295, %s2595_s25   ;;  %s26_s27 = sadd.s32 1, %s2587_s23  ;;  %s2595_s25 = sphi %s2643_s25, %s14_s25   ;;  %s2591_s24 = sphi %s2641_s24, %s3236_s24   ;;  %s2587_s23 = sphi %s2639_s23, %s3235_s23   ;;  %s2583_s22 = sphi %s2637_s22, %s3234_s22   ;;  %s2579_s21 = sphi %s2635_s21, %s3233_s21   ;;  %s2575_s20 = sphi %s2633_s20, %s3232_s20   ;;  %s2571_s19 = sphi %s2631_s19, %s3231_s19   ;;  %s2567_s18 = sphi %s2629_s18, %s3230_s18   ;;  %s2563_s17 = sphi %s2627_s17, %s3229_s17   ;;  %s2559_s16 = sphi %s2625_s16, %s3228_s16   ;;  %s2555_s15 = sphi %s2623_s15, %s3227_s15  }
   0x9   : > { %p27_p0 = scmp.ge.s32.totalorder %s26_s27, 2  ;;  %s29_s28 = sadd.s32 1, %s2591_s24 }
   0xa   : > { %s42_s29 = sadd.s32 1, %s2575_s20  ;;  %p49_p1 = scmp.ne.s32.totalorder %s2575_s20, %s2571_s19 }
   0xb   : > { %s3238_s27 = smov (%p27_p0, %s26_s27), 0  ;;  %s3240_s28 = smov (!%p27_p0, %s29_s28), %s2591_s24 }
   0xc   : > { %3218 = sst [smem:[#allocation7_spill]] %s3238_s27  ;;  %s38_s30 = ssub.s32 %s2587_s23, %s3238_s27 }
   0xd   : > { %p50_p2 = scmp.eq.s32.totalorder %s2595_s25, 0  ;;  %p31_p3 = scmp.ge.s32.totalorder %s3240_s28, 2 }
   0xe   : > { %p40_p4 = scmp.eq.s32.totalorder %s38_s30, 0  ;;  %s70_s6 = sadd.s32 1, %s2567_s18 }
   0xf   : > { %p2692_p5 = por %p50_p2, %p49_p1  ;;  %s3242_s28 = smov (%p31_p3, %s3240_s28), 0 }
  0x10   : > { %3220 = sst [smem:[#allocation8_spill]] %s3242_s28  ;;  %s66_s8 = ssub.s32 %s2591_s24, %s3242_s28 }
  0x11   : > { %s2700_s7 = scalar_select %p40_p4, %s2575_s20, %s42_s29  }
  0x12   : > { %p77_p6 = scmp.ne.s32.totalorder %s2567_s18, %s2563_s17  ;;  %s67_s9 = sor.u32 %s66_s8, %s38_s30 }
  0x13   : > { %p122_p7 = scmp.eq.s32.totalorder %s66_s8, 0  ;;  %p68_p8 = scmp.eq.s32.totalorder %s67_s9, 0 }
  0x14   : > { %p2708_p9 = por %p77_p6, %p50_p2  ;;  %s124_s11 = sadd.s32 1, %s2559_s16 }
  0x15   : > { %p131_p10 = scmp.ne.s32.totalorder %s2559_s16, %s2555_s15  ;;  %p163_p12 = scmp.eq.s32.totalorder %s1977_s26, 3 }
  0x16   : > { %s2716_s12 = scalar_select %p68_p8, %s2567_s18, %s70_s6  }
  0x17   : > { %s2719_s13 = scalar_select %p122_p7, %s2559_s16, %s124_s11  }
  0x18   : > { %p2723_p11 = por %p131_p10, %p50_p2  ;;  %p2727_p13 = por %p163_p12, %p131_p10 }
  0x19   : > { %p1980_p0 = scmp.ge.s32.totalorder %s2595_s25, 4 }
  0x1b   : > { %185 = sbr.rel (%p1980_p0) target bundleno = 208 (0xd0), region = 16 }
  0x20   : > { %188 = sbr.rel (!%p2692_p5) target bundleno = 51 (0x33), region = 20  ;;  %s190_s30 = sand.u32 (%p2692_p5), 1, %s2575_s20  }
  0x21   : > { %s2323_s6 = smul.u32 (%p2692_p5), 36, %s2587_s23  ;;  %s3224_s0 = sld [smem:[#allocation9_spill]] (%p2692_p5) }
  0x22   : > { %s2415_s8 = smul.u32 (%p2692_p5), 72, %s190_s30 }
  0x24   : > { %s192_s26 = scalar_lea.vmem (%p2692_p5), [#allocation3], %s2415_s8 }
  0x27   : > { %s198_s28 = scalar_lea.vmem %s3224_s0, %s2323_s6 }
  0x28   : > { %v213_v0 = vld [vmem:[%s198_s28] sm:$0xff]  ;;  %v215_v1 = vld [vmem:[%s198_s28 + $0x8] sm:$0xff]  ;;  %v217_v2 = vld [vmem:[%s198_s28 + $0x10] sm:$0xff] }
  0x29   : > { %214 = vst [vmem:[%s192_s26] sm:$0xff] %v213_v0  ;;  %v219_v3 = vld [vmem:[%s198_s28 + $0x18] sm:$0xff]  ;;  %v221_v4 = vld [vmem:[%s198_s28 + $0x48] sm:$0xff]  ;;  %v223_v5 = vld [vmem:[%s198_s28 + $0x50] sm:$0xff] }
  0x2a   : > { %216 = vst [vmem:[%s192_s26 + $0x8] sm:$0xff] %v215_v1  ;;  %v225_v6 = vld [vmem:[%s198_s28 + $0x58] sm:$0xff]  ;;  %v227_v7 = vld [vmem:[%s198_s28 + $0x60] sm:$0xff]  ;;  %v1984_v9 = vld [vmem:[%s198_s28 + $0x68] sm:$0xf] }
  0x2b   : > { %218 = vst [vmem:[%s192_s26 + $0x10] sm:$0xff] %v217_v2  ;;  %v1982_v8 = vld [vmem:[%s198_s28 + $0x20] sm:$0xf] }
  0x2c   : > { %220 = vst [vmem:[%s192_s26 + $0x18] sm:$0xff] %v219_v3 }
  0x2d   : > { %222 = vst [vmem:[%s192_s26 + $0x24] sm:$0xff] %v221_v4 }
  0x2e   : > { %224 = vst [vmem:[%s192_s26 + $0x2c] sm:$0xff] %v223_v5 }
  0x2f   : > { %226 = vst [vmem:[%s192_s26 + $0x34] sm:$0xff] %v225_v6 }
  0x30   : > { %228 = vst [vmem:[%s192_s26 + $0x3c] sm:$0xff] %v227_v7 }
  0x31   : > { %1983 = vst [vmem:[%s192_s26 + $0x20] sm:$0xf] %v1982_v8 }
  0x32   : > { %1985 = vst [vmem:[%s192_s26 + $0x44] sm:$0xf] %v1984_v9 }
  0x33 PF: > { %246 = sbr.rel (!%p2708_p9) target bundleno = 202 (0xca), region = 46  ;;  %s248_s5 = sand.u32 (%p2708_p9), 1, %s2567_s18  }
  0x34   : > { %s2324_s30 = smul.u32 (%p2708_p9), 288, %s2587_s23 }
  0x35   : > { %s2416_s6 = smul.u32 (%p2708_p9), 576, %s248_s5 }
  0x36   : > { %s253_s8 = sadd.s32 (%p2708_p9), %s2591_s24, %s2324_s30 }
  0x37   : > { %s1987_s9 = sshll.u32 (%p2708_p9), %s253_s8, 2  ;;  %s2752_s28 = scalar_lea.vmem (%p2708_p9), [#allocation4], %s2416_s6 }
  0x38   : > { %s2747_s27 = scalar_lea.vmem %s3211_s1, %s1987_s9 }
  0x39   : > { %v272_v10 = vld [vmem:[%s2747_s27] sm:$0xf]  ;;  %v274_v11 = vld [vmem:[%s2747_s27 + $0x8] sm:$0xf]  ;;  %v276_v12 = vld [vmem:[%s2747_s27 + $0x10] sm:$0xf] }
  0x3a   : > { %273 = vst [vmem:[%s2752_s28] sm:$0xf] %v272_v10  ;;  %v278_v13 = vld [vmem:[%s2747_s27 + $0x18] sm:$0xf]  ;;  %v280_v14 = vld [vmem:[%s2747_s27 + $0x20] sm:$0xf] }
  0x3b   : > { %275 = vst [vmem:[%s2752_s28 + $0x4] sm:$0xf] %v274_v11  ;;  %v282_v15 = vld [vmem:[%s2747_s27 + $0x28] sm:$0xf]  ;;  %v284_v16 = vld [vmem:[%s2747_s27 + $0x30] sm:$0xf] }
  0x3c   : > { %277 = vst [vmem:[%s2752_s28 + $0x8] sm:$0xf] %v276_v12  ;;  %v286_v17 = vld [vmem:[%s2747_s27 + $0x38] sm:$0xf]  ;;  %v288_v18 = vld [vmem:[%s2747_s27 + $0x40] sm:$0xf] }
  0x3d   : > { %279 = vst [vmem:[%s2752_s28 + $0xc] sm:$0xf] %v278_v13  ;;  %v290_v19 = vld [vmem:[%s2747_s27 + $0x48] sm:$0xf]  ;;  %v292_v20 = vld [vmem:[%s2747_s27 + $0x50] sm:$0xf] }
  0x3e   : > { %281 = vst [vmem:[%s2752_s28 + $0x10] sm:$0xf] %v280_v14  ;;  %v294_v21 = vld [vmem:[%s2747_s27 + $0x58] sm:$0xf]  ;;  %v296_v22 = vld [vmem:[%s2747_s27 + $0x60] sm:$0xf] }
  0x3f   : > { %283 = vst [vmem:[%s2752_s28 + $0x14] sm:$0xf] %v282_v15  ;;  %v298_v23 = vld [vmem:[%s2747_s27 + $0x68] sm:$0xf]  ;;  %v300_v24 = vld [vmem:[%s2747_s27 + $0x70] sm:$0xf] }
  0x40   : > { %285 = vst [vmem:[%s2752_s28 + $0x18] sm:$0xf] %v284_v16  ;;  %v302_v25 = vld [vmem:[%s2747_s27 + $0x78] sm:$0xf]  ;;  %v304_v26 = vld [vmem:[%s2747_s27 + $0x80] sm:$0xf] }
  0x41   : > { %287 = vst [vmem:[%s2752_s28 + $0x1c] sm:$0xf] %v286_v17  ;;  %v306_v27 = vld [vmem:[%s2747_s27 + $0x88] sm:$0xf]  ;;  %v308_v28 = vld [vmem:[%s2747_s27 + $0x90] sm:$0xf] }
  0x42   : > { %289 = vst [vmem:[%s2752_s28 + $0x20] sm:$0xf] %v288_v18  ;;  %v310_v29 = vld [vmem:[%s2747_s27 + $0x98] sm:$0xf]  ;;  %v312_v30 = vld [vmem:[%s2747_s27 + $0xa0] sm:$0xf] }
  0x43   : > { %291 = vst [vmem:[%s2752_s28 + $0x24] sm:$0xf] %v290_v19  ;;  %v314_v31 = vld [vmem:[%s2747_s27 + $0xa8] sm:$0xf]  ;;  %v316_v32 = vld [vmem:[%s2747_s27 + $0xb0] sm:$0xf] }
  0x44   : > { %293 = vst [vmem:[%s2752_s28 + $0x28] sm:$0xf] %v292_v20  ;;  %v318_v33 = vld [vmem:[%s2747_s27 + $0xb8] sm:$0xf]  ;;  %v320_v34 = vld [vmem:[%s2747_s27 + $0xc0] sm:$0xf] }
  0x45   : > { %295 = vst [vmem:[%s2752_s28 + $0x2c] sm:$0xf] %v294_v21  ;;  %v322_v35 = vld [vmem:[%s2747_s27 + $0xc8] sm:$0xf]  ;;  %v324_v36 = vld [vmem:[%s2747_s27 + $0xd0] sm:$0xf] }
  0x46   : > { %297 = vst [vmem:[%s2752_s28 + $0x30] sm:$0xf] %v296_v22  ;;  %v326_v37 = vld [vmem:[%s2747_s27 + $0xd8] sm:$0xf]  ;;  %v328_v38 = vld [vmem:[%s2747_s27 + $0xe0] sm:$0xf] }
  0x47   : > { %299 = vst [vmem:[%s2752_s28 + $0x34] sm:$0xf] %v298_v23  ;;  %v330_v39 = vld [vmem:[%s2747_s27 + $0xe8] sm:$0xf]  ;;  %v332_v40 = vld [vmem:[%s2747_s27 + $0xf0] sm:$0xf] }
  0x48   : > { %301 = vst [vmem:[%s2752_s28 + $0x38] sm:$0xf] %v300_v24  ;;  %v334_v41 = vld [vmem:[%s2747_s27 + $0xf8] sm:$0xf]  ;;  %v336_v42 = vld [vmem:[%s2747_s27 + $0x100] sm:$0xf] }
  0x49   : > { %303 = vst [vmem:[%s2752_s28 + $0x3c] sm:$0xf] %v302_v25  ;;  %v338_v43 = vld [vmem:[%s2747_s27 + $0x108] sm:$0xf]  ;;  %v340_v44 = vld [vmem:[%s2747_s27 + $0x110] sm:$0xf] }
  0x4a   : > { %305 = vst [vmem:[%s2752_s28 + $0x40] sm:$0xf] %v304_v26  ;;  %v342_v45 = vld [vmem:[%s2747_s27 + $0x118] sm:$0xf]  ;;  %v344_v46 = vld [vmem:[%s2747_s27 + $0x120] sm:$0xf] }
  0x4b   : > { %307 = vst [vmem:[%s2752_s28 + $0x44] sm:$0xf] %v306_v27  ;;  %v346_v47 = vld [vmem:[%s2747_s27 + $0x128] sm:$0xf]  ;;  %v348_v48 = vld [vmem:[%s2747_s27 + $0x130] sm:$0xf] }
  0x4c   : > { %309 = vst [vmem:[%s2752_s28 + $0x48] sm:$0xf] %v308_v28  ;;  %v350_v49 = vld [vmem:[%s2747_s27 + $0x138] sm:$0xf]  ;;  %v352_v50 = vld [vmem:[%s2747_s27 + $0x140] sm:$0xf] }
  0x4d   : > { %311 = vst [vmem:[%s2752_s28 + $0x4c] sm:$0xf] %v310_v29  ;;  %v354_v51 = vld [vmem:[%s2747_s27 + $0x148] sm:$0xf]  ;;  %v356_v52 = vld [vmem:[%s2747_s27 + $0x150] sm:$0xf] }
  0x4e   : > { %313 = vst [vmem:[%s2752_s28 + $0x50] sm:$0xf] %v312_v30  ;;  %v358_v53 = vld [vmem:[%s2747_s27 + $0x158] sm:$0xf]  ;;  %v360_v54 = vld [vmem:[%s2747_s27 + $0x160] sm:$0xf] }
  0x4f   : > { %315 = vst [vmem:[%s2752_s28 + $0x54] sm:$0xf] %v314_v31  ;;  %v362_v55 = vld [vmem:[%s2747_s27 + $0x168] sm:$0xf]  ;;  %v364_v56 = vld [vmem:[%s2747_s27 + $0x170] sm:$0xf] }
  0x50   : > { %317 = vst [vmem:[%s2752_s28 + $0x58] sm:$0xf] %v316_v32  ;;  %v366_v57 = vld [vmem:[%s2747_s27 + $0x178] sm:$0xf]  ;;  %v368_v58 = vld [vmem:[%s2747_s27 + $0x180] sm:$0xf] }
  0x51   : > { %319 = vst [vmem:[%s2752_s28 + $0x5c] sm:$0xf] %v318_v33  ;;  %v370_v59 = vld [vmem:[%s2747_s27 + $0x188] sm:$0xf]  ;;  %v372_v60 = vld [vmem:[%s2747_s27 + $0x190] sm:$0xf] }
  0x52   : > { %321 = vst [vmem:[%s2752_s28 + $0x60] sm:$0xf] %v320_v34  ;;  %v374_v61 = vld [vmem:[%s2747_s27 + $0x198] sm:$0xf]  ;;  %v376_v62 = vld [vmem:[%s2747_s27 + $0x1a0] sm:$0xf] }
  0x53   : > { %323 = vst [vmem:[%s2752_s28 + $0x64] sm:$0xf] %v322_v35  ;;  %v378_v63 = vld [vmem:[%s2747_s27 + $0x1a8] sm:$0xf]  ;;  %v380_v0 = vld [vmem:[%s2747_s27 + $0x1b0] sm:$0xf] }
  0x54   : > { %325 = vst [vmem:[%s2752_s28 + $0x68] sm:$0xf] %v324_v36  ;;  %v382_v1 = vld [vmem:[%s2747_s27 + $0x1b8] sm:$0xf]  ;;  %v384_v2 = vld [vmem:[%s2747_s27 + $0x1c0] sm:$0xf] }
  0x55   : > { %327 = vst [vmem:[%s2752_s28 + $0x6c] sm:$0xf] %v326_v37  ;;  %v386_v3 = vld [vmem:[%s2747_s27 + $0x1c8] sm:$0xf]  ;;  %v388_v4 = vld [vmem:[%s2747_s27 + $0x1d0] sm:$0xf] }
  0x56   : > { %329 = vst [vmem:[%s2752_s28 + $0x70] sm:$0xf] %v328_v38  ;;  %v390_v5 = vld [vmem:[%s2747_s27 + $0x1d8] sm:$0xf]  ;;  %v392_v6 = vld [vmem:[%s2747_s27 + $0x1e0] sm:$0xf] }
  0x57   : > { %331 = vst [vmem:[%s2752_s28 + $0x74] sm:$0xf] %v330_v39  ;;  %v394_v7 = vld [vmem:[%s2747_s27 + $0x1e8] sm:$0xf]  ;;  %v396_v8 = vld [vmem:[%s2747_s27 + $0x1f0] sm:$0xf] }
  0x58   : > { %333 = vst [vmem:[%s2752_s28 + $0x78] sm:$0xf] %v332_v40  ;;  %v398_v9 = vld [vmem:[%s2747_s27 + $0x1f8] sm:$0xf]  ;;  %v400_v10 = vld [vmem:[%s2747_s27 + $0x200] sm:$0xf] }
  0x59   : > { %335 = vst [vmem:[%s2752_s28 + $0x7c] sm:$0xf] %v334_v41  ;;  %v402_v11 = vld [vmem:[%s2747_s27 + $0x208] sm:$0xf]  ;;  %v404_v12 = vld [vmem:[%s2747_s27 + $0x210] sm:$0xf] }
  0x5a   : > { %337 = vst [vmem:[%s2752_s28 + $0x80] sm:$0xf] %v336_v42  ;;  %v406_v13 = vld [vmem:[%s2747_s27 + $0x218] sm:$0xf]  ;;  %v408_v14 = vld [vmem:[%s2747_s27 + $0x220] sm:$0xf] }
  0x5b   : > { %339 = vst [vmem:[%s2752_s28 + $0x84] sm:$0xf] %v338_v43  ;;  %v410_v15 = vld [vmem:[%s2747_s27 + $0x228] sm:$0xf]  ;;  %v412_v16 = vld [vmem:[%s2747_s27 + $0x230] sm:$0xf] }
  0x5c   : > { %341 = vst [vmem:[%s2752_s28 + $0x88] sm:$0xf] %v340_v44  ;;  %v414_v17 = vld [vmem:[%s2747_s27 + $0x238] sm:$0xf]  ;;  %v416_v18 = vld [vmem:[%s2747_s27 + $0x240] sm:$0xf] }
  0x5d   : > { %343 = vst [vmem:[%s2752_s28 + $0x8c] sm:$0xf] %v342_v45  ;;  %v418_v19 = vld [vmem:[%s2747_s27 + $0x248] sm:$0xf]  ;;  %v420_v20 = vld [vmem:[%s2747_s27 + $0x250] sm:$0xf] }
  0x5e   : > { %345 = vst [vmem:[%s2752_s28 + $0x90] sm:$0xf] %v344_v46  ;;  %v422_v21 = vld [vmem:[%s2747_s27 + $0x258] sm:$0xf]  ;;  %v424_v22 = vld [vmem:[%s2747_s27 + $0x260] sm:$0xf] }
  0x5f   : > { %347 = vst [vmem:[%s2752_s28 + $0x94] sm:$0xf] %v346_v47  ;;  %v426_v23 = vld [vmem:[%s2747_s27 + $0x268] sm:$0xf]  ;;  %v428_v24 = vld [vmem:[%s2747_s27 + $0x270] sm:$0xf] }
  0x60   : > { %349 = vst [vmem:[%s2752_s28 + $0x98] sm:$0xf] %v348_v48  ;;  %v430_v25 = vld [vmem:[%s2747_s27 + $0x278] sm:$0xf]  ;;  %v432_v26 = vld [vmem:[%s2747_s27 + $0x280] sm:$0xf] }
  0x61   : > { %351 = vst [vmem:[%s2752_s28 + $0x9c] sm:$0xf] %v350_v49  ;;  %v434_v27 = vld [vmem:[%s2747_s27 + $0x288] sm:$0xf]  ;;  %v436_v28 = vld [vmem:[%s2747_s27 + $0x290] sm:$0xf] }
  0x62   : > { %353 = vst [vmem:[%s2752_s28 + $0xa0] sm:$0xf] %v352_v50  ;;  %v438_v29 = vld [vmem:[%s2747_s27 + $0x298] sm:$0xf]  ;;  %v440_v30 = vld [vmem:[%s2747_s27 + $0x2a0] sm:$0xf] }
  0x63   : > { %355 = vst [vmem:[%s2752_s28 + $0xa4] sm:$0xf] %v354_v51  ;;  %v442_v31 = vld [vmem:[%s2747_s27 + $0x2a8] sm:$0xf]  ;;  %v444_v32 = vld [vmem:[%s2747_s27 + $0x2b0] sm:$0xf] }
  0x64   : > { %357 = vst [vmem:[%s2752_s28 + $0xa8] sm:$0xf] %v356_v52  ;;  %v446_v33 = vld [vmem:[%s2747_s27 + $0x2b8] sm:$0xf]  ;;  %v448_v34 = vld [vmem:[%s2747_s27 + $0x2c0] sm:$0xf] }
  0x65   : > { %359 = vst [vmem:[%s2752_s28 + $0xac] sm:$0xf] %v358_v53  ;;  %v450_v35 = vld [vmem:[%s2747_s27 + $0x2c8] sm:$0xf]  ;;  %v452_v36 = vld [vmem:[%s2747_s27 + $0x2d0] sm:$0xf] }
  0x66   : > { %361 = vst [vmem:[%s2752_s28 + $0xb0] sm:$0xf] %v360_v54  ;;  %v454_v37 = vld [vmem:[%s2747_s27 + $0x2d8] sm:$0xf]  ;;  %v456_v38 = vld [vmem:[%s2747_s27 + $0x2e0] sm:$0xf] }
  0x67   : > { %363 = vst [vmem:[%s2752_s28 + $0xb4] sm:$0xf] %v362_v55  ;;  %v458_v39 = vld [vmem:[%s2747_s27 + $0x2e8] sm:$0xf]  ;;  %v460_v40 = vld [vmem:[%s2747_s27 + $0x2f0] sm:$0xf] }
  0x68   : > { %365 = vst [vmem:[%s2752_s28 + $0xb8] sm:$0xf] %v364_v56  ;;  %v462_v41 = vld [vmem:[%s2747_s27 + $0x2f8] sm:$0xf]  ;;  %v464_v42 = vld [vmem:[%s2747_s27 + $0x300] sm:$0xf] }
  0x69   : > { %367 = vst [vmem:[%s2752_s28 + $0xbc] sm:$0xf] %v366_v57  ;;  %v466_v43 = vld [vmem:[%s2747_s27 + $0x308] sm:$0xf]  ;;  %v468_v44 = vld [vmem:[%s2747_s27 + $0x310] sm:$0xf] }
  0x6a   : > { %369 = vst [vmem:[%s2752_s28 + $0xc0] sm:$0xf] %v368_v58  ;;  %v470_v45 = vld [vmem:[%s2747_s27 + $0x318] sm:$0xf]  ;;  %v472_v46 = vld [vmem:[%s2747_s27 + $0x320] sm:$0xf] }
  0x6b   : > { %371 = vst [vmem:[%s2752_s28 + $0xc4] sm:$0xf] %v370_v59  ;;  %v474_v47 = vld [vmem:[%s2747_s27 + $0x328] sm:$0xf]  ;;  %v476_v48 = vld [vmem:[%s2747_s27 + $0x330] sm:$0xf] }
  0x6c   : > { %373 = vst [vmem:[%s2752_s28 + $0xc8] sm:$0xf] %v372_v60  ;;  %v478_v49 = vld [vmem:[%s2747_s27 + $0x338] sm:$0xf]  ;;  %v480_v50 = vld [vmem:[%s2747_s27 + $0x340] sm:$0xf] }
  0x6d   : > { %375 = vst [vmem:[%s2752_s28 + $0xcc] sm:$0xf] %v374_v61  ;;  %v482_v51 = vld [vmem:[%s2747_s27 + $0x348] sm:$0xf]  ;;  %v484_v52 = vld [vmem:[%s2747_s27 + $0x350] sm:$0xf] }
  0x6e   : > { %377 = vst [vmem:[%s2752_s28 + $0xd0] sm:$0xf] %v376_v62  ;;  %v486_v53 = vld [vmem:[%s2747_s27 + $0x358] sm:$0xf]  ;;  %v488_v54 = vld [vmem:[%s2747_s27 + $0x360] sm:$0xf] }
  0x6f   : > { %379 = vst [vmem:[%s2752_s28 + $0xd4] sm:$0xf] %v378_v63  ;;  %v490_v55 = vld [vmem:[%s2747_s27 + $0x368] sm:$0xf]  ;;  %v492_v56 = vld [vmem:[%s2747_s27 + $0x370] sm:$0xf] }
  0x70   : > { %381 = vst [vmem:[%s2752_s28 + $0xd8] sm:$0xf] %v380_v0  ;;  %v494_v57 = vld [vmem:[%s2747_s27 + $0x378] sm:$0xf]  ;;  %v496_v58 = vld [vmem:[%s2747_s27 + $0x380] sm:$0xf] }
  0x71   : > { %383 = vst [vmem:[%s2752_s28 + $0xdc] sm:$0xf] %v382_v1  ;;  %v498_v59 = vld [vmem:[%s2747_s27 + $0x388] sm:$0xf]  ;;  %v500_v60 = vld [vmem:[%s2747_s27 + $0x390] sm:$0xf] }
  0x72   : > { %385 = vst [vmem:[%s2752_s28 + $0xe0] sm:$0xf] %v384_v2  ;;  %v502_v61 = vld [vmem:[%s2747_s27 + $0x398] sm:$0xf]  ;;  %v504_v62 = vld [vmem:[%s2747_s27 + $0x3a0] sm:$0xf] }
  0x73   : > { %387 = vst [vmem:[%s2752_s28 + $0xe4] sm:$0xf] %v386_v3  ;;  %v506_v63 = vld [vmem:[%s2747_s27 + $0x3a8] sm:$0xf]  ;;  %v508_v0 = vld [vmem:[%s2747_s27 + $0x3b0] sm:$0xf] }
  0x74   : > { %389 = vst [vmem:[%s2752_s28 + $0xe8] sm:$0xf] %v388_v4  ;;  %v510_v1 = vld [vmem:[%s2747_s27 + $0x3b8] sm:$0xf]  ;;  %v512_v2 = vld [vmem:[%s2747_s27 + $0x3c0] sm:$0xf] }
  0x75   : > { %391 = vst [vmem:[%s2752_s28 + $0xec] sm:$0xf] %v390_v5  ;;  %v514_v3 = vld [vmem:[%s2747_s27 + $0x3c8] sm:$0xf]  ;;  %v516_v4 = vld [vmem:[%s2747_s27 + $0x3d0] sm:$0xf] }
  0x76   : > { %393 = vst [vmem:[%s2752_s28 + $0xf0] sm:$0xf] %v392_v6  ;;  %v518_v5 = vld [vmem:[%s2747_s27 + $0x3d8] sm:$0xf]  ;;  %v520_v6 = vld [vmem:[%s2747_s27 + $0x3e0] sm:$0xf] }
  0x77   : > { %395 = vst [vmem:[%s2752_s28 + $0xf4] sm:$0xf] %v394_v7  ;;  %v522_v7 = vld [vmem:[%s2747_s27 + $0x3e8] sm:$0xf] }
  0x78   : > { %397 = vst [vmem:[%s2752_s28 + $0xf8] sm:$0xf] %v396_v8  ;;  %v524_v8 = vld [vmem:[%s2747_s27 + $0x3f0] sm:$0xf] }
  0x79   : > { %399 = vst [vmem:[%s2752_s28 + $0xfc] sm:$0xf] %v398_v9  ;;  %v526_v9 = vld [vmem:[%s2747_s27 + $0x3f8] sm:$0xf] }
  0x7a   : > { %401 = vst [vmem:[%s2752_s28 + $0x100] sm:$0xf] %v400_v10  ;;  %v528_v10 = vld [vmem:[%s2747_s27 + $0x400] sm:$0xf] }
  0x7b   : > { %403 = vst [vmem:[%s2752_s28 + $0x104] sm:$0xf] %v402_v11  ;;  %v530_v11 = vld [vmem:[%s2747_s27 + $0x408] sm:$0xf] }
  0x7c   : > { %405 = vst [vmem:[%s2752_s28 + $0x108] sm:$0xf] %v404_v12  ;;  %v532_v12 = vld [vmem:[%s2747_s27 + $0x410] sm:$0xf] }
  0x7d   : > { %407 = vst [vmem:[%s2752_s28 + $0x10c] sm:$0xf] %v406_v13  ;;  %v534_v13 = vld [vmem:[%s2747_s27 + $0x418] sm:$0xf] }
  0x7e   : > { %409 = vst [vmem:[%s2752_s28 + $0x110] sm:$0xf] %v408_v14  ;;  %v536_v14 = vld [vmem:[%s2747_s27 + $0x420] sm:$0xf] }
  0x7f   : > { %411 = vst [vmem:[%s2752_s28 + $0x114] sm:$0xf] %v410_v15  ;;  %v538_v15 = vld [vmem:[%s2747_s27 + $0x428] sm:$0xf] }
  0x80   : > { %413 = vst [vmem:[%s2752_s28 + $0x118] sm:$0xf] %v412_v16  ;;  %v540_v16 = vld [vmem:[%s2747_s27 + $0x430] sm:$0xf] }
  0x81   : > { %415 = vst [vmem:[%s2752_s28 + $0x11c] sm:$0xf] %v414_v17  ;;  %v542_v17 = vld [vmem:[%s2747_s27 + $0x438] sm:$0xf] }
  0x82   : > { %417 = vst [vmem:[%s2752_s28 + $0x120] sm:$0xf] %v416_v18  ;;  %v544_v18 = vld [vmem:[%s2747_s27 + $0x440] sm:$0xf] }
  0x83   : > { %419 = vst [vmem:[%s2752_s28 + $0x124] sm:$0xf] %v418_v19  ;;  %v546_v19 = vld [vmem:[%s2747_s27 + $0x448] sm:$0xf] }
  0x84   : > { %421 = vst [vmem:[%s2752_s28 + $0x128] sm:$0xf] %v420_v20  ;;  %v548_v20 = vld [vmem:[%s2747_s27 + $0x450] sm:$0xf] }
  0x85   : > { %423 = vst [vmem:[%s2752_s28 + $0x12c] sm:$0xf] %v422_v21  ;;  %v550_v21 = vld [vmem:[%s2747_s27 + $0x458] sm:$0xf] }
  0x86   : > { %425 = vst [vmem:[%s2752_s28 + $0x130] sm:$0xf] %v424_v22  ;;  %v552_v22 = vld [vmem:[%s2747_s27 + $0x460] sm:$0xf] }
  0x87   : > { %427 = vst [vmem:[%s2752_s28 + $0x134] sm:$0xf] %v426_v23  ;;  %v554_v23 = vld [vmem:[%s2747_s27 + $0x468] sm:$0xf] }
  0x88   : > { %429 = vst [vmem:[%s2752_s28 + $0x138] sm:$0xf] %v428_v24  ;;  %v556_v24 = vld [vmem:[%s2747_s27 + $0x470] sm:$0xf] }
  0x89   : > { %431 = vst [vmem:[%s2752_s28 + $0x13c] sm:$0xf] %v430_v25  ;;  %v558_v25 = vld [vmem:[%s2747_s27 + $0x478] sm:$0xf] }
  0x8a   : > { %433 = vst [vmem:[%s2752_s28 + $0x140] sm:$0xf] %v432_v26 }
  0x8b   : > { %435 = vst [vmem:[%s2752_s28 + $0x144] sm:$0xf] %v434_v27 }
  0x8c   : > { %437 = vst [vmem:[%s2752_s28 + $0x148] sm:$0xf] %v436_v28 }
  0x8d   : > { %439 = vst [vmem:[%s2752_s28 + $0x14c] sm:$0xf] %v438_v29 }
  0x8e   : > { %441 = vst [vmem:[%s2752_s28 + $0x150] sm:$0xf] %v440_v30 }
  0x8f   : > { %443 = vst [vmem:[%s2752_s28 + $0x154] sm:$0xf] %v442_v31 }
  0x90   : > { %445 = vst [vmem:[%s2752_s28 + $0x158] sm:$0xf] %v444_v32 }
  0x91   : > { %447 = vst [vmem:[%s2752_s28 + $0x15c] sm:$0xf] %v446_v33 }
  0x92   : > { %449 = vst [vmem:[%s2752_s28 + $0x160] sm:$0xf] %v448_v34 }
  0x93   : > { %451 = vst [vmem:[%s2752_s28 + $0x164] sm:$0xf] %v450_v35 }
  0x94   : > { %453 = vst [vmem:[%s2752_s28 + $0x168] sm:$0xf] %v452_v36 }
  0x95   : > { %455 = vst [vmem:[%s2752_s28 + $0x16c] sm:$0xf] %v454_v37 }
  0x96   : > { %457 = vst [vmem:[%s2752_s28 + $0x170] sm:$0xf] %v456_v38 }
  0x97   : > { %459 = vst [vmem:[%s2752_s28 + $0x174] sm:$0xf] %v458_v39 }
  0x98   : > { %461 = vst [vmem:[%s2752_s28 + $0x178] sm:$0xf] %v460_v40 }
  0x99   : > { %463 = vst [vmem:[%s2752_s28 + $0x17c] sm:$0xf] %v462_v41 }
  0x9a   : > { %465 = vst [vmem:[%s2752_s28 + $0x180] sm:$0xf] %v464_v42 }
  0x9b   : > { %467 = vst [vmem:[%s2752_s28 + $0x184] sm:$0xf] %v466_v43 }
  0x9c   : > { %469 = vst [vmem:[%s2752_s28 + $0x188] sm:$0xf] %v468_v44 }
  0x9d   : > { %471 = vst [vmem:[%s2752_s28 + $0x18c] sm:$0xf] %v470_v45 }
  0x9e   : > { %473 = vst [vmem:[%s2752_s28 + $0x190] sm:$0xf] %v472_v46 }
  0x9f   : > { %475 = vst [vmem:[%s2752_s28 + $0x194] sm:$0xf] %v474_v47 }
  0xa0   : > { %477 = vst [vmem:[%s2752_s28 + $0x198] sm:$0xf] %v476_v48 }
  0xa1   : > { %479 = vst [vmem:[%s2752_s28 + $0x19c] sm:$0xf] %v478_v49 }
  0xa2   : > { %481 = vst [vmem:[%s2752_s28 + $0x1a0] sm:$0xf] %v480_v50 }
  0xa3   : > { %483 = vst [vmem:[%s2752_s28 + $0x1a4] sm:$0xf] %v482_v51 }
  0xa4   : > { %485 = vst [vmem:[%s2752_s28 + $0x1a8] sm:$0xf] %v484_v52 }
  0xa5   : > { %487 = vst [vmem:[%s2752_s28 + $0x1ac] sm:$0xf] %v486_v53 }
  0xa6   : > { %489 = vst [vmem:[%s2752_s28 + $0x1b0] sm:$0xf] %v488_v54 }
  0xa7   : > { %491 = vst [vmem:[%s2752_s28 + $0x1b4] sm:$0xf] %v490_v55 }
  0xa8   : > { %493 = vst [vmem:[%s2752_s28 + $0x1b8] sm:$0xf] %v492_v56 }
  0xa9   : > { %495 = vst [vmem:[%s2752_s28 + $0x1bc] sm:$0xf] %v494_v57 }
  0xaa   : > { %497 = vst [vmem:[%s2752_s28 + $0x1c0] sm:$0xf] %v496_v58 }
  0xab   : > { %499 = vst [vmem:[%s2752_s28 + $0x1c4] sm:$0xf] %v498_v59 }
  0xac   : > { %501 = vst [vmem:[%s2752_s28 + $0x1c8] sm:$0xf] %v500_v60 }
  0xad   : > { %503 = vst [vmem:[%s2752_s28 + $0x1cc] sm:$0xf] %v502_v61 }
  0xae   : > { %505 = vst [vmem:[%s2752_s28 + $0x1d0] sm:$0xf] %v504_v62 }
  0xaf   : > { %507 = vst [vmem:[%s2752_s28 + $0x1d4] sm:$0xf] %v506_v63 }
  0xb0   : > { %509 = vst [vmem:[%s2752_s28 + $0x1d8] sm:$0xf] %v508_v0 }
  0xb1   : > { %511 = vst [vmem:[%s2752_s28 + $0x1dc] sm:$0xf] %v510_v1 }
  0xb2   : > { %513 = vst [vmem:[%s2752_s28 + $0x1e0] sm:$0xf] %v512_v2 }
  0xb3   : > { %515 = vst [vmem:[%s2752_s28 + $0x1e4] sm:$0xf] %v514_v3 }
  0xb4   : > { %517 = vst [vmem:[%s2752_s28 + $0x1e8] sm:$0xf] %v516_v4 }
  0xb5   : > { %519 = vst [vmem:[%s2752_s28 + $0x1ec] sm:$0xf] %v518_v5 }
  0xb6   : > { %521 = vst [vmem:[%s2752_s28 + $0x1f0] sm:$0xf] %v520_v6 }
  0xb7   : > { %523 = vst [vmem:[%s2752_s28 + $0x1f4] sm:$0xf] %v522_v7 }
  0xb8   : > { %525 = vst [vmem:[%s2752_s28 + $0x1f8] sm:$0xf] %v524_v8 }
  0xb9   : > { %527 = vst [vmem:[%s2752_s28 + $0x1fc] sm:$0xf] %v526_v9 }
  0xba   : > { %529 = vst [vmem:[%s2752_s28 + $0x200] sm:$0xf] %v528_v10 }
  0xbb   : > { %531 = vst [vmem:[%s2752_s28 + $0x204] sm:$0xf] %v530_v11 }
  0xbc   : > { %533 = vst [vmem:[%s2752_s28 + $0x208] sm:$0xf] %v532_v12 }
  0xbd   : > { %535 = vst [vmem:[%s2752_s28 + $0x20c] sm:$0xf] %v534_v13 }
  0xbe   : > { %537 = vst [vmem:[%s2752_s28 + $0x210] sm:$0xf] %v536_v14 }
  0xbf   : > { %539 = vst [vmem:[%s2752_s28 + $0x214] sm:$0xf] %v538_v15 }
  0xc0   : > { %541 = vst [vmem:[%s2752_s28 + $0x218] sm:$0xf] %v540_v16 }
  0xc1   : > { %543 = vst [vmem:[%s2752_s28 + $0x21c] sm:$0xf] %v542_v17 }
  0xc2   : > { %545 = vst [vmem:[%s2752_s28 + $0x220] sm:$0xf] %v544_v18 }
  0xc3   : > { %547 = vst [vmem:[%s2752_s28 + $0x224] sm:$0xf] %v546_v19 }
  0xc4   : > { %549 = vst [vmem:[%s2752_s28 + $0x228] sm:$0xf] %v548_v20 }
  0xc5   : > { %551 = vst [vmem:[%s2752_s28 + $0x22c] sm:$0xf] %v550_v21 }
  0xc6   : > { %553 = vst [vmem:[%s2752_s28 + $0x230] sm:$0xf] %v552_v22 }
  0xc7   : > { %555 = vst [vmem:[%s2752_s28 + $0x234] sm:$0xf] %v554_v23 }
  0xc8   : > { %557 = vst [vmem:[%s2752_s28 + $0x238] sm:$0xf] %v556_v24 }
  0xc9   : > { %559 = vst [vmem:[%s2752_s28 + $0x23c] sm:$0xf] %v558_v25 }
  0xca PF: > { %877 = sbr.rel (!%p2723_p11) target bundleno = 208 (0xd0), region = 91  ;;  %s879_s0 = sand.u32 (%p2723_p11), 1, %s2559_s16  }
  0xcb   : > { %s1989_s10 = sshll.u32 (%p2723_p11), %s2591_s24, 2  ;;  %s1988_s26 = sshll.u32 (%p2723_p11), %s879_s0, 3 }
  0xcc   : > { %s886_s6 = scalar_lea.vmem (%p2723_p11), %s3213_s3, %s1989_s10  ;;  %s881_s8 = scalar_lea.vmem (%p2723_p11), [#allocation5], %s1988_s26 }
  0xcd   : > { %v903_v26 = vld [vmem:[%s886_s6] sm:$0xf] (%p2723_p11)  ;;  %v905_v27 = vld [vmem:[%s886_s6 + $0x8] sm:$0xf] (%p2723_p11) }
  0xce   : > { %904 = vst [vmem:[%s881_s8] sm:$0xf] (%p2723_p11), %v903_v26 }
  0xcf   : > { %906 = vst [vmem:[%s881_s8 + $0x4] sm:$0xf] %v905_v27 }
  0xd0 PF: > { %p1990_p1 = scmp.ge.s32.totalorder %s2595_s25, 1  ;;  %p933_p2 = scmp.lt.s32.totalorder %s2595_s25, 5 }
  0xd2   : > { %p934_p3 = pnand %p1990_p1, %p933_p2 }
  0xd3   : > { %s940_s27 = sand.u32 (!%p934_p3), 1, %s2571_s19   ;;  %s947_s14 = sand.u32 (!%p934_p3), 1, %s2563_s17  }
  0xd4   : > { %937 = sbr.rel (%p934_p3) target bundleno = 488 (0x1e8), region = 132  ;;  %s954_s11 = sand.u32 (!%p934_p3), 1, %s2555_s15  }
  0xd5   : > { %s2417_s9 = smul.u32 (!%p934_p3), 72, %s940_s27  ;;  %s3051_s0 = sshll.u32 (!%p934_p3), %s954_s11, 3 }
  0xd6   : > { %s2418_s28 = smul.u32 (!%p934_p3), 576, %s947_s14  ;;  %p992_p4 = scmp.lt.s32.totalorder (!%p934_p3), %s2583_s22, 1 }
  0xd7   : > { %s3061_s6 = scalar_lea.vmem (!%p934_p3), [#allocation3], %s2417_s9  ;;  %s956_s17 = scalar_lea.vmem (!%p934_p3), [#allocation5], %s3051_s0 }
  0xd8   : > { %s3063_s8 = scalar_lea.vmem (!%p934_p3), [#allocation4], %s2418_s28  ;;  %s3067_s19 = scalar_lea.vmem (!%p934_p3), [#allocation6], %s3051_s0 }
  0xd9   : > { %s3055_s10 = scalar_select %p992_p4, %s2583_s22, 1 }
  0xda   : > { %p1993_p5 = scmp.ne.s32.totalorder %s2579_s21, 0 }
  0xdb   : > { %s994_s30 = scalar_lea.vmem %s3212_s2, %s3055_s10 }
  0xdc   : > { %1000 = sbr.rel (%p1993_p5) target bundleno = 228 (0xe4), region = 148 }
  0xe1   : > { %v2597_v28 = vmov 0.0  }
  0xe2   : > { %1001 = vst [vmem:[#allocation2] sm:$0xff] %v2597_v28 }
  0xe3   : > { %1002 = vst [vmem:[#allocation2 + $0x8] sm:$0xff] %v2597_v28 }
  0xe4 PF: > { %v2341_v29 = vld [vmem:[%s3063_s8 + $0x38] sm:$0xff]  ;;  %v2340_v33 = vld [vmem:[%s3063_s8 + $0x30] sm:$0xff]  ;;  %v2339_v37 = vld [vmem:[%s3063_s8 + $0x28] sm:$0xff]  ;;  %p2318_p6 = scmp.ne.s32.totalorder %s2579_s21, 1 }
  0xe5   : > { %v2357_v30 = vld [vmem:[%s3063_s8 + $0xb8] sm:$0xff]  ;;  %1637 = vmatpush.bf16.msra.mxu0 %v2341_v29  ;;  %v2356_v34 = vld [vmem:[%s3063_s8 + $0xb0] sm:$0xff]  ;;  %v2355_v38 = vld [vmem:[%s3063_s8 + $0xa8] sm:$0xff] }
  0xe6   : > { %v2349_v31 = vld [vmem:[%s3063_s8 + $0x78] sm:$0xff]  ;;  %1665 = vmatpush.bf16.msra.mxu2 %v2357_v30  ;;  %v2348_v35 = vld [vmem:[%s3063_s8 + $0x70] sm:$0xff]  ;;  %v2347_v39 = vld [vmem:[%s3063_s8 + $0x68] sm:$0xff] }
  0xe7   : > { %v2365_v32 = vld [vmem:[%s3063_s8 + $0xf8] sm:$0xff]  ;;  %1651 = vmatpush.bf16.msra.mxu1 %v2349_v31  ;;  %v2364_v36 = vld [vmem:[%s3063_s8 + $0xf0] sm:$0xff]  ;;  %v2363_v40 = vld [vmem:[%s3063_s8 + $0xe8] sm:$0xff] }
  0xe8   : > { %1679 = vmatpush.bf16.msra.mxu3 %v2365_v32  ;;  %v2338_v41 = vld [vmem:[%s3063_s8 + $0x20] sm:$0xff]  ;;  %v2337_v45 = vld [vmem:[%s3063_s8 + $0x18] sm:$0xff]  ;;  %v2336_v49 = vld [vmem:[%s3063_s8 + $0x10] sm:$0xff] }
  0xe9   : > { %1638 = vmatpush.bf16.msra.mxu0 %v2340_v33  ;;  %v2354_v42 = vld [vmem:[%s3063_s8 + $0xa0] sm:$0xff]  ;;  %v2353_v46 = vld [vmem:[%s3063_s8 + $0x98] sm:$0xff]  ;;  %v2352_v50 = vld [vmem:[%s3063_s8 + $0x90] sm:$0xff] }
  0xea   : > { %1666 = vmatpush.bf16.msra.mxu2 %v2356_v34  ;;  %v2346_v43 = vld [vmem:[%s3063_s8 + $0x60] sm:$0xff]  ;;  %v2345_v47 = vld [vmem:[%s3063_s8 + $0x58] sm:$0xff]  ;;  %v2344_v51 = vld [vmem:[%s3063_s8 + $0x50] sm:$0xff] }
  0xeb   : > { %1652 = vmatpush.bf16.msra.mxu1 %v2348_v35  ;;  %v2362_v44 = vld [vmem:[%s3063_s8 + $0xe0] sm:$0xff]  ;;  %v2361_v48 = vld [vmem:[%s3063_s8 + $0xd8] sm:$0xff]  ;;  %v2360_v52 = vld [vmem:[%s3063_s8 + $0xd0] sm:$0xff] }
  0xec   : > { %1680 = vmatpush.bf16.msra.mxu3 %v2364_v36  ;;  %v2335_v53 = vld [vmem:[%s3063_s8 + $0x8] sm:$0xff]  ;;  %v2334_v57 = vld [vmem:[%s3063_s8] sm:$0xff]  ;;  %v2373_v59 = vld [vmem:[%s3063_s8 + $0x138] sm:$0xff] }
  0xed   : > { %1639 = vmatpush.bf16.msra.mxu0 %v2339_v37  ;;  %v2351_v54 = vld [vmem:[%s3063_s8 + $0x88] sm:$0xff]  ;;  %v2350_v58 = vld [vmem:[%s3063_s8 + $0x80] sm:$0xff]  ;;  %v2389_v60 = vld [vmem:[%s3063_s8 + $0x1b8] sm:$0xff] }
  0xee   : > { %1667 = vmatpush.bf16.msra.mxu2 %v2355_v38  ;;  %v2343_v55 = vld [vmem:[%s3063_s8 + $0x48] sm:$0xff]  ;;  %v2342_v61 = vld [vmem:[%s3063_s8 + $0x40] sm:$0xff]  ;;  %v1996_v63 = vld [vmem:[%s3061_s6] sm:$0xf] }
  0xef   : > { %1653 = vmatpush.bf16.msra.mxu1 %v2347_v39  ;;  %v2359_v56 = vld [vmem:[%s3063_s8 + $0xc8] sm:$0xff]  ;;  %v2358_v62 = vld [vmem:[%s3063_s8 + $0xc0] sm:$0xff]  ;;  %v2329_v0 = vld [vmem:[%s3061_s6 + $0x20] sm:$0xf0] }
  0xf0   : > { %1681 = vmatpush.bf16.msra.mxu3 %v2363_v40  ;;  %v2004_v1 = vld [vmem:[%s3061_s6 + $0x8] sm:$0xf]  ;;  %v2330_v2 = vld [vmem:[%s3061_s6 + $0x28] sm:$0xf0]  ;;  %v2325_v5 = vld [vmem:[%s3061_s6 + $0x4] sm:$0xf]  ;;  %v1997_v9 = vor.u32 %v2329_v0, %v1996_v63 }
  0xf1   : > { %1640 = vmatpush.bf16.msra.mxu0 %v2338_v41  ;;  %v2381_v3 = vld [vmem:[%s3063_s8 + $0x178] sm:$0xff]  ;;  %v2006_v8 = vld [vmem:[%s3061_s6 + $0x2c] sm:$0xf0]  ;;  %v2005_v10 = vor.u32 %v2330_v2, %v2004_v1  ;;  %v2372_v11 = vld [vmem:[%s3063_s8 + $0x130] sm:$0xff] }
  0xf2   : > { %1668 = vmatpush.bf16.msra.mxu2 %v2354_v42  ;;  %v2397_v4 = vld [vmem:[%s3063_s8 + $0x1f8] sm:$0xff]  ;;  %v2388_v12 = vld [vmem:[%s3063_s8 + $0x1b0] sm:$0xff]  ;;  %v2371_v17 = vld [vmem:[%s3063_s8 + $0x128] sm:$0xff] }
  0xf3   : > { %1654 = vmatpush.bf16.msra.mxu1 %v2346_v43  ;;  %v1998_v6 = vld [vmem:[%s3061_s6 + $0x24] sm:$0xf0]  ;;  %v2326_v7 = vld [vmem:[%s3061_s6 + $0xc] sm:$0xf]  ;;  %v2380_v15 = vld [vmem:[%s3063_s8 + $0x170] sm:$0xff] }
  0xf4   : > { %1682 = vmatpush.bf16.msra.mxu3 %v2362_v44  ;;  %v2001_v13 = vor.u32 %v2325_v5, %v1998_v6  ;;  %v2009_v14 = vor.u32 %v2326_v7, %v2006_v8  ;;  %v2396_v16 = vld [vmem:[%s3063_s8 + $0x1f0] sm:$0xff]  ;;  %v2387_v18 = vld [vmem:[%s3063_s8 + $0x1a8] sm:$0xff]  ;;  %v2370_v21 = vld [vmem:[%s3063_s8 + $0x120] sm:$0xff] }
  0xf5   : > { %1641 = vmatpush.bf16.msra.mxu0 %v2337_v45  ;;  %v2379_v19 = vld [vmem:[%s3063_s8 + $0x168] sm:$0xff]  ;;  %v2386_v22 = vld [vmem:[%s3063_s8 + $0x1a0] sm:$0xff]  ;;  %v2369_v25 = vld [vmem:[%s3063_s8 + $0x118] sm:$0xff] }
  0xf6   : > { %1669 = vmatpush.bf16.msra.mxu2 %v2353_v46  ;;  %v2395_v20 = vld [vmem:[%s3063_s8 + $0x1e8] sm:$0xff]  ;;  %v2378_v23 = vld [vmem:[%s3063_s8 + $0x160] sm:$0xff]  ;;  %v2385_v26 = vld [vmem:[%s3063_s8 + $0x198] sm:$0xff] }
  0xf7   : > { %1655 = vmatpush.bf16.msra.mxu1 %v2345_v47  ;;  %v2394_v24 = vld [vmem:[%s3063_s8 + $0x1e0] sm:$0xff]  ;;  %v2377_v27 = vld [vmem:[%s3063_s8 + $0x158] sm:$0xff]  ;;  %v2368_v29 = vld [vmem:[%s3063_s8 + $0x110] sm:$0xff] }
  0xf8   : > { %1683 = vmatpush.bf16.msra.mxu3 %v2361_v48  ;;  %v2393_v28 = vld [vmem:[%s3063_s8 + $0x1d8] sm:$0xff]  ;;  %v2384_v30 = vld [vmem:[%s3063_s8 + $0x190] sm:$0xff]  ;;  %v2367_v33 = vld [vmem:[%s3063_s8 + $0x108] sm:$0xff] }
  0xf9   : > { %1642 = vmatpush.bf16.msra.mxu0 %v2336_v49  ;;  %v2376_v31 = vld [vmem:[%s3063_s8 + $0x150] sm:$0xff]  ;;  %v2383_v34 = vld [vmem:[%s3063_s8 + $0x188] sm:$0xff]  ;;  %v2366_v37 = vld [vmem:[%s3063_s8 + $0x100] sm:$0xff] }
  0xfa   : > { %1670 = vmatpush.bf16.msra.mxu2 %v2352_v50  ;;  %v2392_v32 = vld [vmem:[%s3063_s8 + $0x1d0] sm:$0xff]  ;;  %v2375_v35 = vld [vmem:[%s3063_s8 + $0x148] sm:$0xff]  ;;  %v2382_v38 = vld [vmem:[%s3063_s8 + $0x180] sm:$0xff] }
  0xfb   : > { %1656 = vmatpush.bf16.msra.mxu1 %v2344_v51  ;;  %v2391_v36 = vld [vmem:[%s3063_s8 + $0x1c8] sm:$0xff]  ;;  %v2405_v39 = vld [vmem:[%s3063_s8 + $0x238] sm:$0xff]  ;;  %v2374_v44 = vld [vmem:[%s3063_s8 + $0x140] sm:$0xff] }
  0xfc   : > { %1684 = vmatpush.bf16.msra.mxu3 %v2360_v52  ;;  %v2012_v40 = vld [vmem:[%s3061_s6 + $0x10] sm:$0xf]  ;;  %v2331_v41 = vld [vmem:[%s3061_s6 + $0x30] sm:$0xf0]  ;;  %v2020_v42 = vld [vmem:[%s3061_s6 + $0x18] sm:$0xf] }
  0xfd   : > { %1643 = vmatpush.bf16.msra.mxu0 %v2335_v53  ;;  %v2332_v43 = vld [vmem:[%s3061_s6 + $0x38] sm:$0xf0]  ;;  %v2390_v45 = vld [vmem:[%s3063_s8 + $0x1c0] sm:$0xff]  ;;  %v2014_v47 = vld [vmem:[%s3061_s6 + $0x34] sm:$0xf0]  ;;  %v2013_v50 = vor.u32 %v2331_v41, %v2012_v40 }
  0xfe   : > { %1671 = vmatpush.bf16.msra.mxu2 %v2351_v54  ;;  %v2327_v46 = vld [vmem:[%s3061_s6 + $0x14] sm:$0xf]  ;;  %v2328_v48 = vld [vmem:[%s3061_s6 + $0x1c] sm:$0xf]  ;;  %v2022_v49 = vld [vmem:[%s3061_s6 + $0x3c] sm:$0xf0]  ;;  %v2021_v51 = vor.u32 %v2332_v43, %v2020_v42 }
  0xff   : > { %1657 = vmatpush.bf16.msra.mxu1 %v2343_v55  ;;  %v2017_v52 = vor.u32 %v2327_v46, %v2014_v47  ;;  %v2025_v53 = vor.u32 %v2328_v48, %v2022_v49  ;;  %v2404_v54 = vld [vmem:[%s3063_s8 + $0x230] sm:$0xff]  ;;  %v2403_v55 = vld [vmem:[%s3063_s8 + $0x228] sm:$0xff] }
 0x100   : > { %1685 = vmatpush.bf16.msra.mxu3 %v2359_v56  ;;  %v2402_v56 = vld [vmem:[%s3063_s8 + $0x220] sm:$0xff] }
 0x101   : > { %1644 = vmatpush.bf16.msra.mxu0 %v2334_v57  ;;  %v2401_v57 = vld [vmem:[%s3063_s8 + $0x218] sm:$0xff] }
 0x102   : > { %1672 = vmatpush.bf16.msra.mxu2 %v2350_v58  ;;  %v2400_v58 = vld [vmem:[%s3063_s8 + $0x210] sm:$0xff] }
 0x103   : > { %1658 = vmatpush.bf16.msra.mxu1 %v2342_v61  ;;  %v2028_v61 = vld [vmem:[%s3061_s6 + $0x20] sm:$0xf] }
 0x104   : > { %1686 = vmatpush.bf16.msra.mxu3 %v2358_v62  ;;  %1645 = vmatmul.bf16.vlgmr.msra.gmra.mxu0 %v1997_v9  ;;  %v2333_v62 = vld [vmem:[%s3061_s6 + $0x40] sm:$0xf0] }
 0x105   : > { %1693 = vmatpush.bf16.msrb.mxu0 %v2373_v59  ;;  %1673 = vmatmul.bf16.vlgmr.msra.gmra.mxu2 %v2005_v10  ;;  %v2399_v59 = vld [vmem:[%s3063_s8 + $0x208] sm:$0xff]  ;;  %v2029_v63 = vor.u32 %v2333_v62, %v2028_v61 }
 0x106   : > { %1721 = vmatpush.bf16.msrb.mxu2 %v2389_v60  ;;  %1659 = vmatmul.bf16.vlgmr.msra.gmra.mxu1 %v2001_v13  ;;  %v2398_v60 = vld [vmem:[%s3063_s8 + $0x200] sm:$0xff] }
 0x107   : > { %1707 = vmatpush.bf16.msrb.mxu1 %v2381_v3  ;;  %1687 = vmatmul.bf16.vlgmr.msra.gmra.mxu3 %v2009_v14 }
 0x108   : > { %1735 = vmatpush.bf16.msrb.mxu3 %v2397_v4 }
 0x109   : > { %1694 = vmatpush.bf16.msrb.mxu0 %v2372_v11 }
 0x10a   : > { %1722 = vmatpush.bf16.msrb.mxu2 %v2388_v12 }
 0x10b   : > { %1708 = vmatpush.bf16.msrb.mxu1 %v2380_v15 }
 0x10c   : > { %1736 = vmatpush.bf16.msrb.mxu3 %v2396_v16 }
 0x10d   : > { %1695 = vmatpush.bf16.msrb.mxu0 %v2371_v17 }
 0x10e   : > { %1723 = vmatpush.bf16.msrb.mxu2 %v2387_v18 }
 0x10f   : > { %1709 = vmatpush.bf16.msrb.mxu1 %v2379_v19 }
 0x110   : > { %1737 = vmatpush.bf16.msrb.mxu3 %v2395_v20 }
 0x111   : > { %1696 = vmatpush.bf16.msrb.mxu0 %v2370_v21 }
 0x112   : > { %1724 = vmatpush.bf16.msrb.mxu2 %v2386_v22 }
 0x113   : > { %1710 = vmatpush.bf16.msrb.mxu1 %v2378_v23 }
 0x114   : > { %1738 = vmatpush.bf16.msrb.mxu3 %v2394_v24 }
 0x115   : > { %1697 = vmatpush.bf16.msrb.mxu0 %v2369_v25 }
 0x116   : > { %1725 = vmatpush.bf16.msrb.mxu2 %v2385_v26  ;;  %v1003_v26 = vld [vmem:[#allocation2] sm:$0xff] }
 0x117   : > { %1711 = vmatpush.bf16.msrb.mxu1 %v2377_v27 }
 0x118   : > { %1739 = vmatpush.bf16.msrb.mxu3 %v2393_v28 }
 0x119   : > { %1698 = vmatpush.bf16.msrb.mxu0 %v2368_v29 }
 0x11a   : > { %1726 = vmatpush.bf16.msrb.mxu2 %v2384_v30 }
 0x11b   : > { %1712 = vmatpush.bf16.msrb.mxu1 %v2376_v31 }
 0x11c   : > { %1740 = vmatpush.bf16.msrb.mxu3 %v2392_v32 }
 0x11d   : > { %1699 = vmatpush.bf16.msrb.mxu0 %v2367_v33 }
 0x11e   : > { %1727 = vmatpush.bf16.msrb.mxu2 %v2383_v34  ;;  %v1004_v34 = vld [vmem:[#allocation2 + $0x8] sm:$0xff] }
 0x11f   : > { %1713 = vmatpush.bf16.msrb.mxu1 %v2375_v35 }
 0x120   : > { %1741 = vmatpush.bf16.msrb.mxu3 %v2391_v36 }
 0x121   : > { %1700 = vmatpush.bf16.msrb.mxu0 %v2366_v37 }
 0x122   : > { %1728 = vmatpush.bf16.msrb.mxu2 %v2382_v38 }
 0x123   : > { %1714 = vmatpush.bf16.msrb.mxu1 %v2374_v44 }
 0x124   : > { %1742 = vmatpush.bf16.msrb.mxu3 %v2390_v45  ;;  %1701 = vmatmul.bf16.vlgmr.msrb.gmra.mxu0 %v2013_v50 }
 0x125   : > { %1749 = vmatpush.bf16.msra.mxu0 %v2405_v39  ;;  %1729 = vmatmul.bf16.vlgmr.msrb.gmra.mxu2 %v2021_v51 }
 0x126   : > { %1715 = vmatmul.bf16.vlgmr.msrb.gmra.mxu1 %v2017_v52 }
 0x127   : > { %1743 = vmatmul.bf16.vlgmr.msrb.gmra.mxu3 %v2025_v53 }
 0x129   : > { %1750 = vmatpush.bf16.msra.mxu0 %v2404_v54 }
 0x12d   : > { %1751 = vmatpush.bf16.msra.mxu0 %v2403_v55 }
 0x131   : > { %1752 = vmatpush.bf16.msra.mxu0 %v2402_v56 }
 0x135   : > { %1753 = vmatpush.bf16.msra.mxu0 %v2401_v57 }
 0x139   : > { %1754 = vmatpush.bf16.msra.mxu0 %v2400_v58 }
 0x13d   : > { %1755 = vmatpush.bf16.msra.mxu0 %v2399_v59 }
 0x141   : > { %1756 = vmatpush.bf16.msra.mxu0 %v2398_v60 }
 0x144   : > { %1757 = vmatmul.bf16.vlgmr.msra.gmra.mxu0 %v2029_v63 }
 0x181   : > { %v1646_v0 = vpop.f32.mrf.mxu0 }
 0x183   : > { %v1660_v1 = vpop.f32.mrf.mxu1 }
 0x184   : > { %v1661_v5 = vadd.f32 %v1660_v1, %v1646_v0 }
 0x188   : > { %v1674_v2 = vpop.f32.mrf.mxu2 }
 0x189   : > { %v1648_v3 = vpop.f32.mrf.mxu0  ;;  %v1675_v7 = vadd.f32 %v1674_v2, %v1661_v5 }
 0x18a   : > { %v1688_v4 = vpop.f32.mrf.mxu3 }
 0x18b   : > { %v1662_v6 = vpop.f32.mrf.mxu1  ;;  %v1689_v10 = vadd.f32 %v1688_v4, %v1675_v7 }
 0x18c   : > { %v1663_v12 = vadd.f32 %v1662_v6, %v1648_v3 }
 0x190   : > { %v1676_v8 = vpop.f32.mrf.mxu2 }
 0x191   : > { %v1677_v16 = vadd.f32 %v1676_v8, %v1663_v12 }
 0x192   : > { %v1690_v11 = vpop.f32.mrf.mxu3 }
 0x193   : > { %v1691_v20 = vadd.f32 %v1690_v11, %v1677_v16 }
 0x1a1   : > { %v1702_v9 = vpop.f32.mrf.mxu0 }
 0x1a2   : > { %v1703_v13 = vadd.f32 %v1702_v9, %v1689_v10 }
 0x1a3   : > { %v1716_v14 = vpop.f32.mrf.mxu1 }
 0x1a4   : > { %v1717_v17 = vadd.f32 %v1716_v14, %v1703_v13 }
 0x1a8   : > { %v1730_v15 = vpop.f32.mrf.mxu2 }
 0x1a9   : > { %v1704_v18 = vpop.f32.mrf.mxu0  ;;  %v1731_v21 = vadd.f32 %v1730_v15, %v1717_v17 }
 0x1aa   : > { %v1744_v19 = vpop.f32.mrf.mxu3  ;;  %v1705_v22 = vadd.f32 %v1704_v18, %v1691_v20 }
 0x1ab   : > { %v1718_v23 = vpop.f32.mrf.mxu1  ;;  %v1745_v24 = vadd.f32 %v1744_v19, %v1731_v21 }
 0x1ac   : > { %v1719_v28 = vadd.f32 %v1718_v23, %v1705_v22 }
 0x1b0   : > { %v1732_v25 = vpop.f32.mrf.mxu2 }
 0x1b1   : > { %v1733_v30 = vadd.f32 %v1732_v25, %v1719_v28 }
 0x1b2   : > { %v1746_v32 = vpop.f32.mrf.mxu3 }
 0x1b3   : > { %v1747_v33 = vadd.f32 %v1746_v32, %v1733_v30 }
 0x1c1   : > { %v1758_v27 = vpop.f32.mrf.mxu0 }
 0x1c2   : > { %v1759_v29 = vadd.f32 %v1758_v27, %v1745_v24 }
 0x1c4   : > { %v1763_v31 = vadd.f32 %v1759_v29, %v1003_v26 }
 0x1c6   : > { %1765 = vst [vmem:[#allocation2] sm:$0xff] %v1763_v31 }
 0x1c9   : > { %v1760_v35 = vpop.f32.mrf.mxu0 }
 0x1ca   : > { %v1761_v36 = vadd.f32 %v1760_v35, %v1747_v33  ;;  %1770 = sbr.rel (%p2318_p6) target bundleno = 479 (0x1df), region = 152 }
 0x1cc   : > { %v1764_v37 = vadd.f32 %v1761_v36, %v1004_v34 }
 0x1ce   : > { %1766 = vst [vmem:[#allocation2 + $0x8] sm:$0xff] %v1764_v37 }
 0x1cf   : > { %v1771_v38 = vld [vmem:[#allocation2] sm:$0xff] }
 0x1d0   : > { %v2508_v40 = vld [vmem:[%s994_s30] ss:$0 sm:$0xff] }
 0x1d1   : > { %v2407_v41 = vld [vmem:[%s956_s17] sm:$0xff]   ;;  %v1777_v44 = vadd.f32 %v2508_v40, %v1771_v38 }
 0x1d2   : > { %v2408_v42 = vunpack.c.l.bf16 %v2407_v41  ;;  %v2409_v43 = vunpack.c.h.bf16 %v2407_v41 }
 0x1d4   : > { %v1783_v46 = vadd.f32 %v2408_v42, %v1777_v44 }
 0x1d5   : > { %v1772_v39 = vld [vmem:[#allocation2 + $0x8] sm:$0xff] }
 0x1d6   : > { %v1778_v45 = vadd.f32 %v2508_v40, %v1772_v39  ;;  %v1785_v48 = vmax.f32 %v1783_v46, 0.0 }
 0x1d8   : > { %v1784_v47 = vadd.f32 %v2409_v43, %v1778_v45 }
 0x1da   : > { %v1786_v49 = vmax.f32 %v1784_v47, 0.0 }
 0x1dc   : > { %v2413_v50 = vpack.c.bf16 %v1786_v49, %v1785_v48 }
 0x1de   : > { %2414 = vst [vmem:[%s3067_s19] sm:$0xff] %v2413_v50  }
 0x1df PF: > { %1797 = sbr.rel (!%p2727_p13) target bundleno = 488 (0x1e8), region = 156  ;;  %s2320_s21 = sshll.u32 (%p2727_p13), %s2583_s22, 2 }
 0x1e0   : > { %s1802_s11 = scalar_lea.vmem (%p2727_p13), %s3214_s4, %s2320_s21 }
 0x1e5   : > { %v1819_v51 = vld [vmem:[%s3067_s19] sm:$0xf]  ;;  %v1821_v52 = vld [vmem:[%s3067_s19 + $0x4] sm:$0xf] }
 0x1e6   : > { %1820 = vst [vmem:[%s1802_s11] sm:$0xf] %v1819_v51 }
 0x1e7   : > { %1822 = vst [vmem:[%s1802_s11 + $0x8] sm:$0xf] %v1821_v52 }
 0x1e8 PF: > { %s14_s25 = sadd.s32 1, %s2595_s25   ;;  %s3225_s29 = sld [smem:[#allocation7_spill]] }
 0x1e9   : > { %p11_p7 = scmp.ge.s32.totalorder %s14_s25, 6   ;;  %s3226_s28 = sld [smem:[#allocation8_spill]] }
 0x1ea   : > { %s3227_s15 = smov %s2559_s16  ;;  %s3228_s16 = smov %s2719_s13 }
 0x1eb   : > { %s3229_s17 = smov %s2567_s18  ;;  %s3230_s18 = smov %s2716_s12 }
 0x1ec   : > { %s3231_s19 = smov %s2575_s20  ;;  %s3232_s20 = smov %s2700_s7 }
 0x1ed   : > { %s3233_s21 = smov %s2587_s23  ;;  %s3234_s22 = smov %s2591_s24 }
 0x1ee   : > { %s3235_s23 = smov %s3225_s29  ;;  %13 = sbr.rel (!%p11_p7) target bundleno = 8 (0x8), region = 253 }
 0x1ef   : > { %s3236_s24 = smov %s3226_s28 }

// kernel: _lambda_.40
= control target key start
LH: loop header
LB: loop body
LE: loop exit
PB: predicated region body
PF: predicated region fallthrough
CT: control target
= control target key end

     0   :  { %s1493_s1 = inlined_call_operand.vmem [shape: bf16[1152,128], index: 1, kind: input, shape index: {}]   ;;  %s1494_s2 = inlined_call_operand.vmem [shape: f32[1,128], index: 2, kind: input, shape index: {}]   ;;  %s1495_s0 = inlined_call_operand.vmem [shape: bf16[16,1152], index: 0, kind: input, shape index: {}]   ;;  %s1496_s3 = inlined_call_operand.vmem [shape: bf16[16,128], index: 3, kind: output, shape index: {}]  }
   0x1   :  { %v1126_v0 = vld [vmem:[%s1493_s1 + $0x38] sm:$0xff]  ;;  %v1125_v4 = vld [vmem:[%s1493_s1 + $0x30] sm:$0xff]  ;;  %v1124_v8 = vld [vmem:[%s1493_s1 + $0x28] sm:$0xff] }
   0x2   :  { %v1142_v1 = vld [vmem:[%s1493_s1 + $0xb8] sm:$0xff]  ;;  %650 = vmatpush.bf16.msra.mxu0 %v1126_v0  ;;  %v1141_v5 = vld [vmem:[%s1493_s1 + $0xb0] sm:$0xff]  ;;  %v1140_v9 = vld [vmem:[%s1493_s1 + $0xa8] sm:$0xff] }
   0x3   :  { %v1134_v2 = vld [vmem:[%s1493_s1 + $0x78] sm:$0xff]  ;;  %678 = vmatpush.bf16.msra.mxu2 %v1142_v1  ;;  %v1133_v6 = vld [vmem:[%s1493_s1 + $0x70] sm:$0xff]  ;;  %v1132_v10 = vld [vmem:[%s1493_s1 + $0x68] sm:$0xff] }
   0x4   :  { %v1150_v3 = vld [vmem:[%s1493_s1 + $0xf8] sm:$0xff]  ;;  %664 = vmatpush.bf16.msra.mxu1 %v1134_v2  ;;  %v1149_v7 = vld [vmem:[%s1493_s1 + $0xf0] sm:$0xff]  ;;  %v1148_v11 = vld [vmem:[%s1493_s1 + $0xe8] sm:$0xff] }
   0x5   :  { %692 = vmatpush.bf16.msra.mxu3 %v1150_v3  ;;  %v1123_v12 = vld [vmem:[%s1493_s1 + $0x20] sm:$0xff]  ;;  %v1122_v16 = vld [vmem:[%s1493_s1 + $0x18] sm:$0xff]  ;;  %v1121_v20 = vld [vmem:[%s1493_s1 + $0x10] sm:$0xff] }
   0x6   :  { %651 = vmatpush.bf16.msra.mxu0 %v1125_v4  ;;  %v1139_v13 = vld [vmem:[%s1493_s1 + $0xa0] sm:$0xff]  ;;  %v1138_v17 = vld [vmem:[%s1493_s1 + $0x98] sm:$0xff]  ;;  %v1137_v21 = vld [vmem:[%s1493_s1 + $0x90] sm:$0xff] }
   0x7   :  { %679 = vmatpush.bf16.msra.mxu2 %v1141_v5  ;;  %v1131_v14 = vld [vmem:[%s1493_s1 + $0x60] sm:$0xff]  ;;  %v1130_v18 = vld [vmem:[%s1493_s1 + $0x58] sm:$0xff]  ;;  %v1129_v22 = vld [vmem:[%s1493_s1 + $0x50] sm:$0xff] }
   0x8   :  { %665 = vmatpush.bf16.msra.mxu1 %v1133_v6  ;;  %v1147_v15 = vld [vmem:[%s1493_s1 + $0xe0] sm:$0xff]  ;;  %v1146_v19 = vld [vmem:[%s1493_s1 + $0xd8] sm:$0xff]  ;;  %v1145_v23 = vld [vmem:[%s1493_s1 + $0xd0] sm:$0xff] }
   0x9   :  { %693 = vmatpush.bf16.msra.mxu3 %v1149_v7  ;;  %v1120_v24 = vld [vmem:[%s1493_s1 + $0x8] sm:$0xff]  ;;  %v1119_v28 = vld [vmem:[%s1493_s1] sm:$0xff]  ;;  %v1158_v30 = vld [vmem:[%s1493_s1 + $0x138] sm:$0xff] }
   0xa   :  { %652 = vmatpush.bf16.msra.mxu0 %v1124_v8  ;;  %v1136_v25 = vld [vmem:[%s1493_s1 + $0x88] sm:$0xff]  ;;  %v1135_v29 = vld [vmem:[%s1493_s1 + $0x80] sm:$0xff]  ;;  %v1174_v31 = vld [vmem:[%s1493_s1 + $0x1b8] sm:$0xff] }
   0xb   :  { %680 = vmatpush.bf16.msra.mxu2 %v1140_v9  ;;  %v1128_v26 = vld [vmem:[%s1493_s1 + $0x48] sm:$0xff]  ;;  %v1127_v32 = vld [vmem:[%s1493_s1 + $0x40] sm:$0xff]  ;;  %v1166_v38 = vld [vmem:[%s1493_s1 + $0x178] sm:$0xff] }
   0xc   :  { %666 = vmatpush.bf16.msra.mxu1 %v1132_v10  ;;  %v1144_v27 = vld [vmem:[%s1493_s1 + $0xc8] sm:$0xff]  ;;  %v1143_v33 = vld [vmem:[%s1493_s1 + $0xc0] sm:$0xff]  ;;  %v1182_v39 = vld [vmem:[%s1493_s1 + $0x1f8] sm:$0xff] }
   0xd   :  { %694 = vmatpush.bf16.msra.mxu3 %v1148_v11  ;;  %v788_v34 = vld [vmem:[%s1495_s0] sm:$0xf]  ;;  %v1114_v35 = vld [vmem:[%s1495_s0 + $0x20] sm:$0xf0]  ;;  %v796_v36 = vld [vmem:[%s1495_s0 + $0x8] sm:$0xf] }
   0xe   :  { %653 = vmatpush.bf16.msra.mxu0 %v1123_v12  ;;  %v1115_v37 = vld [vmem:[%s1495_s0 + $0x28] sm:$0xf0]  ;;  %v1110_v40 = vld [vmem:[%s1495_s0 + $0x4] sm:$0xf]  ;;  %v790_v41 = vld [vmem:[%s1495_s0 + $0x24] sm:$0xf0]  ;;  %v789_v44 = vor.u32 %v1114_v35, %v788_v34 }
   0xf   :  { %681 = vmatpush.bf16.msra.mxu2 %v1139_v13  ;;  %v1111_v42 = vld [vmem:[%s1495_s0 + $0xc] sm:$0xf]  ;;  %v798_v43 = vld [vmem:[%s1495_s0 + $0x2c] sm:$0xf0]  ;;  %v797_v45 = vor.u32 %v1115_v37, %v796_v36  ;;  %v793_v48 = vor.u32 %v1110_v40, %v790_v41  ;;  %v1155_v56 = vld [vmem:[%s1493_s1 + $0x120] sm:$0xff] }
  0x10   :  { %667 = vmatpush.bf16.msra.mxu1 %v1131_v14  ;;  %v1157_v46 = vld [vmem:[%s1493_s1 + $0x130] sm:$0xff]  ;;  %v801_v49 = vor.u32 %v1111_v42, %v798_v43  ;;  %v1156_v52 = vld [vmem:[%s1493_s1 + $0x128] sm:$0xff]  ;;  %v1171_v57 = vld [vmem:[%s1493_s1 + $0x1a0] sm:$0xff] }
  0x11   :  { %695 = vmatpush.bf16.msra.mxu3 %v1147_v15  ;;  %v1173_v47 = vld [vmem:[%s1493_s1 + $0x1b0] sm:$0xff]  ;;  %v1172_v53 = vld [vmem:[%s1493_s1 + $0x1a8] sm:$0xff]  ;;  %v1163_v58 = vld [vmem:[%s1493_s1 + $0x160] sm:$0xff] }
  0x12   :  { %654 = vmatpush.bf16.msra.mxu0 %v1122_v16  ;;  %v1165_v50 = vld [vmem:[%s1493_s1 + $0x170] sm:$0xff]  ;;  %v1164_v54 = vld [vmem:[%s1493_s1 + $0x168] sm:$0xff]  ;;  %v1179_v59 = vld [vmem:[%s1493_s1 + $0x1e0] sm:$0xff] }
  0x13   :  { %682 = vmatpush.bf16.msra.mxu2 %v1138_v17  ;;  %v1181_v51 = vld [vmem:[%s1493_s1 + $0x1f0] sm:$0xff]  ;;  %v1180_v55 = vld [vmem:[%s1493_s1 + $0x1e8] sm:$0xff]  ;;  %v1154_v60 = vld [vmem:[%s1493_s1 + $0x118] sm:$0xff] }
  0x14   :  { %668 = vmatpush.bf16.msra.mxu1 %v1130_v18  ;;  %v1170_v61 = vld [vmem:[%s1493_s1 + $0x198] sm:$0xff]  ;;  %v1153_v0 = vld [vmem:[%s1493_s1 + $0x110] sm:$0xff]  ;;  %v1152_v4 = vld [vmem:[%s1493_s1 + $0x108] sm:$0xff] }
  0x15   :  { %696 = vmatpush.bf16.msra.mxu3 %v1146_v19  ;;  %v1162_v62 = vld [vmem:[%s1493_s1 + $0x158] sm:$0xff]  ;;  %v1169_v1 = vld [vmem:[%s1493_s1 + $0x190] sm:$0xff]  ;;  %v1168_v5 = vld [vmem:[%s1493_s1 + $0x188] sm:$0xff] }
  0x16   :  { %655 = vmatpush.bf16.msra.mxu0 %v1121_v20  ;;  %v1178_v63 = vld [vmem:[%s1493_s1 + $0x1d8] sm:$0xff]  ;;  %v1161_v2 = vld [vmem:[%s1493_s1 + $0x150] sm:$0xff]  ;;  %v1160_v6 = vld [vmem:[%s1493_s1 + $0x148] sm:$0xff] }
  0x17   :  { %683 = vmatpush.bf16.msra.mxu2 %v1137_v21  ;;  %v1177_v3 = vld [vmem:[%s1493_s1 + $0x1d0] sm:$0xff]  ;;  %v1176_v7 = vld [vmem:[%s1493_s1 + $0x1c8] sm:$0xff]  ;;  %v1151_v8 = vld [vmem:[%s1493_s1 + $0x100] sm:$0xff] }
  0x18   :  { %669 = vmatpush.bf16.msra.mxu1 %v1129_v22  ;;  %v1167_v9 = vld [vmem:[%s1493_s1 + $0x180] sm:$0xff]  ;;  %v1190_v10 = vld [vmem:[%s1493_s1 + $0x238] sm:$0xff]  ;;  %v804_v11 = vld [vmem:[%s1495_s0 + $0x10] sm:$0xf] }
  0x19   :  { %697 = vmatpush.bf16.msra.mxu3 %v1145_v23  ;;  %v1116_v12 = vld [vmem:[%s1495_s0 + $0x30] sm:$0xf0]  ;;  %v812_v13 = vld [vmem:[%s1495_s0 + $0x18] sm:$0xf]  ;;  %v1117_v14 = vld [vmem:[%s1495_s0 + $0x38] sm:$0xf0] }
  0x1a   :  { %656 = vmatpush.bf16.msra.mxu0 %v1120_v24  ;;  %v1159_v15 = vld [vmem:[%s1493_s1 + $0x140] sm:$0xff]  ;;  %v1112_v17 = vld [vmem:[%s1495_s0 + $0x14] sm:$0xf]  ;;  %v806_v18 = vld [vmem:[%s1495_s0 + $0x34] sm:$0xf0]  ;;  %v805_v21 = vor.u32 %v1116_v12, %v804_v11  ;;  %v813_v22 = vor.u32 %v1117_v14, %v812_v13 }
  0x1b   :  { %684 = vmatpush.bf16.msra.mxu2 %v1136_v25  ;;  %v1175_v16 = vld [vmem:[%s1493_s1 + $0x1c0] sm:$0xff]  ;;  %v1113_v19 = vld [vmem:[%s1495_s0 + $0x1c] sm:$0xf]  ;;  %v809_v23 = vor.u32 %v1112_v17, %v806_v18  ;;  %v1189_v25 = vld [vmem:[%s1493_s1 + $0x230] sm:$0xff] }
  0x1c   :  { %670 = vmatpush.bf16.msra.mxu1 %v1128_v26  ;;  %v814_v20 = vld [vmem:[%s1495_s0 + $0x3c] sm:$0xf0]  ;;  %v1188_v26 = vld [vmem:[%s1493_s1 + $0x228] sm:$0xff] }
  0x1d   :  { %698 = vmatpush.bf16.msra.mxu3 %v1144_v27  ;;  %v817_v24 = vor.u32 %v1113_v19, %v814_v20  ;;  %v1187_v27 = vld [vmem:[%s1493_s1 + $0x220] sm:$0xff] }
  0x1e   :  { %657 = vmatpush.bf16.msra.mxu0 %v1119_v28  ;;  %v1186_v28 = vld [vmem:[%s1493_s1 + $0x218] sm:$0xff] }
  0x1f   :  { %685 = vmatpush.bf16.msra.mxu2 %v1135_v29  ;;  %v1185_v29 = vld [vmem:[%s1493_s1 + $0x210] sm:$0xff] }
  0x20   :  { %671 = vmatpush.bf16.msra.mxu1 %v1127_v32  ;;  %v820_v32 = vld [vmem:[%s1495_s0 + $0x20] sm:$0xf] }
  0x21   :  { %699 = vmatpush.bf16.msra.mxu3 %v1143_v33  ;;  %658 = vmatmul.bf16.vlgmr.msra.gmra.mxu0 %v789_v44  ;;  %v1118_v33 = vld [vmem:[%s1495_s0 + $0x40] sm:$0xf0] }
  0x22   :  { %706 = vmatpush.bf16.msrb.mxu0 %v1158_v30  ;;  %686 = vmatmul.bf16.vlgmr.msra.gmra.mxu2 %v797_v45  ;;  %v1184_v30 = vld [vmem:[%s1493_s1 + $0x208] sm:$0xff]  ;;  %v821_v34 = vor.u32 %v1118_v33, %v820_v32 }
  0x23   :  { %734 = vmatpush.bf16.msrb.mxu2 %v1174_v31  ;;  %672 = vmatmul.bf16.vlgmr.msra.gmra.mxu1 %v793_v48  ;;  %v1183_v31 = vld [vmem:[%s1493_s1 + $0x200] sm:$0xff] }
  0x24   :  { %720 = vmatpush.bf16.msrb.mxu1 %v1166_v38  ;;  %700 = vmatmul.bf16.vlgmr.msra.gmra.mxu3 %v801_v49 }
  0x25   :  { %748 = vmatpush.bf16.msrb.mxu3 %v1182_v39  ;;  %v1196_v39 = vld [vmem:[%s1494_s2] ss:$0 sm:$0xff] }
  0x26   :  { %707 = vmatpush.bf16.msrb.mxu0 %v1157_v46 }
  0x27   :  { %735 = vmatpush.bf16.msrb.mxu2 %v1173_v47 }
  0x28   :  { %721 = vmatpush.bf16.msrb.mxu1 %v1165_v50 }
  0x29   :  { %749 = vmatpush.bf16.msrb.mxu3 %v1181_v51 }
  0x2a   :  { %708 = vmatpush.bf16.msrb.mxu0 %v1156_v52 }
  0x2b   :  { %736 = vmatpush.bf16.msrb.mxu2 %v1172_v53 }
  0x2c   :  { %722 = vmatpush.bf16.msrb.mxu1 %v1164_v54 }
  0x2d   :  { %750 = vmatpush.bf16.msrb.mxu3 %v1180_v55 }
  0x2e   :  { %709 = vmatpush.bf16.msrb.mxu0 %v1155_v56 }
  0x2f   :  { %737 = vmatpush.bf16.msrb.mxu2 %v1171_v57 }
  0x30   :  { %723 = vmatpush.bf16.msrb.mxu1 %v1163_v58 }
  0x31   :  { %751 = vmatpush.bf16.msrb.mxu3 %v1179_v59 }
  0x32   :  { %710 = vmatpush.bf16.msrb.mxu0 %v1154_v60 }
  0x33   :  { %738 = vmatpush.bf16.msrb.mxu2 %v1170_v61 }
  0x34   :  { %724 = vmatpush.bf16.msrb.mxu1 %v1162_v62 }
  0x35   :  { %752 = vmatpush.bf16.msrb.mxu3 %v1178_v63 }
  0x36   :  { %711 = vmatpush.bf16.msrb.mxu0 %v1153_v0 }
  0x37   :  { %739 = vmatpush.bf16.msrb.mxu2 %v1169_v1 }
  0x38   :  { %725 = vmatpush.bf16.msrb.mxu1 %v1161_v2 }
  0x39   :  { %753 = vmatpush.bf16.msrb.mxu3 %v1177_v3 }
  0x3a   :  { %712 = vmatpush.bf16.msrb.mxu0 %v1152_v4 }
  0x3b   :  { %740 = vmatpush.bf16.msrb.mxu2 %v1168_v5 }
  0x3c   :  { %726 = vmatpush.bf16.msrb.mxu1 %v1160_v6 }
  0x3d   :  { %754 = vmatpush.bf16.msrb.mxu3 %v1176_v7 }
  0x3e   :  { %713 = vmatpush.bf16.msrb.mxu0 %v1151_v8 }
  0x3f   :  { %741 = vmatpush.bf16.msrb.mxu2 %v1167_v9 }
  0x40   :  { %727 = vmatpush.bf16.msrb.mxu1 %v1159_v15 }
  0x41   :  { %755 = vmatpush.bf16.msrb.mxu3 %v1175_v16  ;;  %714 = vmatmul.bf16.vlgmr.msrb.gmra.mxu0 %v805_v21 }
  0x42   :  { %762 = vmatpush.bf16.msra.mxu0 %v1190_v10  ;;  %742 = vmatmul.bf16.vlgmr.msrb.gmra.mxu2 %v813_v22 }
  0x43   :  { %728 = vmatmul.bf16.vlgmr.msrb.gmra.mxu1 %v809_v23 }
  0x44   :  { %756 = vmatmul.bf16.vlgmr.msrb.gmra.mxu3 %v817_v24 }
  0x46   :  { %763 = vmatpush.bf16.msra.mxu0 %v1189_v25 }
  0x4a   :  { %764 = vmatpush.bf16.msra.mxu0 %v1188_v26 }
  0x4e   :  { %765 = vmatpush.bf16.msra.mxu0 %v1187_v27 }
  0x52   :  { %766 = vmatpush.bf16.msra.mxu0 %v1186_v28 }
  0x56   :  { %767 = vmatpush.bf16.msra.mxu0 %v1185_v29 }
  0x5a   :  { %768 = vmatpush.bf16.msra.mxu0 %v1184_v30 }
  0x5e   :  { %769 = vmatpush.bf16.msra.mxu0 %v1183_v31 }
  0x61   :  { %770 = vmatmul.bf16.vlgmr.msra.gmra.mxu0 %v821_v34 }
  0x9e   :  { %v659_v35 = vpop.f32.mrf.mxu0 }
  0x9f   :  { %v660_v41 = vadd.f32 %v1196_v39, %v659_v35 }
  0xa0   :  { %v673_v36 = vpop.f32.mrf.mxu1 }
  0xa1   :  { %v674_v44 = vadd.f32 %v673_v36, %v660_v41 }
  0xa5   :  { %v687_v37 = vpop.f32.mrf.mxu2 }
  0xa6   :  { %v661_v38 = vpop.f32.mrf.mxu0  ;;  %v688_v48 = vadd.f32 %v687_v37, %v674_v44 }
  0xa7   :  { %v701_v40 = vpop.f32.mrf.mxu3  ;;  %v662_v46 = vadd.f32 %v1196_v39, %v661_v38 }
  0xa8   :  { %v675_v42 = vpop.f32.mrf.mxu1  ;;  %v702_v51 = vadd.f32 %v701_v40, %v688_v48 }
  0xa9   :  { %v676_v49 = vadd.f32 %v675_v42, %v662_v46 }
  0xad   :  { %v689_v43 = vpop.f32.mrf.mxu2 }
  0xae   :  { %v690_v53 = vadd.f32 %v689_v43, %v676_v49 }
  0xaf   :  { %v703_v47 = vpop.f32.mrf.mxu3 }
  0xb0   :  { %v704_v57 = vadd.f32 %v703_v47, %v690_v53 }
  0xbe   :  { %v715_v45 = vpop.f32.mrf.mxu0 }
  0xbf   :  { %v716_v55 = vadd.f32 %v715_v45, %v702_v51 }
  0xc0   :  { %v729_v50 = vpop.f32.mrf.mxu1 }
  0xc1   :  { %v730_v58 = vadd.f32 %v729_v50, %v716_v55 }
  0xc5   :  { %v743_v52 = vpop.f32.mrf.mxu2 }
  0xc6   :  { %v717_v54 = vpop.f32.mrf.mxu0  ;;  %v744_v63 = vadd.f32 %v743_v52, %v730_v58 }
  0xc7   :  { %v757_v56 = vpop.f32.mrf.mxu3  ;;  %v718_v59 = vadd.f32 %v717_v54, %v704_v57 }
  0xc8   :  { %v731_v60 = vpop.f32.mrf.mxu1  ;;  %v758_v3 = vadd.f32 %v757_v56, %v744_v63 }
  0xc9   :  { %v732_v0 = vadd.f32 %v731_v60, %v718_v59 }
  0xcd   :  { %v745_v61 = vpop.f32.mrf.mxu2 }
  0xce   :  { %v746_v1 = vadd.f32 %v745_v61, %v732_v0 }
  0xcf   :  { %v759_v2 = vpop.f32.mrf.mxu3 }
  0xd0   :  { %v760_v4 = vadd.f32 %v759_v2, %v746_v1 }
  0xde   :  { %v771_v62 = vpop.f32.mrf.mxu0 }
  0xdf   :  { %v772_v5 = vadd.f32 %v771_v62, %v758_v3 }
  0xe1   :  { %v776_v8 = vmax.f32 %v772_v5, 0.0 }
  0xe6   :  { %v773_v6 = vpop.f32.mrf.mxu0 }
  0xe7   :  { %v774_v7 = vadd.f32 %v773_v6, %v760_v4 }
  0xe9   :  { %v777_v9 = vmax.f32 %v774_v7, 0.0 }
  0xeb   :  { %v1194_v10 = vpack.c.bf16 %v777_v9, %v776_v8 }
  0xed   :  { %1195 = vst [vmem:[%s1496_s3] sm:$0xff] %v1194_v10  }

// kernel: _lambda_.49
= control target key start
LH: loop header
LB: loop body
LE: loop exit
PB: predicated region body
PF: predicated region fallthrough
CT: control target
= control target key end

     0   :  { %s212_s1 = inlined_call_operand.vmem [shape: bf16[128,128], index: 1, kind: input, shape index: {}]   ;;  %s213_s2 = inlined_call_operand.vmem [shape: f32[1,128], index: 2, kind: input, shape index: {}]   ;;  %s214_s0 = inlined_call_operand.vmem [shape: bf16[16,128], index: 0, kind: input, shape index: {}]   ;;  %s215_s3 = inlined_call_operand.vmem [shape: f32[16,128], index: 3, kind: output, shape index: {}]  }
   0x1   :  { %v154_v0 = vld [vmem:[%s212_s1 + $0x38] sm:$0xff]  ;;  %v153_v1 = vld [vmem:[%s212_s1 + $0x30] sm:$0xff]  ;;  %v152_v2 = vld [vmem:[%s212_s1 + $0x28] sm:$0xff] }
   0x2   :  { %90 = vmatpush.bf16.msra.mxu0 %v154_v0  ;;  %v151_v3 = vld [vmem:[%s212_s1 + $0x20] sm:$0xff]  ;;  %v150_v4 = vld [vmem:[%s212_s1 + $0x18] sm:$0xff]  ;;  %v149_v5 = vld [vmem:[%s212_s1 + $0x10] sm:$0xff] }
   0x3   :  { %v148_v6 = vld [vmem:[%s212_s1 + $0x8] sm:$0xff]  ;;  %v147_v7 = vld [vmem:[%s212_s1] sm:$0xff] }
   0x4   :  { %v146_v8 = vld [vmem:[%s214_s0] sm:$0xff] }
   0x5   :  { %v155_v9 = vld [vmem:[%s213_s2] ss:$0 sm:$0xff] }
   0x6   :  { %91 = vmatpush.bf16.msra.mxu0 %v153_v1 }
   0xa   :  { %92 = vmatpush.bf16.msra.mxu0 %v152_v2 }
   0xe   :  { %93 = vmatpush.bf16.msra.mxu0 %v151_v3 }
  0x12   :  { %94 = vmatpush.bf16.msra.mxu0 %v150_v4 }
  0x16   :  { %95 = vmatpush.bf16.msra.mxu0 %v149_v5 }
  0x1a   :  { %96 = vmatpush.bf16.msra.mxu0 %v148_v6 }
  0x1e   :  { %97 = vmatpush.bf16.msra.mxu0 %v147_v7 }
  0x21   :  { %98 = vmatmul.bf16.vlgmr.msra.gmra.mxu0 %v146_v8 }
  0x9e   :  { %v99_v10 = vpop.f32.mrf.mxu0 }
  0x9f   :  { %v100_v11 = vadd.f32 %v155_v9, %v99_v10 }
  0xa1   :  { %104 = vst [vmem:[%s215_s3] sm:$0xff] %v100_v11 }
  0xa6   :  { %v101_v12 = vpop.f32.mrf.mxu0 }
  0xa7   :  { %v102_v13 = vadd.f32 %v155_v9, %v101_v12 }
  0xa9   :  { %105 = vst [vmem:[%s215_s3 + $0x8] sm:$0xff] %v102_v13 }

// kernel: _lambda_.47
= control target key start
LH: loop header
LB: loop body
LE: loop exit
PB: predicated region body
PF: predicated region fallthrough
CT: control target
= control target key end

     0   :  { %s574_s12 = smov 0   ;;  %s576_s13 = smov 0   ;;  %s634_s0 = inlined_call_operand.vmem [shape: bf16[64,128], index: 0, kind: input, shape index: {}]   ;;  %s635_s1 = inlined_call_operand.vmem [shape: bf16[128,128], index: 1, kind: input, shape index: {}]   ;;  %s636_s2 = inlined_call_operand.vmem [shape: f32[1,128], index: 2, kind: input, shape index: {}]   ;;  %s637_s3 = inlined_call_operand.vmem [shape: f32[64,128], index: 3, kind: output, shape index: {}]  }
   0x1   :  { %s578_s14 = smov 0  }
   0x2 LB: > { %s22_s15 = sadd.s32 1, %s548_s13  ;;  %p440_p0 = scmp.ge.s32.totalorder %s552_s14, 1  ;;  %s552_s14 = sphi %s578_s14, %s13_s14   ;;  %s548_s13 = sphi %s576_s13, %s639_s13   ;;  %s544_s12 = sphi %s574_s12, %s638_s12  }
   0x3   : > { %p23_p1 = scmp.ge.s32.totalorder %s22_s15, 2  ;;  %p169_p2 = scmp.lt.s32.totalorder %s552_s14, 3 }
   0x5   : > { %s641_s15 = smov (%p23_p1, %s22_s15), 0  ;;  %p170_p3 = pnand %p440_p0, %p169_p2 }
   0x6   : > { %s441_s24 = sshll.u32 (!%p170_p3), %s544_s12, 2 }
   0x7   : > { %173 = sbr.rel (%p170_p3) target bundleno = 182 (0xb6), region = 32  ;;  %p204_p4 = scmp.lt.s32.totalorder (!%p170_p3), %s441_s24, 7 }
   0xc   : > { %v496_v0 = vld [vmem:[%s635_s1 + $0x38] sm:$0xff]  ;;  %v495_v1 = vld [vmem:[%s635_s1 + $0x30] sm:$0xff]  ;;  %v494_v2 = vld [vmem:[%s635_s1 + $0x28] sm:$0xff]  ;;  %s643_s24 = smov (!%p204_p4, %s441_s24), 7 }
   0xd   : > { %309 = vmatpush.bf16.msra.mxu0 %v496_v0  ;;  %497 = vmatpush.bf16.msra.mxu1 %v496_v0  ;;  %v493_v3 = vld [vmem:[%s635_s1 + $0x20] sm:$0xff]  ;;  %v492_v4 = vld [vmem:[%s635_s1 + $0x18] sm:$0xff]  ;;  %v491_v5 = vld [vmem:[%s635_s1 + $0x10] sm:$0xff]  ;;  %s442_s4 = sshll.u32 %s643_s24, 2  ;;  %s444_s10 = sshll.u32 %s643_s24, 3 }
   0xe   : > { %v490_v6 = vld [vmem:[%s635_s1 + $0x8] sm:$0xff]  ;;  %v489_v7 = vld [vmem:[%s635_s1] sm:$0xff]  ;;  %s207_s9 = scalar_lea.vmem %s634_s0, %s442_s4  ;;  %s223_s18 = scalar_lea.vmem %s637_s3, %s444_s10 }
   0xf   : > { %v487_v8 = vld [vmem:[%s207_s9] sm:$0xff]  ;;  %v488_v9 = vld [vmem:[%s207_s9 + $0x8] sm:$0xff] }
  0x10   : > { %v529_v10 = vld [vmem:[%s636_s2] ss:$0 sm:$0xff] }
  0x11   : > { %310 = vmatpush.bf16.msra.mxu0 %v495_v1  ;;  %498 = vmatpush.bf16.msra.mxu1 %v495_v1 }
  0x15   : > { %311 = vmatpush.bf16.msra.mxu0 %v494_v2  ;;  %499 = vmatpush.bf16.msra.mxu1 %v494_v2 }
  0x19   : > { %312 = vmatpush.bf16.msra.mxu0 %v493_v3  ;;  %500 = vmatpush.bf16.msra.mxu1 %v493_v3 }
  0x1d   : > { %313 = vmatpush.bf16.msra.mxu0 %v492_v4  ;;  %501 = vmatpush.bf16.msra.mxu1 %v492_v4 }
  0x21   : > { %314 = vmatpush.bf16.msra.mxu0 %v491_v5  ;;  %502 = vmatpush.bf16.msra.mxu1 %v491_v5 }
  0x25   : > { %315 = vmatpush.bf16.msra.mxu0 %v490_v6  ;;  %503 = vmatpush.bf16.msra.mxu1 %v490_v6 }
  0x29   : > { %316 = vmatpush.bf16.msra.mxu0 %v489_v7  ;;  %504 = vmatpush.bf16.msra.mxu1 %v489_v7 }
  0x2c   : > { %317 = vmatmul.bf16.vlgmr.msra.gmra.mxu0 %v487_v8  ;;  %322 = vmatmul.bf16.vlgmr.msra.gmra.mxu1 %v488_v9 }
  0xa9   : > { %v318_v11 = vpop.f32.mrf.mxu0  ;;  %v323_v12 = vpop.f32.mrf.mxu1 }
  0xaa   : > { %v319_v13 = vadd.f32 %v529_v10, %v318_v11  ;;  %v324_v17 = vadd.f32 %v529_v10, %v323_v12 }
  0xac   : > { %328 = vst [vmem:[%s223_s18] sm:$0xff] %v319_v13 }
  0xad   : > { %330 = vst [vmem:[%s223_s18 + $0x10] sm:$0xff] %v324_v17 }
  0xb1   : > { %v320_v14 = vpop.f32.mrf.mxu0  ;;  %v325_v15 = vpop.f32.mrf.mxu1 }
  0xb2   : > { %v321_v16 = vadd.f32 %v529_v10, %v320_v14  ;;  %v326_v18 = vadd.f32 %v529_v10, %v325_v15 }
  0xb4   : > { %329 = vst [vmem:[%s223_s18 + $0x8] sm:$0xff] %v321_v16 }
  0xb5   : > { %331 = vst [vmem:[%s223_s18 + $0x18] sm:$0xff] %v326_v18 }
  0xb6 PF: > { %s13_s14 = sadd.s32 1, %s552_s14   ;;  %s638_s12 = smov %s548_s13 }
  0xb7   : > { %p10_p5 = scmp.ge.s32.totalorder %s13_s14, 4   ;;  %s639_s13 = smov %s641_s15 }
  0xb9   :  { %12 = sbr.rel (!%p10_p5) target bundleno = 2 (0x2), region = 68 }

// kernel: _lambda_.41
= control target key start
LH: loop header
LB: loop body
LE: loop exit
PB: predicated region body
PF: predicated region fallthrough
CT: control target
= control target key end

     0   :  { %s1737_s12 = smov 0   ;;  %s1739_s13 = smov 0   ;;  %s1904_s0 = inlined_call_operand.vmem [shape: bf16[16,2304], index: 0, kind: input, shape index: {}]   ;;  %s1905_s1 = inlined_call_operand.vmem [shape: bf16[2304,128], index: 1, kind: input, shape index: {}]   ;;  %s1906_s2 = inlined_call_operand.vmem [shape: f32[1,128], index: 2, kind: input, shape index: {}]   ;;  %s1907_s3 = inlined_call_operand.vmem [shape: bf16[16,128], index: 3, kind: output, shape index: {}]  }
   0x1   :  { %s1741_s14 = smov 0   ;;  %s1743_s15 = smov 0  }
   0x2   :  { %s1745_s16 = smov 0  }
   0x3 LB: > { %s25_s17 = sadd.s32 1, %s1710_s15  ;;  %p48_p1 = scmp.ne.s32.totalorder %s1702_s13, %s1698_s12  ;;  %s1714_s16 = sphi %s1745_s16, %s13_s16   ;;  %s1710_s15 = sphi %s1743_s15, %s1911_s15   ;;  %s1706_s14 = sphi %s1741_s14, %s1910_s14   ;;  %s1702_s13 = sphi %s1739_s13, %s1909_s13   ;;  %s1698_s12 = sphi %s1737_s12, %s1908_s12  }
   0x4   : > { %p26_p0 = scmp.ge.s32.totalorder %s25_s17, 2  ;;  %p49_p2 = scmp.eq.s32.totalorder %s1714_s16, 0 }
   0x5   : > { %s41_s19 = sadd.s32 1, %s1702_s13  ;;  %p1207_p5 = scmp.ge.s32.totalorder %s1714_s16, 2 }
   0x6   : > { %s1913_s17 = smov (%p26_p0, %s25_s17), 0  ;;  %p50_p3 = por %p49_p2, %p48_p1 }
   0x7   : > { %s37_s18 = ssub.s32 %s1710_s15, %s1913_s17  ;;  %162 = sbr.rel (%p1207_p5) target bundleno = 27 (0x1b), region = 20 }
   0x8   : > { %p39_p4 = scmp.eq.s32.totalorder %s37_s18, 0 }
   0xa   : > { %s1772_s20 = scalar_select %p39_p4, %s1702_s13, %s41_s19  }
   0xc   : > { %165 = sbr.rel (!%p50_p3) target bundleno = 27 (0x1b), region = 24  ;;  %s167_s21 = sand.u32 (%p50_p3), 1, %s1702_s13  }
   0xd   : > { %s1545_s22 = smul.u32 (%p50_p3), 36, %s1710_s15 }
   0xe   : > { %s1632_s23 = smul.u32 (%p50_p3), 72, %s167_s21 }
   0xf   : > { %s175_s26 = scalar_lea.vmem (%p50_p3), %s1904_s0, %s1545_s22 }
  0x10   : > { %v190_v0 = vld [vmem:[%s175_s26] sm:$0xff] (%p50_p3)  ;;  %v192_v1 = vld [vmem:[%s175_s26 + $0x8] sm:$0xff] (%p50_p3)  ;;  %v194_v2 = vld [vmem:[%s175_s26 + $0x10] sm:$0xff] (%p50_p3)  ;;  %s169_s27 = scalar_lea.vmem (%p50_p3), [#allocation3], %s1632_s23 }
  0x11   : > { %191 = vst [vmem:[%s169_s27] sm:$0xff] %v190_v0  ;;  %v196_v3 = vld [vmem:[%s175_s26 + $0x18] sm:$0xff]  ;;  %v198_v4 = vld [vmem:[%s175_s26 + $0x48] sm:$0xff]  ;;  %v200_v5 = vld [vmem:[%s175_s26 + $0x50] sm:$0xff] }
  0x12   : > { %193 = vst [vmem:[%s169_s27 + $0x8] sm:$0xff] %v192_v1  ;;  %v202_v6 = vld [vmem:[%s175_s26 + $0x58] sm:$0xff]  ;;  %v204_v7 = vld [vmem:[%s175_s26 + $0x60] sm:$0xff]  ;;  %v1211_v9 = vld [vmem:[%s175_s26 + $0x68] sm:$0xf] }
  0x13   : > { %195 = vst [vmem:[%s169_s27 + $0x10] sm:$0xff] %v194_v2  ;;  %v1209_v8 = vld [vmem:[%s175_s26 + $0x20] sm:$0xf] }
  0x14   : > { %197 = vst [vmem:[%s169_s27 + $0x18] sm:$0xff] %v196_v3 }
  0x15   : > { %199 = vst [vmem:[%s169_s27 + $0x24] sm:$0xff] %v198_v4 }
  0x16   : > { %201 = vst [vmem:[%s169_s27 + $0x2c] sm:$0xff] %v200_v5 }
  0x17   : > { %203 = vst [vmem:[%s169_s27 + $0x34] sm:$0xff] %v202_v6 }
  0x18   : > { %205 = vst [vmem:[%s169_s27 + $0x3c] sm:$0xff] %v204_v7 }
  0x19   : > { %1210 = vst [vmem:[%s169_s27 + $0x20] sm:$0xf] %v1209_v8 }
  0x1a   : > { %1212 = vst [vmem:[%s169_s27 + $0x44] sm:$0xf] %v1211_v9 }
  0x1b PF: > { %p1213_p6 = scmp.ge.s32.totalorder %s1714_s16, 1  ;;  %p234_p7 = scmp.lt.s32.totalorder %s1714_s16, 3 }
  0x1d   : > { %p235_p8 = pnand %p1213_p6, %p234_p7 }
  0x1e   : > { %s241_s28 = sand.u32 (!%p235_p8), 1, %s1698_s12   ;;  %s280_s29 = smul.u32 (!%p235_p8), 144, %s1706_s14 }
  0x1f   : > { %238 = sbr.rel (%p235_p8) target bundleno = 293 (0x125), region = 54  ;;  %p1215_p10 = scmp.ne.s32.totalorder (!%p235_p8), %s1706_s14, 0 }
  0x20   : > { %s1633_s30 = smul.u32 (!%p235_p8), 72, %s241_s28  ;;  %p281_p9 = scmp.lt.s32.totalorder (!%p235_p8), %s280_s29, 287 }
  0x22   : > { %s1789_s8 = scalar_lea.vmem (!%p235_p8), [#allocation3], %s1633_s30 }
  0x24   : > { %s1915_s29 = smov (!%p281_p9, %s280_s29), 287  ;;  %304 = sbr.rel (%p1215_p10) target bundleno = 44 (0x2c), region = 62 }
  0x25   : > { %s1214_s4 = sshll.u32 %s1915_s29, 2 }
  0x26   : > { %s1787_s7 = scalar_lea.vmem %s1905_s1, %s1214_s4 }
  0x29   : > { %v1716_v10 = vmov 0.0  }
  0x2a   : > { %305 = vst [vmem:[#allocation2] sm:$0xff] %v1716_v10 }
  0x2b   : > { %306 = vst [vmem:[#allocation2 + $0x8] sm:$0xff] %v1716_v10 }
  0x2c PF: > { %v1562_v11 = vld [vmem:[%s1787_s7 + $0x38] sm:$0xff]  ;;  %v1561_v15 = vld [vmem:[%s1787_s7 + $0x30] sm:$0xff]  ;;  %v1560_v19 = vld [vmem:[%s1787_s7 + $0x28] sm:$0xff]  ;;  %p1540_p11 = scmp.ne.s32.totalorder %s1706_s14, 1 }
  0x2d   : > { %v1578_v12 = vld [vmem:[%s1787_s7 + $0xb8] sm:$0xff]  ;;  %941 = vmatpush.bf16.msra.mxu0 %v1562_v11  ;;  %v1577_v16 = vld [vmem:[%s1787_s7 + $0xb0] sm:$0xff]  ;;  %v1576_v20 = vld [vmem:[%s1787_s7 + $0xa8] sm:$0xff] }
  0x2e   : > { %v1570_v13 = vld [vmem:[%s1787_s7 + $0x78] sm:$0xff]  ;;  %969 = vmatpush.bf16.msra.mxu2 %v1578_v12  ;;  %v1569_v17 = vld [vmem:[%s1787_s7 + $0x70] sm:$0xff]  ;;  %v1568_v21 = vld [vmem:[%s1787_s7 + $0x68] sm:$0xff] }
  0x2f   : > { %v1586_v14 = vld [vmem:[%s1787_s7 + $0xf8] sm:$0xff]  ;;  %955 = vmatpush.bf16.msra.mxu1 %v1570_v13  ;;  %v1585_v18 = vld [vmem:[%s1787_s7 + $0xf0] sm:$0xff]  ;;  %v1584_v22 = vld [vmem:[%s1787_s7 + $0xe8] sm:$0xff] }
  0x30   : > { %983 = vmatpush.bf16.msra.mxu3 %v1586_v14  ;;  %v1559_v23 = vld [vmem:[%s1787_s7 + $0x20] sm:$0xff]  ;;  %v1558_v27 = vld [vmem:[%s1787_s7 + $0x18] sm:$0xff]  ;;  %v1557_v31 = vld [vmem:[%s1787_s7 + $0x10] sm:$0xff] }
  0x31   : > { %942 = vmatpush.bf16.msra.mxu0 %v1561_v15  ;;  %v1575_v24 = vld [vmem:[%s1787_s7 + $0xa0] sm:$0xff]  ;;  %v1574_v28 = vld [vmem:[%s1787_s7 + $0x98] sm:$0xff]  ;;  %v1573_v32 = vld [vmem:[%s1787_s7 + $0x90] sm:$0xff] }
  0x32   : > { %970 = vmatpush.bf16.msra.mxu2 %v1577_v16  ;;  %v1567_v25 = vld [vmem:[%s1787_s7 + $0x60] sm:$0xff]  ;;  %v1566_v29 = vld [vmem:[%s1787_s7 + $0x58] sm:$0xff]  ;;  %v1565_v33 = vld [vmem:[%s1787_s7 + $0x50] sm:$0xff] }
  0x33   : > { %956 = vmatpush.bf16.msra.mxu1 %v1569_v17  ;;  %v1583_v26 = vld [vmem:[%s1787_s7 + $0xe0] sm:$0xff]  ;;  %v1582_v30 = vld [vmem:[%s1787_s7 + $0xd8] sm:$0xff]  ;;  %v1581_v34 = vld [vmem:[%s1787_s7 + $0xd0] sm:$0xff] }
  0x34   : > { %984 = vmatpush.bf16.msra.mxu3 %v1585_v18  ;;  %v1556_v35 = vld [vmem:[%s1787_s7 + $0x8] sm:$0xff]  ;;  %v1555_v39 = vld [vmem:[%s1787_s7] sm:$0xff]  ;;  %v1594_v41 = vld [vmem:[%s1787_s7 + $0x138] sm:$0xff] }
  0x35   : > { %943 = vmatpush.bf16.msra.mxu0 %v1560_v19  ;;  %v1572_v36 = vld [vmem:[%s1787_s7 + $0x88] sm:$0xff]  ;;  %v1571_v40 = vld [vmem:[%s1787_s7 + $0x80] sm:$0xff]  ;;  %v1610_v42 = vld [vmem:[%s1787_s7 + $0x1b8] sm:$0xff] }
  0x36   : > { %971 = vmatpush.bf16.msra.mxu2 %v1576_v20  ;;  %v1564_v37 = vld [vmem:[%s1787_s7 + $0x48] sm:$0xff]  ;;  %v1563_v43 = vld [vmem:[%s1787_s7 + $0x40] sm:$0xff]  ;;  %v1218_v45 = vld [vmem:[%s1789_s8] sm:$0xf] }
  0x37   : > { %957 = vmatpush.bf16.msra.mxu1 %v1568_v21  ;;  %v1580_v38 = vld [vmem:[%s1787_s7 + $0xc8] sm:$0xff]  ;;  %v1579_v44 = vld [vmem:[%s1787_s7 + $0xc0] sm:$0xff]  ;;  %v1550_v46 = vld [vmem:[%s1789_s8 + $0x20] sm:$0xf0] }
  0x38   : > { %985 = vmatpush.bf16.msra.mxu3 %v1584_v22  ;;  %v1226_v47 = vld [vmem:[%s1789_s8 + $0x8] sm:$0xf]  ;;  %v1551_v48 = vld [vmem:[%s1789_s8 + $0x28] sm:$0xf0]  ;;  %v1546_v51 = vld [vmem:[%s1789_s8 + $0x4] sm:$0xf]  ;;  %v1219_v55 = vor.u32 %v1550_v46, %v1218_v45 }
  0x39   : > { %944 = vmatpush.bf16.msra.mxu0 %v1559_v23  ;;  %v1602_v49 = vld [vmem:[%s1787_s7 + $0x178] sm:$0xff]  ;;  %v1228_v54 = vld [vmem:[%s1789_s8 + $0x2c] sm:$0xf0]  ;;  %v1227_v56 = vor.u32 %v1551_v48, %v1226_v47  ;;  %v1593_v57 = vld [vmem:[%s1787_s7 + $0x130] sm:$0xff] }
  0x3a   : > { %972 = vmatpush.bf16.msra.mxu2 %v1575_v24  ;;  %v1618_v50 = vld [vmem:[%s1787_s7 + $0x1f8] sm:$0xff]  ;;  %v1609_v58 = vld [vmem:[%s1787_s7 + $0x1b0] sm:$0xff]  ;;  %v1592_v63 = vld [vmem:[%s1787_s7 + $0x128] sm:$0xff] }
  0x3b   : > { %958 = vmatpush.bf16.msra.mxu1 %v1567_v25  ;;  %v1220_v52 = vld [vmem:[%s1789_s8 + $0x24] sm:$0xf0]  ;;  %v1547_v53 = vld [vmem:[%s1789_s8 + $0xc] sm:$0xf]  ;;  %v1601_v61 = vld [vmem:[%s1787_s7 + $0x170] sm:$0xff] }
  0x3c   : > { %986 = vmatpush.bf16.msra.mxu3 %v1583_v26  ;;  %v1223_v59 = vor.u32 %v1546_v51, %v1220_v52  ;;  %v1231_v60 = vor.u32 %v1547_v53, %v1228_v54  ;;  %v1617_v62 = vld [vmem:[%s1787_s7 + $0x1f0] sm:$0xff]  ;;  %v1608_v0 = vld [vmem:[%s1787_s7 + $0x1a8] sm:$0xff]  ;;  %v1591_v3 = vld [vmem:[%s1787_s7 + $0x120] sm:$0xff] }
  0x3d   : > { %945 = vmatpush.bf16.msra.mxu0 %v1558_v27  ;;  %v1600_v1 = vld [vmem:[%s1787_s7 + $0x168] sm:$0xff]  ;;  %v1607_v4 = vld [vmem:[%s1787_s7 + $0x1a0] sm:$0xff]  ;;  %v1590_v7 = vld [vmem:[%s1787_s7 + $0x118] sm:$0xff] }
  0x3e   : > { %973 = vmatpush.bf16.msra.mxu2 %v1574_v28  ;;  %v1616_v2 = vld [vmem:[%s1787_s7 + $0x1e8] sm:$0xff]  ;;  %v1599_v5 = vld [vmem:[%s1787_s7 + $0x160] sm:$0xff]  ;;  %v1606_v8 = vld [vmem:[%s1787_s7 + $0x198] sm:$0xff] }
  0x3f   : > { %959 = vmatpush.bf16.msra.mxu1 %v1566_v29  ;;  %v1615_v6 = vld [vmem:[%s1787_s7 + $0x1e0] sm:$0xff]  ;;  %v1598_v9 = vld [vmem:[%s1787_s7 + $0x158] sm:$0xff]  ;;  %v1589_v11 = vld [vmem:[%s1787_s7 + $0x110] sm:$0xff] }
  0x40   : > { %987 = vmatpush.bf16.msra.mxu3 %v1582_v30  ;;  %v1614_v10 = vld [vmem:[%s1787_s7 + $0x1d8] sm:$0xff]  ;;  %v1605_v12 = vld [vmem:[%s1787_s7 + $0x190] sm:$0xff]  ;;  %v1588_v15 = vld [vmem:[%s1787_s7 + $0x108] sm:$0xff] }
  0x41   : > { %946 = vmatpush.bf16.msra.mxu0 %v1557_v31  ;;  %v1597_v13 = vld [vmem:[%s1787_s7 + $0x150] sm:$0xff]  ;;  %v1604_v16 = vld [vmem:[%s1787_s7 + $0x188] sm:$0xff]  ;;  %v1587_v19 = vld [vmem:[%s1787_s7 + $0x100] sm:$0xff] }
  0x42   : > { %974 = vmatpush.bf16.msra.mxu2 %v1573_v32  ;;  %v1613_v14 = vld [vmem:[%s1787_s7 + $0x1d0] sm:$0xff]  ;;  %v1596_v17 = vld [vmem:[%s1787_s7 + $0x148] sm:$0xff]  ;;  %v1603_v20 = vld [vmem:[%s1787_s7 + $0x180] sm:$0xff] }
  0x43   : > { %960 = vmatpush.bf16.msra.mxu1 %v1565_v33  ;;  %v1612_v18 = vld [vmem:[%s1787_s7 + $0x1c8] sm:$0xff]  ;;  %v1626_v21 = vld [vmem:[%s1787_s7 + $0x238] sm:$0xff]  ;;  %v1595_v26 = vld [vmem:[%s1787_s7 + $0x140] sm:$0xff] }
  0x44   : > { %988 = vmatpush.bf16.msra.mxu3 %v1581_v34  ;;  %v1234_v22 = vld [vmem:[%s1789_s8 + $0x10] sm:$0xf]  ;;  %v1552_v23 = vld [vmem:[%s1789_s8 + $0x30] sm:$0xf0]  ;;  %v1242_v24 = vld [vmem:[%s1789_s8 + $0x18] sm:$0xf] }
  0x45   : > { %947 = vmatpush.bf16.msra.mxu0 %v1556_v35  ;;  %v1553_v25 = vld [vmem:[%s1789_s8 + $0x38] sm:$0xf0]  ;;  %v1611_v27 = vld [vmem:[%s1787_s7 + $0x1c0] sm:$0xff]  ;;  %v1236_v29 = vld [vmem:[%s1789_s8 + $0x34] sm:$0xf0]  ;;  %v1235_v32 = vor.u32 %v1552_v23, %v1234_v22 }
  0x46   : > { %975 = vmatpush.bf16.msra.mxu2 %v1572_v36  ;;  %v1548_v28 = vld [vmem:[%s1789_s8 + $0x14] sm:$0xf]  ;;  %v1549_v30 = vld [vmem:[%s1789_s8 + $0x1c] sm:$0xf]  ;;  %v1244_v31 = vld [vmem:[%s1789_s8 + $0x3c] sm:$0xf0]  ;;  %v1243_v33 = vor.u32 %v1553_v25, %v1242_v24 }
  0x47   : > { %961 = vmatpush.bf16.msra.mxu1 %v1564_v37  ;;  %v1239_v34 = vor.u32 %v1548_v28, %v1236_v29  ;;  %v1247_v35 = vor.u32 %v1549_v30, %v1244_v31  ;;  %v1625_v36 = vld [vmem:[%s1787_s7 + $0x230] sm:$0xff]  ;;  %v1624_v37 = vld [vmem:[%s1787_s7 + $0x228] sm:$0xff] }
  0x48   : > { %989 = vmatpush.bf16.msra.mxu3 %v1580_v38  ;;  %v1623_v38 = vld [vmem:[%s1787_s7 + $0x220] sm:$0xff] }
  0x49   : > { %948 = vmatpush.bf16.msra.mxu0 %v1555_v39  ;;  %v1622_v39 = vld [vmem:[%s1787_s7 + $0x218] sm:$0xff] }
  0x4a   : > { %976 = vmatpush.bf16.msra.mxu2 %v1571_v40  ;;  %v1621_v40 = vld [vmem:[%s1787_s7 + $0x210] sm:$0xff] }
  0x4b   : > { %962 = vmatpush.bf16.msra.mxu1 %v1563_v43  ;;  %v1250_v43 = vld [vmem:[%s1789_s8 + $0x20] sm:$0xf] }
  0x4c   : > { %990 = vmatpush.bf16.msra.mxu3 %v1579_v44  ;;  %949 = vmatmul.bf16.vlgmr.msra.gmra.mxu0 %v1219_v55  ;;  %v1554_v44 = vld [vmem:[%s1789_s8 + $0x40] sm:$0xf0] }
  0x4d   : > { %997 = vmatpush.bf16.msrb.mxu0 %v1594_v41  ;;  %977 = vmatmul.bf16.vlgmr.msra.gmra.mxu2 %v1227_v56  ;;  %v1620_v41 = vld [vmem:[%s1787_s7 + $0x208] sm:$0xff]  ;;  %v1251_v45 = vor.u32 %v1554_v44, %v1250_v43 }
  0x4e   : > { %1025 = vmatpush.bf16.msrb.mxu2 %v1610_v42  ;;  %963 = vmatmul.bf16.vlgmr.msra.gmra.mxu1 %v1223_v59  ;;  %v1619_v42 = vld [vmem:[%s1787_s7 + $0x200] sm:$0xff] }
  0x4f   : > { %1011 = vmatpush.bf16.msrb.mxu1 %v1602_v49  ;;  %991 = vmatmul.bf16.vlgmr.msra.gmra.mxu3 %v1231_v60 }
  0x50   : > { %1039 = vmatpush.bf16.msrb.mxu3 %v1618_v50 }
  0x51   : > { %998 = vmatpush.bf16.msrb.mxu0 %v1593_v57 }
  0x52   : > { %1026 = vmatpush.bf16.msrb.mxu2 %v1609_v58 }
  0x53   : > { %1012 = vmatpush.bf16.msrb.mxu1 %v1601_v61 }
  0x54   : > { %1040 = vmatpush.bf16.msrb.mxu3 %v1617_v62 }
  0x55   : > { %999 = vmatpush.bf16.msrb.mxu0 %v1592_v63 }
  0x56   : > { %1027 = vmatpush.bf16.msrb.mxu2 %v1608_v0 }
  0x57   : > { %1013 = vmatpush.bf16.msrb.mxu1 %v1600_v1 }
  0x58   : > { %1041 = vmatpush.bf16.msrb.mxu3 %v1616_v2 }
  0x59   : > { %1000 = vmatpush.bf16.msrb.mxu0 %v1591_v3 }
  0x5a   : > { %1028 = vmatpush.bf16.msrb.mxu2 %v1607_v4 }
  0x5b   : > { %1014 = vmatpush.bf16.msrb.mxu1 %v1599_v5 }
  0x5c   : > { %1042 = vmatpush.bf16.msrb.mxu3 %v1615_v6 }
  0x5d   : > { %1001 = vmatpush.bf16.msrb.mxu0 %v1590_v7 }
  0x5e   : > { %1029 = vmatpush.bf16.msrb.mxu2 %v1606_v8  ;;  %v307_v8 = vld [vmem:[#allocation2] sm:$0xff] }
  0x5f   : > { %1015 = vmatpush.bf16.msrb.mxu1 %v1598_v9 }
  0x60   : > { %1043 = vmatpush.bf16.msrb.mxu3 %v1614_v10 }
  0x61   : > { %1002 = vmatpush.bf16.msrb.mxu0 %v1589_v11 }
  0x62   : > { %1030 = vmatpush.bf16.msrb.mxu2 %v1605_v12 }
  0x63   : > { %1016 = vmatpush.bf16.msrb.mxu1 %v1597_v13 }
  0x64   : > { %1044 = vmatpush.bf16.msrb.mxu3 %v1613_v14 }
  0x65   : > { %1003 = vmatpush.bf16.msrb.mxu0 %v1588_v15 }
  0x66   : > { %1031 = vmatpush.bf16.msrb.mxu2 %v1604_v16  ;;  %v308_v16 = vld [vmem:[#allocation2 + $0x8] sm:$0xff] }
  0x67   : > { %1017 = vmatpush.bf16.msrb.mxu1 %v1596_v17 }
  0x68   : > { %1045 = vmatpush.bf16.msrb.mxu3 %v1612_v18 }
  0x69   : > { %1004 = vmatpush.bf16.msrb.mxu0 %v1587_v19 }
  0x6a   : > { %1032 = vmatpush.bf16.msrb.mxu2 %v1603_v20 }
  0x6b   : > { %1018 = vmatpush.bf16.msrb.mxu1 %v1595_v26 }
  0x6c   : > { %1046 = vmatpush.bf16.msrb.mxu3 %v1611_v27  ;;  %1005 = vmatmul.bf16.vlgmr.msrb.gmra.mxu0 %v1235_v32 }
  0x6d   : > { %1053 = vmatpush.bf16.msra.mxu0 %v1626_v21  ;;  %1033 = vmatmul.bf16.vlgmr.msrb.gmra.mxu2 %v1243_v33 }
  0x6e   : > { %1019 = vmatmul.bf16.vlgmr.msrb.gmra.mxu1 %v1239_v34 }
  0x6f   : > { %1047 = vmatmul.bf16.vlgmr.msrb.gmra.mxu3 %v1247_v35 }
  0x71   : > { %1054 = vmatpush.bf16.msra.mxu0 %v1625_v36 }
  0x75   : > { %1055 = vmatpush.bf16.msra.mxu0 %v1624_v37 }
  0x79   : > { %1056 = vmatpush.bf16.msra.mxu0 %v1623_v38 }
  0x7d   : > { %1057 = vmatpush.bf16.msra.mxu0 %v1622_v39 }
  0x81   : > { %1058 = vmatpush.bf16.msra.mxu0 %v1621_v40 }
  0x85   : > { %1059 = vmatpush.bf16.msra.mxu0 %v1620_v41 }
  0x89   : > { %1060 = vmatpush.bf16.msra.mxu0 %v1619_v42 }
  0x8c   : > { %1061 = vmatmul.bf16.vlgmr.msra.gmra.mxu0 %v1251_v45 }
  0xc9   : > { %v950_v46 = vpop.f32.mrf.mxu0 }
  0xcb   : > { %v964_v47 = vpop.f32.mrf.mxu1 }
  0xcc   : > { %v965_v51 = vadd.f32 %v964_v47, %v950_v46 }
  0xd0   : > { %v978_v48 = vpop.f32.mrf.mxu2 }
  0xd1   : > { %v952_v49 = vpop.f32.mrf.mxu0  ;;  %v979_v53 = vadd.f32 %v978_v48, %v965_v51 }
  0xd2   : > { %v992_v50 = vpop.f32.mrf.mxu3 }
  0xd3   : > { %v966_v52 = vpop.f32.mrf.mxu1  ;;  %v993_v56 = vadd.f32 %v992_v50, %v979_v53 }
  0xd4   : > { %v967_v58 = vadd.f32 %v966_v52, %v952_v49 }
  0xd8   : > { %v980_v54 = vpop.f32.mrf.mxu2 }
  0xd9   : > { %v981_v62 = vadd.f32 %v980_v54, %v967_v58 }
  0xda   : > { %v994_v57 = vpop.f32.mrf.mxu3 }
  0xdb   : > { %v995_v2 = vadd.f32 %v994_v57, %v981_v62 }
  0xe9   : > { %v1006_v55 = vpop.f32.mrf.mxu0 }
  0xea   : > { %v1007_v59 = vadd.f32 %v1006_v55, %v993_v56 }
  0xeb   : > { %v1020_v60 = vpop.f32.mrf.mxu1 }
  0xec   : > { %v1021_v63 = vadd.f32 %v1020_v60, %v1007_v59 }
  0xf0   : > { %v1034_v61 = vpop.f32.mrf.mxu2 }
  0xf1   : > { %v1008_v0 = vpop.f32.mrf.mxu0  ;;  %v1035_v3 = vadd.f32 %v1034_v61, %v1021_v63 }
  0xf2   : > { %v1048_v1 = vpop.f32.mrf.mxu3  ;;  %v1009_v4 = vadd.f32 %v1008_v0, %v995_v2 }
  0xf3   : > { %v1022_v5 = vpop.f32.mrf.mxu1  ;;  %v1049_v6 = vadd.f32 %v1048_v1, %v1035_v3 }
  0xf4   : > { %v1023_v10 = vadd.f32 %v1022_v5, %v1009_v4 }
  0xf8   : > { %v1036_v7 = vpop.f32.mrf.mxu2 }
  0xf9   : > { %v1037_v12 = vadd.f32 %v1036_v7, %v1023_v10 }
  0xfa   : > { %v1050_v14 = vpop.f32.mrf.mxu3 }
  0xfb   : > { %v1051_v15 = vadd.f32 %v1050_v14, %v1037_v12 }
 0x109   : > { %v1062_v9 = vpop.f32.mrf.mxu0 }
 0x10a   : > { %v1063_v11 = vadd.f32 %v1062_v9, %v1049_v6 }
 0x10c   : > { %v1067_v13 = vadd.f32 %v1063_v11, %v307_v8 }
 0x10e   : > { %1069 = vst [vmem:[#allocation2] sm:$0xff] %v1067_v13 }
 0x111   : > { %v1064_v17 = vpop.f32.mrf.mxu0 }
 0x112   : > { %v1065_v18 = vadd.f32 %v1064_v17, %v1051_v15  ;;  %1074 = sbr.rel (%p1540_p11) target bundleno = 293 (0x125), region = 66 }
 0x114   : > { %v1068_v19 = vadd.f32 %v1065_v18, %v308_v16 }
 0x116   : > { %1070 = vst [vmem:[#allocation2 + $0x8] sm:$0xff] %v1068_v19 }
 0x117   : > { %v1075_v20 = vld [vmem:[#allocation2] sm:$0xff] }
 0x118   : > { %v1675_v22 = vld [vmem:[%s1906_s2] ss:$0 sm:$0xff] }
 0x119   : > { %v1081_v23 = vadd.f32 %v1675_v22, %v1075_v20 }
 0x11b   : > { %v1083_v25 = vmax.f32 %v1081_v23, 0.0 }
 0x11d   : > { %v1076_v21 = vld [vmem:[#allocation2 + $0x8] sm:$0xff] }
 0x11e   : > { %v1082_v24 = vadd.f32 %v1675_v22, %v1076_v21 }
 0x120   : > { %v1084_v26 = vmax.f32 %v1082_v24, 0.0 }
 0x122   : > { %v1630_v27 = vpack.c.bf16 %v1084_v26, %v1083_v25 }
 0x124   : > { %1631 = vst [vmem:[%s1907_s3] sm:$0xff] %v1630_v27  }
 0x125 PF: > { %s13_s16 = sadd.s32 1, %s1714_s16   ;;  %s1908_s12 = smov %s1702_s13 }
 0x126   : > { %p10_p12 = scmp.ge.s32.totalorder %s13_s16, 4   ;;  %s1909_s13 = smov %s1772_s20 }
 0x127   : > { %s1910_s14 = smov %s1710_s15  ;;  %s1911_s15 = smov %s1913_s17 }
 0x128   :  { %12 = sbr.rel (!%p10_p12) target bundleno = 3 (0x3), region = 113 }

// kernel: _lambda_.45
= control target key start
LH: loop header
LB: loop body
LE: loop exit
PB: predicated region body
PF: predicated region fallthrough
CT: control target
= control target key end

     0   :  { %s728_s12 = smov 0   ;;  %s730_s13 = smov 0   ;;  %s822_s0 = inlined_call_operand.vmem [shape: bf16[64,256], index: 0, kind: input, shape index: {}]   ;;  %s823_s1 = inlined_call_operand.vmem [shape: bf16[256,128], index: 1, kind: input, shape index: {}]   ;;  %s824_s2 = inlined_call_operand.vmem [shape: f32[1,128], index: 2, kind: input, shape index: {}]   ;;  %s825_s3 = inlined_call_operand.vmem [shape: f32[64,128], index: 3, kind: output, shape index: {}]  }
   0x1   :  { %s732_s14 = smov 0  }
   0x2 LB: > { %s22_s15 = sadd.s32 1, %s702_s13  ;;  %p534_p0 = scmp.ge.s32.totalorder %s706_s14, 1  ;;  %s706_s14 = sphi %s732_s14, %s13_s14   ;;  %s702_s13 = sphi %s730_s13, %s827_s13   ;;  %s698_s12 = sphi %s728_s12, %s826_s12  }
   0x3   : > { %p23_p1 = scmp.ge.s32.totalorder %s22_s15, 2  ;;  %p170_p2 = scmp.lt.s32.totalorder %s706_s14, 3 }
   0x5   : > { %s829_s15 = smov (%p23_p1, %s22_s15), 0  ;;  %p171_p3 = pnand %p534_p0, %p170_p2 }
   0x6   : > { %s535_s28 = sshll.u32 (!%p171_p3), %s698_s12, 2 }
   0x7   : > { %174 = sbr.rel (%p171_p3) target bundleno = 189 (0xbd), region = 32  ;;  %p206_p4 = scmp.lt.s32.totalorder (!%p171_p3), %s535_s28, 7 }
   0xc   : > { %v634_v0 = vld [vmem:[%s823_s1 + $0x38] sm:$0xff]  ;;  %v633_v2 = vld [vmem:[%s823_s1 + $0x30] sm:$0xff]  ;;  %v632_v4 = vld [vmem:[%s823_s1 + $0x28] sm:$0xff]  ;;  %s831_s28 = smov (!%p206_p4, %s535_s28), 7 }
   0xd   : > { %v642_v1 = vld [vmem:[%s823_s1 + $0x78] sm:$0xff]  ;;  %384 = vmatpush.bf16.msra.mxu0 %v634_v0  ;;  %643 = vmatpush.bf16.msra.mxu2 %v634_v0  ;;  %v641_v3 = vld [vmem:[%s823_s1 + $0x70] sm:$0xff]  ;;  %v640_v5 = vld [vmem:[%s823_s1 + $0x68] sm:$0xff]  ;;  %s622_s17 = sshll.u32 %s831_s28, 3 }
   0xe   : > { %403 = vmatpush.bf16.msra.mxu1 %v642_v1  ;;  %651 = vmatpush.bf16.msra.mxu3 %v642_v1  ;;  %v631_v6 = vld [vmem:[%s823_s1 + $0x20] sm:$0xff]  ;;  %v630_v8 = vld [vmem:[%s823_s1 + $0x18] sm:$0xff]  ;;  %v629_v10 = vld [vmem:[%s823_s1 + $0x10] sm:$0xff]  ;;  %s210_s22 = scalar_lea.vmem %s822_s0, %s622_s17  ;;  %s226_s7 = scalar_lea.vmem %s825_s3, %s622_s17 }
   0xf   : > { %v639_v7 = vld [vmem:[%s823_s1 + $0x60] sm:$0xff]  ;;  %v638_v9 = vld [vmem:[%s823_s1 + $0x58] sm:$0xff]  ;;  %v637_v11 = vld [vmem:[%s823_s1 + $0x50] sm:$0xff] }
  0x10   : > { %v628_v12 = vld [vmem:[%s823_s1 + $0x8] sm:$0xff]  ;;  %v627_v14 = vld [vmem:[%s823_s1] sm:$0xff]  ;;  %v550_v18 = vld [vmem:[%s210_s22 + $0x10] sm:$0xf] }
  0x11   : > { %385 = vmatpush.bf16.msra.mxu0 %v633_v2  ;;  %644 = vmatpush.bf16.msra.mxu2 %v633_v2  ;;  %v636_v13 = vld [vmem:[%s823_s1 + $0x48] sm:$0xff]  ;;  %v635_v15 = vld [vmem:[%s823_s1 + $0x40] sm:$0xff]  ;;  %v626_v19 = vld [vmem:[%s210_s22 + $0x14] sm:$0xf0] }
  0x12   : > { %404 = vmatpush.bf16.msra.mxu1 %v641_v3  ;;  %652 = vmatpush.bf16.msra.mxu3 %v641_v3  ;;  %v542_v16 = vld [vmem:[%s210_s22] sm:$0xf]  ;;  %v624_v17 = vld [vmem:[%s210_s22 + $0x4] sm:$0xf0]  ;;  %v623_v20 = vld [vmem:[%s210_s22 + $0x4] sm:$0xf]  ;;  %v551_v25 = vor.u32 %v626_v19, %v550_v18 }
  0x13   : > { %v544_v21 = vld [vmem:[%s210_s22 + $0x8] sm:$0xf0]  ;;  %v625_v22 = vld [vmem:[%s210_s22 + $0x14] sm:$0xf]  ;;  %v552_v23 = vld [vmem:[%s210_s22 + $0x18] sm:$0xf0]  ;;  %v543_v24 = vor.u32 %v624_v17, %v542_v16 }
  0x14   : > { %v547_v26 = vor.u32 %v623_v20, %v544_v21  ;;  %v555_v27 = vor.u32 %v625_v22, %v552_v23  ;;  %v683_v28 = vld [vmem:[%s824_s2] ss:$0 sm:$0xff] }
  0x15   : > { %386 = vmatpush.bf16.msra.mxu0 %v632_v4  ;;  %645 = vmatpush.bf16.msra.mxu2 %v632_v4 }
  0x16   : > { %405 = vmatpush.bf16.msra.mxu1 %v640_v5  ;;  %653 = vmatpush.bf16.msra.mxu3 %v640_v5 }
  0x19   : > { %387 = vmatpush.bf16.msra.mxu0 %v631_v6  ;;  %646 = vmatpush.bf16.msra.mxu2 %v631_v6 }
  0x1a   : > { %406 = vmatpush.bf16.msra.mxu1 %v639_v7  ;;  %654 = vmatpush.bf16.msra.mxu3 %v639_v7 }
  0x1d   : > { %388 = vmatpush.bf16.msra.mxu0 %v630_v8  ;;  %647 = vmatpush.bf16.msra.mxu2 %v630_v8 }
  0x1e   : > { %407 = vmatpush.bf16.msra.mxu1 %v638_v9  ;;  %655 = vmatpush.bf16.msra.mxu3 %v638_v9 }
  0x21   : > { %389 = vmatpush.bf16.msra.mxu0 %v629_v10  ;;  %648 = vmatpush.bf16.msra.mxu2 %v629_v10 }
  0x22   : > { %408 = vmatpush.bf16.msra.mxu1 %v637_v11  ;;  %656 = vmatpush.bf16.msra.mxu3 %v637_v11 }
  0x25   : > { %390 = vmatpush.bf16.msra.mxu0 %v628_v12  ;;  %649 = vmatpush.bf16.msra.mxu2 %v628_v12 }
  0x26   : > { %409 = vmatpush.bf16.msra.mxu1 %v636_v13  ;;  %657 = vmatpush.bf16.msra.mxu3 %v636_v13 }
  0x29   : > { %391 = vmatpush.bf16.msra.mxu0 %v627_v14  ;;  %650 = vmatpush.bf16.msra.mxu2 %v627_v14 }
  0x2a   : > { %410 = vmatpush.bf16.msra.mxu1 %v635_v15  ;;  %658 = vmatpush.bf16.msra.mxu3 %v635_v15 }
  0x2c   : > { %392 = vmatmul.bf16.vlgmr.msra.gmra.mxu0 %v543_v24  ;;  %397 = vmatmul.bf16.vlgmr.msra.gmra.mxu2 %v551_v25 }
  0x2d   : > { %411 = vmatmul.bf16.vlgmr.msra.gmra.mxu1 %v547_v26  ;;  %416 = vmatmul.bf16.vlgmr.msra.gmra.mxu3 %v555_v27 }
  0xa9   : > { %v393_v29 = vpop.f32.mrf.mxu0 }
  0xaa   : > { %v394_v30 = vadd.f32 %v683_v28, %v393_v29  ;;  %v412_v31 = vpop.f32.mrf.mxu1 }
  0xac   : > { %v413_v32 = vadd.f32 %v412_v31, %v394_v30 }
  0xae   : > { %422 = vst [vmem:[%s226_s7] sm:$0xff] %v413_v32 }
  0xaf   : > { %v398_v33 = vpop.f32.mrf.mxu2 }
  0xb0   : > { %v417_v34 = vpop.f32.mrf.mxu3  ;;  %v399_v35 = vadd.f32 %v683_v28, %v398_v33 }
  0xb1   : > { %v395_v36 = vpop.f32.mrf.mxu0 }
  0xb2   : > { %v396_v37 = vadd.f32 %v683_v28, %v395_v36  ;;  %v414_v38 = vpop.f32.mrf.mxu1  ;;  %v418_v40 = vadd.f32 %v417_v34, %v399_v35 }
  0xb4   : > { %v415_v39 = vadd.f32 %v414_v38, %v396_v37  ;;  %424 = vst [vmem:[%s226_s7 + $0x10] sm:$0xff] %v418_v40 }
  0xb6   : > { %423 = vst [vmem:[%s226_s7 + $0x8] sm:$0xff] %v415_v39 }
  0xb7   : > { %v400_v41 = vpop.f32.mrf.mxu2 }
  0xb8   : > { %v401_v42 = vadd.f32 %v683_v28, %v400_v41  ;;  %v419_v43 = vpop.f32.mrf.mxu3 }
  0xba   : > { %v420_v44 = vadd.f32 %v419_v43, %v401_v42 }
  0xbc   : > { %425 = vst [vmem:[%s226_s7 + $0x18] sm:$0xff] %v420_v44 }
  0xbd PF: > { %s13_s14 = sadd.s32 1, %s706_s14   ;;  %s826_s12 = smov %s702_s13 }
  0xbe   : > { %p10_p5 = scmp.ge.s32.totalorder %s13_s14, 4   ;;  %s827_s13 = smov %s829_s15 }
  0xc0   :  { %12 = sbr.rel (!%p10_p5) target bundleno = 2 (0x2), region = 68 }

// kernel: _lambda_.43
= control target key start
LH: loop header
LB: loop body
LE: loop exit
PB: predicated region body
PF: predicated region fallthrough
CT: control target
= control target key end

     0   :  { %s1297_s18 = smov 0   ;;  %s1299_s19 = smov 0   ;;  %s1485_s0 = inlined_call_operand.vmem [shape: bf16[64,128], index: 0, kind: input, shape index: {}]   ;;  %s1486_s1 = inlined_call_operand.vmem [shape: bf16[128,256], index: 1, kind: input, shape index: {}]   ;;  %s1487_s2 = inlined_call_operand.vmem [shape: bf16[64,128], index: 2, kind: input, shape index: {}]   ;;  %s1488_s3 = inlined_call_operand.vmem [shape: bf16[128,256], index: 3, kind: input, shape index: {}]   ;;  %s1489_s4 = inlined_call_operand.vmem [shape: f32[1,256], index: 4, kind: input, shape index: {}]   ;;  %s1490_s5 = inlined_call_operand.vmem [shape: bf16[64,256], index: 5, kind: output, shape index: {}]  }
   0x1   :  { %s1301_s20 = smov 0   ;;  %s1303_s21 = smov 0  }
   0x2   :  { %s1305_s22 = smov 0  }
   0x3 LB: > { %s24_s23 = sadd.s32 1, %s1261_s21  ;;  %s1009_s24 = sadd.s32 4294967295, %s1265_s22   ;;  %s1265_s22 = sphi %s1305_s22, %s15_s22   ;;  %s1261_s21 = sphi %s1303_s21, %s1496_s21   ;;  %s1257_s20 = sphi %s1301_s20, %s1495_s20   ;;  %s1253_s19 = sphi %s1299_s19, %s1494_s19   ;;  %s1249_s18 = sphi %s1297_s18, %s1493_s18  }
   0x4   : > { %p25_p0 = scmp.ge.s32.totalorder %s24_s23, 2  ;;  %p67_p1 = scmp.ne.s32.totalorder %s1253_s19, %s1249_s18 }
   0x5   : > { %p68_p2 = scmp.eq.s32.totalorder %s1265_s22, 0  ;;  %p177_p4 = scmp.eq.s32.totalorder %s1009_s24, 1 }
   0x6   : > { %s1498_s23 = smov (%p25_p0, %s24_s23), 0  ;;  %s60_s27 = sadd.s32 1, %s1253_s19 }
   0x7   : > { %p1329_p3 = por %p68_p2, %p67_p1  ;;  %s57_s26 = ssub.s32 %s1261_s21, %s1498_s23 }
   0x8   : > { %p58_p5 = scmp.eq.s32.totalorder %s57_s26, 0  ;;  %p1336_p6 = por %p177_p4, %p67_p1 }
   0x9   : > { %p1014_p7 = scmp.ge.s32.totalorder %s1265_s22, 2 }
   0xa   : > { %s1341_s29 = scalar_select %p58_p5, %s1253_s19, %s60_s27  }
   0xb   : > { %217 = sbr.rel (%p1014_p7) target bundleno = 56 (0x38), region = 24 }
  0x10   : > { %220 = sbr.rel (!%p1329_p3) target bundleno = 36 (0x24), region = 28  ;;  %s222_s30 = sand.u32 (%p1329_p3), 1, %s1253_s19  }
  0x11   : > { %s1016_s6 = sshll.u32 (%p1329_p3), %s1261_s21, 2  ;;  %s1015_s7 = sshll.u32 (%p1329_p3), %s222_s30, 6 }
  0x12   : > { %s1351_s10 = scalar_lea.vmem (%p1329_p3), %s1486_s1, %s1016_s6  ;;  %s224_s11 = scalar_lea.vmem (%p1329_p3), [#allocation2], %s1015_s7 }
  0x13   : > { %v243_v0 = vld [vmem:[%s1351_s10] sm:$0xf] (%p1329_p3)  ;;  %v245_v1 = vld [vmem:[%s1351_s10 + $0x8] sm:$0xf] (%p1329_p3)  ;;  %v247_v2 = vld [vmem:[%s1351_s10 + $0x10] sm:$0xf] (%p1329_p3) }
  0x14   : > { %244 = vst [vmem:[%s224_s11] sm:$0xf] (%p1329_p3), %v243_v0  ;;  %v249_v3 = vld [vmem:[%s1351_s10 + $0x18] sm:$0xf] (%p1329_p3)  ;;  %v251_v4 = vld [vmem:[%s1351_s10 + $0x20] sm:$0xf] (%p1329_p3) }
  0x15   : > { %246 = vst [vmem:[%s224_s11 + $0x4] sm:$0xf] %v245_v1  ;;  %v253_v5 = vld [vmem:[%s1351_s10 + $0x28] sm:$0xf]  ;;  %v255_v6 = vld [vmem:[%s1351_s10 + $0x30] sm:$0xf] }
  0x16   : > { %248 = vst [vmem:[%s224_s11 + $0x8] sm:$0xf] %v247_v2  ;;  %v257_v7 = vld [vmem:[%s1351_s10 + $0x38] sm:$0xf]  ;;  %v259_v8 = vld [vmem:[%s1351_s10 + $0x40] sm:$0xf] }
  0x17   : > { %250 = vst [vmem:[%s224_s11 + $0xc] sm:$0xf] %v249_v3  ;;  %v261_v9 = vld [vmem:[%s1351_s10 + $0x48] sm:$0xf]  ;;  %v263_v10 = vld [vmem:[%s1351_s10 + $0x50] sm:$0xf] }
  0x18   : > { %252 = vst [vmem:[%s224_s11 + $0x10] sm:$0xf] %v251_v4  ;;  %v265_v11 = vld [vmem:[%s1351_s10 + $0x58] sm:$0xf]  ;;  %v267_v12 = vld [vmem:[%s1351_s10 + $0x60] sm:$0xf] }
  0x19   : > { %254 = vst [vmem:[%s224_s11 + $0x14] sm:$0xf] %v253_v5  ;;  %v269_v13 = vld [vmem:[%s1351_s10 + $0x68] sm:$0xf]  ;;  %v271_v14 = vld [vmem:[%s1351_s10 + $0x70] sm:$0xf] }
  0x1a   : > { %256 = vst [vmem:[%s224_s11 + $0x18] sm:$0xf] %v255_v6  ;;  %v273_v15 = vld [vmem:[%s1351_s10 + $0x78] sm:$0xf] }
  0x1b   : > { %258 = vst [vmem:[%s224_s11 + $0x1c] sm:$0xf] %v257_v7 }
  0x1c   : > { %260 = vst [vmem:[%s224_s11 + $0x20] sm:$0xf] %v259_v8 }
  0x1d   : > { %262 = vst [vmem:[%s224_s11 + $0x24] sm:$0xf] %v261_v9 }
  0x1e   : > { %264 = vst [vmem:[%s224_s11 + $0x28] sm:$0xf] %v263_v10 }
  0x1f   : > { %266 = vst [vmem:[%s224_s11 + $0x2c] sm:$0xf] %v265_v11 }
  0x20   : > { %268 = vst [vmem:[%s224_s11 + $0x30] sm:$0xf] %v267_v12 }
  0x21   : > { %270 = vst [vmem:[%s224_s11 + $0x34] sm:$0xf] %v269_v13 }
  0x22   : > { %272 = vst [vmem:[%s224_s11 + $0x38] sm:$0xf] %v271_v14 }
  0x23   : > { %274 = vst [vmem:[%s224_s11 + $0x3c] sm:$0xf] %v273_v15 }
  0x24 PF: > { %330 = sbr.rel (!%p1329_p3) target bundleno = 56 (0x38), region = 69  ;;  %s332_s12 = sand.u32 (%p1329_p3), 1, %s1253_s19  }
  0x25   : > { %s1018_s13 = sshll.u32 (%p1329_p3), %s1261_s21, 2  ;;  %s1017_s14 = sshll.u32 (%p1329_p3), %s332_s12, 6 }
  0x26   : > { %s1376_s17 = scalar_lea.vmem (%p1329_p3), %s1488_s3, %s1018_s13  ;;  %s334_s24 = scalar_lea.vmem (%p1329_p3), [#allocation3], %s1017_s14 }
  0x27   : > { %v353_v16 = vld [vmem:[%s1376_s17] sm:$0xf] (%p1329_p3)  ;;  %v355_v17 = vld [vmem:[%s1376_s17 + $0x8] sm:$0xf] (%p1329_p3)  ;;  %v357_v18 = vld [vmem:[%s1376_s17 + $0x10] sm:$0xf] (%p1329_p3) }
  0x28   : > { %354 = vst [vmem:[%s334_s24] sm:$0xf] (%p1329_p3), %v353_v16  ;;  %v359_v19 = vld [vmem:[%s1376_s17 + $0x18] sm:$0xf] (%p1329_p3)  ;;  %v361_v20 = vld [vmem:[%s1376_s17 + $0x20] sm:$0xf] (%p1329_p3) }
  0x29   : > { %356 = vst [vmem:[%s334_s24 + $0x4] sm:$0xf] %v355_v17  ;;  %v363_v21 = vld [vmem:[%s1376_s17 + $0x28] sm:$0xf]  ;;  %v365_v22 = vld [vmem:[%s1376_s17 + $0x30] sm:$0xf] }
  0x2a   : > { %358 = vst [vmem:[%s334_s24 + $0x8] sm:$0xf] %v357_v18  ;;  %v367_v23 = vld [vmem:[%s1376_s17 + $0x38] sm:$0xf]  ;;  %v369_v24 = vld [vmem:[%s1376_s17 + $0x40] sm:$0xf] }
  0x2b   : > { %360 = vst [vmem:[%s334_s24 + $0xc] sm:$0xf] %v359_v19  ;;  %v371_v25 = vld [vmem:[%s1376_s17 + $0x48] sm:$0xf]  ;;  %v373_v26 = vld [vmem:[%s1376_s17 + $0x50] sm:$0xf] }
  0x2c   : > { %362 = vst [vmem:[%s334_s24 + $0x10] sm:$0xf] %v361_v20  ;;  %v375_v27 = vld [vmem:[%s1376_s17 + $0x58] sm:$0xf]  ;;  %v377_v28 = vld [vmem:[%s1376_s17 + $0x60] sm:$0xf] }
  0x2d   : > { %364 = vst [vmem:[%s334_s24 + $0x14] sm:$0xf] %v363_v21  ;;  %v379_v29 = vld [vmem:[%s1376_s17 + $0x68] sm:$0xf]  ;;  %v381_v30 = vld [vmem:[%s1376_s17 + $0x70] sm:$0xf] }
  0x2e   : > { %366 = vst [vmem:[%s334_s24 + $0x18] sm:$0xf] %v365_v22  ;;  %v383_v31 = vld [vmem:[%s1376_s17 + $0x78] sm:$0xf] }
  0x2f   : > { %368 = vst [vmem:[%s334_s24 + $0x1c] sm:$0xf] %v367_v23 }
  0x30   : > { %370 = vst [vmem:[%s334_s24 + $0x20] sm:$0xf] %v369_v24 }
  0x31   : > { %372 = vst [vmem:[%s334_s24 + $0x24] sm:$0xf] %v371_v25 }
  0x32   : > { %374 = vst [vmem:[%s334_s24 + $0x28] sm:$0xf] %v373_v26 }
  0x33   : > { %376 = vst [vmem:[%s334_s24 + $0x2c] sm:$0xf] %v375_v27 }
  0x34   : > { %378 = vst [vmem:[%s334_s24 + $0x30] sm:$0xf] %v377_v28 }
  0x35   : > { %380 = vst [vmem:[%s334_s24 + $0x34] sm:$0xf] %v379_v29 }
  0x36   : > { %382 = vst [vmem:[%s334_s24 + $0x38] sm:$0xf] %v381_v30 }
  0x37   : > { %384 = vst [vmem:[%s334_s24 + $0x3c] sm:$0xf] %v383_v31 }
  0x38 PF: > { %p1019_p8 = scmp.ge.s32.totalorder %s1265_s22, 1  ;;  %p445_p9 = scmp.lt.s32.totalorder %s1265_s22, 3 }
  0x3a   : > { %p446_p10 = pnand %p1019_p8, %p445_p9 }
  0x3b   : > { %s452_s25 = sand.u32 (!%p446_p10), 1, %s1249_s18   ;;  %p514_p11 = scmp.lt.s32.totalorder (!%p446_p10), %s1257_s20, 1 }
  0x3c   : > { %449 = sbr.rel (%p446_p10) target bundleno = 272 (0x110), region = 114  ;;  %s1020_s26 = sshll.u32 (!%p446_p10), %s452_s25, 6 }
  0x3d   : > { %s1399_s27 = scalar_lea.vmem (!%p446_p10), [#allocation3], %s1020_s26  ;;  %s1402_s30 = scalar_lea.vmem (!%p446_p10), [#allocation2], %s1020_s26 }
  0x3e   : > { %s1022_s10 = sshll.u32 (!%p446_p10), %s452_s25, 5 }
  0x3f   : > { %s1450_s11 = scalar_lea.vmem (!%p446_p10), [#allocation4], %s1022_s10 }
  0x41   : > { %v1146_v32 = vld [vmem:[%s1399_s27 + $0x38] sm:$0xff]  ;;  %v1145_v34 = vld [vmem:[%s1399_s27 + $0x30] sm:$0xff]  ;;  %v1144_v36 = vld [vmem:[%s1399_s27 + $0x28] sm:$0xff]  ;;  %s515_s14 = scalar_select %p514_p11, %s1257_s20, 1 }
  0x42   : > { %v1134_v33 = vld [vmem:[%s1402_s30 + $0x38] sm:$0xff]  ;;  %638 = vmatpush.bf16.msra.mxu0 %v1146_v32  ;;  %1170 = vmatpush.bf16.msra.mxu2 %v1146_v32  ;;  %v1133_v35 = vld [vmem:[%s1402_s30 + $0x30] sm:$0xff]  ;;  %v1132_v37 = vld [vmem:[%s1402_s30 + $0x28] sm:$0xff]  ;;  %s1120_s18 = sshll.u32 (%p1336_p6), %s1257_s20, 2 }
  0x43   : > { %739 = vmatpush.bf16.msra.mxu1 %v1134_v33  ;;  %1178 = vmatpush.bf16.msra.mxu3 %v1134_v33  ;;  %v1143_v38 = vld [vmem:[%s1399_s27 + $0x20] sm:$0xff]  ;;  %v1142_v40 = vld [vmem:[%s1399_s27 + $0x18] sm:$0xff]  ;;  %v1141_v42 = vld [vmem:[%s1399_s27 + $0x10] sm:$0xff]  ;;  %s516_s17 = scalar_lea.vmem %s1489_s4, %s515_s14  ;;  %s815_s13 = scalar_lea.vmem (%p1336_p6), %s1490_s5, %s1120_s18 }
  0x44   : > { %v1131_v39 = vld [vmem:[%s1402_s30 + $0x20] sm:$0xff]  ;;  %v1130_v41 = vld [vmem:[%s1402_s30 + $0x18] sm:$0xff]  ;;  %v1129_v43 = vld [vmem:[%s1402_s30 + $0x10] sm:$0xff] }
  0x45   : > { %v1140_v44 = vld [vmem:[%s1399_s27 + $0x8] sm:$0xff]  ;;  %v1139_v46 = vld [vmem:[%s1399_s27] sm:$0xff]  ;;  %v1137_v49 = vld [vmem:[%s1487_s2 + $0x10] sm:$0xff] }
  0x46   : > { %639 = vmatpush.bf16.msra.mxu0 %v1145_v34  ;;  %1171 = vmatpush.bf16.msra.mxu2 %v1145_v34  ;;  %v1128_v45 = vld [vmem:[%s1402_s30 + $0x8] sm:$0xff]  ;;  %v1127_v47 = vld [vmem:[%s1402_s30] sm:$0xff]  ;;  %v1125_v51 = vld [vmem:[%s1485_s0 + $0x10] sm:$0xff] }
  0x47   : > { %740 = vmatpush.bf16.msra.mxu1 %v1133_v35  ;;  %1179 = vmatpush.bf16.msra.mxu3 %v1133_v35  ;;  %v1135_v48 = vld [vmem:[%s1487_s2] sm:$0xff]  ;;  %v1136_v52 = vld [vmem:[%s1487_s2 + $0x8] sm:$0xff]  ;;  %v1138_v53 = vld [vmem:[%s1487_s2 + $0x18] sm:$0xff] }
  0x48   : > { %v1123_v50 = vld [vmem:[%s1485_s0] sm:$0xff]  ;;  %v1124_v54 = vld [vmem:[%s1485_s0 + $0x8] sm:$0xff]  ;;  %v1126_v55 = vld [vmem:[%s1485_s0 + $0x18] sm:$0xff] }
  0x49   : > { %v1226_v59 = vld [vmem:[%s516_s17] ss:$0 sm:$0xff] }
  0x4a   : > { %640 = vmatpush.bf16.msra.mxu0 %v1144_v36  ;;  %1172 = vmatpush.bf16.msra.mxu2 %v1144_v36 }
  0x4b   : > { %741 = vmatpush.bf16.msra.mxu1 %v1132_v37  ;;  %1180 = vmatpush.bf16.msra.mxu3 %v1132_v37 }
  0x4e   : > { %641 = vmatpush.bf16.msra.mxu0 %v1143_v38  ;;  %1173 = vmatpush.bf16.msra.mxu2 %v1143_v38 }
  0x4f   : > { %742 = vmatpush.bf16.msra.mxu1 %v1131_v39  ;;  %1181 = vmatpush.bf16.msra.mxu3 %v1131_v39 }
  0x52   : > { %642 = vmatpush.bf16.msra.mxu0 %v1142_v40  ;;  %1174 = vmatpush.bf16.msra.mxu2 %v1142_v40 }
  0x53   : > { %743 = vmatpush.bf16.msra.mxu1 %v1130_v41  ;;  %1182 = vmatpush.bf16.msra.mxu3 %v1130_v41 }
  0x56   : > { %643 = vmatpush.bf16.msra.mxu0 %v1141_v42  ;;  %1175 = vmatpush.bf16.msra.mxu2 %v1141_v42 }
  0x57   : > { %744 = vmatpush.bf16.msra.mxu1 %v1129_v43  ;;  %1183 = vmatpush.bf16.msra.mxu3 %v1129_v43 }
  0x5a   : > { %644 = vmatpush.bf16.msra.mxu0 %v1140_v44  ;;  %1176 = vmatpush.bf16.msra.mxu2 %v1140_v44 }
  0x5b   : > { %745 = vmatpush.bf16.msra.mxu1 %v1128_v45  ;;  %1184 = vmatpush.bf16.msra.mxu3 %v1128_v45 }
  0x5e   : > { %645 = vmatpush.bf16.msra.mxu0 %v1139_v46  ;;  %1177 = vmatpush.bf16.msra.mxu2 %v1139_v46 }
  0x5f   : > { %746 = vmatpush.bf16.msra.mxu1 %v1127_v47  ;;  %1185 = vmatpush.bf16.msra.mxu3 %v1127_v47 }
  0x61   : > { %646 = vmatmul.bf16.vlgmr.msra.gmra.mxu0 %v1135_v48  ;;  %656 = vmatmul.bf16.vlgmr.msra.gmra.mxu2 %v1137_v49 }
  0x62   : > { %747 = vmatmul.bf16.vlgmr.msra.gmra.mxu1 %v1123_v50  ;;  %757 = vmatmul.bf16.vlgmr.msra.gmra.mxu3 %v1125_v51 }
  0x71   : > { %651 = vmatmul.bf16.gmra.mxu0 %v1136_v52  ;;  %661 = vmatmul.bf16.gmra.mxu2 %v1138_v53 }
  0x72   : > { %752 = vmatmul.bf16.gmra.mxu1 %v1124_v54  ;;  %762 = vmatmul.bf16.gmra.mxu3 %v1126_v55 }
  0xde   : > { %v647_v56 = vpop.f32.mrf.mxu0 }
  0xdf   : > { %v748_v57 = vpop.f32.mrf.mxu1 }
  0xe0   : > { %v749_v58 = vadd.f32 %v748_v57, %v647_v56 }
  0xe2   : > { %v772_v0 = vadd.f32 %v1226_v59, %v749_v58 }
  0xe4   : > { %v657_v60 = vpop.f32.mrf.mxu2  ;;  %v780_v4 = vmax.f32 %v772_v0, 0.0 }
  0xe5   : > { %v758_v61 = vpop.f32.mrf.mxu3 }
  0xe6   : > { %v649_v62 = vpop.f32.mrf.mxu0  ;;  %v759_v2 = vadd.f32 %v758_v61, %v657_v60 }
  0xe7   : > { %v750_v63 = vpop.f32.mrf.mxu1 }
  0xe8   : > { %v751_v1 = vadd.f32 %v750_v63, %v649_v62  ;;  %v776_v8 = vadd.f32 %v1226_v59, %v759_v2 }
  0xea   : > { %v773_v3 = vadd.f32 %v1226_v59, %v751_v1  ;;  %v784_v14 = vmax.f32 %v776_v8, 0.0 }
  0xec   : > { %v781_v5 = vmax.f32 %v773_v3, 0.0  ;;  %v659_v6 = vpop.f32.mrf.mxu2 }
  0xed   : > { %v760_v7 = vpop.f32.mrf.mxu3 }
  0xee   : > { %v1150_v9 = vpack.c.bf16 %v781_v5, %v780_v4  ;;  %v761_v10 = vadd.f32 %v760_v7, %v659_v6  ;;  %v652_v11 = vpop.f32.mrf.mxu0 }
  0xef   : > { %v753_v12 = vpop.f32.mrf.mxu1 }
  0xf0   : > { %1151 = vst [vmem:[%s1450_s11] sm:$0xff] %v1150_v9   ;;  %v777_v13 = vadd.f32 %v1226_v59, %v761_v10  ;;  %v754_v17 = vadd.f32 %v753_v12, %v652_v11 }
  0xf2   : > { %v785_v15 = vmax.f32 %v777_v13, 0.0  ;;  %v774_v22 = vadd.f32 %v1226_v59, %v754_v17 }
  0xf4   : > { %v1160_v16 = vpack.c.bf16 %v785_v15, %v784_v14  ;;  %v662_v18 = vpop.f32.mrf.mxu2  ;;  %v782_v26 = vmax.f32 %v774_v22, 0.0 }
  0xf5   : > { %v763_v19 = vpop.f32.mrf.mxu3 }
  0xf6   : > { %1168 = vst [vmem:[%s1450_s11 + $0x10] sm:$0xff] %v1160_v16   ;;  %v654_v20 = vpop.f32.mrf.mxu0  ;;  %v764_v24 = vadd.f32 %v763_v19, %v662_v18 }
  0xf7   : > { %v755_v21 = vpop.f32.mrf.mxu1  ;;  %v832_v37 = vld [vmem:[%s1450_s11] sm:$0xf] (%p1336_p6)  ;;  %v834_v38 = vld [vmem:[%s1450_s11 + $0x4] sm:$0xf] (%p1336_p6) }
  0xf8   : > { %v756_v23 = vadd.f32 %v755_v21, %v654_v20  ;;  %v778_v30 = vadd.f32 %v1226_v59, %v764_v24  ;;  %833 = vst [vmem:[%s815_s13] sm:$0xf] (%p1336_p6), %v832_v37 }
  0xf9   : > { %835 = vst [vmem:[%s815_s13 + $0x8] sm:$0xf] (%p1336_p6), %v834_v38 }
  0xfa   : > { %v775_v25 = vadd.f32 %v1226_v59, %v756_v23  ;;  %v786_v34 = vmax.f32 %v778_v30, 0.0 }
  0xfc   : > { %v783_v27 = vmax.f32 %v775_v25, 0.0  ;;  %v664_v28 = vpop.f32.mrf.mxu2 }
  0xfd   : > { %v765_v29 = vpop.f32.mrf.mxu3  ;;  %v840_v41 = vld [vmem:[%s1450_s11 + $0x10] sm:$0xf] (%p1336_p6)  ;;  %v842_v42 = vld [vmem:[%s1450_s11 + $0x14] sm:$0xf] (%p1336_p6) }
  0xfe   : > { %v1155_v31 = vpack.c.bf16 %v783_v27, %v782_v26  ;;  %v766_v32 = vadd.f32 %v765_v29, %v664_v28  ;;  %841 = vst [vmem:[%s815_s13 + $0x20] sm:$0xf] (%p1336_p6), %v840_v41 }
  0xff   : > { %843 = vst [vmem:[%s815_s13 + $0x28] sm:$0xf] (%p1336_p6), %v842_v42 }
 0x100   : > { %1167 = vst [vmem:[%s1450_s11 + $0x8] sm:$0xff] %v1155_v31   ;;  %v779_v33 = vadd.f32 %v1226_v59, %v766_v32 }
 0x102   : > { %v787_v35 = vmax.f32 %v779_v33, 0.0  ;;  %810 = sbr.rel (!%p1336_p6) target bundleno = 272 (0x110), region = 126 }
 0x104   : > { %v1165_v36 = vpack.c.bf16 %v787_v35, %v786_v34 }
 0x106   : > { %1169 = vst [vmem:[%s1450_s11 + $0x18] sm:$0xff] %v1165_v36  }
 0x107   : > { %v836_v39 = vld [vmem:[%s1450_s11 + $0x8] sm:$0xf]  ;;  %v838_v40 = vld [vmem:[%s1450_s11 + $0xc] sm:$0xf] }
 0x108   : > { %837 = vst [vmem:[%s815_s13 + $0x10] sm:$0xf] %v836_v39 }
 0x109   : > { %839 = vst [vmem:[%s815_s13 + $0x18] sm:$0xf] %v838_v40 }
 0x10d   : > { %v844_v43 = vld [vmem:[%s1450_s11 + $0x18] sm:$0xf]  ;;  %v846_v44 = vld [vmem:[%s1450_s11 + $0x1c] sm:$0xf] }
 0x10e   : > { %845 = vst [vmem:[%s815_s13 + $0x30] sm:$0xf] %v844_v43 }
 0x10f   : > { %847 = vst [vmem:[%s815_s13 + $0x38] sm:$0xf] %v846_v44 }
 0x110 PF: > { %s15_s22 = sadd.s32 1, %s1265_s22   ;;  %s1493_s18 = smov %s1253_s19 }
 0x111   : > { %p12_p12 = scmp.ge.s32.totalorder %s15_s22, 4   ;;  %s1494_s19 = smov %s1341_s29 }
 0x112   : > { %s1495_s20 = smov %s1261_s21  ;;  %s1496_s21 = smov %s1498_s23 }
 0x113   :  { %14 = sbr.rel (!%p12_p12) target bundleno = 3 (0x3), region = 215 }

// kernel: _lambda_.44
= control target key start
LH: loop header
LB: loop body
LE: loop exit
PB: predicated region body
PF: predicated region fallthrough
CT: control target
= control target key end

     0   :  { %s3860_s0 = inlined_call_operand.vmem [shape: bf16[64,2304], index: 0, kind: input, shape index: {}]   ;;  %s3861_s1 = inlined_call_operand.vmem [shape: bf16[2304,256], index: 1, kind: input, shape index: {}]   ;;  %s3862_s2 = inlined_call_operand.vmem [shape: f32[1,256], index: 2, kind: input, shape index: {}]   ;;  %s3863_s3 = inlined_call_operand.vmem [shape: bf16[64,256], index: 3, kind: output, shape index: {}]  }
   0x1   :  { %3865 = sst [smem:[#allocation7_spill]] %s3860_s0 }
   0x2   :  { %3866 = sst [smem:[#allocation8_spill]] %s3861_s1 }
   0x3   :  { %s3107_s12 = smov 0   ;;  %s3109_s13 = smov 0  }
   0x4   :  { %s3111_s14 = smov 0   ;;  %s3113_s15 = smov 0  }
   0x5   :  { %s3115_s16 = smov 0   ;;  %s3117_s17 = smov 0  }
   0x6   :  { %s3119_s18 = smov 0   ;;  %s3121_s19 = smov 0  }
   0x7   :  { %s3123_s20 = smov 0   ;;  %s3125_s21 = smov 0  }
   0x8   :  { %s3127_s22 = smov 0  }
   0x9 LB: > { %s2292_s23 = sadd.s32 4294967295, %s3084_s22   ;;  %s25_s24 = sadd.s32 1, %s3076_s20  ;;  %s3084_s22 = sphi %s3127_s22, %s13_s22   ;;  %s3080_s21 = sphi %s3125_s21, %s3883_s21   ;;  %s3076_s20 = sphi %s3123_s20, %s3882_s20   ;;  %s3072_s19 = sphi %s3121_s19, %s3881_s19   ;;  %s3068_s18 = sphi %s3119_s18, %s3880_s18   ;;  %s3064_s17 = sphi %s3117_s17, %s3879_s17   ;;  %s3060_s16 = sphi %s3115_s16, %s3878_s16   ;;  %s3056_s15 = sphi %s3113_s15, %s3877_s15   ;;  %s3052_s14 = sphi %s3111_s14, %s3876_s14   ;;  %s3048_s13 = sphi %s3109_s13, %s3875_s13   ;;  %s3044_s12 = sphi %s3107_s12, %s3874_s12  }
   0xa   : > { %p26_p0 = scmp.ge.s32.totalorder %s25_s24, 2  ;;  %s28_s25 = sadd.s32 1, %s3080_s21 }
   0xb   : > { %s41_s26 = sadd.s32 1, %s3064_s17  ;;  %p48_p1 = scmp.ne.s32.totalorder %s3064_s17, %s3060_s16 }
   0xc   : > { %s3885_s24 = smov (%p26_p0, %s25_s24), 0  ;;  %s3887_s25 = smov (!%p26_p0, %s28_s25), %s3080_s21 }
   0xd   : > { %s37_s27 = ssub.s32 %s3076_s20, %s3885_s24  ;;  %p49_p2 = scmp.eq.s32.totalorder %s3084_s22, 0 }
   0xe   : > { %p30_p3 = scmp.ge.s32.totalorder %s3887_s25, 2  ;;  %p39_p4 = scmp.eq.s32.totalorder %s37_s27, 0 }
   0xf   : > { %p3174_p5 = por %p49_p2, %p48_p1  ;;  %s69_s29 = sadd.s32 1, %s3056_s15 }
  0x10   : > { %s3889_s25 = smov (%p30_p3, %s3887_s25), 0  ;;  %p76_p6 = scmp.ne.s32.totalorder %s3056_s15, %s3052_s14 }
  0x11   : > { %3868 = sst [smem:[#allocation6_spill]] %s3889_s25  ;;  %s65_s4 = ssub.s32 %s3080_s21, %s3889_s25 }
  0x12   : > { %s3182_s30 = scalar_select %p39_p4, %s3064_s17, %s41_s26  }
  0x13   : > { %s66_s5 = sor.u32 %s65_s4, %s37_s27  ;;  %p121_p7 = scmp.eq.s32.totalorder %s65_s4, 0 }
  0x14   : > { %p67_p8 = scmp.eq.s32.totalorder %s66_s5, 0  ;;  %p3188_p9 = por %p76_p6, %p49_p2 }
  0x15   : > { %s123_s7 = sadd.s32 1, %s3048_s13  ;;  %p133_p10 = scmp.ne.s32.totalorder %s3048_s13, %s3044_s12 }
  0x16   : > { %s3196_s8 = scalar_select %p67_p8, %s3056_s15, %s69_s29  }
  0x17   : > { %s3199_s9 = scalar_select %p121_p7, %s3048_s13, %s123_s7  }
  0x18   : > { %p134_p11 = scmp.eq.s32.totalorder %s2292_s23, 3  ;;  %p2295_p13 = scmp.ge.s32.totalorder %s3084_s22, 4 }
  0x1a   : > { %p3201_p12 = por %p134_p11, %p133_p10  ;;  %156 = sbr.rel (%p2295_p13) target bundleno = 233 (0xe9), region = 16 }
  0x1f   : > { %159 = sbr.rel (!%p3174_p5) target bundleno = 80 (0x50), region = 20  ;;  %s161_s11 = sand.u32 (%p3174_p5), 1, %s3064_s17  }
  0x20   : > { %s2755_s26 = smul.u32 (%p3174_p5), 36, %s3076_s20  ;;  %s3871_s0 = sld [smem:[#allocation7_spill]] (%p3174_p5) }
  0x21   : > { %s2904_s27 = smul.u32 (%p3174_p5), 288, %s161_s11 }
  0x23   : > { %s3218_s23 = scalar_lea.vmem (%p3174_p5), [#allocation3], %s2904_s27 }
  0x26   : > { %s3213_s5 = scalar_lea.vmem %s3871_s0, %s2755_s26 }
  0x27   : > { %v184_v0 = vld [vmem:[%s3213_s5] sm:$0xff]  ;;  %v186_v1 = vld [vmem:[%s3213_s5 + $0x8] sm:$0xff]  ;;  %v188_v2 = vld [vmem:[%s3213_s5 + $0x10] sm:$0xff] }
  0x28   : > { %185 = vst [vmem:[%s3218_s23] sm:$0xff] %v184_v0  ;;  %v190_v3 = vld [vmem:[%s3213_s5 + $0x18] sm:$0xff]  ;;  %v192_v4 = vld [vmem:[%s3213_s5 + $0x48] sm:$0xff]  ;;  %v194_v5 = vld [vmem:[%s3213_s5 + $0x50] sm:$0xff] }
  0x29   : > { %187 = vst [vmem:[%s3218_s23 + $0x8] sm:$0xff] %v186_v1  ;;  %v196_v6 = vld [vmem:[%s3213_s5 + $0x58] sm:$0xff]  ;;  %v198_v7 = vld [vmem:[%s3213_s5 + $0x60] sm:$0xff]  ;;  %v200_v8 = vld [vmem:[%s3213_s5 + $0x90] sm:$0xff] }
  0x2a   : > { %189 = vst [vmem:[%s3218_s23 + $0x10] sm:$0xff] %v188_v2  ;;  %v202_v9 = vld [vmem:[%s3213_s5 + $0x98] sm:$0xff]  ;;  %v204_v10 = vld [vmem:[%s3213_s5 + $0xa0] sm:$0xff]  ;;  %v206_v11 = vld [vmem:[%s3213_s5 + $0xa8] sm:$0xff] }
  0x2b   : > { %191 = vst [vmem:[%s3218_s23 + $0x18] sm:$0xff] %v190_v3  ;;  %v208_v12 = vld [vmem:[%s3213_s5 + $0xd8] sm:$0xff]  ;;  %v210_v13 = vld [vmem:[%s3213_s5 + $0xe0] sm:$0xff]  ;;  %v212_v14 = vld [vmem:[%s3213_s5 + $0xe8] sm:$0xff] }
  0x2c   : > { %193 = vst [vmem:[%s3218_s23 + $0x24] sm:$0xff] %v192_v4  ;;  %v214_v15 = vld [vmem:[%s3213_s5 + $0xf0] sm:$0xff]  ;;  %v216_v16 = vld [vmem:[%s3213_s5 + $0x120] sm:$0xff]  ;;  %v218_v17 = vld [vmem:[%s3213_s5 + $0x128] sm:$0xff] }
  0x2d   : > { %195 = vst [vmem:[%s3218_s23 + $0x2c] sm:$0xff] %v194_v5  ;;  %v220_v18 = vld [vmem:[%s3213_s5 + $0x130] sm:$0xff]  ;;  %v222_v19 = vld [vmem:[%s3213_s5 + $0x138] sm:$0xff]  ;;  %v224_v20 = vld [vmem:[%s3213_s5 + $0x168] sm:$0xff] }
  0x2e   : > { %197 = vst [vmem:[%s3218_s23 + $0x34] sm:$0xff] %v196_v6  ;;  %v226_v21 = vld [vmem:[%s3213_s5 + $0x170] sm:$0xff]  ;;  %v228_v22 = vld [vmem:[%s3213_s5 + $0x178] sm:$0xff]  ;;  %v230_v23 = vld [vmem:[%s3213_s5 + $0x180] sm:$0xff] }
  0x2f   : > { %199 = vst [vmem:[%s3218_s23 + $0x3c] sm:$0xff] %v198_v7  ;;  %v232_v24 = vld [vmem:[%s3213_s5 + $0x1b0] sm:$0xff]  ;;  %v234_v25 = vld [vmem:[%s3213_s5 + $0x1b8] sm:$0xff]  ;;  %v236_v26 = vld [vmem:[%s3213_s5 + $0x1c0] sm:$0xff] }
  0x30   : > { %201 = vst [vmem:[%s3218_s23 + $0x48] sm:$0xff] %v200_v8  ;;  %v238_v27 = vld [vmem:[%s3213_s5 + $0x1c8] sm:$0xff]  ;;  %v240_v28 = vld [vmem:[%s3213_s5 + $0x1f8] sm:$0xff]  ;;  %v242_v29 = vld [vmem:[%s3213_s5 + $0x200] sm:$0xff] }
  0x31   : > { %203 = vst [vmem:[%s3218_s23 + $0x50] sm:$0xff] %v202_v9  ;;  %v244_v30 = vld [vmem:[%s3213_s5 + $0x208] sm:$0xff]  ;;  %v246_v31 = vld [vmem:[%s3213_s5 + $0x210] sm:$0xff]  ;;  %v2297_v32 = vld [vmem:[%s3213_s5 + $0x20] sm:$0xf] }
  0x32   : > { %205 = vst [vmem:[%s3218_s23 + $0x58] sm:$0xff] %v204_v10  ;;  %v2299_v33 = vld [vmem:[%s3213_s5 + $0x68] sm:$0xf]  ;;  %v2301_v34 = vld [vmem:[%s3213_s5 + $0xb0] sm:$0xf] }
  0x33   : > { %207 = vst [vmem:[%s3218_s23 + $0x60] sm:$0xff] %v206_v11  ;;  %v2303_v35 = vld [vmem:[%s3213_s5 + $0xf8] sm:$0xf]  ;;  %v2305_v36 = vld [vmem:[%s3213_s5 + $0x140] sm:$0xf] }
  0x34   : > { %209 = vst [vmem:[%s3218_s23 + $0x6c] sm:$0xff] %v208_v12  ;;  %v2307_v37 = vld [vmem:[%s3213_s5 + $0x188] sm:$0xf]  ;;  %v2309_v38 = vld [vmem:[%s3213_s5 + $0x1d0] sm:$0xf] }
  0x35   : > { %211 = vst [vmem:[%s3218_s23 + $0x74] sm:$0xff] %v210_v13  ;;  %v2311_v39 = vld [vmem:[%s3213_s5 + $0x218] sm:$0xf] }
  0x36   : > { %213 = vst [vmem:[%s3218_s23 + $0x7c] sm:$0xff] %v212_v14 }
  0x37   : > { %215 = vst [vmem:[%s3218_s23 + $0x84] sm:$0xff] %v214_v15 }
  0x38   : > { %217 = vst [vmem:[%s3218_s23 + $0x90] sm:$0xff] %v216_v16 }
  0x39   : > { %219 = vst [vmem:[%s3218_s23 + $0x98] sm:$0xff] %v218_v17 }
  0x3a   : > { %221 = vst [vmem:[%s3218_s23 + $0xa0] sm:$0xff] %v220_v18 }
  0x3b   : > { %223 = vst [vmem:[%s3218_s23 + $0xa8] sm:$0xff] %v222_v19 }
  0x3c   : > { %225 = vst [vmem:[%s3218_s23 + $0xb4] sm:$0xff] %v224_v20 }
  0x3d   : > { %227 = vst [vmem:[%s3218_s23 + $0xbc] sm:$0xff] %v226_v21 }
  0x3e   : > { %229 = vst [vmem:[%s3218_s23 + $0xc4] sm:$0xff] %v228_v22 }
  0x3f   : > { %231 = vst [vmem:[%s3218_s23 + $0xcc] sm:$0xff] %v230_v23 }
  0x40   : > { %233 = vst [vmem:[%s3218_s23 + $0xd8] sm:$0xff] %v232_v24 }
  0x41   : > { %235 = vst [vmem:[%s3218_s23 + $0xe0] sm:$0xff] %v234_v25 }
  0x42   : > { %237 = vst [vmem:[%s3218_s23 + $0xe8] sm:$0xff] %v236_v26 }
  0x43   : > { %239 = vst [vmem:[%s3218_s23 + $0xf0] sm:$0xff] %v238_v27 }
  0x44   : > { %241 = vst [vmem:[%s3218_s23 + $0xfc] sm:$0xff] %v240_v28 }
  0x45   : > { %243 = vst [vmem:[%s3218_s23 + $0x104] sm:$0xff] %v242_v29 }
  0x46   : > { %245 = vst [vmem:[%s3218_s23 + $0x10c] sm:$0xff] %v244_v30 }
  0x47   : > { %247 = vst [vmem:[%s3218_s23 + $0x114] sm:$0xff] %v246_v31 }
  0x48   : > { %2298 = vst [vmem:[%s3218_s23 + $0x20] sm:$0xf] %v2297_v32 }
  0x49   : > { %2300 = vst [vmem:[%s3218_s23 + $0x44] sm:$0xf] %v2299_v33 }
  0x4a   : > { %2302 = vst [vmem:[%s3218_s23 + $0x68] sm:$0xf] %v2301_v34 }
  0x4b   : > { %2304 = vst [vmem:[%s3218_s23 + $0x8c] sm:$0xf] %v2303_v35 }
  0x4c   : > { %2306 = vst [vmem:[%s3218_s23 + $0xb0] sm:$0xf] %v2305_v36 }
  0x4d   : > { %2308 = vst [vmem:[%s3218_s23 + $0xd4] sm:$0xf] %v2307_v37 }
  0x4e   : > { %2310 = vst [vmem:[%s3218_s23 + $0xf8] sm:$0xf] %v2309_v38 }
  0x4f   : > { %2312 = vst [vmem:[%s3218_s23 + $0x11c] sm:$0xf] %v2311_v39 }
  0x50 PF: > { %277 = sbr.rel (!%p3188_p9) target bundleno = 233 (0xe9), region = 46  ;;  %s279_s28 = sand.u32 (%p3188_p9), 1, %s3056_s15  }
  0x51   : > { %s2756_s7 = smul.u32 (%p3188_p9), 288, %s3076_s20  ;;  %s3872_s1 = sld [smem:[#allocation8_spill]] (%p3188_p9) }
  0x52   : > { %s2905_s11 = smul.u32 (%p3188_p9), 576, %s279_s28 }
  0x53   : > { %s284_s26 = sadd.s32 (%p3188_p9), %s3080_s21, %s2756_s7 }
  0x54   : > { %s2314_s27 = sshll.u32 (%p3188_p9), %s284_s26, 2  ;;  %s3310_s6 = scalar_lea.vmem (%p3188_p9), [#allocation4], %s2905_s11 }
  0x57   : > { %s3305_s0 = scalar_lea.vmem %s3872_s1, %s2314_s27 }
  0x58   : > { %v303_v40 = vld [vmem:[%s3305_s0] sm:$0xf]  ;;  %v305_v41 = vld [vmem:[%s3305_s0 + $0x8] sm:$0xf]  ;;  %v307_v42 = vld [vmem:[%s3305_s0 + $0x10] sm:$0xf] }
  0x59   : > { %304 = vst [vmem:[%s3310_s6] sm:$0xf] %v303_v40  ;;  %v309_v43 = vld [vmem:[%s3305_s0 + $0x18] sm:$0xf]  ;;  %v311_v44 = vld [vmem:[%s3305_s0 + $0x20] sm:$0xf] }
  0x5a   : > { %306 = vst [vmem:[%s3310_s6 + $0x4] sm:$0xf] %v305_v41  ;;  %v313_v45 = vld [vmem:[%s3305_s0 + $0x28] sm:$0xf]  ;;  %v315_v46 = vld [vmem:[%s3305_s0 + $0x30] sm:$0xf] }
  0x5b   : > { %308 = vst [vmem:[%s3310_s6 + $0x8] sm:$0xf] %v307_v42  ;;  %v317_v47 = vld [vmem:[%s3305_s0 + $0x38] sm:$0xf]  ;;  %v319_v48 = vld [vmem:[%s3305_s0 + $0x40] sm:$0xf] }
  0x5c   : > { %310 = vst [vmem:[%s3310_s6 + $0xc] sm:$0xf] %v309_v43  ;;  %v321_v49 = vld [vmem:[%s3305_s0 + $0x48] sm:$0xf]  ;;  %v323_v50 = vld [vmem:[%s3305_s0 + $0x50] sm:$0xf] }
  0x5d   : > { %312 = vst [vmem:[%s3310_s6 + $0x10] sm:$0xf] %v311_v44  ;;  %v325_v51 = vld [vmem:[%s3305_s0 + $0x58] sm:$0xf]  ;;  %v327_v52 = vld [vmem:[%s3305_s0 + $0x60] sm:$0xf] }
  0x5e   : > { %314 = vst [vmem:[%s3310_s6 + $0x14] sm:$0xf] %v313_v45  ;;  %v329_v53 = vld [vmem:[%s3305_s0 + $0x68] sm:$0xf]  ;;  %v331_v54 = vld [vmem:[%s3305_s0 + $0x70] sm:$0xf] }
  0x5f   : > { %316 = vst [vmem:[%s3310_s6 + $0x18] sm:$0xf] %v315_v46  ;;  %v333_v55 = vld [vmem:[%s3305_s0 + $0x78] sm:$0xf]  ;;  %v335_v56 = vld [vmem:[%s3305_s0 + $0x80] sm:$0xf] }
  0x60   : > { %318 = vst [vmem:[%s3310_s6 + $0x1c] sm:$0xf] %v317_v47  ;;  %v337_v57 = vld [vmem:[%s3305_s0 + $0x88] sm:$0xf]  ;;  %v339_v58 = vld [vmem:[%s3305_s0 + $0x90] sm:$0xf] }
  0x61   : > { %320 = vst [vmem:[%s3310_s6 + $0x20] sm:$0xf] %v319_v48  ;;  %v341_v59 = vld [vmem:[%s3305_s0 + $0x98] sm:$0xf]  ;;  %v343_v60 = vld [vmem:[%s3305_s0 + $0xa0] sm:$0xf] }
  0x62   : > { %322 = vst [vmem:[%s3310_s6 + $0x24] sm:$0xf] %v321_v49  ;;  %v345_v61 = vld [vmem:[%s3305_s0 + $0xa8] sm:$0xf]  ;;  %v347_v62 = vld [vmem:[%s3305_s0 + $0xb0] sm:$0xf] }
  0x63   : > { %324 = vst [vmem:[%s3310_s6 + $0x28] sm:$0xf] %v323_v50  ;;  %v349_v63 = vld [vmem:[%s3305_s0 + $0xb8] sm:$0xf]  ;;  %v351_v0 = vld [vmem:[%s3305_s0 + $0xc0] sm:$0xf] }
  0x64   : > { %326 = vst [vmem:[%s3310_s6 + $0x2c] sm:$0xf] %v325_v51  ;;  %v353_v1 = vld [vmem:[%s3305_s0 + $0xc8] sm:$0xf]  ;;  %v355_v2 = vld [vmem:[%s3305_s0 + $0xd0] sm:$0xf] }
  0x65   : > { %328 = vst [vmem:[%s3310_s6 + $0x30] sm:$0xf] %v327_v52  ;;  %v357_v3 = vld [vmem:[%s3305_s0 + $0xd8] sm:$0xf]  ;;  %v359_v4 = vld [vmem:[%s3305_s0 + $0xe0] sm:$0xf] }
  0x66   : > { %330 = vst [vmem:[%s3310_s6 + $0x34] sm:$0xf] %v329_v53  ;;  %v361_v5 = vld [vmem:[%s3305_s0 + $0xe8] sm:$0xf]  ;;  %v363_v6 = vld [vmem:[%s3305_s0 + $0xf0] sm:$0xf] }
  0x67   : > { %332 = vst [vmem:[%s3310_s6 + $0x38] sm:$0xf] %v331_v54  ;;  %v365_v7 = vld [vmem:[%s3305_s0 + $0xf8] sm:$0xf]  ;;  %v367_v8 = vld [vmem:[%s3305_s0 + $0x100] sm:$0xf] }
  0x68   : > { %334 = vst [vmem:[%s3310_s6 + $0x3c] sm:$0xf] %v333_v55  ;;  %v369_v9 = vld [vmem:[%s3305_s0 + $0x108] sm:$0xf]  ;;  %v371_v10 = vld [vmem:[%s3305_s0 + $0x110] sm:$0xf] }
  0x69   : > { %336 = vst [vmem:[%s3310_s6 + $0x40] sm:$0xf] %v335_v56  ;;  %v373_v11 = vld [vmem:[%s3305_s0 + $0x118] sm:$0xf]  ;;  %v375_v12 = vld [vmem:[%s3305_s0 + $0x120] sm:$0xf] }
  0x6a   : > { %338 = vst [vmem:[%s3310_s6 + $0x44] sm:$0xf] %v337_v57  ;;  %v377_v13 = vld [vmem:[%s3305_s0 + $0x128] sm:$0xf]  ;;  %v379_v14 = vld [vmem:[%s3305_s0 + $0x130] sm:$0xf] }
  0x6b   : > { %340 = vst [vmem:[%s3310_s6 + $0x48] sm:$0xf] %v339_v58  ;;  %v381_v15 = vld [vmem:[%s3305_s0 + $0x138] sm:$0xf]  ;;  %v383_v16 = vld [vmem:[%s3305_s0 + $0x140] sm:$0xf] }
  0x6c   : > { %342 = vst [vmem:[%s3310_s6 + $0x4c] sm:$0xf] %v341_v59  ;;  %v385_v17 = vld [vmem:[%s3305_s0 + $0x148] sm:$0xf]  ;;  %v387_v18 = vld [vmem:[%s3305_s0 + $0x150] sm:$0xf] }
  0x6d   : > { %344 = vst [vmem:[%s3310_s6 + $0x50] sm:$0xf] %v343_v60  ;;  %v389_v19 = vld [vmem:[%s3305_s0 + $0x158] sm:$0xf]  ;;  %v391_v20 = vld [vmem:[%s3305_s0 + $0x160] sm:$0xf] }
  0x6e   : > { %346 = vst [vmem:[%s3310_s6 + $0x54] sm:$0xf] %v345_v61  ;;  %v393_v21 = vld [vmem:[%s3305_s0 + $0x168] sm:$0xf]  ;;  %v395_v22 = vld [vmem:[%s3305_s0 + $0x170] sm:$0xf] }
  0x6f   : > { %348 = vst [vmem:[%s3310_s6 + $0x58] sm:$0xf] %v347_v62  ;;  %v397_v23 = vld [vmem:[%s3305_s0 + $0x178] sm:$0xf]  ;;  %v399_v24 = vld [vmem:[%s3305_s0 + $0x180] sm:$0xf] }
  0x70   : > { %350 = vst [vmem:[%s3310_s6 + $0x5c] sm:$0xf] %v349_v63  ;;  %v401_v25 = vld [vmem:[%s3305_s0 + $0x188] sm:$0xf]  ;;  %v403_v26 = vld [vmem:[%s3305_s0 + $0x190] sm:$0xf] }
  0x71   : > { %352 = vst [vmem:[%s3310_s6 + $0x60] sm:$0xf] %v351_v0  ;;  %v405_v27 = vld [vmem:[%s3305_s0 + $0x198] sm:$0xf]  ;;  %v407_v28 = vld [vmem:[%s3305_s0 + $0x1a0] sm:$0xf] }
  0x72   : > { %354 = vst [vmem:[%s3310_s6 + $0x64] sm:$0xf] %v353_v1  ;;  %v409_v29 = vld [vmem:[%s3305_s0 + $0x1a8] sm:$0xf]  ;;  %v411_v30 = vld [vmem:[%s3305_s0 + $0x1b0] sm:$0xf] }
  0x73   : > { %356 = vst [vmem:[%s3310_s6 + $0x68] sm:$0xf] %v355_v2  ;;  %v413_v31 = vld [vmem:[%s3305_s0 + $0x1b8] sm:$0xf]  ;;  %v415_v32 = vld [vmem:[%s3305_s0 + $0x1c0] sm:$0xf] }
  0x74   : > { %358 = vst [vmem:[%s3310_s6 + $0x6c] sm:$0xf] %v357_v3  ;;  %v417_v33 = vld [vmem:[%s3305_s0 + $0x1c8] sm:$0xf]  ;;  %v419_v34 = vld [vmem:[%s3305_s0 + $0x1d0] sm:$0xf] }
  0x75   : > { %360 = vst [vmem:[%s3310_s6 + $0x70] sm:$0xf] %v359_v4  ;;  %v421_v35 = vld [vmem:[%s3305_s0 + $0x1d8] sm:$0xf]  ;;  %v423_v36 = vld [vmem:[%s3305_s0 + $0x1e0] sm:$0xf] }
  0x76   : > { %362 = vst [vmem:[%s3310_s6 + $0x74] sm:$0xf] %v361_v5  ;;  %v425_v37 = vld [vmem:[%s3305_s0 + $0x1e8] sm:$0xf]  ;;  %v427_v38 = vld [vmem:[%s3305_s0 + $0x1f0] sm:$0xf] }
  0x77   : > { %364 = vst [vmem:[%s3310_s6 + $0x78] sm:$0xf] %v363_v6  ;;  %v429_v39 = vld [vmem:[%s3305_s0 + $0x1f8] sm:$0xf]  ;;  %v431_v40 = vld [vmem:[%s3305_s0 + $0x200] sm:$0xf] }
  0x78   : > { %366 = vst [vmem:[%s3310_s6 + $0x7c] sm:$0xf] %v365_v7  ;;  %v433_v41 = vld [vmem:[%s3305_s0 + $0x208] sm:$0xf]  ;;  %v435_v42 = vld [vmem:[%s3305_s0 + $0x210] sm:$0xf] }
  0x79   : > { %368 = vst [vmem:[%s3310_s6 + $0x80] sm:$0xf] %v367_v8  ;;  %v437_v43 = vld [vmem:[%s3305_s0 + $0x218] sm:$0xf]  ;;  %v439_v44 = vld [vmem:[%s3305_s0 + $0x220] sm:$0xf] }
  0x7a   : > { %370 = vst [vmem:[%s3310_s6 + $0x84] sm:$0xf] %v369_v9  ;;  %v441_v45 = vld [vmem:[%s3305_s0 + $0x228] sm:$0xf]  ;;  %v443_v46 = vld [vmem:[%s3305_s0 + $0x230] sm:$0xf] }
  0x7b   : > { %372 = vst [vmem:[%s3310_s6 + $0x88] sm:$0xf] %v371_v10  ;;  %v445_v47 = vld [vmem:[%s3305_s0 + $0x238] sm:$0xf]  ;;  %v447_v48 = vld [vmem:[%s3305_s0 + $0x240] sm:$0xf] }
  0x7c   : > { %374 = vst [vmem:[%s3310_s6 + $0x8c] sm:$0xf] %v373_v11  ;;  %v449_v49 = vld [vmem:[%s3305_s0 + $0x248] sm:$0xf]  ;;  %v451_v50 = vld [vmem:[%s3305_s0 + $0x250] sm:$0xf] }
  0x7d   : > { %376 = vst [vmem:[%s3310_s6 + $0x90] sm:$0xf] %v375_v12  ;;  %v453_v51 = vld [vmem:[%s3305_s0 + $0x258] sm:$0xf]  ;;  %v455_v52 = vld [vmem:[%s3305_s0 + $0x260] sm:$0xf] }
  0x7e   : > { %378 = vst [vmem:[%s3310_s6 + $0x94] sm:$0xf] %v377_v13  ;;  %v457_v53 = vld [vmem:[%s3305_s0 + $0x268] sm:$0xf]  ;;  %v459_v54 = vld [vmem:[%s3305_s0 + $0x270] sm:$0xf] }
  0x7f   : > { %380 = vst [vmem:[%s3310_s6 + $0x98] sm:$0xf] %v379_v14  ;;  %v461_v55 = vld [vmem:[%s3305_s0 + $0x278] sm:$0xf]  ;;  %v463_v56 = vld [vmem:[%s3305_s0 + $0x280] sm:$0xf] }
  0x80   : > { %382 = vst [vmem:[%s3310_s6 + $0x9c] sm:$0xf] %v381_v15  ;;  %v465_v57 = vld [vmem:[%s3305_s0 + $0x288] sm:$0xf]  ;;  %v467_v58 = vld [vmem:[%s3305_s0 + $0x290] sm:$0xf] }
  0x81   : > { %384 = vst [vmem:[%s3310_s6 + $0xa0] sm:$0xf] %v383_v16  ;;  %v469_v59 = vld [vmem:[%s3305_s0 + $0x298] sm:$0xf]  ;;  %v471_v60 = vld [vmem:[%s3305_s0 + $0x2a0] sm:$0xf] }
  0x82   : > { %386 = vst [vmem:[%s3310_s6 + $0xa4] sm:$0xf] %v385_v17  ;;  %v473_v61 = vld [vmem:[%s3305_s0 + $0x2a8] sm:$0xf]  ;;  %v475_v62 = vld [vmem:[%s3305_s0 + $0x2b0] sm:$0xf] }
  0x83   : > { %388 = vst [vmem:[%s3310_s6 + $0xa8] sm:$0xf] %v387_v18  ;;  %v477_v63 = vld [vmem:[%s3305_s0 + $0x2b8] sm:$0xf]  ;;  %v479_v0 = vld [vmem:[%s3305_s0 + $0x2c0] sm:$0xf] }
  0x84   : > { %390 = vst [vmem:[%s3310_s6 + $0xac] sm:$0xf] %v389_v19  ;;  %v481_v1 = vld [vmem:[%s3305_s0 + $0x2c8] sm:$0xf]  ;;  %v483_v2 = vld [vmem:[%s3305_s0 + $0x2d0] sm:$0xf] }
  0x85   : > { %392 = vst [vmem:[%s3310_s6 + $0xb0] sm:$0xf] %v391_v20  ;;  %v485_v3 = vld [vmem:[%s3305_s0 + $0x2d8] sm:$0xf]  ;;  %v487_v4 = vld [vmem:[%s3305_s0 + $0x2e0] sm:$0xf] }
  0x86   : > { %394 = vst [vmem:[%s3310_s6 + $0xb4] sm:$0xf] %v393_v21  ;;  %v489_v5 = vld [vmem:[%s3305_s0 + $0x2e8] sm:$0xf]  ;;  %v491_v6 = vld [vmem:[%s3305_s0 + $0x2f0] sm:$0xf] }
  0x87   : > { %396 = vst [vmem:[%s3310_s6 + $0xb8] sm:$0xf] %v395_v22  ;;  %v493_v7 = vld [vmem:[%s3305_s0 + $0x2f8] sm:$0xf]  ;;  %v495_v8 = vld [vmem:[%s3305_s0 + $0x300] sm:$0xf] }
  0x88   : > { %398 = vst [vmem:[%s3310_s6 + $0xbc] sm:$0xf] %v397_v23  ;;  %v497_v9 = vld [vmem:[%s3305_s0 + $0x308] sm:$0xf]  ;;  %v499_v10 = vld [vmem:[%s3305_s0 + $0x310] sm:$0xf] }
  0x89   : > { %400 = vst [vmem:[%s3310_s6 + $0xc0] sm:$0xf] %v399_v24  ;;  %v501_v11 = vld [vmem:[%s3305_s0 + $0x318] sm:$0xf]  ;;  %v503_v12 = vld [vmem:[%s3305_s0 + $0x320] sm:$0xf] }
  0x8a   : > { %402 = vst [vmem:[%s3310_s6 + $0xc4] sm:$0xf] %v401_v25  ;;  %v505_v13 = vld [vmem:[%s3305_s0 + $0x328] sm:$0xf]  ;;  %v507_v14 = vld [vmem:[%s3305_s0 + $0x330] sm:$0xf] }
  0x8b   : > { %404 = vst [vmem:[%s3310_s6 + $0xc8] sm:$0xf] %v403_v26  ;;  %v509_v15 = vld [vmem:[%s3305_s0 + $0x338] sm:$0xf]  ;;  %v511_v16 = vld [vmem:[%s3305_s0 + $0x340] sm:$0xf] }
  0x8c   : > { %406 = vst [vmem:[%s3310_s6 + $0xcc] sm:$0xf] %v405_v27  ;;  %v513_v17 = vld [vmem:[%s3305_s0 + $0x348] sm:$0xf]  ;;  %v515_v18 = vld [vmem:[%s3305_s0 + $0x350] sm:$0xf] }
  0x8d   : > { %408 = vst [vmem:[%s3310_s6 + $0xd0] sm:$0xf] %v407_v28  ;;  %v517_v19 = vld [vmem:[%s3305_s0 + $0x358] sm:$0xf]  ;;  %v519_v20 = vld [vmem:[%s3305_s0 + $0x360] sm:$0xf] }
  0x8e   : > { %410 = vst [vmem:[%s3310_s6 + $0xd4] sm:$0xf] %v409_v29  ;;  %v521_v21 = vld [vmem:[%s3305_s0 + $0x368] sm:$0xf]  ;;  %v523_v22 = vld [vmem:[%s3305_s0 + $0x370] sm:$0xf] }
  0x8f   : > { %412 = vst [vmem:[%s3310_s6 + $0xd8] sm:$0xf] %v411_v30  ;;  %v525_v23 = vld [vmem:[%s3305_s0 + $0x378] sm:$0xf]  ;;  %v527_v24 = vld [vmem:[%s3305_s0 + $0x380] sm:$0xf] }
  0x90   : > { %414 = vst [vmem:[%s3310_s6 + $0xdc] sm:$0xf] %v413_v31  ;;  %v529_v25 = vld [vmem:[%s3305_s0 + $0x388] sm:$0xf]  ;;  %v531_v26 = vld [vmem:[%s3305_s0 + $0x390] sm:$0xf] }
  0x91   : > { %416 = vst [vmem:[%s3310_s6 + $0xe0] sm:$0xf] %v415_v32  ;;  %v533_v27 = vld [vmem:[%s3305_s0 + $0x398] sm:$0xf]  ;;  %v535_v28 = vld [vmem:[%s3305_s0 + $0x3a0] sm:$0xf] }
  0x92   : > { %418 = vst [vmem:[%s3310_s6 + $0xe4] sm:$0xf] %v417_v33  ;;  %v537_v29 = vld [vmem:[%s3305_s0 + $0x3a8] sm:$0xf]  ;;  %v539_v30 = vld [vmem:[%s3305_s0 + $0x3b0] sm:$0xf] }
  0x93   : > { %420 = vst [vmem:[%s3310_s6 + $0xe8] sm:$0xf] %v419_v34  ;;  %v541_v31 = vld [vmem:[%s3305_s0 + $0x3b8] sm:$0xf]  ;;  %v543_v32 = vld [vmem:[%s3305_s0 + $0x3c0] sm:$0xf] }
  0x94   : > { %422 = vst [vmem:[%s3310_s6 + $0xec] sm:$0xf] %v421_v35  ;;  %v545_v33 = vld [vmem:[%s3305_s0 + $0x3c8] sm:$0xf]  ;;  %v547_v34 = vld [vmem:[%s3305_s0 + $0x3d0] sm:$0xf] }
  0x95   : > { %424 = vst [vmem:[%s3310_s6 + $0xf0] sm:$0xf] %v423_v36  ;;  %v549_v35 = vld [vmem:[%s3305_s0 + $0x3d8] sm:$0xf]  ;;  %v551_v36 = vld [vmem:[%s3305_s0 + $0x3e0] sm:$0xf] }
  0x96   : > { %426 = vst [vmem:[%s3310_s6 + $0xf4] sm:$0xf] %v425_v37  ;;  %v553_v37 = vld [vmem:[%s3305_s0 + $0x3e8] sm:$0xf] }
  0x97   : > { %428 = vst [vmem:[%s3310_s6 + $0xf8] sm:$0xf] %v427_v38  ;;  %v555_v38 = vld [vmem:[%s3305_s0 + $0x3f0] sm:$0xf] }
  0x98   : > { %430 = vst [vmem:[%s3310_s6 + $0xfc] sm:$0xf] %v429_v39  ;;  %v557_v39 = vld [vmem:[%s3305_s0 + $0x3f8] sm:$0xf] }
  0x99   : > { %432 = vst [vmem:[%s3310_s6 + $0x100] sm:$0xf] %v431_v40  ;;  %v559_v40 = vld [vmem:[%s3305_s0 + $0x400] sm:$0xf] }
  0x9a   : > { %434 = vst [vmem:[%s3310_s6 + $0x104] sm:$0xf] %v433_v41  ;;  %v561_v41 = vld [vmem:[%s3305_s0 + $0x408] sm:$0xf] }
  0x9b   : > { %436 = vst [vmem:[%s3310_s6 + $0x108] sm:$0xf] %v435_v42  ;;  %v563_v42 = vld [vmem:[%s3305_s0 + $0x410] sm:$0xf] }
  0x9c   : > { %438 = vst [vmem:[%s3310_s6 + $0x10c] sm:$0xf] %v437_v43  ;;  %v565_v43 = vld [vmem:[%s3305_s0 + $0x418] sm:$0xf] }
  0x9d   : > { %440 = vst [vmem:[%s3310_s6 + $0x110] sm:$0xf] %v439_v44  ;;  %v567_v44 = vld [vmem:[%s3305_s0 + $0x420] sm:$0xf] }
  0x9e   : > { %442 = vst [vmem:[%s3310_s6 + $0x114] sm:$0xf] %v441_v45  ;;  %v569_v45 = vld [vmem:[%s3305_s0 + $0x428] sm:$0xf] }
  0x9f   : > { %444 = vst [vmem:[%s3310_s6 + $0x118] sm:$0xf] %v443_v46  ;;  %v571_v46 = vld [vmem:[%s3305_s0 + $0x430] sm:$0xf] }
  0xa0   : > { %446 = vst [vmem:[%s3310_s6 + $0x11c] sm:$0xf] %v445_v47  ;;  %v573_v47 = vld [vmem:[%s3305_s0 + $0x438] sm:$0xf] }
  0xa1   : > { %448 = vst [vmem:[%s3310_s6 + $0x120] sm:$0xf] %v447_v48  ;;  %v575_v48 = vld [vmem:[%s3305_s0 + $0x440] sm:$0xf] }
  0xa2   : > { %450 = vst [vmem:[%s3310_s6 + $0x124] sm:$0xf] %v449_v49  ;;  %v577_v49 = vld [vmem:[%s3305_s0 + $0x448] sm:$0xf] }
  0xa3   : > { %452 = vst [vmem:[%s3310_s6 + $0x128] sm:$0xf] %v451_v50  ;;  %v579_v50 = vld [vmem:[%s3305_s0 + $0x450] sm:$0xf] }
  0xa4   : > { %454 = vst [vmem:[%s3310_s6 + $0x12c] sm:$0xf] %v453_v51  ;;  %v581_v51 = vld [vmem:[%s3305_s0 + $0x458] sm:$0xf] }
  0xa5   : > { %456 = vst [vmem:[%s3310_s6 + $0x130] sm:$0xf] %v455_v52  ;;  %v583_v52 = vld [vmem:[%s3305_s0 + $0x460] sm:$0xf] }
  0xa6   : > { %458 = vst [vmem:[%s3310_s6 + $0x134] sm:$0xf] %v457_v53  ;;  %v585_v53 = vld [vmem:[%s3305_s0 + $0x468] sm:$0xf] }
  0xa7   : > { %460 = vst [vmem:[%s3310_s6 + $0x138] sm:$0xf] %v459_v54  ;;  %v587_v54 = vld [vmem:[%s3305_s0 + $0x470] sm:$0xf] }
  0xa8   : > { %462 = vst [vmem:[%s3310_s6 + $0x13c] sm:$0xf] %v461_v55  ;;  %v589_v55 = vld [vmem:[%s3305_s0 + $0x478] sm:$0xf] }
  0xa9   : > { %464 = vst [vmem:[%s3310_s6 + $0x140] sm:$0xf] %v463_v56 }
  0xaa   : > { %466 = vst [vmem:[%s3310_s6 + $0x144] sm:$0xf] %v465_v57 }
  0xab   : > { %468 = vst [vmem:[%s3310_s6 + $0x148] sm:$0xf] %v467_v58 }
  0xac   : > { %470 = vst [vmem:[%s3310_s6 + $0x14c] sm:$0xf] %v469_v59 }
  0xad   : > { %472 = vst [vmem:[%s3310_s6 + $0x150] sm:$0xf] %v471_v60 }
  0xae   : > { %474 = vst [vmem:[%s3310_s6 + $0x154] sm:$0xf] %v473_v61 }
  0xaf   : > { %476 = vst [vmem:[%s3310_s6 + $0x158] sm:$0xf] %v475_v62 }
  0xb0   : > { %478 = vst [vmem:[%s3310_s6 + $0x15c] sm:$0xf] %v477_v63 }
  0xb1   : > { %480 = vst [vmem:[%s3310_s6 + $0x160] sm:$0xf] %v479_v0 }
  0xb2   : > { %482 = vst [vmem:[%s3310_s6 + $0x164] sm:$0xf] %v481_v1 }
  0xb3   : > { %484 = vst [vmem:[%s3310_s6 + $0x168] sm:$0xf] %v483_v2 }
  0xb4   : > { %486 = vst [vmem:[%s3310_s6 + $0x16c] sm:$0xf] %v485_v3 }
  0xb5   : > { %488 = vst [vmem:[%s3310_s6 + $0x170] sm:$0xf] %v487_v4 }
  0xb6   : > { %490 = vst [vmem:[%s3310_s6 + $0x174] sm:$0xf] %v489_v5 }
  0xb7   : > { %492 = vst [vmem:[%s3310_s6 + $0x178] sm:$0xf] %v491_v6 }
  0xb8   : > { %494 = vst [vmem:[%s3310_s6 + $0x17c] sm:$0xf] %v493_v7 }
  0xb9   : > { %496 = vst [vmem:[%s3310_s6 + $0x180] sm:$0xf] %v495_v8 }
  0xba   : > { %498 = vst [vmem:[%s3310_s6 + $0x184] sm:$0xf] %v497_v9 }
  0xbb   : > { %500 = vst [vmem:[%s3310_s6 + $0x188] sm:$0xf] %v499_v10 }
  0xbc   : > { %502 = vst [vmem:[%s3310_s6 + $0x18c] sm:$0xf] %v501_v11 }
  0xbd   : > { %504 = vst [vmem:[%s3310_s6 + $0x190] sm:$0xf] %v503_v12 }
  0xbe   : > { %506 = vst [vmem:[%s3310_s6 + $0x194] sm:$0xf] %v505_v13 }
  0xbf   : > { %508 = vst [vmem:[%s3310_s6 + $0x198] sm:$0xf] %v507_v14 }
  0xc0   : > { %510 = vst [vmem:[%s3310_s6 + $0x19c] sm:$0xf] %v509_v15 }
  0xc1   : > { %512 = vst [vmem:[%s3310_s6 + $0x1a0] sm:$0xf] %v511_v16 }
  0xc2   : > { %514 = vst [vmem:[%s3310_s6 + $0x1a4] sm:$0xf] %v513_v17 }
  0xc3   : > { %516 = vst [vmem:[%s3310_s6 + $0x1a8] sm:$0xf] %v515_v18 }
  0xc4   : > { %518 = vst [vmem:[%s3310_s6 + $0x1ac] sm:$0xf] %v517_v19 }
  0xc5   : > { %520 = vst [vmem:[%s3310_s6 + $0x1b0] sm:$0xf] %v519_v20 }
  0xc6   : > { %522 = vst [vmem:[%s3310_s6 + $0x1b4] sm:$0xf] %v521_v21 }
  0xc7   : > { %524 = vst [vmem:[%s3310_s6 + $0x1b8] sm:$0xf] %v523_v22 }
  0xc8   : > { %526 = vst [vmem:[%s3310_s6 + $0x1bc] sm:$0xf] %v525_v23 }
  0xc9   : > { %528 = vst [vmem:[%s3310_s6 + $0x1c0] sm:$0xf] %v527_v24 }
  0xca   : > { %530 = vst [vmem:[%s3310_s6 + $0x1c4] sm:$0xf] %v529_v25 }
  0xcb   : > { %532 = vst [vmem:[%s3310_s6 + $0x1c8] sm:$0xf] %v531_v26 }
  0xcc   : > { %534 = vst [vmem:[%s3310_s6 + $0x1cc] sm:$0xf] %v533_v27 }
  0xcd   : > { %536 = vst [vmem:[%s3310_s6 + $0x1d0] sm:$0xf] %v535_v28 }
  0xce   : > { %538 = vst [vmem:[%s3310_s6 + $0x1d4] sm:$0xf] %v537_v29 }
  0xcf   : > { %540 = vst [vmem:[%s3310_s6 + $0x1d8] sm:$0xf] %v539_v30 }
  0xd0   : > { %542 = vst [vmem:[%s3310_s6 + $0x1dc] sm:$0xf] %v541_v31 }
  0xd1   : > { %544 = vst [vmem:[%s3310_s6 + $0x1e0] sm:$0xf] %v543_v32 }
  0xd2   : > { %546 = vst [vmem:[%s3310_s6 + $0x1e4] sm:$0xf] %v545_v33 }
  0xd3   : > { %548 = vst [vmem:[%s3310_s6 + $0x1e8] sm:$0xf] %v547_v34 }
  0xd4   : > { %550 = vst [vmem:[%s3310_s6 + $0x1ec] sm:$0xf] %v549_v35 }
  0xd5   : > { %552 = vst [vmem:[%s3310_s6 + $0x1f0] sm:$0xf] %v551_v36 }
  0xd6   : > { %554 = vst [vmem:[%s3310_s6 + $0x1f4] sm:$0xf] %v553_v37 }
  0xd7   : > { %556 = vst [vmem:[%s3310_s6 + $0x1f8] sm:$0xf] %v555_v38 }
  0xd8   : > { %558 = vst [vmem:[%s3310_s6 + $0x1fc] sm:$0xf] %v557_v39 }
  0xd9   : > { %560 = vst [vmem:[%s3310_s6 + $0x200] sm:$0xf] %v559_v40 }
  0xda   : > { %562 = vst [vmem:[%s3310_s6 + $0x204] sm:$0xf] %v561_v41 }
  0xdb   : > { %564 = vst [vmem:[%s3310_s6 + $0x208] sm:$0xf] %v563_v42 }
  0xdc   : > { %566 = vst [vmem:[%s3310_s6 + $0x20c] sm:$0xf] %v565_v43 }
  0xdd   : > { %568 = vst [vmem:[%s3310_s6 + $0x210] sm:$0xf] %v567_v44 }
  0xde   : > { %570 = vst [vmem:[%s3310_s6 + $0x214] sm:$0xf] %v569_v45 }
  0xdf   : > { %572 = vst [vmem:[%s3310_s6 + $0x218] sm:$0xf] %v571_v46 }
  0xe0   : > { %574 = vst [vmem:[%s3310_s6 + $0x21c] sm:$0xf] %v573_v47 }
  0xe1   : > { %576 = vst [vmem:[%s3310_s6 + $0x220] sm:$0xf] %v575_v48 }
  0xe2   : > { %578 = vst [vmem:[%s3310_s6 + $0x224] sm:$0xf] %v577_v49 }
  0xe3   : > { %580 = vst [vmem:[%s3310_s6 + $0x228] sm:$0xf] %v579_v50 }
  0xe4   : > { %582 = vst [vmem:[%s3310_s6 + $0x22c] sm:$0xf] %v581_v51 }
  0xe5   : > { %584 = vst [vmem:[%s3310_s6 + $0x230] sm:$0xf] %v583_v52 }
  0xe6   : > { %586 = vst [vmem:[%s3310_s6 + $0x234] sm:$0xf] %v585_v53 }
  0xe7   : > { %588 = vst [vmem:[%s3310_s6 + $0x238] sm:$0xf] %v587_v54 }
  0xe8   : > { %590 = vst [vmem:[%s3310_s6 + $0x23c] sm:$0xf] %v589_v55 }
  0xe9 PF: > { %p2315_p0 = scmp.ge.s32.totalorder %s3084_s22, 1  ;;  %p907_p1 = scmp.lt.s32.totalorder %s3084_s22, 5 }
  0xeb   : > { %p908_p2 = pnand %p2315_p0, %p907_p1 }
  0xec   : > { %s914_s5 = sand.u32 (!%p908_p2), 1, %s3060_s16   ;;  %s921_s23 = sand.u32 (!%p908_p2), 1, %s3052_s14  }
  0xed   : > { %911 = sbr.rel (%p908_p2) target bundleno = 602 (0x25a), region = 91  ;;  %s947_s0 = sand.u32 (!%p908_p2), 1, %s3044_s12  }
  0xee   : > { %s2906_s28 = smul.u32 (!%p908_p2), 288, %s914_s5  ;;  %s2316_s11 = sshll.u32 (!%p908_p2), %s947_s0, 5 }
  0xef   : > { %s2907_s7 = smul.u32 (!%p908_p2), 576, %s921_s23  ;;  %p953_p3 = scmp.lt.s32.totalorder (!%p908_p2), %s3072_s19, 1 }
  0xf0   : > { %s3610_s6 = scalar_lea.vmem (!%p908_p2), [#allocation3], %s2906_s28  ;;  %s3614_s25 = scalar_lea.vmem (!%p908_p2), [#allocation5], %s2316_s11 }
  0xf1   : > { %s3612_s1 = scalar_lea.vmem (!%p908_p2), [#allocation4], %s2907_s7  ;;  %p2317_p4 = scmp.ne.s32.totalorder (!%p908_p2), %s3068_s18, 0 }
  0xf2   : > { %s3604_s26 = scalar_select %p953_p3, %s3072_s19, 1 }
  0xf3   : > { %960 = sbr.rel (%p2317_p4) target bundleno = 257 (0x101), region = 103 }
  0xf4   : > { %s955_s4 = scalar_lea.vmem %s3862_s2, %s3604_s26 }
  0xf8   : > { %v3086_v56 = vmov 0.0  }
  0xf9   : > { %961 = vst [vmem:[#allocation2 + $0x30] sm:$0xff] %v3086_v56 }
  0xfa   : > { %962 = vst [vmem:[#allocation2] sm:$0xff] %v3086_v56 }
  0xfb   : > { %963 = vst [vmem:[#allocation2 + $0x18] sm:$0xff] %v3086_v56 }
  0xfc   : > { %964 = vst [vmem:[#allocation2 + $0x10] sm:$0xff] %v3086_v56 }
  0xfd   : > { %965 = vst [vmem:[#allocation2 + $0x8] sm:$0xff] %v3086_v56 }
  0xfe   : > { %966 = vst [vmem:[#allocation2 + $0x20] sm:$0xff] %v3086_v56 }
  0xff   : > { %967 = vst [vmem:[#allocation2 + $0x28] sm:$0xff] %v3086_v56 }
 0x100   : > { %968 = vst [vmem:[#allocation2 + $0x38] sm:$0xff] %v3086_v56 }
 0x101 PF: > { %v2800_v57 = vld [vmem:[%s3612_s1 + $0x38] sm:$0xff]  ;;  %v2799_v59 = vld [vmem:[%s3612_s1 + $0x30] sm:$0xff]  ;;  %v2798_v63 = vld [vmem:[%s3612_s1 + $0x28] sm:$0xff]  ;;  %p2750_p5 = scmp.ne.s32.totalorder %s3068_s18, 1 }
 0x102   : > { %v2816_v58 = vld [vmem:[%s3612_s1 + $0xb8] sm:$0xff]  ;;  %2888 = vmatpush.bf16.msra.mxu1 %v2800_v57  ;;  %1777 = vmatpush.bf16.msra.mxu0 %v2800_v57  ;;  %v2815_v60 = vld [vmem:[%s3612_s1 + $0xb0] sm:$0xff]  ;;  %v2814_v0 = vld [vmem:[%s3612_s1 + $0xa8] sm:$0xff] }
 0x103   : > { %1835 = vmatpush.bf16.msra.mxu2 %v2816_v58  ;;  %v2824_v61 = vld [vmem:[%s3612_s1 + $0xf8] sm:$0xff]  ;;  %v2823_v62 = vld [vmem:[%s3612_s1 + $0xf0] sm:$0xff]  ;;  %v2822_v1 = vld [vmem:[%s3612_s1 + $0xe8] sm:$0xff] }
 0x104   : > { %1864 = vmatpush.bf16.msra.mxu3 %v2824_v61  ;;  %v2797_v2 = vld [vmem:[%s3612_s1 + $0x20] sm:$0xff]  ;;  %v2796_v5 = vld [vmem:[%s3612_s1 + $0x18] sm:$0xff]  ;;  %v2795_v8 = vld [vmem:[%s3612_s1 + $0x10] sm:$0xff] }
 0x105   : > { %v2813_v3 = vld [vmem:[%s3612_s1 + $0xa0] sm:$0xff]  ;;  %v2812_v6 = vld [vmem:[%s3612_s1 + $0x98] sm:$0xff]  ;;  %v2811_v9 = vld [vmem:[%s3612_s1 + $0x90] sm:$0xff] }
 0x106   : > { %2889 = vmatpush.bf16.msra.mxu1 %v2799_v59  ;;  %1778 = vmatpush.bf16.msra.mxu0 %v2799_v59  ;;  %v2821_v4 = vld [vmem:[%s3612_s1 + $0xe0] sm:$0xff]  ;;  %v2820_v7 = vld [vmem:[%s3612_s1 + $0xd8] sm:$0xff]  ;;  %v2819_v10 = vld [vmem:[%s3612_s1 + $0xd0] sm:$0xff] }
 0x107   : > { %1836 = vmatpush.bf16.msra.mxu2 %v2815_v60  ;;  %v2794_v11 = vld [vmem:[%s3612_s1 + $0x8] sm:$0xff]  ;;  %v2793_v13 = vld [vmem:[%s3612_s1] sm:$0xff]  ;;  %v2392_v14 = vld [vmem:[%s3610_s6 + $0x90] sm:$0xf] }
 0x108   : > { %1865 = vmatpush.bf16.msra.mxu3 %v2823_v62  ;;  %v2810_v12 = vld [vmem:[%s3612_s1 + $0x88] sm:$0xff]  ;;  %v2779_v15 = vld [vmem:[%s3610_s6 + $0xb0] sm:$0xf0]  ;;  %v2808_v17 = vld [vmem:[%s3612_s1 + $0x78] sm:$0xff] }
 0x109   : > { %v2818_v16 = vld [vmem:[%s3612_s1 + $0xc8] sm:$0xff]  ;;  %v2320_v18 = vld [vmem:[%s3610_s6] sm:$0xf]  ;;  %v2761_v19 = vld [vmem:[%s3610_s6 + $0x20] sm:$0xf0]  ;;  %v2393_v25 = vor.u32 %v2779_v15, %v2392_v14 }
 0x10a   : > { %2890 = vmatpush.bf16.msra.mxu1 %v2798_v63  ;;  %1779 = vmatpush.bf16.msra.mxu0 %v2798_v63  ;;  %v2809_v20 = vld [vmem:[%s3612_s1 + $0x80] sm:$0xff]  ;;  %v2328_v21 = vld [vmem:[%s3610_s6 + $0x8] sm:$0xf]  ;;  %v2762_v22 = vld [vmem:[%s3610_s6 + $0x28] sm:$0xf0]  ;;  %v2321_v26 = vor.u32 %v2761_v19, %v2320_v18 }
 0x10b   : > { %1837 = vmatpush.bf16.msra.mxu2 %v2814_v0  ;;  %v2832_v23 = vld [vmem:[%s3612_s1 + $0x138] sm:$0xff]  ;;  %v2329_v27 = vor.u32 %v2762_v22, %v2328_v21  ;;  %v2817_v28 = vld [vmem:[%s3612_s1 + $0xc0] sm:$0xff]  ;;  %v2758_v29 = vld [vmem:[%s3610_s6 + $0xc] sm:$0xf] }
 0x10c   : > { %1866 = vmatpush.bf16.msra.mxu3 %v2822_v1  ;;  %v2848_v24 = vld [vmem:[%s3612_s1 + $0x1b8] sm:$0xff]  ;;  %v2330_v30 = vld [vmem:[%s3610_s6 + $0x2c] sm:$0xf0]  ;;  %v2806_v36 = vld [vmem:[%s3612_s1 + $0x68] sm:$0xff] }
 0x10d   : > { %v2807_v31 = vld [vmem:[%s3612_s1 + $0x70] sm:$0xff]  ;;  %v2856_v32 = vld [vmem:[%s3612_s1 + $0x1f8] sm:$0xff]  ;;  %v2333_v35 = vor.u32 %v2758_v29, %v2330_v30  ;;  %v2830_v38 = vld [vmem:[%s3612_s1 + $0x128] sm:$0xff] }
 0x10e   : > { %2891 = vmatpush.bf16.msra.mxu1 %v2797_v2  ;;  %1780 = vmatpush.bf16.msra.mxu0 %v2797_v2  ;;  %v2831_v33 = vld [vmem:[%s3612_s1 + $0x130] sm:$0xff]  ;;  %v2846_v39 = vld [vmem:[%s3612_s1 + $0x1a8] sm:$0xff]  ;;  %v2805_v40 = vld [vmem:[%s3612_s1 + $0x60] sm:$0xff] }
 0x10f   : > { %1838 = vmatpush.bf16.msra.mxu2 %v2813_v3  ;;  %v2847_v34 = vld [vmem:[%s3612_s1 + $0x1b0] sm:$0xff]  ;;  %v2854_v41 = vld [vmem:[%s3612_s1 + $0x1e8] sm:$0xff]  ;;  %v2829_v42 = vld [vmem:[%s3612_s1 + $0x120] sm:$0xff] }
 0x110   : > { %1867 = vmatpush.bf16.msra.mxu3 %v2821_v4  ;;  %v2855_v37 = vld [vmem:[%s3612_s1 + $0x1f0] sm:$0xff]  ;;  %v2845_v43 = vld [vmem:[%s3612_s1 + $0x1a0] sm:$0xff]  ;;  %v2428_v44 = vld [vmem:[%s3610_s6 + $0xd8] sm:$0xf] }
 0x111   : > { %v2788_v45 = vld [vmem:[%s3610_s6 + $0xf8] sm:$0xf0]  ;;  %v2356_v46 = vld [vmem:[%s3610_s6 + $0x48] sm:$0xf]  ;;  %v2770_v47 = vld [vmem:[%s3610_s6 + $0x68] sm:$0xf0] }
 0x112   : > { %2892 = vmatpush.bf16.msra.mxu1 %v2796_v5  ;;  %1781 = vmatpush.bf16.msra.mxu0 %v2796_v5  ;;  %v2804_v48 = vld [vmem:[%s3612_s1 + $0x58] sm:$0xff]  ;;  %v2364_v49 = vld [vmem:[%s3610_s6 + $0x50] sm:$0xf]  ;;  %v2771_v50 = vld [vmem:[%s3610_s6 + $0x70] sm:$0xf0]  ;;  %v2429_v52 = vor.u32 %v2788_v45, %v2428_v44  ;;  %v2357_v53 = vor.u32 %v2770_v47, %v2356_v46 }
 0x113   : > { %1839 = vmatpush.bf16.msra.mxu2 %v2812_v6  ;;  %v2828_v51 = vld [vmem:[%s3612_s1 + $0x118] sm:$0xff]  ;;  %v2365_v54 = vor.u32 %v2771_v50, %v2364_v49  ;;  %v2767_v55 = vld [vmem:[%s3610_s6 + $0x54] sm:$0xf]  ;;  %v2802_v61 = vld [vmem:[%s3612_s1 + $0x48] sm:$0xff] }
 0x114   : > { %1868 = vmatpush.bf16.msra.mxu3 %v2820_v7  ;;  %v2366_v56 = vld [vmem:[%s3610_s6 + $0x74] sm:$0xf0]  ;;  %v2803_v57 = vld [vmem:[%s3612_s1 + $0x50] sm:$0xff]  ;;  %v2853_v62 = vld [vmem:[%s3612_s1 + $0x1e0] sm:$0xff] }
 0x115   : > { %v2827_v58 = vld [vmem:[%s3612_s1 + $0x110] sm:$0xff]  ;;  %v2369_v59 = vor.u32 %v2767_v55, %v2366_v56  ;;  %v2844_v60 = vld [vmem:[%s3612_s1 + $0x198] sm:$0xff]  ;;  %v2826_v63 = vld [vmem:[%s3612_s1 + $0x108] sm:$0xff] }
 0x116   : > { %2893 = vmatpush.bf16.msra.mxu1 %v2795_v8  ;;  %1782 = vmatpush.bf16.msra.mxu0 %v2795_v8  ;;  %v2843_v0 = vld [vmem:[%s3612_s1 + $0x190] sm:$0xff]  ;;  %v2852_v1 = vld [vmem:[%s3612_s1 + $0x1d8] sm:$0xff]  ;;  %v2801_v2 = vld [vmem:[%s3612_s1 + $0x40] sm:$0xff] }
 0x117   : > { %1840 = vmatpush.bf16.msra.mxu2 %v2811_v9  ;;  %v2840_v3 = vld [vmem:[%s3612_s1 + $0x178] sm:$0xff]  ;;  %v2825_v4 = vld [vmem:[%s3612_s1 + $0x100] sm:$0xff]  ;;  %v2322_v7 = vld [vmem:[%s3610_s6 + $0x24] sm:$0xf0] }
 0x118   : > { %1869 = vmatpush.bf16.msra.mxu3 %v2819_v10  ;;  %v2757_v5 = vld [vmem:[%s3610_s6 + $0x4] sm:$0xf]  ;;  %v2864_v6 = vld [vmem:[%s3612_s1 + $0x238] sm:$0xff]  ;;  %v2336_v8 = vld [vmem:[%s3610_s6 + $0x10] sm:$0xf] }
 0x119   : > { %v2763_v9 = vld [vmem:[%s3610_s6 + $0x30] sm:$0xf0]  ;;  %v2400_v10 = vld [vmem:[%s3610_s6 + $0x98] sm:$0xf]  ;;  %v2838_v19 = vld [vmem:[%s3612_s1 + $0x168] sm:$0xff] }
 0x11a   : > { %2894 = vmatpush.bf16.msra.mxu1 %v2794_v11  ;;  %1783 = vmatpush.bf16.msra.mxu0 %v2794_v11  ;;  %v2780_v11 = vld [vmem:[%s3610_s6 + $0xb8] sm:$0xf0]  ;;  %v2337_v14 = vor.u32 %v2763_v9, %v2336_v8  ;;  %v2863_v18 = vld [vmem:[%s3612_s1 + $0x230] sm:$0xff]  ;;  %v2841_v22 = vld [vmem:[%s3612_s1 + $0x180] sm:$0xff] }
 0x11b   : > { %1841 = vmatpush.bf16.msra.mxu2 %v2810_v12  ;;  %v2839_v12 = vld [vmem:[%s3612_s1 + $0x170] sm:$0xff]  ;;  %v2401_v15 = vor.u32 %v2780_v11, %v2400_v10  ;;  %v2766_v29 = vld [vmem:[%s3610_s6 + $0x4c] sm:$0xf]  ;;  %v2860_v44 = vld [vmem:[%s3612_s1 + $0x218] sm:$0xff] }
 0x11c   : > { %1870 = vmatpush.bf16.msra.mxu3 %v2818_v16  ;;  %v2776_v16 = vld [vmem:[%s3610_s6 + $0x9c] sm:$0xf]  ;;  %v2358_v30 = vld [vmem:[%s3610_s6 + $0x6c] sm:$0xf0]  ;;  %v2833_v45 = vld [vmem:[%s3612_s1 + $0x140] sm:$0xff] }
 0x11d   : > { %v2859_v46 = vld [vmem:[%s3612_s1 + $0x210] sm:$0xff]  ;;  %v2394_v49 = vld [vmem:[%s3610_s6 + $0xb4] sm:$0xf0]  ;;  %v2408_v50 = vld [vmem:[%s3610_s6 + $0xa0] sm:$0xf] }
 0x11e   : > { %2895 = vmatpush.bf16.msra.mxu1 %v2793_v13  ;;  %1784 = vmatpush.bf16.msra.mxu0 %v2793_v13  ;;  %v2325_v13 = vor.u32 %v2757_v5, %v2322_v7  ;;  %v2775_v47 = vld [vmem:[%s3610_s6 + $0x94] sm:$0xf]  ;;  %v2382_v7 = vld [vmem:[%s3610_s6 + $0x84] sm:$0xf0]  ;;  %v2338_v10 = vld [vmem:[%s3610_s6 + $0x34] sm:$0xf0] }
 0x11f   : > { %1842 = vmatpush.bf16.msra.mxu2 %v2809_v20  ;;  %v2842_v20 = vld [vmem:[%s3612_s1 + $0x188] sm:$0xff]  ;;  %v2759_v9 = vld [vmem:[%s3610_s6 + $0x14] sm:$0xf]  ;;  %v2352_v11 = vld [vmem:[%s3610_s6 + $0x20] sm:$0xf] }
 0x120   : > { %1871 = vmatpush.bf16.msra.mxu3 %v2817_v28  ;;  %v2836_v28 = vld [vmem:[%s3612_s1 + $0x158] sm:$0xff] }
 0x121   : > { %1795 = vmatmul.bf16.vlgmr.msra.gmra.mxu1 %v2393_v25  ;;  %1785 = vmatmul.bf16.vlgmr.msra.gmra.mxu0 %v2321_v26  ;;  %v2837_v25 = vld [vmem:[%s3612_s1 + $0x160] sm:$0xff]  ;;  %v2850_v26 = vld [vmem:[%s3612_s1 + $0x1c8] sm:$0xff] }
 0x122   : > { %1806 = vmatpush.bf16.msrb.mxu1 %v2808_v17  ;;  %1893 = vmatpush.bf16.msrb.mxu0 %v2832_v23  ;;  %v2402_v17 = vld [vmem:[%s3610_s6 + $0xbc] sm:$0xf0]  ;;  %v2851_v23 = vld [vmem:[%s3612_s1 + $0x1d0] sm:$0xff] }
 0x123   : > { %1951 = vmatpush.bf16.msrb.mxu2 %v2848_v24  ;;  %1872 = vmatmul.bf16.vlgmr.msra.gmra.mxu3 %v2333_v35  ;;  %v2405_v21 = vor.u32 %v2776_v16, %v2402_v17  ;;  %v2862_v24 = vld [vmem:[%s3612_s1 + $0x228] sm:$0xff]  ;;  %v2835_v35 = vld [vmem:[%s3612_s1 + $0x150] sm:$0xff] }
 0x124   : > { %1843 = vmatmul.bf16.vlgmr.msra.gmra.mxu2 %v2329_v27  ;;  %1980 = vmatpush.bf16.msrb.mxu3 %v2856_v32  ;;  %v2861_v27 = vld [vmem:[%s3612_s1 + $0x220] sm:$0xff]  ;;  %v2772_v32 = vld [vmem:[%s3610_s6 + $0x78] sm:$0xf0] }
 0x126   : > { %1807 = vmatpush.bf16.msrb.mxu1 %v2807_v31  ;;  %1894 = vmatpush.bf16.msrb.mxu0 %v2831_v33  ;;  %v2372_v31 = vld [vmem:[%s3610_s6 + $0x58] sm:$0xf]  ;;  %v2436_v33 = vld [vmem:[%s3610_s6 + $0xe0] sm:$0xf] }
 0x127   : > { %1952 = vmatpush.bf16.msrb.mxu2 %v2847_v34  ;;  %v2789_v34 = vld [vmem:[%s3610_s6 + $0x100] sm:$0xf0] }
 0x128   : > { %1981 = vmatpush.bf16.msrb.mxu3 %v2855_v37  ;;  %v2373_v37 = vor.u32 %v2772_v32, %v2372_v31  ;;  %v2454_v31 = vld [vmem:[%s3610_s6 + $0x114] sm:$0xf0] }
 0x12a   : > { %1808 = vmatpush.bf16.msrb.mxu1 %v2806_v36  ;;  %1895 = vmatpush.bf16.msrb.mxu0 %v2830_v38  ;;  %v2361_v36 = vor.u32 %v2766_v29, %v2358_v30  ;;  %v2437_v38 = vor.u32 %v2789_v34, %v2436_v33  ;;  %v2787_v30 = vld [vmem:[%s3610_s6 + $0xf4] sm:$0xf]  ;;  %v2777_v33 = vld [vmem:[%s3610_s6 + $0xa4] sm:$0xf]  ;;  %v2410_v34 = vld [vmem:[%s3610_s6 + $0xc4] sm:$0xf0] }
 0x12b   : > { %1953 = vmatpush.bf16.msrb.mxu2 %v2846_v39  ;;  %v2785_v39 = vld [vmem:[%s3610_s6 + $0xe4] sm:$0xf]  ;;  %v2457_v32 = vor.u32 %v2787_v30, %v2454_v31 }
 0x12c   : > { %1982 = vmatpush.bf16.msrb.mxu3 %v2854_v41 }
 0x12e   : > { %1809 = vmatpush.bf16.msrb.mxu1 %v2805_v40  ;;  %1896 = vmatpush.bf16.msrb.mxu0 %v2829_v42  ;;  %v2438_v40 = vld [vmem:[%s3610_s6 + $0x104] sm:$0xf0] }
 0x12f   : > { %1954 = vmatpush.bf16.msrb.mxu2 %v2845_v43  ;;  %v2441_v41 = vor.u32 %v2785_v39, %v2438_v40  ;;  %v2834_v42 = vld [vmem:[%s3612_s1 + $0x148] sm:$0xff]  ;;  %v2849_v43 = vld [vmem:[%s3612_s1 + $0x1c0] sm:$0xff]  ;;  %v2413_v39 = vor.u32 %v2777_v33, %v2410_v34 }
 0x130   : > { %1983 = vmatpush.bf16.msrb.mxu3 %v2853_v62  ;;  %v2430_v62 = vld [vmem:[%s3610_s6 + $0xfc] sm:$0xf0] }
 0x131   : > { %1800 = vmatmul.bf16.gmra.mxu1 %v2429_v52  ;;  %1790 = vmatmul.bf16.gmra.mxu0 %v2357_v53  ;;  %v2344_v52 = vld [vmem:[%s3610_s6 + $0x18] sm:$0xf]  ;;  %v2764_v53 = vld [vmem:[%s3610_s6 + $0x38] sm:$0xf0] }
 0x132   : > { %1810 = vmatpush.bf16.msrb.mxu1 %v2804_v48  ;;  %1897 = vmatpush.bf16.msrb.mxu0 %v2828_v51  ;;  %v2858_v48 = vld [vmem:[%s3612_s1 + $0x208] sm:$0xff]  ;;  %v2781_v51 = vld [vmem:[%s3610_s6 + $0xc0] sm:$0xf0]  ;;  %v2345_v56 = vor.u32 %v2764_v53, %v2344_v52 }
 0x133   : > { %1955 = vmatpush.bf16.msrb.mxu2 %v2844_v60  ;;  %1877 = vmatmul.bf16.gmra.mxu3 %v2369_v59  ;;  %v2409_v55 = vor.u32 %v2781_v51, %v2408_v50  ;;  %v2857_v60 = vld [vmem:[%s3612_s1 + $0x200] sm:$0xff] }
 0x134   : > { %1848 = vmatmul.bf16.gmra.mxu2 %v2365_v54  ;;  %1984 = vmatpush.bf16.msrb.mxu3 %v2852_v1  ;;  %v2397_v54 = vor.u32 %v2775_v47, %v2394_v49  ;;  %v2380_v1 = vld [vmem:[%s3610_s6 + $0x60] sm:$0xf]  ;;  %v2446_v49 = vld [vmem:[%s3610_s6 + $0x10c] sm:$0xf0] }
 0x136   : > { %1811 = vmatpush.bf16.msrb.mxu1 %v2803_v57  ;;  %1898 = vmatpush.bf16.msrb.mxu0 %v2827_v58  ;;  %v2760_v57 = vld [vmem:[%s3610_s6 + $0x1c] sm:$0xf]  ;;  %v2346_v58 = vld [vmem:[%s3610_s6 + $0x3c] sm:$0xf0] }
 0x137   : > { %1956 = vmatpush.bf16.msrb.mxu2 %v2843_v0  ;;  %v2349_v59 = vor.u32 %v2760_v57, %v2346_v58  ;;  %v2790_v0 = vld [vmem:[%s3610_s6 + $0x108] sm:$0xf0] }
 0x138   : > { %1985 = vmatpush.bf16.msrb.mxu3 %v2851_v23  ;;  %v2388_v23 = vld [vmem:[%s3610_s6 + $0x68] sm:$0xf] }
 0x13a   : > { %1812 = vmatpush.bf16.msrb.mxu1 %v2802_v61  ;;  %1899 = vmatpush.bf16.msrb.mxu0 %v2826_v63  ;;  %v2784_v61 = vld [vmem:[%s3610_s6 + $0xdc] sm:$0xf]  ;;  %v2444_v63 = vld [vmem:[%s3610_s6 + $0xe8] sm:$0xf] }
 0x13b   : > { %1957 = vmatpush.bf16.msrb.mxu2 %v2842_v20 }
 0x13c   : > { %1986 = vmatpush.bf16.msrb.mxu3 %v2850_v26  ;;  %v2791_v26 = vld [vmem:[%s3610_s6 + $0x110] sm:$0xf0] }
 0x13e   : > { %1813 = vmatpush.bf16.msrb.mxu1 %v2801_v2  ;;  %1900 = vmatpush.bf16.msrb.mxu0 %v2825_v4  ;;  %v2773_v2 = vld [vmem:[%s3610_s6 + $0x80] sm:$0xf0]  ;;  %v2445_v4 = vor.u32 %v2790_v0, %v2444_v63 }
 0x13f   : > { %1958 = vmatpush.bf16.msrb.mxu2 %v2841_v22  ;;  %v2381_v5 = vor.u32 %v2773_v2, %v2380_v1  ;;  %v2374_v22 = vld [vmem:[%s3610_s6 + $0x7c] sm:$0xf0] }
 0x140   : > { %1987 = vmatpush.bf16.msrb.mxu3 %v2849_v43 }
 0x141   : > { %1814 = vmatmul.bf16.vlgmr.msrb.gmra.mxu1 %v2325_v13  ;;  %1901 = vmatmul.bf16.vlgmr.msrb.gmra.mxu0 %v2337_v14  ;;  %v2416_v13 = vld [vmem:[%s3610_s6 + $0xa8] sm:$0xf]  ;;  %v2782_v14 = vld [vmem:[%s3610_s6 + $0xc8] sm:$0xf0] }
 0x142   : > { %1922 = vmatpush.bf16.msra.mxu1 %v2840_v3  ;;  %2009 = vmatpush.bf16.msra.mxu0 %v2864_v6  ;;  %v2433_v3 = vor.u32 %v2784_v61, %v2430_v62  ;;  %v2417_v17 = vor.u32 %v2782_v14, %v2416_v13 }
 0x143   : > { %1882 = vmatmul.bf16.gmra.mxu3 %v2405_v21  ;;  %2896 = vmatpush.bf16.msra.mxu2 %v2864_v6  ;;  %v2769_v6 = vld [vmem:[%s3610_s6 + $0x64] sm:$0xf]  ;;  %v2768_v21 = vld [vmem:[%s3610_s6 + $0x5c] sm:$0xf] }
 0x144   : > { %1853 = vmatmul.bf16.gmra.mxu2 %v2401_v15  ;;  %v2385_v8 = vor.u32 %v2769_v6, %v2382_v7  ;;  %v2341_v15 = vor.u32 %v2759_v9, %v2338_v10 }
 0x146   : > { %1923 = vmatpush.bf16.msra.mxu1 %v2839_v12  ;;  %2010 = vmatpush.bf16.msra.mxu0 %v2863_v18  ;;  %v2765_v12 = vld [vmem:[%s3610_s6 + $0x40] sm:$0xf0] }
 0x147   : > { %2897 = vmatpush.bf16.msra.mxu2 %v2863_v18  ;;  %v2353_v16 = vor.u32 %v2765_v12, %v2352_v11  ;;  %v2778_v18 = vld [vmem:[%s3610_s6 + $0xac] sm:$0xf] }
 0x14a   : > { %1924 = vmatpush.bf16.msra.mxu1 %v2838_v19  ;;  %2011 = vmatpush.bf16.msra.mxu0 %v2862_v24  ;;  %v2418_v19 = vld [vmem:[%s3610_s6 + $0xcc] sm:$0xf0] }
 0x14b   : > { %2898 = vmatpush.bf16.msra.mxu2 %v2862_v24  ;;  %v2421_v20 = vor.u32 %v2778_v18, %v2418_v19  ;;  %v2774_v24 = vld [vmem:[%s3610_s6 + $0x88] sm:$0xf0] }
 0x14e   : > { %1925 = vmatpush.bf16.msra.mxu1 %v2837_v25  ;;  %2012 = vmatpush.bf16.msra.mxu0 %v2861_v27  ;;  %v2452_v25 = vld [vmem:[%s3610_s6 + $0xf0] sm:$0xf] }
 0x14f   : > { %2899 = vmatpush.bf16.msra.mxu2 %v2861_v27  ;;  %v2377_v27 = vor.u32 %v2768_v21, %v2374_v22  ;;  %v2453_v29 = vor.u32 %v2791_v26, %v2452_v25 }
 0x151   : > { %1819 = vmatmul.bf16.gmra.mxu1 %v2361_v36  ;;  %1906 = vmatmul.bf16.gmra.mxu0 %v2373_v37  ;;  %v2783_v36 = vld [vmem:[%s3610_s6 + $0xd0] sm:$0xf0]  ;;  %v2460_v37 = vld [vmem:[%s3610_s6 + $0xf8] sm:$0xf] }
 0x152   : > { %1926 = vmatpush.bf16.msra.mxu1 %v2836_v28  ;;  %2013 = vmatpush.bf16.msra.mxu0 %v2860_v44  ;;  %v2389_v28 = vor.u32 %v2774_v24, %v2388_v23 }
 0x153   : > { %1887 = vmatmul.bf16.gmra.mxu3 %v2441_v41  ;;  %2900 = vmatpush.bf16.msra.mxu2 %v2860_v44 }
 0x154   : > { %1858 = vmatmul.bf16.gmra.mxu2 %v2437_v38  ;;  %v2792_v38 = vld [vmem:[%s3610_s6 + $0x118] sm:$0xf0] }
 0x155   : > { %v2461_v43 = vor.u32 %v2792_v38, %v2460_v37 }
 0x156   : > { %1927 = vmatpush.bf16.msra.mxu1 %v2835_v35  ;;  %2014 = vmatpush.bf16.msra.mxu0 %v2859_v46  ;;  %v2424_v35 = vld [vmem:[%s3610_s6 + $0xb0] sm:$0xf] }
 0x157   : > { %2901 = vmatpush.bf16.msra.mxu2 %v2859_v46  ;;  %v2425_v40 = vor.u32 %v2783_v36, %v2424_v35 }
 0x15a   : > { %1928 = vmatpush.bf16.msra.mxu1 %v2834_v42  ;;  %2015 = vmatpush.bf16.msra.mxu0 %v2858_v48 }
 0x15b   : > { %2902 = vmatpush.bf16.msra.mxu2 %v2858_v48  ;;  %v2786_v48 = vld [vmem:[%s3610_s6 + $0xec] sm:$0xf] }
 0x15c   : > { %v2449_v50 = vor.u32 %v2786_v48, %v2446_v49 }
 0x15e   : > { %1929 = vmatpush.bf16.msra.mxu1 %v2833_v45  ;;  %2016 = vmatpush.bf16.msra.mxu0 %v2857_v60 }
 0x15f   : > { %2903 = vmatpush.bf16.msra.mxu2 %v2857_v60 }
 0x161   : > { %1824 = vmatmul.bf16.gmra.mxu1 %v2397_v54  ;;  %1911 = vmatmul.bf16.gmra.mxu0 %v2409_v55 }
 0x163   : > { %1988 = vmatmul.bf16.vlgmr.msrb.gmra.mxu3 %v2349_v59 }
 0x164   : > { %1959 = vmatmul.bf16.vlgmr.msrb.gmra.mxu2 %v2345_v56 }
 0x171   : > { %1829 = vmatmul.bf16.gmra.mxu1 %v2433_v3  ;;  %1916 = vmatmul.bf16.gmra.mxu0 %v2445_v4 }
 0x173   : > { %1993 = vmatmul.bf16.gmra.mxu3 %v2385_v8 }
 0x174   : > { %1964 = vmatmul.bf16.gmra.mxu2 %v2381_v5 }
 0x181   : > { %1930 = vmatmul.bf16.vlgmr.msra.gmra.mxu1 %v2341_v15  ;;  %2017 = vmatmul.bf16.vlgmr.msra.gmra.mxu0 %v2353_v16 }
 0x183   : > { %1998 = vmatmul.bf16.gmra.mxu3 %v2421_v20 }
 0x184   : > { %1969 = vmatmul.bf16.gmra.mxu2 %v2417_v17 }
 0x191   : > { %1935 = vmatmul.bf16.gmra.mxu1 %v2377_v27  ;;  %2022 = vmatmul.bf16.gmra.mxu0 %v2389_v28 }
 0x193   : > { %2003 = vmatmul.bf16.gmra.mxu3 %v2457_v32 }
 0x194   : > { %1974 = vmatmul.bf16.gmra.mxu2 %v2453_v29 }
 0x19e   : > { %v1796_v41 = vpop.f32.mrf.mxu1  ;;  %v1786_v42 = vpop.f32.mrf.mxu0 }
 0x1a1   : > { %1940 = vmatmul.bf16.gmra.mxu1 %v2413_v39  ;;  %2027 = vmatmul.bf16.gmra.mxu0 %v2425_v40 }
 0x1a4   : > { %2032 = vmatmul.bf16.vlgmr.msra.gmra.mxu2 %v2461_v43 }
 0x1a6   : > { %v1798_v45 = vpop.f32.mrf.mxu1  ;;  %v1788_v46 = vpop.f32.mrf.mxu0 }
 0x1a7   : > { %v1844_v44 = vpop.f32.mrf.mxu2  ;;  %v1873_v47 = vpop.f32.mrf.mxu3 }
 0x1ae   : > { %v1801_v52 = vpop.f32.mrf.mxu1  ;;  %v1791_v53 = vpop.f32.mrf.mxu0 }
 0x1af   : > { %v1846_v51 = vpop.f32.mrf.mxu2  ;;  %v1875_v54 = vpop.f32.mrf.mxu3 }
 0x1b1   : > { %1945 = vmatmul.bf16.gmra.mxu1 %v2449_v50 }
 0x1b6   : > { %v1803_v56 = vpop.f32.mrf.mxu1  ;;  %v1793_v57 = vpop.f32.mrf.mxu0 }
 0x1b7   : > { %v1849_v55 = vpop.f32.mrf.mxu2  ;;  %v3761_v58 = vpop.f32.mrf.mxu3 }
 0x1be   : > { %v1815_v60 = vpop.f32.mrf.mxu1  ;;  %v1902_v61 = vpop.f32.mrf.mxu0 }
 0x1bf   : > { %v1851_v59 = vpop.f32.mrf.mxu2  ;;  %v1816_v62 = vadd.f32 %v1815_v60, %v1786_v42  ;;  %v3763_v0 = vpop.f32.mrf.mxu3 }
 0x1c1   : > { %v1845_v63 = vadd.f32 %v1844_v44, %v1816_v62 }
 0x1c3   : > { %v1874_v40 = vadd.f32 %v1873_v47, %v1845_v63 }
 0x1c5   : > { %v1903_v42 = vadd.f32 %v1902_v61, %v1874_v40 }
 0x1c6   : > { %v1817_v2 = vpop.f32.mrf.mxu1  ;;  %v1904_v3 = vpop.f32.mrf.mxu0 }
 0x1c7   : > { %v1854_v1 = vpop.f32.mrf.mxu2  ;;  %v1818_v4 = vadd.f32 %v1817_v2, %v1788_v46  ;;  %v3765_v6 = vpop.f32.mrf.mxu3  ;;  %v970_v2 = vld [vmem:[#allocation2] sm:$0xff] }
 0x1c9   : > { %v1847_v5 = vadd.f32 %v1846_v51, %v1818_v4 }
 0x1cb   : > { %v1876_v49 = vadd.f32 %v1875_v54, %v1847_v5 }
 0x1ce   : > { %v1820_v8 = vpop.f32.mrf.mxu1  ;;  %v1907_v9 = vpop.f32.mrf.mxu0 }
 0x1cf   : > { %v1856_v7 = vpop.f32.mrf.mxu2  ;;  %v1821_v10 = vadd.f32 %v1820_v8, %v1791_v53  ;;  %v3767_v13 = vpop.f32.mrf.mxu3  ;;  %v1905_v53 = vadd.f32 %v1904_v3, %v1876_v49 }
 0x1d1   : > { %v1850_v11 = vadd.f32 %v1849_v55, %v1821_v10 }
 0x1d3   : > { %v1879_v47 = vadd.f32 %v3761_v58, %v1850_v11 }
 0x1d5   : > { %v1908_v4 = vadd.f32 %v1907_v9, %v1879_v47 }
 0x1d6   : > { %v1822_v14 = vpop.f32.mrf.mxu1  ;;  %v3769_v15 = vpop.f32.mrf.mxu0 }
 0x1d7   : > { %v1859_v12 = vpop.f32.mrf.mxu2  ;;  %v1823_v16 = vadd.f32 %v1822_v14, %v1793_v57  ;;  %v3773_v22 = vpop.f32.mrf.mxu3 }
 0x1d9   : > { %v1852_v17 = vadd.f32 %v1851_v59, %v1823_v16 }
 0x1db   : > { %v1881_v3 = vadd.f32 %v3763_v0, %v1852_v17  ;;  %v972_v0 = vld [vmem:[#allocation2 + $0x10] sm:$0xff] }
 0x1dd   : > { %v1910_v58 = vadd.f32 %v3769_v15, %v1881_v3 }
 0x1de   : > { %v1825_v19 = vpop.f32.mrf.mxu1  ;;  %v3771_v20 = vpop.f32.mrf.mxu0 }
 0x1df   : > { %v1861_v18 = vpop.f32.mrf.mxu2  ;;  %v1826_v21 = vadd.f32 %v1825_v19, %v1796_v41  ;;  %v3779_v29 = vpop.f32.mrf.mxu3  ;;  %v971_v19 = vld [vmem:[#allocation2 + $0x18] sm:$0xff] }
 0x1e1   : > { %v1855_v23 = vadd.f32 %v1854_v1, %v1826_v21 }
 0x1e6   : > { %v1827_v25 = vpop.f32.mrf.mxu1  ;;  %v3775_v26 = vpop.f32.mrf.mxu0 }
 0x1e7   : > { %v1960_v24 = vpop.f32.mrf.mxu2  ;;  %v1828_v27 = vadd.f32 %v1827_v25, %v1798_v45  ;;  %v1989_v35 = vpop.f32.mrf.mxu3 }
 0x1e9   : > { %v3777_v28 = vadd.f32 %v1856_v7, %v1828_v27  ;;  %v1884_v27 = vadd.f32 %v3765_v6, %v1855_v23  ;;  %v973_v6 = vld [vmem:[#allocation2 + $0x8] sm:$0xff] }
 0x1eb   : > { %v1913_v17 = vadd.f32 %v3771_v20, %v1884_v27 }
 0x1ee   : > { %v1830_v31 = vpop.f32.mrf.mxu1  ;;  %v3781_v32 = vpop.f32.mrf.mxu0 }
 0x1ef   : > { %v1962_v30 = vpop.f32.mrf.mxu2  ;;  %v1831_v33 = vadd.f32 %v1830_v31, %v1801_v52  ;;  %v1991_v43 = vpop.f32.mrf.mxu3  ;;  %v969_v52 = vld [vmem:[#allocation2 + $0x30] sm:$0xff] }
 0x1f1   : > { %v3783_v34 = vadd.f32 %v1859_v12, %v1831_v33 }
 0x1f6   : > { %v1832_v37 = vpop.f32.mrf.mxu1  ;;  %v3785_v38 = vpop.f32.mrf.mxu0 }
 0x1f7   : > { %v1965_v36 = vpop.f32.mrf.mxu2  ;;  %v1833_v39 = vadd.f32 %v1832_v37, %v1803_v56  ;;  %v1994_v56 = vpop.f32.mrf.mxu3 }
 0x1f9   : > { %v3787_v41 = vadd.f32 %v1861_v18, %v1833_v39 }
 0x1fe   : > { %v1931_v44 = vpop.f32.mrf.mxu1  ;;  %v2018_v45 = vpop.f32.mrf.mxu0 }
 0x1ff   : > { %v1932_v46 = vadd.f32 %v1931_v44, %v1903_v42  ;;  %v1967_v48 = vpop.f32.mrf.mxu2  ;;  %v1996_v14 = vpop.f32.mrf.mxu3  ;;  %v1886_v42 = vadd.f32 %v3767_v13, %v3777_v28  ;;  %v974_v13 = vld [vmem:[#allocation2 + $0x20] sm:$0xff] }
 0x201   : > { %v1961_v50 = vadd.f32 %v1960_v24, %v1932_v46  ;;  %v1915_v23 = vadd.f32 %v3775_v26, %v1886_v42 }
 0x203   : > { %v1990_v51 = vadd.f32 %v1989_v35, %v1961_v50 }
 0x205   : > { %v2019_v55 = vadd.f32 %v2018_v45, %v1990_v51  ;;  %v1889_v51 = vadd.f32 %v3773_v22, %v3783_v34  ;;  %v975_v22 = vld [vmem:[#allocation2 + $0x28] sm:$0xff] }
 0x206   : > { %v1933_v57 = vpop.f32.mrf.mxu1  ;;  %v2020_v59 = vpop.f32.mrf.mxu0 }
 0x207   : > { %v2038_v60 = vadd.f32 %v2019_v55, %v969_v52  ;;  %v1934_v62 = vadd.f32 %v1933_v57, %v1905_v53  ;;  %v1970_v63 = vpop.f32.mrf.mxu2  ;;  %v1999_v33 = vpop.f32.mrf.mxu3  ;;  %v1918_v28 = vadd.f32 %v3781_v32, %v1889_v51 }
 0x209   : > { %2046 = vst [vmem:[#allocation2 + $0x30] sm:$0xff] %v2038_v60  ;;  %v1963_v61 = vadd.f32 %v1962_v30, %v1934_v62 }
 0x20b   : > { %v1992_v1 = vadd.f32 %v1991_v43, %v1963_v61 }
 0x20d   : > { %v2021_v7 = vadd.f32 %v2020_v59, %v1992_v1 }
 0x20e   : > { %v1936_v54 = vpop.f32.mrf.mxu1  ;;  %v2023_v5 = vpop.f32.mrf.mxu0 }
 0x20f   : > { %v2039_v8 = vadd.f32 %v2021_v7, %v970_v2  ;;  %v1937_v10 = vadd.f32 %v1936_v54, %v1908_v4  ;;  %v1972_v18 = vpop.f32.mrf.mxu2  ;;  %v2001_v46 = vpop.f32.mrf.mxu3 }
 0x211   : > { %2047 = vst [vmem:[#allocation2] sm:$0xff] %v2039_v8  ;;  %v1966_v12 = vadd.f32 %v1965_v36, %v1937_v10  ;;  %v976_v10 = vld [vmem:[#allocation2 + $0x38] sm:$0xff] }
 0x213   : > { %v1995_v16 = vadd.f32 %v1994_v56, %v1966_v12  ;;  %v1891_v56 = vadd.f32 %v3779_v29, %v3787_v41 }
 0x215   : > { %v2024_v11 = vadd.f32 %v2023_v5, %v1995_v16  ;;  %v1920_v34 = vadd.f32 %v3785_v38, %v1891_v56 }
 0x216   : > { %v1938_v21 = vpop.f32.mrf.mxu1  ;;  %v2025_v24 = vpop.f32.mrf.mxu0 }
 0x217   : > { %v2040_v25 = vadd.f32 %v2024_v11, %v971_v19  ;;  %v1939_v9 = vadd.f32 %v1938_v21, %v1910_v58  ;;  %v1975_v36 = vpop.f32.mrf.mxu2  ;;  %v2004_v62 = vpop.f32.mrf.mxu3 }
 0x219   : > { %2048 = vst [vmem:[#allocation2 + $0x18] sm:$0xff] %v2040_v25  ;;  %v1968_v30 = vadd.f32 %v1967_v48, %v1939_v9 }
 0x21b   : > { %v1997_v31 = vadd.f32 %v1996_v14, %v1968_v30 }
 0x21d   : > { %v2026_v35 = vadd.f32 %v2025_v24, %v1997_v31 }
 0x21e   : > { %v1941_v37 = vpop.f32.mrf.mxu1  ;;  %v2028_v15 = vpop.f32.mrf.mxu0 }
 0x21f   : > { %v2041_v39 = vadd.f32 %v2026_v35, %v972_v0  ;;  %v1942_v40 = vadd.f32 %v1941_v37, %v1913_v17  ;;  %v1977_v50 = vpop.f32.mrf.mxu2  ;;  %v2006_v54 = vpop.f32.mrf.mxu3 }
 0x221   : > { %2049 = vst [vmem:[#allocation2 + $0x10] sm:$0xff] %v2041_v39  ;;  %v1971_v43 = vadd.f32 %v1970_v63, %v1942_v40 }
 0x223   : > { %v2000_v44 = vadd.f32 %v1999_v33, %v1971_v43 }
 0x225   : > { %v2029_v45 = vadd.f32 %v2028_v15, %v2000_v44 }
 0x226   : > { %v1943_v48 = vpop.f32.mrf.mxu1  ;;  %v2030_v53 = vpop.f32.mrf.mxu0 }
 0x227   : > { %v2042_v49 = vadd.f32 %v2029_v45, %v973_v6  ;;  %v1944_v20 = vadd.f32 %v1943_v48, %v1915_v23  ;;  %v2033_v61 = vpop.f32.mrf.mxu2 }
 0x229   : > { %2050 = vst [vmem:[#allocation2 + $0x8] sm:$0xff] %v2042_v49  ;;  %v1973_v52 = vadd.f32 %v1972_v18, %v1944_v20 }
 0x22b   : > { %v2002_v55 = vadd.f32 %v2001_v46, %v1973_v52 }
 0x22d   : > { %v2031_v57 = vadd.f32 %v2030_v53, %v2002_v55 }
 0x22e   : > { %v1946_v59 = vpop.f32.mrf.mxu1 }
 0x22f   : > { %v2043_v60 = vadd.f32 %v2031_v57, %v974_v13  ;;  %v1947_v26 = vadd.f32 %v1946_v59, %v1918_v28  ;;  %v2035_v8 = vpop.f32.mrf.mxu2 }
 0x231   : > { %2051 = vst [vmem:[#allocation2 + $0x20] sm:$0xff] %v2043_v60  ;;  %v1976_v47 = vadd.f32 %v1975_v36, %v1947_v26 }
 0x233   : > { %v2005_v63 = vadd.f32 %v2004_v62, %v1976_v47 }
 0x235   : > { %v2034_v1 = vadd.f32 %v2033_v61, %v2005_v63 }
 0x236   : > { %v1948_v2 = vpop.f32.mrf.mxu1 }
 0x237   : > { %v2044_v4 = vadd.f32 %v2034_v1, %v975_v22  ;;  %v1949_v7 = vadd.f32 %v1948_v2, %v1920_v34 }
 0x239   : > { %2052 = vst [vmem:[#allocation2 + $0x28] sm:$0xff] %v2044_v4  ;;  %v1978_v32 = vadd.f32 %v1977_v50, %v1949_v7 }
 0x23b   : > { %v2007_v5 = vadd.f32 %v2006_v54, %v1978_v32 }
 0x23d   : > { %v2036_v3 = vadd.f32 %v2035_v8, %v2007_v5  ;;  %2057 = sbr.rel (%p2750_p5) target bundleno = 592 (0x250), region = 107 }
 0x23f   : > { %v2045_v12 = vadd.f32 %v2036_v3, %v976_v10 }
 0x241   : > { %2053 = vst [vmem:[#allocation2 + $0x38] sm:$0xff] %v2045_v12 }
 0x242   : > { %v2058_v29 = vld [vmem:[#allocation2 + $0x30] sm:$0xff]  ;;  %v2059_v41 = vld [vmem:[#allocation2] sm:$0xff]  ;;  %v2060_v14 = vld [vmem:[#allocation2 + $0x18] sm:$0xff] }
 0x243   : > { %v2997_v38 = vld [vmem:[%s955_s4] ss:$0 sm:$0xff]  ;;  %v2061_v16 = vld [vmem:[#allocation2 + $0x10] sm:$0xff]  ;;  %v2062_v18 = vld [vmem:[#allocation2 + $0x8] sm:$0xff] }
 0x244   : > { %v2063_v19 = vld [vmem:[#allocation2 + $0x20] sm:$0xff]  ;;  %v2064_v58 = vld [vmem:[#allocation2 + $0x28] sm:$0xff]  ;;  %v2070_v11 = vadd.f32 %v2997_v38, %v2058_v29  ;;  %v2071_v21 = vadd.f32 %v2997_v38, %v2059_v41  ;;  %v2072_v24 = vadd.f32 %v2997_v38, %v2060_v14  ;;  %v2073_v25 = vadd.f32 %v2997_v38, %v2061_v16 }
 0x245   : > { %v2074_v27 = vadd.f32 %v2997_v38, %v2062_v18  ;;  %v2075_v30 = vadd.f32 %v2997_v38, %v2063_v19  ;;  %v2076_v31 = vadd.f32 %v2997_v38, %v2064_v58 }
 0x246   : > { %v2078_v0 = vmax.f32 %v2070_v11, 0.0  ;;  %v2079_v17 = vmax.f32 %v2071_v21, 0.0  ;;  %v2080_v35 = vmax.f32 %v2072_v24, 0.0  ;;  %v2081_v36 = vmax.f32 %v2073_v25, 0.0 }
 0x247   : > { %v2082_v37 = vmax.f32 %v2074_v27, 0.0  ;;  %v2083_v39 = vmax.f32 %v2075_v30, 0.0  ;;  %v2084_v40 = vmax.f32 %v2076_v31, 0.0 }
 0x248   : > { %v2065_v9 = vld [vmem:[#allocation2 + $0x38] sm:$0xff]  ;;  %v2868_v42 = vpack.c.bf16 %v2079_v17, %v2078_v0  ;;  %v2873_v43 = vpack.c.bf16 %v2081_v36, %v2080_v35 }
 0x249   : > { %v2077_v33 = vadd.f32 %v2997_v38, %v2065_v9  ;;  %v2878_v44 = vpack.c.bf16 %v2083_v39, %v2082_v37 }
 0x24a   : > { %2869 = vst [vmem:[%s3614_s25] sm:$0xff] %v2868_v42  }
 0x24b   : > { %v2085_v15 = vmax.f32 %v2077_v33, 0.0  ;;  %2885 = vst [vmem:[%s3614_s25 + $0x8] sm:$0xff] %v2873_v43  }
 0x24c   : > { %2886 = vst [vmem:[%s3614_s25 + $0x10] sm:$0xff] %v2878_v44  }
 0x24d   : > { %v2883_v6 = vpack.c.bf16 %v2085_v15, %v2084_v40 }
 0x24f   : > { %2887 = vst [vmem:[%s3614_s25 + $0x18] sm:$0xff] %v2883_v6  }
 0x250 PF: > { %2108 = sbr.rel (!%p3201_p12) target bundleno = 602 (0x25a), region = 111  ;;  %s2752_s14 = sshll.u32 (%p3201_p12), %s3072_s19, 2 }
 0x251   : > { %v2130_v23 = vld [vmem:[%s3614_s25] sm:$0xf] (%p3201_p12)  ;;  %v2132_v45 = vld [vmem:[%s3614_s25 + $0x4] sm:$0xf] (%p3201_p12)  ;;  %s2113_s5 = scalar_lea.vmem (%p3201_p12), %s3863_s3, %s2752_s14 }
 0x252   : > { %v2134_v46 = vld [vmem:[%s3614_s25 + $0x8] sm:$0xf] (%p3201_p12)  ;;  %2131 = vst [vmem:[%s2113_s5] sm:$0xf] (%p3201_p12), %v2130_v23  ;;  %v2136_v48 = vld [vmem:[%s3614_s25 + $0xc] sm:$0xf] (%p3201_p12) }
 0x253   : > { %2133 = vst [vmem:[%s2113_s5 + $0x8] sm:$0xf] (%p3201_p12), %v2132_v45  ;;  %v2138_v49 = vld [vmem:[%s3614_s25 + $0x10] sm:$0xf] (%p3201_p12)  ;;  %v2140_v20 = vld [vmem:[%s3614_s25 + $0x14] sm:$0xf] (%p3201_p12) }
 0x254   : > { %2135 = vst [vmem:[%s2113_s5 + $0x10] sm:$0xf] (%p3201_p12), %v2134_v46 }
 0x255   : > { %2137 = vst [vmem:[%s2113_s5 + $0x18] sm:$0xf] %v2136_v48 }
 0x256   : > { %v2142_v50 = vld [vmem:[%s3614_s25 + $0x18] sm:$0xf]  ;;  %2139 = vst [vmem:[%s2113_s5 + $0x20] sm:$0xf] %v2138_v49  ;;  %v2144_v51 = vld [vmem:[%s3614_s25 + $0x1c] sm:$0xf] }
 0x257   : > { %2141 = vst [vmem:[%s2113_s5 + $0x28] sm:$0xf] %v2140_v20 }
 0x258   : > { %2143 = vst [vmem:[%s2113_s5 + $0x30] sm:$0xf] %v2142_v50 }
 0x259   : > { %2145 = vst [vmem:[%s2113_s5 + $0x38] sm:$0xf] %v2144_v51 }
 0x25a PF: > { %s13_s22 = sadd.s32 1, %s3084_s22   ;;  %s3873_s10 = sld [smem:[#allocation6_spill]] }
 0x25b   : > { %p10_p6 = scmp.ge.s32.totalorder %s13_s22, 6   ;;  %s3874_s12 = smov %s3048_s13 }
 0x25c   : > { %s3875_s13 = smov %s3199_s9  ;;  %s3876_s14 = smov %s3056_s15 }
 0x25d   : > { %s3877_s15 = smov %s3196_s8  ;;  %s3878_s16 = smov %s3064_s17 }
 0x25e   : > { %s3879_s17 = smov %s3182_s30  ;;  %s3880_s18 = smov %s3076_s20 }
 0x25f   : > { %s3881_s19 = smov %s3080_s21  ;;  %s3882_s20 = smov %s3885_s24 }
 0x260   : > { %s3883_s21 = smov %s3873_s10  ;;  %12 = sbr.rel (!%p10_p6) target bundleno = 9 (0x9), region = 200 }

</bundles_post_ra>
